<compile_context>
chip_gen: v5e
topology: v5e:2x2
jax: 0.10.0
libtpu: 0.0.40
codegen_flags: <defaults>
</compile_context>

<pallas_src>
import jax
import jax.numpy as jnp
from jax import lax
from jax.experimental import pallas as pl
from jax.experimental.pallas import tpu as pltpu


def lstm_fc_kernel(ids_ref, wfused_ref, whh_t_ref, bias_ref, wfc_hbm_ref,
                   bfc_ref, out_ref, wfc_vmem_ref, fc_sem):
    """Fused embedding+input-projection + single-layer LSTM + final Linear.

    ids_ref    : (T*Bp, 1)  int32  token ids, time-major flattened (t*Bp + b)
    wfused_ref : (vocab, 4H) bf16  embedding @ w_ih_t, gate order (i,f,o,g)
    whh_t_ref  : (H, 4H)     bf16  hidden->gates weight (transposed, reordered)
    bias_ref   : (1, 4H)     f32   b_ih + b_hh (combined, reordered)
    wfc_hbm_ref: (H, L)      bf16  final Linear weight (transposed), in HBM
    bfc_ref    : (1, L)      f32   final Linear bias
    out_ref    : (Bp, L)     f32   latent vector (pre-reshape), padded batch
    wfc_vmem_ref: (H, L)     bf16  VMEM landing buffer for wfc
    fc_sem     : DMA semaphore for the wfc copy
    """
    TB = ids_ref.shape[0]
    vocab = wfused_ref.shape[0]
    H = whh_t_ref.shape[0]
    Bp = out_ref.shape[0]
    T = TB // Bp

    # Kick off the FC weight DMA now; it completes under the recurrence.
    fc_cp = pltpu.make_async_copy(wfc_hbm_ref, wfc_vmem_ref, fc_sem)
    fc_cp.start()

    # ---- Fused embedding + input projection: exact gather via one-hot. ----
    ids = ids_ref[...]                                          # (TB, 1) int32
    iota = lax.broadcasted_iota(jnp.int32, (TB, vocab), 1)      # (TB, vocab)
    onehot = (ids == iota).astype(jnp.bfloat16)                 # 0.0/1.0 exact
    gates_x = (jnp.dot(onehot, wfused_ref[...],
                       preferred_element_type=jnp.float32)
               + bias_ref[...])                                 # (TB, 4H) f32

    whh_t = whh_t_ref[...]                                      # (H, 4H) bf16

    # ---- Recurrence: fully unrolled (T static & small). ----
    h = jnp.zeros((Bp, H), jnp.float32)
    c = jnp.zeros((Bp, H), jnp.float32)
    for t in range(T):
        g = (gates_x[t * Bp:(t + 1) * Bp, :]
             + jnp.dot(h.astype(jnp.bfloat16), whh_t,
                       preferred_element_type=jnp.float32))     # (Bp, 4H) f32
        # Reordered gate layout (i, f, o, g): one sigmoid slab + one tanh.
        sig = jax.nn.sigmoid(g[:, 0:3 * H])                     # (Bp, 3H)
        g_g = jnp.tanh(g[:, 3 * H:4 * H])                       # (Bp, H)
        i_g = sig[:, 0 * H:1 * H]
        f_g = sig[:, 1 * H:2 * H]
        o_g = sig[:, 2 * H:3 * H]
        c = f_g * c + i_g * g_g
        h = o_g * jnp.tanh(c)

    # ---- Final Linear(H -> L) on h_n[-1]; weight DMA finishes here. ----
    fc_cp.wait()
    out_ref[...] = (jnp.dot(h.astype(jnp.bfloat16), wfc_vmem_ref[...],
                            preferred_element_type=jnp.float32)
                    + bfc_ref[...])


def _reorder_gates(x):
    """Permute last-dim gate blocks from PyTorch (i, f, g, o) to (i, f, o, g)."""
    H = x.shape[-1] // 4
    return jnp.concatenate(
        [x[..., 0:2 * H], x[..., 3 * H:4 * H], x[..., 2 * H:3 * H]], axis=-1)


def prepare_params(params):
    """Parameter-only prep (reorder + fuse + cast); constant-folded under jit."""
    wih_t = _reorder_gates(params["w_ih_t"].astype(jnp.float32))   # (E, 4H)
    whh_t = _reorder_gates(params["w_hh_t"].astype(jnp.float32))   # (H, 4H)
    bias = _reorder_gates(params["b_gates"].astype(jnp.float32))   # (1, 4H)
    table = params["embedding"].astype(jnp.float32)                # (vocab, E)
    # Fused embedding + input projection, stored bf16 (gather exactness
    # preserved: the kernel's one-hot matmul just selects bf16 rows).
    w_fused = jnp.dot(table, wih_t).astype(jnp.bfloat16)           # (vocab, 4H)
    return {
        "w_fused": w_fused,
        "w_hh_t": whh_t.astype(jnp.bfloat16),
        "b_gates": bias,
        "w_fc_t": params["w_fc_t"].astype(jnp.bfloat16),           # (H, L)
        "b_fc": params["b_fc"].astype(jnp.float32),                # (1, L)
    }


def music_bert_adapter_forward(token_vectors, lyris_vector, params,
                               *, latent_channels=4, latent_side=8):
    """JAX wrapper reproducing MusicBERT2DiffusionAdapterWithCLIP.forward."""
    p = prepare_params(params)
    w_fused, whh_t = p["w_fused"], p["w_hh_t"]
    bias, wfc_t, bfc = p["b_gates"], p["w_fc_t"], p["b_fc"]
    H = whh_t.shape[0]
    L = wfc_t.shape[1]

    # tokens = cat([token_vectors, lyris_vector], dim=1)
    tokens = jnp.concatenate([token_vectors, lyris_vector], axis=1)  # (B, T)
    B, T = tokens.shape

    # Pad batch to a multiple of 16 (bf16 sublane tile) so the per-step bf16
    # h @ W_hh LHS and the output store use full tiles.
    Bp = max(16, ((B + 15) // 16) * 16)
    tokens_p = jnp.pad(tokens, ((0, Bp - B), (0, 0)))   # pad rows use token 0
    # Time-major flatten: row index = t*Bp + b.
    ids_tb = jnp.transpose(tokens_p, (1, 0)).reshape(T * Bp, 1).astype(jnp.int32)

    latent_flat = pl.pallas_call(
        lstm_fc_kernel,
        out_shape=jax.ShapeDtypeStruct((Bp, L), jnp.float32),
        in_specs=[
            pl.BlockSpec(memory_space=pltpu.MemorySpace.VMEM),  # ids
            pl.BlockSpec(memory_space=pltpu.MemorySpace.VMEM),  # w_fused
            pl.BlockSpec(memory_space=pltpu.MemorySpace.VMEM),  # w_hh_t
            pl.BlockSpec(memory_space=pltpu.MemorySpace.VMEM),  # bias
            pl.BlockSpec(memory_space=pl.ANY),                  # w_fc_t (HBM)
            pl.BlockSpec(memory_space=pltpu.MemorySpace.VMEM),  # b_fc
        ],
        out_specs=pl.BlockSpec(memory_space=pltpu.MemorySpace.VMEM),
        scratch_shapes=[
            pltpu.VMEM((H, L), jnp.bfloat16),       # FC weight landing buffer
            pltpu.SemaphoreType.DMA(()),            # its DMA semaphore
        ],
        compiler_params=pltpu.CompilerParams(
            vmem_limit_bytes=32 * 1024 * 1024),
    )(ids_tb, w_fused, whh_t, bias, wfc_t, bfc)

    # Drop batch padding; latent_vector.view(-1, 4, 64, 64) (scaled), NCHW.
    return latent_flat[:B].reshape(-1, latent_channels, latent_side,
                                   latent_side)


def adapter_reference(token_vectors, lyris_vector, params,
                      *, latent_channels=4, latent_side=8):
    """Pure-JAX reference with the SAME precision policy (fused bf16 table,
    bf16 weights, f32 accumulation, reordered gates) for the correctness check."""
    p = prepare_params(params)
    w_fused, whh_t = p["w_fused"], p["w_hh_t"]
    bias, wfc_t, bfc = p["b_gates"], p["w_fc_t"], p["b_fc"]
    H = whh_t.shape[0]

    tokens = jnp.concatenate([token_vectors, lyris_vector], axis=1)  # (B, T)
    B, T = tokens.shape
    # Real gather of the fused (vocab, 4H) bf16 table, widened to f32.
    gx = w_fused[tokens].astype(jnp.float32) + bias                  # (B, T, 4H)

    h = jnp.zeros((B, H), jnp.float32)
    c = jnp.zeros((B, H), jnp.float32)
    for t in range(T):
        g = gx[:, t, :] + jnp.dot(h.astype(jnp.bfloat16), whh_t,
                                  preferred_element_type=jnp.float32)
        sig = jax.nn.sigmoid(g[:, 0:3 * H])
        g_g = jnp.tanh(g[:, 3 * H:4 * H])
        i_g = sig[:, 0 * H:1 * H]
        f_g = sig[:, 1 * H:2 * H]
        o_g = sig[:, 2 * H:3 * H]
        c = f_g * c + i_g * g_g
        h = o_g * jnp.tanh(c)

    out = (jnp.dot(h.astype(jnp.bfloat16), wfc_t,
                   preferred_element_type=jnp.float32) + bfc)
    return out.reshape(-1, latent_channels, latent_side, latent_side)


def init_params(key, *, max_token_dim, bert_dim, embedding_dim, hidden_dim,
                latent_dim):
    """Deterministic synthetic parameters (shapes follow the nn.Module,
    PyTorch gate order i,f,g,o)."""
    vocab = max_token_dim + bert_dim
    E, H, L = embedding_dim, hidden_dim, latent_dim
    ks = jax.random.split(key, 7)
    scale = 0.1
    return {
        "embedding": scale * jax.random.normal(ks[0], (vocab, E), jnp.float32),
        # nn.LSTM: weight_ih_l0 (4H, E), weight_hh_l0 (4H, H) -> pre-transposed
        "w_ih_t": scale * jax.random.normal(ks[1], (E, 4 * H), jnp.float32),
        "w_hh_t": scale * jax.random.normal(ks[2], (H, 4 * H), jnp.float32),
        # b_ih + b_hh combined
        "b_gates": scale * jax.random.normal(ks[3], (1, 4 * H), jnp.float32),
        # nn.Linear(hidden_dim, latent_dim): weight (L, H) -> pre-transposed
        "w_fc_t": scale * jax.random.normal(ks[4], (H, L), jnp.float32),
        "b_fc": scale * jax.random.normal(ks[5], (1, L), jnp.float32),
    }


if __name__ == "__main__":
    # Small shapes consistent with the module.
    MAX_TOKEN_DIM = 128      # original: 1024
    BERT_DIM = 64            # original: 768
    EMBEDDING_DIM = 32       # original: 64
    HIDDEN_DIM = 128         # original: 128
    LATENT_CH, LATENT_SIDE = 4, 8
    LATENT_DIM = LATENT_CH * LATENT_SIDE * LATENT_SIDE   # original: 16384
    B = 2
    MUSIC_SEQ = 8
    LYRICS_SEQ = 8

    key = jax.random.PRNGKey(0)
    k_params, k_tok, k_lyr = jax.random.split(key, 3)

    params = init_params(
        k_params,
        max_token_dim=MAX_TOKEN_DIM, bert_dim=BERT_DIM,
        embedding_dim=EMBEDDING_DIM, hidden_dim=HIDDEN_DIM,
        latent_dim=LATENT_DIM)

    vocab = MAX_TOKEN_DIM + BERT_DIM
    token_vectors = jax.random.randint(k_tok, (B, MUSIC_SEQ), 0, MAX_TOKEN_DIM,
                                       dtype=jnp.int32)
    lyris_vector = jax.random.randint(k_lyr, (B, LYRICS_SEQ), MAX_TOKEN_DIM,
                                      vocab, dtype=jnp.int32)

    latent = music_bert_adapter_forward(
        token_vectors, lyris_vector, params,
        latent_channels=LATENT_CH, latent_side=LATENT_SIDE)
    latent = jax.block_until_ready(latent)

    assert latent.shape == (B, LATENT_CH, LATENT_SIDE, LATENT_SIDE), latent.shape
    assert latent.dtype == jnp.float32

    # Correctness check vs pure-JAX reference (same precision policy).
    ref = adapter_reference(token_vectors, lyris_vector, params,
                            latent_channels=LATENT_CH,
                            latent_side=LATENT_SIDE)
    max_err = float(jnp.max(jnp.abs(latent - ref)))
    assert jnp.allclose(latent, ref, atol=2e-3, rtol=2e-3), max_err

    # TODO(synk): CLIP text/image encoders (calculate_similarity_loss) are a
    # pretrained external model, not part of forward(); not implemented.
    print("KERNEL_OK")
</pallas_src>

<mosaic_0001>
module attributes {stable_mosaic.version = 11 : i64} {
  func.func @lstm_fc_kernel(%arg0: memref<256x1xi32, #tpu.memory_space<vmem>>, %arg1: memref<192x512xbf16, #tpu.memory_space<vmem>>, %arg2: memref<128x512xbf16, #tpu.memory_space<vmem>>, %arg3: memref<1x512xf32, #tpu.memory_space<vmem>>, %arg4: memref<128x256xbf16, #tpu.memory_space<any>>, %arg5: memref<1x256xf32, #tpu.memory_space<vmem>>, %arg6: memref<16x256xf32, #tpu.memory_space<vmem>>, %arg7: memref<128x256xbf16, #tpu.memory_space<vmem>>, %arg8: memref<!tpu.dma_semaphore, #tpu.memory_space<semaphore_mem>>) attributes {dimension_semantics = [], scalar_prefetch = 0 : i64, scratch_operands = 2 : i64, tpu.core_type = #tpu.core_type<tc>} {
    tpu.enqueue_dma source(%arg4 : memref<128x256xbf16, #tpu.memory_space<any>>) target(%arg7 : memref<128x256xbf16, #tpu.memory_space<vmem>>) target_semaphore(%arg8 : memref<!tpu.dma_semaphore, #tpu.memory_space<semaphore_mem>>)
    %c0 = arith.constant 0 : index
    %c0_0 = arith.constant 0 : index
    %0 = vector.load %arg0[%c0, %c0_0] : memref<256x1xi32, #tpu.memory_space<vmem>>, vector<256x1xi32>
    %1 = tpu.iota {dimensions = array<i32: 1>} : vector<256x192xi32>
    %2 = vector.broadcast %0 : vector<256x1xi32> to vector<256x192xi32>
    %3 = arith.cmpi eq, %2, %1 : vector<256x192xi32>
    %4 = arith.extui %3 : vector<256x192xi1> to vector<256x192xi32>
    %5 = arith.sitofp %4 : vector<256x192xi32> to vector<256x192xf32>
    %6 = arith.truncf %5 : vector<256x192xf32> to vector<256x192xbf16>
    %c0_1 = arith.constant 0 : index
    %c0_2 = arith.constant 0 : index
    %7 = vector.load %arg1[%c0_1, %c0_2] : memref<192x512xbf16, #tpu.memory_space<vmem>>, vector<192x512xbf16>
    %cst = arith.constant dense<0.000000e+00> : vector<256x512xf32>
    %8 = tpu.matmul %6, %7, %cst {dimension_numbers = #tpu.dot_dimension_numbers<[1], [0], [0], [1], [0, 0, 1, 1], [], []>} : vector<256x192xbf16>, vector<192x512xbf16>, vector<256x512xf32> -> vector<256x512xf32>
    %c0_3 = arith.constant 0 : index
    %c0_4 = arith.constant 0 : index
    %9 = vector.load %arg3[%c0_3, %c0_4] : memref<1x512xf32, #tpu.memory_space<vmem>>, vector<1x512xf32>
    %10 = vector.broadcast %9 : vector<1x512xf32> to vector<256x512xf32>
    %11 = arith.addf %8, %10 : vector<256x512xf32>
    %c0_5 = arith.constant 0 : index
    %c0_6 = arith.constant 0 : index
    %12 = vector.load %arg2[%c0_5, %c0_6] : memref<128x512xbf16, #tpu.memory_space<vmem>>, vector<128x512xbf16>
    %cst_7 = arith.constant 0.000000e+00 : f32
    %13 = vector.broadcast %cst_7 : f32 to vector<16x128xf32>
    %cst_8 = arith.constant 0.000000e+00 : f32
    %14 = vector.broadcast %cst_8 : f32 to vector<16x128xf32>
    %15 = vector.extract_strided_slice %11 {offsets = [0, 0], sizes = [16, 512], strides = [1, 1]} : vector<256x512xf32> to vector<16x512xf32>
    %16 = arith.truncf %13 : vector<16x128xf32> to vector<16x128xbf16>
    %cst_9 = arith.constant dense<0.000000e+00> : vector<16x512xf32>
    %17 = tpu.matmul %16, %12, %cst_9 {dimension_numbers = #tpu.dot_dimension_numbers<[1], [0], [0], [1], [0, 0, 1, 1], [], []>} : vector<16x128xbf16>, vector<128x512xbf16>, vector<16x512xf32> -> vector<16x512xf32>
    %18 = arith.addf %15, %17 : vector<16x512xf32>
    %19 = vector.extract_strided_slice %18 {offsets = [0, 0], sizes = [16, 384], strides = [1, 1]} : vector<16x512xf32> to vector<16x384xf32>
    %20 = arith.negf %19 : vector<16x384xf32>
    %21 = math.exp %20 : vector<16x384xf32>
    %cst_10 = arith.constant 1.000000e+00 : f32
    %22 = vector.broadcast %cst_10 : f32 to vector<16x384xf32>
    %23 = arith.addf %22, %21 : vector<16x384xf32>
    %24 = arith.divf %22, %23 : vector<16x384xf32>
    %25 = vector.extract_strided_slice %18 {offsets = [0, 384], sizes = [16, 128], strides = [1, 1]} : vector<16x512xf32> to vector<16x128xf32>
    %26 = math.tanh %25 : vector<16x128xf32>
    %27 = vector.extract_strided_slice %24 {offsets = [0, 0], sizes = [16, 128], strides = [1, 1]} : vector<16x384xf32> to vector<16x128xf32>
    %28 = vector.extract_strided_slice %24 {offsets = [0, 128], sizes = [16, 128], strides = [1, 1]} : vector<16x384xf32> to vector<16x128xf32>
    %29 = vector.extract_strided_slice %24 {offsets = [0, 256], sizes = [16, 128], strides = [1, 1]} : vector<16x384xf32> to vector<16x128xf32>
    %30 = arith.mulf %28, %14 : vector<16x128xf32>
    %31 = arith.mulf %27, %26 : vector<16x128xf32>
    %32 = arith.addf %30, %31 : vector<16x128xf32>
    %33 = math.tanh %32 : vector<16x128xf32>
    %34 = arith.mulf %29, %33 : vector<16x128xf32>
    %35 = vector.extract_strided_slice %11 {offsets = [16, 0], sizes = [16, 512], strides = [1, 1]} : vector<256x512xf32> to vector<16x512xf32>
    %36 = arith.truncf %34 : vector<16x128xf32> to vector<16x128xbf16>
    %cst_11 = arith.constant dense<0.000000e+00> : vector<16x512xf32>
    %37 = tpu.matmul %36, %12, %cst_11 {dimension_numbers = #tpu.dot_dimension_numbers<[1], [0], [0], [1], [0, 0, 1, 1], [], []>} : vector<16x128xbf16>, vector<128x512xbf16>, vector<16x512xf32> -> vector<16x512xf32>
    %38 = arith.addf %35, %37 : vector<16x512xf32>
    %39 = vector.extract_strided_slice %38 {offsets = [0, 0], sizes = [16, 384], strides = [1, 1]} : vector<16x512xf32> to vector<16x384xf32>
    %40 = arith.negf %39 : vector<16x384xf32>
    %41 = math.exp %40 : vector<16x384xf32>
    %cst_12 = arith.constant 1.000000e+00 : f32
    %42 = vector.broadcast %cst_12 : f32 to vector<16x384xf32>
    %43 = arith.addf %42, %41 : vector<16x384xf32>
    %44 = arith.divf %42, %43 : vector<16x384xf32>
    %45 = vector.extract_strided_slice %38 {offsets = [0, 384], sizes = [16, 128], strides = [1, 1]} : vector<16x512xf32> to vector<16x128xf32>
    %46 = math.tanh %45 : vector<16x128xf32>
    %47 = vector.extract_strided_slice %44 {offsets = [0, 0], sizes = [16, 128], strides = [1, 1]} : vector<16x384xf32> to vector<16x128xf32>
    %48 = vector.extract_strided_slice %44 {offsets = [0, 128], sizes = [16, 128], strides = [1, 1]} : vector<16x384xf32> to vector<16x128xf32>
    %49 = vector.extract_strided_slice %44 {offsets = [0, 256], sizes = [16, 128], strides = [1, 1]} : vector<16x384xf32> to vector<16x128xf32>
    %50 = arith.mulf %48, %32 : vector<16x128xf32>
    %51 = arith.mulf %47, %46 : vector<16x128xf32>
    %52 = arith.addf %50, %51 : vector<16x128xf32>
    %53 = math.tanh %52 : vector<16x128xf32>
    %54 = arith.mulf %49, %53 : vector<16x128xf32>
    %55 = vector.extract_strided_slice %11 {offsets = [32, 0], sizes = [16, 512], strides = [1, 1]} : vector<256x512xf32> to vector<16x512xf32>
    %56 = arith.truncf %54 : vector<16x128xf32> to vector<16x128xbf16>
    %cst_13 = arith.constant dense<0.000000e+00> : vector<16x512xf32>
    %57 = tpu.matmul %56, %12, %cst_13 {dimension_numbers = #tpu.dot_dimension_numbers<[1], [0], [0], [1], [0, 0, 1, 1], [], []>} : vector<16x128xbf16>, vector<128x512xbf16>, vector<16x512xf32> -> vector<16x512xf32>
    %58 = arith.addf %55, %57 : vector<16x512xf32>
    %59 = vector.extract_strided_slice %58 {offsets = [0, 0], sizes = [16, 384], strides = [1, 1]} : vector<16x512xf32> to vector<16x384xf32>
    %60 = arith.negf %59 : vector<16x384xf32>
    %61 = math.exp %60 : vector<16x384xf32>
    %cst_14 = arith.constant 1.000000e+00 : f32
    %62 = vector.broadcast %cst_14 : f32 to vector<16x384xf32>
    %63 = arith.addf %62, %61 : vector<16x384xf32>
    %64 = arith.divf %62, %63 : vector<16x384xf32>
    %65 = vector.extract_strided_slice %58 {offsets = [0, 384], sizes = [16, 128], strides = [1, 1]} : vector<16x512xf32> to vector<16x128xf32>
    %66 = math.tanh %65 : vector<16x128xf32>
    %67 = vector.extract_strided_slice %64 {offsets = [0, 0], sizes = [16, 128], strides = [1, 1]} : vector<16x384xf32> to vector<16x128xf32>
    %68 = vector.extract_strided_slice %64 {offsets = [0, 128], sizes = [16, 128], strides = [1, 1]} : vector<16x384xf32> to vector<16x128xf32>
    %69 = vector.extract_strided_slice %64 {offsets = [0, 256], sizes = [16, 128], strides = [1, 1]} : vector<16x384xf32> to vector<16x128xf32>
    %70 = arith.mulf %68, %52 : vector<16x128xf32>
    %71 = arith.mulf %67, %66 : vector<16x128xf32>
    %72 = arith.addf %70, %71 : vector<16x128xf32>
    %73 = math.tanh %72 : vector<16x128xf32>
    %74 = arith.mulf %69, %73 : vector<16x128xf32>
    %75 = vector.extract_strided_slice %11 {offsets = [48, 0], sizes = [16, 512], strides = [1, 1]} : vector<256x512xf32> to vector<16x512xf32>
    %76 = arith.truncf %74 : vector<16x128xf32> to vector<16x128xbf16>
    %cst_15 = arith.constant dense<0.000000e+00> : vector<16x512xf32>
    %77 = tpu.matmul %76, %12, %cst_15 {dimension_numbers = #tpu.dot_dimension_numbers<[1], [0], [0], [1], [0, 0, 1, 1], [], []>} : vector<16x128xbf16>, vector<128x512xbf16>, vector<16x512xf32> -> vector<16x512xf32>
    %78 = arith.addf %75, %77 : vector<16x512xf32>
    %79 = vector.extract_strided_slice %78 {offsets = [0, 0], sizes = [16, 384], strides = [1, 1]} : vector<16x512xf32> to vector<16x384xf32>
    %80 = arith.negf %79 : vector<16x384xf32>
    %81 = math.exp %80 : vector<16x384xf32>
    %cst_16 = arith.constant 1.000000e+00 : f32
    %82 = vector.broadcast %cst_16 : f32 to vector<16x384xf32>
    %83 = arith.addf %82, %81 : vector<16x384xf32>
    %84 = arith.divf %82, %83 : vector<16x384xf32>
    %85 = vector.extract_strided_slice %78 {offsets = [0, 384], sizes = [16, 128], strides = [1, 1]} : vector<16x512xf32> to vector<16x128xf32>
    %86 = math.tanh %85 : vector<16x128xf32>
    %87 = vector.extract_strided_slice %84 {offsets = [0, 0], sizes = [16, 128], strides = [1, 1]} : vector<16x384xf32> to vector<16x128xf32>
    %88 = vector.extract_strided_slice %84 {offsets = [0, 128], sizes = [16, 128], strides = [1, 1]} : vector<16x384xf32> to vector<16x128xf32>
    %89 = vector.extract_strided_slice %84 {offsets = [0, 256], sizes = [16, 128], strides = [1, 1]} : vector<16x384xf32> to vector<16x128xf32>
    %90 = arith.mulf %88, %72 : vector<16x128xf32>
    %91 = arith.mulf %87, %86 : vector<16x128xf32>
    %92 = arith.addf %90, %91 : vector<16x128xf32>
    %93 = math.tanh %92 : vector<16x128xf32>
    %94 = arith.mulf %89, %93 : vector<16x128xf32>
    %95 = vector.extract_strided_slice %11 {offsets = [64, 0], sizes = [16, 512], strides = [1, 1]} : vector<256x512xf32> to vector<16x512xf32>
    %96 = arith.truncf %94 : vector<16x128xf32> to vector<16x128xbf16>
    %cst_17 = arith.constant dense<0.000000e+00> : vector<16x512xf32>
    %97 = tpu.matmul %96, %12, %cst_17 {dimension_numbers = #tpu.dot_dimension_numbers<[1], [0], [0], [1], [0, 0, 1, 1], [], []>} : vector<16x128xbf16>, vector<128x512xbf16>, vector<16x512xf32> -> vector<16x512xf32>
    %98 = arith.addf %95, %97 : vector<16x512xf32>
    %99 = vector.extract_strided_slice %98 {offsets = [0, 0], sizes = [16, 384], strides = [1, 1]} : vector<16x512xf32> to vector<16x384xf32>
    %100 = arith.negf %99 : vector<16x384xf32>
    %101 = math.exp %100 : vector<16x384xf32>
    %cst_18 = arith.constant 1.000000e+00 : f32
    %102 = vector.broadcast %cst_18 : f32 to vector<16x384xf32>
    %103 = arith.addf %102, %101 : vector<16x384xf32>
    %104 = arith.divf %102, %103 : vector<16x384xf32>
    %105 = vector.extract_strided_slice %98 {offsets = [0, 384], sizes = [16, 128], strides = [1, 1]} : vector<16x512xf32> to vector<16x128xf32>
    %106 = math.tanh %105 : vector<16x128xf32>
    %107 = vector.extract_strided_slice %104 {offsets = [0, 0], sizes = [16, 128], strides = [1, 1]} : vector<16x384xf32> to vector<16x128xf32>
    %108 = vector.extract_strided_slice %104 {offsets = [0, 128], sizes = [16, 128], strides = [1, 1]} : vector<16x384xf32> to vector<16x128xf32>
    %109 = vector.extract_strided_slice %104 {offsets = [0, 256], sizes = [16, 128], strides = [1, 1]} : vector<16x384xf32> to vector<16x128xf32>
    %110 = arith.mulf %108, %92 : vector<16x128xf32>
    %111 = arith.mulf %107, %106 : vector<16x128xf32>
    %112 = arith.addf %110, %111 : vector<16x128xf32>
    %113 = math.tanh %112 : vector<16x128xf32>
    %114 = arith.mulf %109, %113 : vector<16x128xf32>
    %115 = vector.extract_strided_slice %11 {offsets = [80, 0], sizes = [16, 512], strides = [1, 1]} : vector<256x512xf32> to vector<16x512xf32>
    %116 = arith.truncf %114 : vector<16x128xf32> to vector<16x128xbf16>
    %cst_19 = arith.constant dense<0.000000e+00> : vector<16x512xf32>
    %117 = tpu.matmul %116, %12, %cst_19 {dimension_numbers = #tpu.dot_dimension_numbers<[1], [0], [0], [1], [0, 0, 1, 1], [], []>} : vector<16x128xbf16>, vector<128x512xbf16>, vector<16x512xf32> -> vector<16x512xf32>
    %118 = arith.addf %115, %117 : vector<16x512xf32>
    %119 = vector.extract_strided_slice %118 {offsets = [0, 0], sizes = [16, 384], strides = [1, 1]} : vector<16x512xf32> to vector<16x384xf32>
    %120 = arith.negf %119 : vector<16x384xf32>
    %121 = math.exp %120 : vector<16x384xf32>
    %cst_20 = arith.constant 1.000000e+00 : f32
    %122 = vector.broadcast %cst_20 : f32 to vector<16x384xf32>
    %123 = arith.addf %122, %121 : vector<16x384xf32>
    %124 = arith.divf %122, %123 : vector<16x384xf32>
    %125 = vector.extract_strided_slice %118 {offsets = [0, 384], sizes = [16, 128], strides = [1, 1]} : vector<16x512xf32> to vector<16x128xf32>
    %126 = math.tanh %125 : vector<16x128xf32>
    %127 = vector.extract_strided_slice %124 {offsets = [0, 0], sizes = [16, 128], strides = [1, 1]} : vector<16x384xf32> to vector<16x128xf32>
    %128 = vector.extract_strided_slice %124 {offsets = [0, 128], sizes = [16, 128], strides = [1, 1]} : vector<16x384xf32> to vector<16x128xf32>
    %129 = vector.extract_strided_slice %124 {offsets = [0, 256], sizes = [16, 128], strides = [1, 1]} : vector<16x384xf32> to vector<16x128xf32>
    %130 = arith.mulf %128, %112 : vector<16x128xf32>
    %131 = arith.mulf %127, %126 : vector<16x128xf32>
    %132 = arith.addf %130, %131 : vector<16x128xf32>
    %133 = math.tanh %132 : vector<16x128xf32>
    %134 = arith.mulf %129, %133 : vector<16x128xf32>
    %135 = vector.extract_strided_slice %11 {offsets = [96, 0], sizes = [16, 512], strides = [1, 1]} : vector<256x512xf32> to vector<16x512xf32>
    %136 = arith.truncf %134 : vector<16x128xf32> to vector<16x128xbf16>
    %cst_21 = arith.constant dense<0.000000e+00> : vector<16x512xf32>
    %137 = tpu.matmul %136, %12, %cst_21 {dimension_numbers = #tpu.dot_dimension_numbers<[1], [0], [0], [1], [0, 0, 1, 1], [], []>} : vector<16x128xbf16>, vector<128x512xbf16>, vector<16x512xf32> -> vector<16x512xf32>
    %138 = arith.addf %135, %137 : vector<16x512xf32>
    %139 = vector.extract_strided_slice %138 {offsets = [0, 0], sizes = [16, 384], strides = [1, 1]} : vector<16x512xf32> to vector<16x384xf32>
    %140 = arith.negf %139 : vector<16x384xf32>
    %141 = math.exp %140 : vector<16x384xf32>
    %cst_22 = arith.constant 1.000000e+00 : f32
    %142 = vector.broadcast %cst_22 : f32 to vector<16x384xf32>
    %143 = arith.addf %142, %141 : vector<16x384xf32>
    %144 = arith.divf %142, %143 : vector<16x384xf32>
    %145 = vector.extract_strided_slice %138 {offsets = [0, 384], sizes = [16, 128], strides = [1, 1]} : vector<16x512xf32> to vector<16x128xf32>
    %146 = math.tanh %145 : vector<16x128xf32>
    %147 = vector.extract_strided_slice %144 {offsets = [0, 0], sizes = [16, 128], strides = [1, 1]} : vector<16x384xf32> to vector<16x128xf32>
    %148 = vector.extract_strided_slice %144 {offsets = [0, 128], sizes = [16, 128], strides = [1, 1]} : vector<16x384xf32> to vector<16x128xf32>
    %149 = vector.extract_strided_slice %144 {offsets = [0, 256], sizes = [16, 128], strides = [1, 1]} : vector<16x384xf32> to vector<16x128xf32>
    %150 = arith.mulf %148, %132 : vector<16x128xf32>
    %151 = arith.mulf %147, %146 : vector<16x128xf32>
    %152 = arith.addf %150, %151 : vector<16x128xf32>
    %153 = math.tanh %152 : vector<16x128xf32>
    %154 = arith.mulf %149, %153 : vector<16x128xf32>
    %155 = vector.extract_strided_slice %11 {offsets = [112, 0], sizes = [16, 512], strides = [1, 1]} : vector<256x512xf32> to vector<16x512xf32>
    %156 = arith.truncf %154 : vector<16x128xf32> to vector<16x128xbf16>
    %cst_23 = arith.constant dense<0.000000e+00> : vector<16x512xf32>
    %157 = tpu.matmul %156, %12, %cst_23 {dimension_numbers = #tpu.dot_dimension_numbers<[1], [0], [0], [1], [0, 0, 1, 1], [], []>} : vector<16x128xbf16>, vector<128x512xbf16>, vector<16x512xf32> -> vector<16x512xf32>
    %158 = arith.addf %155, %157 : vector<16x512xf32>
    %159 = vector.extract_strided_slice %158 {offsets = [0, 0], sizes = [16, 384], strides = [1, 1]} : vector<16x512xf32> to vector<16x384xf32>
    %160 = arith.negf %159 : vector<16x384xf32>
    %161 = math.exp %160 : vector<16x384xf32>
    %cst_24 = arith.constant 1.000000e+00 : f32
    %162 = vector.broadcast %cst_24 : f32 to vector<16x384xf32>
    %163 = arith.addf %162, %161 : vector<16x384xf32>
    %164 = arith.divf %162, %163 : vector<16x384xf32>
    %165 = vector.extract_strided_slice %158 {offsets = [0, 384], sizes = [16, 128], strides = [1, 1]} : vector<16x512xf32> to vector<16x128xf32>
    %166 = math.tanh %165 : vector<16x128xf32>
    %167 = vector.extract_strided_slice %164 {offsets = [0, 0], sizes = [16, 128], strides = [1, 1]} : vector<16x384xf32> to vector<16x128xf32>
    %168 = vector.extract_strided_slice %164 {offsets = [0, 128], sizes = [16, 128], strides = [1, 1]} : vector<16x384xf32> to vector<16x128xf32>
    %169 = vector.extract_strided_slice %164 {offsets = [0, 256], sizes = [16, 128], strides = [1, 1]} : vector<16x384xf32> to vector<16x128xf32>
    %170 = arith.mulf %168, %152 : vector<16x128xf32>
    %171 = arith.mulf %167, %166 : vector<16x128xf32>
    %172 = arith.addf %170, %171 : vector<16x128xf32>
    %173 = math.tanh %172 : vector<16x128xf32>
    %174 = arith.mulf %169, %173 : vector<16x128xf32>
    %175 = vector.extract_strided_slice %11 {offsets = [128, 0], sizes = [16, 512], strides = [1, 1]} : vector<256x512xf32> to vector<16x512xf32>
    %176 = arith.truncf %174 : vector<16x128xf32> to vector<16x128xbf16>
    %cst_25 = arith.constant dense<0.000000e+00> : vector<16x512xf32>
    %177 = tpu.matmul %176, %12, %cst_25 {dimension_numbers = #tpu.dot_dimension_numbers<[1], [0], [0], [1], [0, 0, 1, 1], [], []>} : vector<16x128xbf16>, vector<128x512xbf16>, vector<16x512xf32> -> vector<16x512xf32>
    %178 = arith.addf %175, %177 : vector<16x512xf32>
    %179 = vector.extract_strided_slice %178 {offsets = [0, 0], sizes = [16, 384], strides = [1, 1]} : vector<16x512xf32> to vector<16x384xf32>
    %180 = arith.negf %179 : vector<16x384xf32>
    %181 = math.exp %180 : vector<16x384xf32>
    %cst_26 = arith.constant 1.000000e+00 : f32
    %182 = vector.broadcast %cst_26 : f32 to vector<16x384xf32>
    %183 = arith.addf %182, %181 : vector<16x384xf32>
    %184 = arith.divf %182, %183 : vector<16x384xf32>
    %185 = vector.extract_strided_slice %178 {offsets = [0, 384], sizes = [16, 128], strides = [1, 1]} : vector<16x512xf32> to vector<16x128xf32>
    %186 = math.tanh %185 : vector<16x128xf32>
    %187 = vector.extract_strided_slice %184 {offsets = [0, 0], sizes = [16, 128], strides = [1, 1]} : vector<16x384xf32> to vector<16x128xf32>
    %188 = vector.extract_strided_slice %184 {offsets = [0, 128], sizes = [16, 128], strides = [1, 1]} : vector<16x384xf32> to vector<16x128xf32>
    %189 = vector.extract_strided_slice %184 {offsets = [0, 256], sizes = [16, 128], strides = [1, 1]} : vector<16x384xf32> to vector<16x128xf32>
    %190 = arith.mulf %188, %172 : vector<16x128xf32>
    %191 = arith.mulf %187, %186 : vector<16x128xf32>
    %192 = arith.addf %190, %191 : vector<16x128xf32>
    %193 = math.tanh %192 : vector<16x128xf32>
    %194 = arith.mulf %189, %193 : vector<16x128xf32>
    %195 = vector.extract_strided_slice %11 {offsets = [144, 0], sizes = [16, 512], strides = [1, 1]} : vector<256x512xf32> to vector<16x512xf32>
    %196 = arith.truncf %194 : vector<16x128xf32> to vector<16x128xbf16>
    %cst_27 = arith.constant dense<0.000000e+00> : vector<16x512xf32>
    %197 = tpu.matmul %196, %12, %cst_27 {dimension_numbers = #tpu.dot_dimension_numbers<[1], [0], [0], [1], [0, 0, 1, 1], [], []>} : vector<16x128xbf16>, vector<128x512xbf16>, vector<16x512xf32> -> vector<16x512xf32>
    %198 = arith.addf %195, %197 : vector<16x512xf32>
    %199 = vector.extract_strided_slice %198 {offsets = [0, 0], sizes = [16, 384], strides = [1, 1]} : vector<16x512xf32> to vector<16x384xf32>
    %200 = arith.negf %199 : vector<16x384xf32>
    %201 = math.exp %200 : vector<16x384xf32>
    %cst_28 = arith.constant 1.000000e+00 : f32
    %202 = vector.broadcast %cst_28 : f32 to vector<16x384xf32>
    %203 = arith.addf %202, %201 : vector<16x384xf32>
    %204 = arith.divf %202, %203 : vector<16x384xf32>
    %205 = vector.extract_strided_slice %198 {offsets = [0, 384], sizes = [16, 128], strides = [1, 1]} : vector<16x512xf32> to vector<16x128xf32>
    %206 = math.tanh %205 : vector<16x128xf32>
    %207 = vector.extract_strided_slice %204 {offsets = [0, 0], sizes = [16, 128], strides = [1, 1]} : vector<16x384xf32> to vector<16x128xf32>
    %208 = vector.extract_strided_slice %204 {offsets = [0, 128], sizes = [16, 128], strides = [1, 1]} : vector<16x384xf32> to vector<16x128xf32>
    %209 = vector.extract_strided_slice %204 {offsets = [0, 256], sizes = [16, 128], strides = [1, 1]} : vector<16x384xf32> to vector<16x128xf32>
    %210 = arith.mulf %208, %192 : vector<16x128xf32>
    %211 = arith.mulf %207, %206 : vector<16x128xf32>
    %212 = arith.addf %210, %211 : vector<16x128xf32>
    %213 = math.tanh %212 : vector<16x128xf32>
    %214 = arith.mulf %209, %213 : vector<16x128xf32>
    %215 = vector.extract_strided_slice %11 {offsets = [160, 0], sizes = [16, 512], strides = [1, 1]} : vector<256x512xf32> to vector<16x512xf32>
    %216 = arith.truncf %214 : vector<16x128xf32> to vector<16x128xbf16>
    %cst_29 = arith.constant dense<0.000000e+00> : vector<16x512xf32>
    %217 = tpu.matmul %216, %12, %cst_29 {dimension_numbers = #tpu.dot_dimension_numbers<[1], [0], [0], [1], [0, 0, 1, 1], [], []>} : vector<16x128xbf16>, vector<128x512xbf16>, vector<16x512xf32> -> vector<16x512xf32>
    %218 = arith.addf %215, %217 : vector<16x512xf32>
    %219 = vector.extract_strided_slice %218 {offsets = [0, 0], sizes = [16, 384], strides = [1, 1]} : vector<16x512xf32> to vector<16x384xf32>
    %220 = arith.negf %219 : vector<16x384xf32>
    %221 = math.exp %220 : vector<16x384xf32>
    %cst_30 = arith.constant 1.000000e+00 : f32
    %222 = vector.broadcast %cst_30 : f32 to vector<16x384xf32>
    %223 = arith.addf %222, %221 : vector<16x384xf32>
    %224 = arith.divf %222, %223 : vector<16x384xf32>
    %225 = vector.extract_strided_slice %218 {offsets = [0, 384], sizes = [16, 128], strides = [1, 1]} : vector<16x512xf32> to vector<16x128xf32>
    %226 = math.tanh %225 : vector<16x128xf32>
    %227 = vector.extract_strided_slice %224 {offsets = [0, 0], sizes = [16, 128], strides = [1, 1]} : vector<16x384xf32> to vector<16x128xf32>
    %228 = vector.extract_strided_slice %224 {offsets = [0, 128], sizes = [16, 128], strides = [1, 1]} : vector<16x384xf32> to vector<16x128xf32>
    %229 = vector.extract_strided_slice %224 {offsets = [0, 256], sizes = [16, 128], strides = [1, 1]} : vector<16x384xf32> to vector<16x128xf32>
    %230 = arith.mulf %228, %212 : vector<16x128xf32>
    %231 = arith.mulf %227, %226 : vector<16x128xf32>
    %232 = arith.addf %230, %231 : vector<16x128xf32>
    %233 = math.tanh %232 : vector<16x128xf32>
    %234 = arith.mulf %229, %233 : vector<16x128xf32>
    %235 = vector.extract_strided_slice %11 {offsets = [176, 0], sizes = [16, 512], strides = [1, 1]} : vector<256x512xf32> to vector<16x512xf32>
    %236 = arith.truncf %234 : vector<16x128xf32> to vector<16x128xbf16>
    %cst_31 = arith.constant dense<0.000000e+00> : vector<16x512xf32>
    %237 = tpu.matmul %236, %12, %cst_31 {dimension_numbers = #tpu.dot_dimension_numbers<[1], [0], [0], [1], [0, 0, 1, 1], [], []>} : vector<16x128xbf16>, vector<128x512xbf16>, vector<16x512xf32> -> vector<16x512xf32>
    %238 = arith.addf %235, %237 : vector<16x512xf32>
    %239 = vector.extract_strided_slice %238 {offsets = [0, 0], sizes = [16, 384], strides = [1, 1]} : vector<16x512xf32> to vector<16x384xf32>
    %240 = arith.negf %239 : vector<16x384xf32>
    %241 = math.exp %240 : vector<16x384xf32>
    %cst_32 = arith.constant 1.000000e+00 : f32
    %242 = vector.broadcast %cst_32 : f32 to vector<16x384xf32>
    %243 = arith.addf %242, %241 : vector<16x384xf32>
    %244 = arith.divf %242, %243 : vector<16x384xf32>
    %245 = vector.extract_strided_slice %238 {offsets = [0, 384], sizes = [16, 128], strides = [1, 1]} : vector<16x512xf32> to vector<16x128xf32>
    %246 = math.tanh %245 : vector<16x128xf32>
    %247 = vector.extract_strided_slice %244 {offsets = [0, 0], sizes = [16, 128], strides = [1, 1]} : vector<16x384xf32> to vector<16x128xf32>
    %248 = vector.extract_strided_slice %244 {offsets = [0, 128], sizes = [16, 128], strides = [1, 1]} : vector<16x384xf32> to vector<16x128xf32>
    %249 = vector.extract_strided_slice %244 {offsets = [0, 256], sizes = [16, 128], strides = [1, 1]} : vector<16x384xf32> to vector<16x128xf32>
    %250 = arith.mulf %248, %232 : vector<16x128xf32>
    %251 = arith.mulf %247, %246 : vector<16x128xf32>
    %252 = arith.addf %250, %251 : vector<16x128xf32>
    %253 = math.tanh %252 : vector<16x128xf32>
    %254 = arith.mulf %249, %253 : vector<16x128xf32>
    %255 = vector.extract_strided_slice %11 {offsets = [192, 0], sizes = [16, 512], strides = [1, 1]} : vector<256x512xf32> to vector<16x512xf32>
    %256 = arith.truncf %254 : vector<16x128xf32> to vector<16x128xbf16>
    %cst_33 = arith.constant dense<0.000000e+00> : vector<16x512xf32>
    %257 = tpu.matmul %256, %12, %cst_33 {dimension_numbers = #tpu.dot_dimension_numbers<[1], [0], [0], [1], [0, 0, 1, 1], [], []>} : vector<16x128xbf16>, vector<128x512xbf16>, vector<16x512xf32> -> vector<16x512xf32>
    %258 = arith.addf %255, %257 : vector<16x512xf32>
    %259 = vector.extract_strided_slice %258 {offsets = [0, 0], sizes = [16, 384], strides = [1, 1]} : vector<16x512xf32> to vector<16x384xf32>
    %260 = arith.negf %259 : vector<16x384xf32>
    %261 = math.exp %260 : vector<16x384xf32>
    %cst_34 = arith.constant 1.000000e+00 : f32
    %262 = vector.broadcast %cst_34 : f32 to vector<16x384xf32>
    %263 = arith.addf %262, %261 : vector<16x384xf32>
    %264 = arith.divf %262, %263 : vector<16x384xf32>
    %265 = vector.extract_strided_slice %258 {offsets = [0, 384], sizes = [16, 128], strides = [1, 1]} : vector<16x512xf32> to vector<16x128xf32>
    %266 = math.tanh %265 : vector<16x128xf32>
    %267 = vector.extract_strided_slice %264 {offsets = [0, 0], sizes = [16, 128], strides = [1, 1]} : vector<16x384xf32> to vector<16x128xf32>
    %268 = vector.extract_strided_slice %264 {offsets = [0, 128], sizes = [16, 128], strides = [1, 1]} : vector<16x384xf32> to vector<16x128xf32>
    %269 = vector.extract_strided_slice %264 {offsets = [0, 256], sizes = [16, 128], strides = [1, 1]} : vector<16x384xf32> to vector<16x128xf32>
    %270 = arith.mulf %268, %252 : vector<16x128xf32>
    %271 = arith.mulf %267, %266 : vector<16x128xf32>
    %272 = arith.addf %270, %271 : vector<16x128xf32>
    %273 = math.tanh %272 : vector<16x128xf32>
    %274 = arith.mulf %269, %273 : vector<16x128xf32>
    %275 = vector.extract_strided_slice %11 {offsets = [208, 0], sizes = [16, 512], strides = [1, 1]} : vector<256x512xf32> to vector<16x512xf32>
    %276 = arith.truncf %274 : vector<16x128xf32> to vector<16x128xbf16>
    %cst_35 = arith.constant dense<0.000000e+00> : vector<16x512xf32>
    %277 = tpu.matmul %276, %12, %cst_35 {dimension_numbers = #tpu.dot_dimension_numbers<[1], [0], [0], [1], [0, 0, 1, 1], [], []>} : vector<16x128xbf16>, vector<128x512xbf16>, vector<16x512xf32> -> vector<16x512xf32>
    %278 = arith.addf %275, %277 : vector<16x512xf32>
    %279 = vector.extract_strided_slice %278 {offsets = [0, 0], sizes = [16, 384], strides = [1, 1]} : vector<16x512xf32> to vector<16x384xf32>
    %280 = arith.negf %279 : vector<16x384xf32>
    %281 = math.exp %280 : vector<16x384xf32>
    %cst_36 = arith.constant 1.000000e+00 : f32
    %282 = vector.broadcast %cst_36 : f32 to vector<16x384xf32>
    %283 = arith.addf %282, %281 : vector<16x384xf32>
    %284 = arith.divf %282, %283 : vector<16x384xf32>
    %285 = vector.extract_strided_slice %278 {offsets = [0, 384], sizes = [16, 128], strides = [1, 1]} : vector<16x512xf32> to vector<16x128xf32>
    %286 = math.tanh %285 : vector<16x128xf32>
    %287 = vector.extract_strided_slice %284 {offsets = [0, 0], sizes = [16, 128], strides = [1, 1]} : vector<16x384xf32> to vector<16x128xf32>
    %288 = vector.extract_strided_slice %284 {offsets = [0, 128], sizes = [16, 128], strides = [1, 1]} : vector<16x384xf32> to vector<16x128xf32>
    %289 = vector.extract_strided_slice %284 {offsets = [0, 256], sizes = [16, 128], strides = [1, 1]} : vector<16x384xf32> to vector<16x128xf32>
    %290 = arith.mulf %288, %272 : vector<16x128xf32>
    %291 = arith.mulf %287, %286 : vector<16x128xf32>
    %292 = arith.addf %290, %291 : vector<16x128xf32>
    %293 = math.tanh %292 : vector<16x128xf32>
    %294 = arith.mulf %289, %293 : vector<16x128xf32>
    %295 = vector.extract_strided_slice %11 {offsets = [224, 0], sizes = [16, 512], strides = [1, 1]} : vector<256x512xf32> to vector<16x512xf32>
    %296 = arith.truncf %294 : vector<16x128xf32> to vector<16x128xbf16>
    %cst_37 = arith.constant dense<0.000000e+00> : vector<16x512xf32>
    %297 = tpu.matmul %296, %12, %cst_37 {dimension_numbers = #tpu.dot_dimension_numbers<[1], [0], [0], [1], [0, 0, 1, 1], [], []>} : vector<16x128xbf16>, vector<128x512xbf16>, vector<16x512xf32> -> vector<16x512xf32>
    %298 = arith.addf %295, %297 : vector<16x512xf32>
    %299 = vector.extract_strided_slice %298 {offsets = [0, 0], sizes = [16, 384], strides = [1, 1]} : vector<16x512xf32> to vector<16x384xf32>
    %300 = arith.negf %299 : vector<16x384xf32>
    %301 = math.exp %300 : vector<16x384xf32>
    %cst_38 = arith.constant 1.000000e+00 : f32
    %302 = vector.broadcast %cst_38 : f32 to vector<16x384xf32>
    %303 = arith.addf %302, %301 : vector<16x384xf32>
    %304 = arith.divf %302, %303 : vector<16x384xf32>
    %305 = vector.extract_strided_slice %298 {offsets = [0, 384], sizes = [16, 128], strides = [1, 1]} : vector<16x512xf32> to vector<16x128xf32>
    %306 = math.tanh %305 : vector<16x128xf32>
    %307 = vector.extract_strided_slice %304 {offsets = [0, 0], sizes = [16, 128], strides = [1, 1]} : vector<16x384xf32> to vector<16x128xf32>
    %308 = vector.extract_strided_slice %304 {offsets = [0, 128], sizes = [16, 128], strides = [1, 1]} : vector<16x384xf32> to vector<16x128xf32>
    %309 = vector.extract_strided_slice %304 {offsets = [0, 256], sizes = [16, 128], strides = [1, 1]} : vector<16x384xf32> to vector<16x128xf32>
    %310 = arith.mulf %308, %292 : vector<16x128xf32>
    %311 = arith.mulf %307, %306 : vector<16x128xf32>
    %312 = arith.addf %310, %311 : vector<16x128xf32>
    %313 = math.tanh %312 : vector<16x128xf32>
    %314 = arith.mulf %309, %313 : vector<16x128xf32>
    %315 = vector.extract_strided_slice %11 {offsets = [240, 0], sizes = [16, 512], strides = [1, 1]} : vector<256x512xf32> to vector<16x512xf32>
    %316 = arith.truncf %314 : vector<16x128xf32> to vector<16x128xbf16>
    %cst_39 = arith.constant dense<0.000000e+00> : vector<16x512xf32>
    %317 = tpu.matmul %316, %12, %cst_39 {dimension_numbers = #tpu.dot_dimension_numbers<[1], [0], [0], [1], [0, 0, 1, 1], [], []>} : vector<16x128xbf16>, vector<128x512xbf16>, vector<16x512xf32> -> vector<16x512xf32>
    %318 = arith.addf %315, %317 : vector<16x512xf32>
    %319 = vector.extract_strided_slice %318 {offsets = [0, 0], sizes = [16, 384], strides = [1, 1]} : vector<16x512xf32> to vector<16x384xf32>
    %320 = arith.negf %319 : vector<16x384xf32>
    %321 = math.exp %320 : vector<16x384xf32>
    %cst_40 = arith.constant 1.000000e+00 : f32
    %322 = vector.broadcast %cst_40 : f32 to vector<16x384xf32>
    %323 = arith.addf %322, %321 : vector<16x384xf32>
    %324 = arith.divf %322, %323 : vector<16x384xf32>
    %325 = vector.extract_strided_slice %318 {offsets = [0, 384], sizes = [16, 128], strides = [1, 1]} : vector<16x512xf32> to vector<16x128xf32>
    %326 = math.tanh %325 : vector<16x128xf32>
    %327 = vector.extract_strided_slice %324 {offsets = [0, 0], sizes = [16, 128], strides = [1, 1]} : vector<16x384xf32> to vector<16x128xf32>
    %328 = vector.extract_strided_slice %324 {offsets = [0, 128], sizes = [16, 128], strides = [1, 1]} : vector<16x384xf32> to vector<16x128xf32>
    %329 = vector.extract_strided_slice %324 {offsets = [0, 256], sizes = [16, 128], strides = [1, 1]} : vector<16x384xf32> to vector<16x128xf32>
    %330 = arith.mulf %328, %312 : vector<16x128xf32>
    %331 = arith.mulf %327, %326 : vector<16x128xf32>
    %332 = arith.addf %330, %331 : vector<16x128xf32>
    %333 = math.tanh %332 : vector<16x128xf32>
    %334 = arith.mulf %329, %333 : vector<16x128xf32>
    tpu.wait_dma2 semaphore(%arg8 : memref<!tpu.dma_semaphore, #tpu.memory_space<semaphore_mem>>) src(%arg4 : memref<128x256xbf16, #tpu.memory_space<any>>) dst(%arg7 : memref<128x256xbf16, #tpu.memory_space<vmem>>)
    %335 = arith.truncf %334 : vector<16x128xf32> to vector<16x128xbf16>
    %c0_41 = arith.constant 0 : index
    %c0_42 = arith.constant 0 : index
    %336 = vector.load %arg7[%c0_41, %c0_42] : memref<128x256xbf16, #tpu.memory_space<vmem>>, vector<128x256xbf16>
    %cst_43 = arith.constant dense<0.000000e+00> : vector<16x256xf32>
    %337 = tpu.matmul %335, %336, %cst_43 {dimension_numbers = #tpu.dot_dimension_numbers<[1], [0], [0], [1], [0, 0, 1, 1], [], []>} : vector<16x128xbf16>, vector<128x256xbf16>, vector<16x256xf32> -> vector<16x256xf32>
    %c0_44 = arith.constant 0 : index
    %c0_45 = arith.constant 0 : index
    %338 = vector.load %arg5[%c0_44, %c0_45] : memref<1x256xf32, #tpu.memory_space<vmem>>, vector<1x256xf32>
    %339 = vector.broadcast %338 : vector<1x256xf32> to vector<16x256xf32>
    %340 = arith.addf %337, %339 : vector<16x256xf32>
    %c0_46 = arith.constant 0 : index
    %c0_47 = arith.constant 0 : index
    %341 = vector.load %arg6[%c0_46, %c0_47] : memref<16x256xf32, #tpu.memory_space<vmem>>, vector<16x256xf32>
    tpu.vector_store %arg6[%c0_46, %c0_47], %340 {strides = array<i32>} : memref<16x256xf32, #tpu.memory_space<vmem>>, vector<16x256xf32>,
    return
  }
}

</mosaic_0001>

<bundles_post_ra>
// kernel: tpu_custom_call.1
= control target key start
LH: loop header
LB: loop body
LE: loop exit
PB: predicated region body
PF: predicated region fallthrough
CT: control target
= control target key end

     0   :  { %11 = vsyncpa [#allocation5], 0  ;;  %s9080_s0 = inlined_call_operand.vmem [shape: s32[256,1], index: 0, kind: input, shape index: {}]   ;;  %s9081_s1 = inlined_call_operand.hbm [shape: bf16[192,512], index: 1, kind: input, shape index: {}]   ;;  %s9082_s2 = inlined_call_operand.vmem [shape: bf16[128,512], index: 2, kind: input, shape index: {}]   ;;  %s9083_s3 = inlined_call_operand.vmem [shape: f32[1,512], index: 3, kind: input, shape index: {}]   ;;  %s9084_s4 = inlined_call_operand.hbm [shape: bf16[128,256], index: 4, kind: input, shape index: {}]   ;;  %s9085_s5 = inlined_call_operand.hbm [shape: f32[1,256], index: 5, kind: input, shape index: {}]   ;;  %s9086_s6 = inlined_call_operand.hbm [shape: f32[16,256], index: 6, kind: output, shape index: {}]  }
   0x1   :  { %12 = vsyncpa [#allocation8], 0 }
   0x2   :  { %13 = vsyncpa [#allocation6], 0  ;;  %s20_s23 = sshll.u32 %s9081_s1, 4  ;;  %s6354_s24 = smov [#allocation4]   ;;  %s21_s23 = int_to_ptr.hbm [resolvable:$true] %s20_s23 }
   0x3   :  { %s22_s25 = sshll.u32 %s6354_s24, 4  ;;  %s38_s28 = sshll.u32 %s9085_s5, 4  ;;  %s23_s25 = int_to_ptr.vmem [resolvable:$true] %s22_s25  ;;  %s39_s28 = int_to_ptr.hbm [resolvable:$true] %s38_s28 }
   0x4   :  { %s6355_s29 = smov 256   ;;  %s6356_s30 = smov 16  }
   0x5   :  { %28 = dma.hbm_to_vmem [thread:$0]  %s21_s23, 6144, %s23_s25, [#allocation5], %s6355_s29, %s6355_s29, %s6356_s30  }
   0x6   :  { %s6357_s7 = smov [#allocation7]  }
   0x7   :  { %s40_s8 = sshll.u32 %s6357_s7, 4  ;;  %s41_s8 = int_to_ptr.vmem [resolvable:$true] %s40_s8 }
   0x8   :  { %43 = dma.hbm_to_vmem [thread:$0]  %s39_s28, 32, %s41_s8, [#allocation8]  }
   0x9   :  { %6346 = dma.done.wait [#allocation5], 6144  }
   0xa   :  { %6347 = vsyncadd [#allocation5], 4294961152 }
   0xb   :  { %6348 = dma.done.wait [#allocation8], 32  }
   0xc   :  { %6349 = vsyncadd [#allocation8], 4294967264  ;;  %v9092_v0 = vmov 0   ;;  %v70_v1 = vld [vmem:[%s9080_s0 + $0x20] sm:$0xff]  ;;  %v68_v2 = vld [vmem:[%s9080_s0 + $0x10] sm:$0xff]  ;;  %vm9087_vm5 = vcmask 523264  }
   0xd   :  { %5736 = vset.pattern.permute.xlu2 %v9092_v0  ;;  %5735 = vset.pattern.permute.xlu1 %v9092_v0  ;;  %v66_v3 = vld [vmem:[%s9080_s0] sm:$0xff]  ;;  %v71_v4 = vld [vmem:[%s9080_s0 + $0x28] sm:$0xff]  ;;  %v69_v5 = vld [vmem:[%s9080_s0 + $0x18] sm:$0xff]  ;;  %s60_s28 = sshll.u32 %s9084_s4, 4  ;;  %s6361_s7 = smov [#allocation2]   ;;  %s61_s28 = int_to_ptr.hbm [resolvable:$true] %s60_s28 }
   0xe   :  { %5734 = vset.pattern.permute.xlu0 %v9092_v0  ;;  %114 = vperm.xlu2 %5736, %v70_v1   ;;  %v67_v6 = vld [vmem:[%s9080_s0 + $0x8] sm:$0xff]  ;;  %v74_v7 = vld [vmem:[%s9080_s0 + $0x40] sm:$0xff]  ;;  %v73_v8 = vld [vmem:[%s9080_s0 + $0x38] sm:$0xff]  ;;  %s62_s8 = sshll.u32 %s6361_s7, 4  ;;  %s63_s8 = int_to_ptr.vmem [resolvable:$true] %s62_s8 }
   0xf   :  { %108 = vperm.xlu1 %5735, %v68_v2   ;;  %102 = vperm.xlu0 %5734, %v66_v3   ;;  %v72_v9 = vld [vmem:[%s9080_s0 + $0x30] sm:$0xff]  ;;  %v77_v10 = vld [vmem:[%s9080_s0 + $0x58] sm:$0xff]  ;;  %v75_v12 = vld [vmem:[%s9080_s0 + $0x48] sm:$0xff]  ;;  %65 = dma.hbm_to_vmem [thread:$0]  %s61_s28, 2048, %s63_s8, [#allocation3] }
  0x10   :  { %v76_v11 = vld [vmem:[%s9080_s0 + $0x50] sm:$0xff]  ;;  %v79_v14 = vld [vmem:[%s9080_s0 + $0x68] sm:$0xff]  ;;  %v78_v15 = vld [vmem:[%s9080_s0 + $0x60] sm:$0xff] }
  0x11   :  { %v80_v13 = vld [vmem:[%s9080_s0 + $0x70] sm:$0xff]  ;;  %v83_v16 = vld [vmem:[%s9080_s0 + $0x88] sm:$0xff]  ;;  %v82_v17 = vld [vmem:[%s9080_s0 + $0x80] sm:$0xff] }
  0x12   :  { %v81_v18 = vld [vmem:[%s9080_s0 + $0x78] sm:$0xff]  ;;  %v86_v19 = vld [vmem:[%s9080_s0 + $0xa0] sm:$0xff]  ;;  %v84_v21 = vld [vmem:[%s9080_s0 + $0x90] sm:$0xff] }
  0x13   :  { %v85_v20 = vld [vmem:[%s9080_s0 + $0x98] sm:$0xff]  ;;  %v88_v23 = vld [vmem:[%s9080_s0 + $0xb0] sm:$0xff]  ;;  %v87_v24 = vld [vmem:[%s9080_s0 + $0xa8] sm:$0xff] }
  0x14   :  { %v89_v22 = vld [vmem:[%s9080_s0 + $0xb8] sm:$0xff]  ;;  %v92_v25 = vld [vmem:[%s9080_s0 + $0xd0] sm:$0xff]  ;;  %v91_v26 = vld [vmem:[%s9080_s0 + $0xc8] sm:$0xff] }
  0x15   :  { %v5070_v27 = vld [vmem:[#allocation4 + $0xe0] sm:$0xf]  ;;  %v5659_v28 = vld [vmem:[#allocation4 + $0xec] sm:$0xf0]  ;;  %v5657_v29 = vld [vmem:[#allocation4 + $0xe4] sm:$0xf] }
  0x16   :  { %117 = vperm.xlu2 %5736, %v71_v4   ;;  %v5071_v30 = vor.u32 %v5659_v28, %v5070_v27  ;;  %v5072_v31 = vld [vmem:[#allocation4 + $0xf0] sm:$0xf0]  ;;  %v5054_v32 = vld [vmem:[#allocation4 + $0xc0] sm:$0xf]  ;;  %v5655_v33 = vld [vmem:[#allocation4 + $0xcc] sm:$0xf0] }
  0x17   :  { %111 = vperm.xlu1 %5735, %v69_v5   ;;  %105 = vperm.xlu0 %5734, %v67_v6   ;;  %v90_v34 = vld [vmem:[%s9080_s0 + $0xc0] sm:$0xff]  ;;  %v5075_v35 = vor.u32 %v5657_v29, %v5072_v31  ;;  %v5056_v37 = vld [vmem:[#allocation4 + $0xd0] sm:$0xf0]  ;;  %v5055_v38 = vor.u32 %v5655_v33, %v5054_v32  ;;  %v95_v40 = vld [vmem:[%s9080_s0 + $0xe8] sm:$0xff] }
  0x18   :  { %v5653_v36 = vld [vmem:[#allocation4 + $0xc4] sm:$0xf]  ;;  %768 = vmatpush.bf16.msra.mxu0 %v5071_v30  ;;  %v5038_v42 = vld [vmem:[#allocation4 + $0xa0] sm:$0xf]  ;;  %v5651_v43 = vld [vmem:[#allocation4 + $0xac] sm:$0xf0] }
  0x19   :  { %946 = vmatpush.bf16.msra.mxu2 %v5075_v35  ;;  %v5059_v39 = vor.u32 %v5653_v36, %v5056_v37  ;;  %v94_v41 = vld [vmem:[%s9080_s0 + $0xe0] sm:$0xff]  ;;  %v5039_v45 = vor.u32 %v5651_v43, %v5038_v42  ;;  %v5040_v46 = vld [vmem:[#allocation4 + $0xb0] sm:$0xf0]  ;;  %v5647_v48 = vld [vmem:[#allocation4 + $0x8c] sm:$0xf0] }
  0x1a   :  { %v5649_v44 = vld [vmem:[#allocation4 + $0xa4] sm:$0xf]  ;;  %v5022_v47 = vld [vmem:[#allocation4 + $0x80] sm:$0xf]  ;;  %v93_v49 = vld [vmem:[%s9080_s0 + $0xd8] sm:$0xff] }
  0x1b   :  { %v5043_v50 = vor.u32 %v5649_v44, %v5040_v46  ;;  %v5645_v51 = vld [vmem:[#allocation4 + $0x84] sm:$0xf]  ;;  %v5024_v52 = vld [vmem:[#allocation4 + $0x90] sm:$0xf0]  ;;  %v5023_v53 = vor.u32 %v5647_v48, %v5022_v47  ;;  %v97_v55 = vld [vmem:[%s9080_s0 + $0xf8] sm:$0xff]  ;;  %v98_v48 = vlaneseq }
  0x1c   :  { %769 = vmatpush.bf16.msra.mxu0 %v5055_v38  ;;  %v5027_v54 = vor.u32 %v5645_v51, %v5024_v52  ;;  %v96_v56 = vld [vmem:[%s9080_s0 + $0xf0] sm:$0xff]  ;;  %v5006_v57 = vld [vmem:[#allocation4 + $0x60] sm:$0xf]  ;;  %v5641_v59 = vld [vmem:[#allocation4 + $0x64] sm:$0xf] }
  0x1d   :  { %947 = vmatpush.bf16.msra.mxu2 %v5059_v39  ;;  %v5643_v58 = vld [vmem:[#allocation4 + $0x6c] sm:$0xf0]  ;;  %v5008_v61 = vld [vmem:[#allocation4 + $0x70] sm:$0xf0]  ;;  %v5134_v62 = vld [vmem:[#allocation4 + $0x160] sm:$0xf] }
  0x1e   :  { %126 = vperm.xlu2 %5736, %v74_v7   ;;  %v5007_v60 = vor.u32 %v5643_v58, %v5006_v57  ;;  %v5675_v63 = vld [vmem:[#allocation4 + $0x16c] sm:$0xf0]  ;;  %v5011_v1 = vor.u32 %v5641_v59, %v5008_v61  ;;  %v5673_v3 = vld [vmem:[#allocation4 + $0x164] sm:$0xf]  ;;  %v5136_v4 = vld [vmem:[#allocation4 + $0x170] sm:$0xf0] }
  0x1f   :  { %123 = vperm.xlu1 %5735, %v73_v8   ;;  %120 = vperm.xlu0 %5734, %v72_v9   ;;  %v5135_v2 = vor.u32 %v5675_v63, %v5134_v62  ;;  %v4990_v5 = vld [vmem:[#allocation4 + $0x40] sm:$0xf]  ;;  %v5139_v6 = vor.u32 %v5673_v3, %v5136_v4  ;;  %v5639_v7 = vld [vmem:[#allocation4 + $0x4c] sm:$0xf0]  ;;  %v5637_v8 = vld [vmem:[#allocation4 + $0x44] sm:$0xf] }
  0x20   :  { %770 = vmatpush.bf16.msra.mxu0 %v5039_v45  ;;  %v4992_v9 = vld [vmem:[#allocation4 + $0x50] sm:$0xf0]  ;;  %v5665_v27 = vld [vmem:[#allocation4 + $0x124] sm:$0xf]  ;;  %v4958_v29 = vld [vmem:[#allocation4] sm:$0xf] }
  0x21   :  { %948 = vmatpush.bf16.msra.mxu2 %v5043_v50  ;;  %861 = vmatpush.bf16.msra.mxu1 %v5135_v2  ;;  %v5104_v28 = vld [vmem:[#allocation4 + $0x130] sm:$0xf0]  ;;  %v5631_v31 = vld [vmem:[#allocation4 + $0xc] sm:$0xf0]  ;;  %v5629_v32 = vld [vmem:[#allocation4 + $0x4] sm:$0xf] }
  0x22   :  { %1039 = vmatpush.bf16.msra.mxu3 %v5139_v6  ;;  %v5107_v30 = vor.u32 %v5665_v27, %v5104_v28  ;;  %v4960_v33 = vld [vmem:[#allocation4 + $0x10] sm:$0xf0]  ;;  %v5086_v36 = vld [vmem:[#allocation4 + $0x100] sm:$0xf]  ;;  %v5663_v37 = vld [vmem:[#allocation4 + $0x10c] sm:$0xf0] }
  0x23   :  { %v4963_v35 = vor.u32 %v5629_v32, %v4960_v33  ;;  %v5661_v38 = vld [vmem:[#allocation4 + $0x104] sm:$0xf]  ;;  %v5087_v39 = vor.u32 %v5663_v37, %v5086_v36  ;;  %v5142_v42 = vld [vmem:[#allocation4 + $0x168] sm:$0xf]  ;;  %v5676_v43 = vld [vmem:[#allocation4 + $0x174] sm:$0xf0] }
  0x24   :  { %771 = vmatpush.bf16.msra.mxu0 %v5023_v53  ;;  %v5143_v44 = vor.u32 %v5676_v43, %v5142_v42  ;;  %v5078_v45 = vld [vmem:[#allocation4 + $0xe8] sm:$0xf]  ;;  %v5660_v46 = vld [vmem:[#allocation4 + $0xf4] sm:$0xf0]  ;;  %v5080_v50 = vld [vmem:[#allocation4 + $0xf8] sm:$0xf0] }
  0x25   :  { %949 = vmatpush.bf16.msra.mxu2 %v5027_v54  ;;  %v5079_v47 = vor.u32 %v5660_v46, %v5078_v45  ;;  %v6506_v52 = vand.u32 127, %v98_v48  ;;  %v9096_v2 = vmov 1.0|1.0   ;;  %v5062_v3 = vld [vmem:[#allocation4 + $0xc8] sm:$0xf] }
  0x26   :  { %135 = vperm.xlu2 %5736, %v77_v10   ;;  %v4991_v10 = vor.u32 %v5639_v7, %v4990_v5  ;;  %v5656_v4 = vld [vmem:[#allocation4 + $0xd4] sm:$0xf0]  ;;  %v5650_v32 = vld [vmem:[#allocation4 + $0xac] sm:$0xf]  ;;  %v5048_v33 = vld [vmem:[#allocation4 + $0xb8] sm:$0xf0] }
  0x27   :  { %132 = vperm.xlu1 %5735, %v76_v11   ;;  %129 = vperm.xlu0 %5734, %v75_v12   ;;  %v4995_v11 = vor.u32 %v5637_v8, %v4992_v9  ;;  %v5118_v12 = vld [vmem:[#allocation4 + $0x140] sm:$0xf]  ;;  %v6509_v54 = vadd.s32 128, %v6506_v52  ;;  %v5063_v6 = vor.u32 %v5656_v4, %v5062_v3  ;;  %v5128_v36 = vld [vmem:[#allocation4 + $0x158] sm:$0xf0] }
  0x28   :  { %772 = vmatpush.bf16.msra.mxu0 %v5007_v60  ;;  %v9094_v60 = vmov 0.0   ;;  %v5648_v45 = vld [vmem:[#allocation4 + $0x94] sm:$0xf0] }
  0x29   :  { %950 = vmatpush.bf16.msra.mxu2 %v5011_v1 }
  0x2c   :  { %773 = vmatpush.bf16.msra.mxu0 %v4991_v10 }
  0x2d   :  { %951 = vmatpush.bf16.msra.mxu2 %v4995_v11 }
  0x2e   :  { %144 = vperm.xlu2 %5736, %v80_v13   ;;  %v5671_v13 = vld [vmem:[#allocation4 + $0x14c] sm:$0xf0] }
  0x2f   :  { %141 = vperm.xlu1 %5735, %v79_v14   ;;  %138 = vperm.xlu0 %5734, %v78_v15   ;;  %v5669_v14 = vld [vmem:[#allocation4 + $0x144] sm:$0xf]  ;;  %v5119_v15 = vor.u32 %v5671_v13, %v5118_v12  ;;  %v5654_v12 = vld [vmem:[#allocation4 + $0xcc] sm:$0xf]  ;;  %v5064_v13 = vld [vmem:[#allocation4 + $0xd8] sm:$0xf0] }
  0x31   :  { %862 = vmatpush.bf16.msra.mxu1 %v5119_v15 }
  0x36   :  { %153 = vperm.xlu2 %5736, %v83_v16   ;;  %v5120_v16 = vld [vmem:[#allocation4 + $0x150] sm:$0xf0] }
  0x37   :  { %150 = vperm.xlu1 %5735, %v82_v17   ;;  %147 = vperm.xlu0 %5734, %v81_v18   ;;  %v5123_v17 = vor.u32 %v5669_v14, %v5120_v16  ;;  %v4974_v18 = vld [vmem:[#allocation4 + $0x20] sm:$0xf]  ;;  %v5067_v14 = vor.u32 %v5654_v12, %v5064_v13  ;;  %v5644_v12 = vld [vmem:[#allocation4 + $0x74] sm:$0xf0] }
  0x39   :  { %1040 = vmatpush.bf16.msra.mxu3 %v5123_v17 }
  0x3d   :  { %1041 = vmatpush.bf16.msra.mxu3 %v5107_v30 }
  0x3e   :  { %162 = vperm.xlu2 %5736, %v86_v19   ;;  %v5635_v19 = vld [vmem:[#allocation4 + $0x2c] sm:$0xf0] }
  0x3f   :  { %159 = vperm.xlu1 %5735, %v85_v20   ;;  %156 = vperm.xlu0 %5734, %v84_v21   ;;  %v5633_v20 = vld [vmem:[#allocation4 + $0x24] sm:$0xf]  ;;  %v4975_v21 = vor.u32 %v5635_v19, %v4974_v18 }
  0x41   :  { %774 = vmatpush.bf16.msra.mxu0 %v4975_v21  ;;  %v5672_v21 = vld [vmem:[#allocation4 + $0x154] sm:$0xf0] }
  0x46   :  { %171 = vperm.xlu2 %5736, %v89_v22   ;;  %v4976_v22 = vld [vmem:[#allocation4 + $0x30] sm:$0xf0] }
  0x47   :  { %168 = vperm.xlu1 %5735, %v88_v23   ;;  %165 = vperm.xlu0 %5734, %v87_v24   ;;  %v5102_v23 = vld [vmem:[#allocation4 + $0x120] sm:$0xf]  ;;  %v5667_v24 = vld [vmem:[#allocation4 + $0x12c] sm:$0xf0] }
  0x4e   :  { %180 = vperm.xlu2 %5736, %v92_v25   ;;  %v4979_v25 = vor.u32 %v5633_v20, %v4976_v22  ;;  %v5126_v20 = vld [vmem:[#allocation4 + $0x148] sm:$0xf] }
  0x4f   :  { %177 = vperm.xlu1 %5735, %v91_v26   ;;  %174 = vperm.xlu0 %5734, %v90_v34   ;;  %v5103_v26 = vor.u32 %v5667_v24, %v5102_v23  ;;  %v4959_v34 = vor.u32 %v5631_v31, %v4958_v29  ;;  %v5127_v22 = vor.u32 %v5672_v21, %v5126_v20  ;;  %v5642_v21 = vld [vmem:[#allocation4 + $0x6c] sm:$0xf] }
  0x50   :  { %952 = vmatpush.bf16.msra.mxu2 %v4979_v25  ;;  %v5046_v25 = vld [vmem:[#allocation4 + $0xa8] sm:$0xf] }
  0x51   :  { %863 = vmatpush.bf16.msra.mxu1 %v5103_v26  ;;  %775 = vmatpush.bf16.msra.mxu0 %v4959_v34  ;;  %v5652_v26 = vld [vmem:[#allocation4 + $0xb4] sm:$0xf0]  ;;  %v5670_v34 = vld [vmem:[#allocation4 + $0x14c] sm:$0xf] }
  0x52   :  { %v5047_v27 = vor.u32 %v5652_v26, %v5046_v25  ;;  %v5131_v37 = vor.u32 %v5670_v34, %v5128_v36  ;;  %v469_v25 = vld [vmem:[%s9083_s3] sm:$0xf]  ;;  %v5666_v26 = vld [vmem:[#allocation4 + $0x12c] sm:$0xf] }
  0x54   :  { %953 = vmatpush.bf16.msra.mxu2 %v4963_v35  ;;  %v5051_v35 = vor.u32 %v5650_v32, %v5048_v33 }
  0x55   :  { %864 = vmatpush.bf16.msra.mxu1 %v5087_v39 }
  0x56   :  { %189 = vperm.xlu2 %5736, %v95_v40   ;;  %v5088_v40 = vld [vmem:[#allocation4 + $0x110] sm:$0xf0] }
  0x57   :  { %186 = vperm.xlu1 %5735, %v94_v41   ;;  %183 = vperm.xlu0 %5734, %v93_v49   ;;  %v5091_v41 = vor.u32 %v5661_v38, %v5088_v40  ;;  %v5658_v49 = vld [vmem:[#allocation4 + $0xec] sm:$0xf] }
  0x58   :  { %v5083_v51 = vor.u32 %v5658_v49, %v5080_v50 }
  0x59   :  { %1042 = vmatpush.bf16.msra.mxu3 %v5091_v41  ;;  %1124 = vmatpush.bf16.msrb.mxu1 %v5079_v47 }
  0x5a   :  { %1302 = vmatpush.bf16.msrb.mxu0 %v5083_v51 }
  0x5d   :  { %1217 = vmatpush.bf16.msrb.mxu3 %v5143_v44  ;;  %1125 = vmatpush.bf16.msrb.mxu1 %v5063_v6  ;;  %v5030_v44 = vld [vmem:[#allocation4 + $0x88] sm:$0xf]  ;;  %v5668_v6 = vld [vmem:[#allocation4 + $0x134] sm:$0xf0] }
  0x5e   :  { %1303 = vmatpush.bf16.msrb.mxu0 %v5067_v14  ;;  %v5031_v46 = vor.u32 %v5648_v45, %v5030_v44 }
  0x5f   :  { %195 = vperm.xlu1 %5735, %v97_v55   ;;  %192 = vperm.xlu0 %5734, %v96_v56   ;;  %v5674_v55 = vld [vmem:[#allocation4 + $0x16c] sm:$0xf]  ;;  %v5144_v56 = vld [vmem:[#allocation4 + $0x178] sm:$0xf0] }
  0x60   :  { %v5147_v57 = vor.u32 %v5674_v55, %v5144_v56  ;;  %v5646_v55 = vld [vmem:[#allocation4 + $0x8c] sm:$0xf]  ;;  %v5032_v56 = vld [vmem:[#allocation4 + $0x98] sm:$0xf0] }
  0x61   :  { %1218 = vmatpush.bf16.msrb.mxu3 %v5127_v22  ;;  %1126 = vmatpush.bf16.msrb.mxu1 %v5047_v27  ;;  %v5016_v22 = vld [vmem:[#allocation4 + $0x78] sm:$0xf0] }
  0x62   :  { %1395 = vmatpush.bf16.msrb.mxu2 %v5147_v57  ;;  %1304 = vmatpush.bf16.msrb.mxu0 %v5051_v35  ;;  %v5035_v57 = vor.u32 %v5646_v55, %v5032_v56  ;;  %v5112_v27 = vld [vmem:[#allocation4 + $0x138] sm:$0xf0] }
  0x65   :  { %1127 = vmatpush.bf16.msrb.mxu1 %v5031_v46 }
  0x66   :  { %1396 = vmatpush.bf16.msrb.mxu2 %v5131_v37  ;;  %1305 = vmatpush.bf16.msrb.mxu0 %v5035_v57 }
  0x68   :  { %v115_v9 = vpop.permute.xlu2 %114 }
  0x69   :  { %vm206_vm11 = vcmp.eq.s32.totalorder %v115_v9, %v6509_v54  ;;  %vm205_vm13 = vcmp.eq.s32.totalorder %v115_v9, %v6506_v52  ;;  %v5014_v9 = vld [vmem:[#allocation4 + $0x68] sm:$0xf] }
  0x6a   :  { %v4901_v16 = vsel %vm206_vm11, 1.0, %v9094_v60  ;;  %v5015_v13 = vor.u32 %v5644_v12, %v5014_v9 }
  0x6c   :  { %1128 = vmatpush.bf16.msrb.mxu1 %v5015_v13 }
  0x70   :  { %v118_v15 = vpop.permute.xlu2 %117 }
  0x71   :  { %vm208_vm12 = vcmp.eq.s32.totalorder %v118_v15, %v6509_v54  ;;  %vm207_vm14 = vcmp.eq.s32.totalorder %v118_v15, %v6506_v52 }
  0x72   :  { %v4903_v17 = vsel %vm208_vm12, 1.0, %v9094_v60  ;;  %vm6561_vm15 = vmpackc.low %vm207_vm14, %vm205_vm13 }
  0x73   :  { %v6565_v19 = vpack.c.bf16 %v4903_v17, %v4901_v16 }
  0x78   :  { %v127_v39 = vpop.permute.xlu2 %126 }
  0x80   :  { %v136_v48 = vpop.permute.xlu2 %135 }
  0x81   :  { %v103_v53 = vpop.permute.xlu0 %102  ;;  %v109_v59 = vpop.permute.xlu1 %108  ;;  %vm220_vm13 = vcmp.eq.s32.totalorder %v136_v48, %v6509_v54 }
  0x82   :  { %vm198_vm0 = vcmp.eq.s32.totalorder %v103_v53, %v6509_v54  ;;  %vm197_vm1 = vcmp.eq.s32.totalorder %v103_v53, %v6506_v52  ;;  %vm202_vm6 = vcmp.eq.s32.totalorder %v109_v59, %v6509_v54  ;;  %vm201_vm8 = vcmp.eq.s32.totalorder %v109_v59, %v6506_v52 }
  0x83   :  { %v4893_v61 = vsel %vm198_vm0, 1.0, %v9094_v60  ;;  %v4897_v7 = vsel %vm202_vm6, 1.0, %v9094_v60  ;;  %v4915_v49 = vsel %vm220_vm13, 1.0, %v9094_v60 }
  0x88   :  { %v145_v14 = vpop.permute.xlu2 %144 }
  0x89   :  { %v106_v58 = vpop.permute.xlu0 %105  ;;  %v112_v5 = vpop.permute.xlu1 %111 }
  0x8a   :  { %vm199_vm2 = vcmp.eq.s32.totalorder %v106_v58, %v6506_v52  ;;  %vm200_vm3 = vcmp.eq.s32.totalorder %v106_v58, %v6509_v54  ;;  %vm204_vm7 = vcmp.eq.s32.totalorder %v112_v5, %v6509_v54  ;;  %vm203_vm9 = vcmp.eq.s32.totalorder %v112_v5, %v6506_v52  ;;  %v5110_v5 = vld [vmem:[#allocation4 + $0x128] sm:$0xf] }
  0x8b   :  { %v4895_v62 = vsel %vm200_vm3, 1.0, %v9094_v60  ;;  %vm6517_vm4 = vmpackc.low %vm199_vm2, %vm197_vm1  ;;  %v4899_v8 = vsel %vm204_vm7, 1.0, %v9094_v60  ;;  %vm214_vm7 = vcmp.eq.s32.totalorder %v127_v39, %v6509_v54 }
  0x8c   :  { %v6521_v1 = vpack.c.bf16 %v4895_v62, %v4893_v61  ;;  %5149 = vmatmul.msk.bf16.vlgmr.msra.gmra.mxu0 %vm6517_vm4, %v9096_v2  ;;  %5197 = vmatmul.msk.bf16.vlgmr.msra.gmra.mxu2 %vm6517_vm4, %v9096_v2  ;;  %vm6539_vm10 = vmpackc.low %vm203_vm9, %vm201_vm8  ;;  %v6543_v11 = vpack.c.bf16 %v4899_v8, %v4897_v7  ;;  %vm213_vm9 = vcmp.eq.s32.totalorder %v127_v39, %v6506_v52  ;;  %v4909_v40 = vsel %vm214_vm7, 1.0, %v9094_v60 }
  0x8d   :  { %v5111_v7 = vor.u32 %v5668_v6, %v5110_v5 }
  0x8e   :  { %5180 = vmatmul.msk.bf16.vlgmr.msra.gmra.mxu1 %vm9087_vm5, %v6521_v1  ;;  %5228 = vmatmul.msk.bf16.vlgmr.msra.gmra.mxu3 %vm9087_vm5, %v6521_v1 }
  0x8f   :  { %1219 = vmatpush.bf16.msrb.mxu3 %v5111_v7 }
  0x90   :  { %v154_v32 = vpop.permute.xlu2 %153 }
  0x91   :  { %v124_v23 = vpop.permute.xlu1 %123  ;;  %v121_v24 = vpop.permute.xlu0 %120 }
  0x92   :  { %vm212_vm0 = vcmp.eq.s32.totalorder %v124_v23, %v6509_v54  ;;  %vm210_vm1 = vcmp.eq.s32.totalorder %v121_v24, %v6509_v54  ;;  %vm211_vm2 = vcmp.eq.s32.totalorder %v124_v23, %v6506_v52  ;;  %vm209_vm3 = vcmp.eq.s32.totalorder %v121_v24, %v6506_v52 }
  0x93   :  { %v4907_v28 = vsel %vm212_vm0, 1.0, %v9094_v60  ;;  %v4905_v29 = vsel %vm210_vm1, 1.0, %v9094_v60  ;;  %vm6583_vm6 = vmpackc.low %vm211_vm2, %vm209_vm3  ;;  %vm219_vm0 = vcmp.eq.s32.totalorder %v136_v48, %v6506_v52  ;;  %v5019_v23 = vor.u32 %v5642_v21, %v5016_v22 }
  0x94   :  { %v6587_v31 = vpack.c.bf16 %v4907_v28, %v4905_v29  ;;  %v5115_v28 = vor.u32 %v5666_v26, %v5112_v27  ;;  %v6691_v29 = vperm.slane %v469_v25, 0 }
  0x95   :  { %1306 = vmatpush.bf16.msrb.mxu0 %v5019_v23 }
  0x96   :  { %1397 = vmatpush.bf16.msrb.mxu2 %v5115_v28 }
  0x99   :  { %v130_v38 = vpop.permute.xlu0 %129  ;;  %v133_v47 = vpop.permute.xlu1 %132 }
  0x9a   :  { %vm216_vm8 = vcmp.eq.s32.totalorder %v130_v38, %v6509_v54  ;;  %vm215_vm11 = vcmp.eq.s32.totalorder %v130_v38, %v6506_v52  ;;  %vm218_vm14 = vcmp.eq.s32.totalorder %v133_v47, %v6509_v54  ;;  %vm217_vm1 = vcmp.eq.s32.totalorder %v133_v47, %v6506_v52 }
  0x9b   :  { %v4911_v41 = vsel %vm216_vm8, 1.0, %v9094_v60  ;;  %vm6605_vm12 = vmpackc.low %vm215_vm11, %vm213_vm9  ;;  %v4913_v50 = vsel %vm218_vm14, 1.0, %v9094_v60  ;;  %vm226_vm14 = vcmp.eq.s32.totalorder %v145_v14, %v6509_v54 }
  0x9c   :  { %5151 = vmatmul.msk.bf16.gmra.mxu0 %vm6539_vm10, %v9096_v2  ;;  %5199 = vmatmul.msk.bf16.gmra.mxu2 %vm6539_vm10, %v9096_v2  ;;  %v6609_v43 = vpack.c.bf16 %v4911_v41, %v4909_v40  ;;  %vm6627_vm2 = vmpackc.low %vm219_vm0, %vm217_vm1  ;;  %v6631_v53 = vpack.c.bf16 %v4915_v49, %v4913_v50  ;;  %vm225_vm1 = vcmp.eq.s32.totalorder %v145_v14, %v6506_v52  ;;  %v4921_v16 = vsel %vm226_vm14, 1.0, %v9094_v60 }
  0x9d   :  { %v6713_v41 = vperm.slane %v469_v25, 1  ;;  %v5000_v25 = vld [vmem:[#allocation4 + $0x58] sm:$0xf0] }
  0x9e   :  { %5181 = vmatmul.msk.bf16.gmra.mxu1 %vm9087_vm5, %v6543_v11  ;;  %5229 = vmatmul.msk.bf16.gmra.mxu3 %vm9087_vm5, %v6543_v11 }
  0xa1   :  { %v142_v58 = vpop.permute.xlu1 %141  ;;  %v139_v59 = vpop.permute.xlu0 %138 }
  0xa2   :  { %vm224_vm3 = vcmp.eq.s32.totalorder %v142_v58, %v6509_v54  ;;  %vm222_vm7 = vcmp.eq.s32.totalorder %v139_v59, %v6509_v54  ;;  %vm223_vm8 = vcmp.eq.s32.totalorder %v142_v58, %v6506_v52  ;;  %vm221_vm9 = vcmp.eq.s32.totalorder %v139_v59, %v6506_v52  ;;  %v4998_v58 = vld [vmem:[#allocation4 + $0x48] sm:$0xf]  ;;  %v5640_v59 = vld [vmem:[#allocation4 + $0x54] sm:$0xf0] }
  0xa3   :  { %v4919_v61 = vsel %vm224_vm3, 1.0, %v9094_v60  ;;  %v4917_v62 = vsel %vm222_vm7, 1.0, %v9094_v60  ;;  %vm6649_vm11 = vmpackc.low %vm223_vm8, %vm221_vm9  ;;  %vm232_vm8 = vcmp.eq.s32.totalorder %v154_v32, %v6509_v54 }
  0xa4   :  { %v6653_v4 = vpack.c.bf16 %v4919_v61, %v4917_v62  ;;  %v4927_v36 = vsel %vm232_vm8, 1.0, %v9094_v60  ;;  %v4999_v61 = vor.u32 %v5640_v59, %v4998_v58 }
  0xa6   :  { %1129 = vmatpush.bf16.msrb.mxu1 %v4999_v61 }
  0xa9   :  { %v148_v8 = vpop.permute.xlu0 %147  ;;  %v151_v24 = vpop.permute.xlu1 %150 }
  0xaa   :  { %vm228_vm13 = vcmp.eq.s32.totalorder %v148_v8, %v6509_v54  ;;  %vm227_vm0 = vcmp.eq.s32.totalorder %v148_v8, %v6506_v52  ;;  %vm230_vm7 = vcmp.eq.s32.totalorder %v151_v24, %v6509_v54  ;;  %vm229_vm9 = vcmp.eq.s32.totalorder %v151_v24, %v6506_v52  ;;  %v5638_v24 = vld [vmem:[#allocation4 + $0x4c] sm:$0xf] }
  0xab   :  { %v4923_v15 = vsel %vm228_vm13, 1.0, %v9094_v60  ;;  %vm6671_vm3 = vmpackc.low %vm227_vm0, %vm225_vm1  ;;  %v4925_v33 = vsel %vm230_vm7, 1.0, %v9094_v60  ;;  %vm231_vm13 = vcmp.eq.s32.totalorder %v154_v32, %v6506_v52  ;;  %v5003_v28 = vor.u32 %v5638_v24, %v5000_v25 }
  0xac   :  { %5153 = vmatmul.msk.bf16.gmra.mxu0 %vm6561_vm15, %v9096_v2  ;;  %5201 = vmatmul.msk.bf16.gmra.mxu2 %vm6561_vm15, %v9096_v2  ;;  %v6675_v20 = vpack.c.bf16 %v4923_v15, %v4921_v16  ;;  %vm6699_vm14 = vmpackc.low %vm231_vm13, %vm229_vm9  ;;  %v6703_v39 = vpack.c.bf16 %v4927_v36, %v4925_v33 }
  0xad   :  { %1307 = vmatpush.bf16.msrb.mxu0 %v5003_v28  ;;  %v5636_v28 = vld [vmem:[#allocation4 + $0x34] sm:$0xf0] }
  0xae   :  { %5182 = vmatmul.msk.bf16.gmra.mxu1 %vm9087_vm5, %v6565_v19  ;;  %5230 = vmatmul.msk.bf16.gmra.mxu3 %vm9087_vm5, %v6565_v19 }
  0xb1   :  { %v160_v48 = vpop.permute.xlu1 %159  ;;  %v157_v55 = vpop.permute.xlu0 %156 }
  0xb2   :  { %vm236_vm0 = vcmp.eq.s32.totalorder %v160_v48, %v6509_v54  ;;  %vm234_vm1 = vcmp.eq.s32.totalorder %v157_v55, %v6509_v54  ;;  %vm235_vm7 = vcmp.eq.s32.totalorder %v160_v48, %v6506_v52  ;;  %vm233_vm8 = vcmp.eq.s32.totalorder %v157_v55, %v6506_v52 }
  0xb3   :  { %v4931_v6 = vsel %vm236_vm0, 1.0, %v9094_v60  ;;  %v4929_v7 = vsel %vm234_vm1, 1.0, %v9094_v60  ;;  %vm6735_vm9 = vmpackc.low %vm235_vm7, %vm233_vm8 }
  0xb4   :  { %v6739_v16 = vpack.c.bf16 %v4931_v6, %v4929_v7  ;;  %v5664_v6 = vld [vmem:[#allocation4 + $0x114] sm:$0xf0] }
  0xb9   :  { %v169_v24 = vpop.permute.xlu1 %168 }
  0xbc   :  { %5155 = vmatmul.msk.bf16.gmra.mxu0 %vm6583_vm6, %v9096_v2  ;;  %5203 = vmatmul.msk.bf16.gmra.mxu2 %vm6583_vm6, %v9096_v2 }
  0xbe   :  { %5183 = vmatmul.msk.bf16.gmra.mxu1 %vm9087_vm5, %v6587_v31  ;;  %5231 = vmatmul.msk.bf16.gmra.mxu3 %vm9087_vm5, %v6587_v31 }
  0xcc   :  { %5157 = vmatmul.msk.bf16.gmra.mxu0 %vm6605_vm12, %v9096_v2  ;;  %5205 = vmatmul.msk.bf16.gmra.mxu2 %vm6605_vm12, %v9096_v2 }
  0xce   :  { %5184 = vmatmul.msk.bf16.gmra.mxu1 %vm9087_vm5, %v6609_v43  ;;  %5232 = vmatmul.msk.bf16.gmra.mxu3 %vm9087_vm5, %v6609_v43 }
  0xdc   :  { %5159 = vmatmul.msk.bf16.gmra.mxu0 %vm6627_vm2, %v9096_v2  ;;  %5207 = vmatmul.msk.bf16.gmra.mxu2 %vm6627_vm2, %v9096_v2 }
  0xde   :  { %5185 = vmatmul.msk.bf16.gmra.mxu1 %vm9087_vm5, %v6631_v53  ;;  %5233 = vmatmul.msk.bf16.gmra.mxu3 %vm9087_vm5, %v6631_v53 }
  0xec   :  { %5161 = vmatmul.msk.bf16.gmra.mxu0 %vm6649_vm11, %v9096_v2  ;;  %5209 = vmatmul.msk.bf16.gmra.mxu2 %vm6649_vm11, %v9096_v2 }
  0xee   :  { %5186 = vmatmul.msk.bf16.gmra.mxu1 %vm9087_vm5, %v6653_v4  ;;  %5234 = vmatmul.msk.bf16.gmra.mxu3 %vm9087_vm5, %v6653_v4 }
  0xfc   :  { %5163 = vmatmul.msk.bf16.gmra.mxu0 %vm6671_vm3, %v9096_v2  ;;  %5211 = vmatmul.msk.bf16.gmra.mxu2 %vm6671_vm3, %v9096_v2 }
  0xfe   :  { %5187 = vmatmul.msk.bf16.gmra.mxu1 %vm9087_vm5, %v6675_v20  ;;  %5235 = vmatmul.msk.bf16.gmra.mxu3 %vm9087_vm5, %v6675_v20 }
 0x109   :  { %v777_v34 = vpop.f32.mrf.mxu0 }
 0x10a   :  { %v778_v35 = vadd.f32 %v777_v34, %v6691_v29  ;;  %v166_v34 = vpop.permute.xlu0 %165 }
 0x10b   :  { %v866_v38 = vpop.f32.mrf.mxu1  ;;  %vm240_vm13 = vcmp.eq.s32.totalorder %v166_v34, %v6509_v54  ;;  %vm239_vm1 = vcmp.eq.s32.totalorder %v166_v34, %v6506_v52 }
 0x10c   :  { %v6705_v40 = vadd.f32 %v866_v38, %v778_v35  ;;  %5165 = vmatmul.msk.bf16.gmra.mxu0 %vm6699_vm14, %v9096_v2  ;;  %5213 = vmatmul.msk.bf16.gmra.mxu2 %vm6699_vm14, %v9096_v2  ;;  %v163_v38 = vpop.permute.xlu2 %162 }
 0x10d   :  { %vm238_vm0 = vcmp.eq.s32.totalorder %v163_v38, %v6509_v54  ;;  %vm237_vm7 = vcmp.eq.s32.totalorder %v163_v38, %v6506_v52 }
 0x10e   :  { %5188 = vmatmul.msk.bf16.gmra.mxu1 %vm9087_vm5, %v6703_v39  ;;  %5236 = vmatmul.msk.bf16.gmra.mxu3 %vm9087_vm5, %v6703_v39  ;;  %vm6769_vm8 = vmpackc.low %vm239_vm1, %vm237_vm7  ;;  %vm241_vm1 = vcmp.eq.s32.totalorder %v169_v24, %v6506_v52 }
 0x10f   :  { %v955_v44 = vpop.f32.mrf.mxu2 }
 0x110   :  { %v956_v45 = vadd.f32 %v955_v44, %v6713_v41 }
 0x111   :  { %v779_v46 = vpop.f32.mrf.mxu0  ;;  %v1044_v47 = vpop.f32.mrf.mxu3 }
 0x112   :  { %v780_v49 = vadd.f32 %v779_v46, %v6691_v29  ;;  %v6721_v50 = vadd.f32 %v1044_v47, %v956_v45  ;;  %v4935_v46 = vsel %vm240_vm13, 1.0, %v9094_v60  ;;  %vm242_vm13 = vcmp.eq.s32.totalorder %v169_v24, %v6509_v54 }
 0x113   :  { %v868_v56 = vpop.f32.mrf.mxu1 }
 0x114   :  { %v6723_v57 = vadd.f32 %v868_v56, %v780_v49  ;;  %v4933_v56 = vsel %vm238_vm0, 1.0, %v9094_v60 }
 0x115   :  { %v6773_v61 = vpack.c.bf16 %v4935_v46, %v4933_v56  ;;  %v9135_v56 = vmov 0 }
 0x117   :  { %v957_v62 = vpop.f32.mrf.mxu2 }
 0x118   :  { %v958_v5 = vadd.f32 %v957_v62, %v6713_v41 }
 0x119   :  { %v782_v8 = vpop.f32.mrf.mxu0  ;;  %v1046_v9 = vpop.f32.mrf.mxu3 }
 0x11a   :  { %v783_v12 = vadd.f32 %v782_v8, %v6691_v29  ;;  %v6733_v13 = vadd.f32 %v1046_v9, %v958_v5  ;;  %v5094_v5 = vld [vmem:[#allocation4 + $0x108] sm:$0xf] }
 0x11b   :  { %v871_v15 = vpop.f32.mrf.mxu1  ;;  %v5095_v8 = vor.u32 %v5664_v6, %v5094_v5 }
 0x11c   :  { %v6741_v21 = vadd.f32 %v871_v15, %v783_v12  ;;  %5167 = vmatmul.msk.bf16.gmra.mxu0 %vm6735_vm9, %v9096_v2  ;;  %5215 = vmatmul.msk.bf16.gmra.mxu2 %vm6735_vm9, %v9096_v2 }
 0x11d   :  { %1220 = vmatpush.bf16.msrb.mxu3 %v5095_v8 }
 0x11e   :  { %5189 = vmatmul.msk.bf16.gmra.mxu1 %vm9087_vm5, %v6739_v16  ;;  %5237 = vmatmul.msk.bf16.gmra.mxu3 %vm9087_vm5, %v6739_v16 }
 0x11f   :  { %v960_v22 = vpop.f32.mrf.mxu2 }
 0x120   :  { %v961_v23 = vadd.f32 %v960_v22, %v6713_v41 }
 0x121   :  { %v784_v26 = vpop.f32.mrf.mxu0  ;;  %v1049_v27 = vpop.f32.mrf.mxu3 }
 0x122   :  { %v785_v32 = vadd.f32 %v784_v26, %v6691_v29  ;;  %v6755_v33 = vadd.f32 %v1049_v27, %v961_v23  ;;  %v4982_v27 = vld [vmem:[#allocation4 + $0x28] sm:$0xf] }
 0x123   :  { %v873_v35 = vpop.f32.mrf.mxu1  ;;  %v4983_v34 = vor.u32 %v5636_v28, %v4982_v27 }
 0x124   :  { %9126 = vst [vmem:[#allocation18_spill] sm:$0xff] %v6755_v33  ;;  %v6757_v36 = vadd.f32 %v873_v35, %v785_v32  ;;  %v172_v32 = vpop.permute.xlu2 %171 }
 0x125   :  { %1130 = vmatpush.bf16.msrb.mxu1 %v4983_v34  ;;  %vm244_vm0 = vcmp.eq.s32.totalorder %v172_v32, %v6509_v54  ;;  %vm243_vm7 = vcmp.eq.s32.totalorder %v172_v32, %v6506_v52  ;;  %v175_v32 = vpop.permute.xlu0 %174 }
 0x126   :  { %9127 = vst [vmem:[#allocation19_spill] sm:$0xff] %v6757_v36 }
 0x127   :  { %v962_v44 = vpop.f32.mrf.mxu2 }
 0x128   :  { %v963_v45 = vadd.f32 %v962_v44, %v6713_v41  ;;  %v4937_v44 = vsel %vm242_vm13, 1.0, %v9094_v60  ;;  %vm9138_vm13 = vcmask 523264  }
 0x129   :  { %v787_v47 = vpop.f32.mrf.mxu0  ;;  %v1051_v48 = vpop.f32.mrf.mxu3 }
 0x12a   :  { %v788_v49 = vadd.f32 %v787_v47, %v6691_v29  ;;  %v6766_v55 = vadd.f32 %v1051_v48, %v963_v45 }
 0x12b   :  { %v876_v59 = vpop.f32.mrf.mxu1 }
 0x12c   :  { %9128 = vst [vmem:[#allocation20_spill] sm:$0xff] %v6766_v55  ;;  %v6775_v62 = vadd.f32 %v876_v59, %v788_v49  ;;  %5169 = vmatmul.msk.bf16.gmra.mxu0 %vm6769_vm8, %v9096_v2  ;;  %5217 = vmatmul.msk.bf16.gmra.mxu2 %vm6769_vm8, %v9096_v2  ;;  %v4939_v49 = vsel %vm244_vm0, 1.0, %v9094_v60  ;;  %vm9139_vm0 = vmmov %vm9138_vm13 }
 0x12d   :  { %v6807_v5 = vpack.c.bf16 %v4939_v49, %v4937_v44  ;;  %v5096_v44 = vld [vmem:[#allocation4 + $0x118] sm:$0xf0] }
 0x12e   :  { %9131 = vst [vmem:[#allocation21_spill] sm:$0xff] %v6775_v62  ;;  %5190 = vmatmul.msk.bf16.gmra.mxu1 %vm9087_vm5, %v6773_v61  ;;  %5238 = vmatmul.msk.bf16.gmra.mxu3 %vm9087_vm5, %v6773_v61  ;;  %vm6803_vm5 = vmpackc.low %vm243_vm7, %vm241_vm1  ;;  %vm246_vm7 = vcmp.eq.s32.totalorder %v175_v32, %v6509_v54 }
 0x12f   :  { %v965_v7 = vpop.f32.mrf.mxu2  ;;  %v9136_v56 = vsel %vm6803_vm5, 4294967295, %v9135_v56 }
 0x130   :  { %v966_v9 = vadd.f32 %v965_v7, %v6713_v41 }
 0x131   :  { %v789_v12 = vpop.f32.mrf.mxu0  ;;  %v1054_v15 = vpop.f32.mrf.mxu3 }
 0x132   :  { %v790_v22 = vadd.f32 %v789_v12, %v6691_v29  ;;  %v6789_v23 = vadd.f32 %v1054_v15, %v966_v9  ;;  %v5634_v9 = vld [vmem:[#allocation4 + $0x2c] sm:$0xf]  ;;  %v4984_v12 = vld [vmem:[#allocation4 + $0x38] sm:$0xf0] }
 0x133   :  { %v878_v25 = vpop.f32.mrf.mxu1  ;;  %v4987_v24 = vor.u32 %v5634_v9, %v4984_v12 }
 0x134   :  { %9132 = vst [vmem:[#allocation22_spill] sm:$0xff] %v6789_v23  ;;  %v6791_v26 = vadd.f32 %v878_v25, %v790_v22  ;;  %v178_v25 = vpop.permute.xlu1 %177 }
 0x135   :  { %1308 = vmatpush.bf16.msrb.mxu0 %v4987_v24  ;;  %vm248_vm1 = vcmp.eq.s32.totalorder %v178_v25, %v6509_v54 }
 0x136   :  { %9133 = vst [vmem:[#allocation23_spill] sm:$0xff] %v6791_v26  ;;  %v4943_v49 = vsel %vm248_vm1, 1.0, %v9094_v60  ;;  %vm9146_vm1 = vcmask 523264  }
 0x137   :  { %v967_v35 = vpop.f32.mrf.mxu2 }
 0x138   :  { %v968_v38 = vadd.f32 %v967_v35, %v6713_v41 }
 0x139   :  { %v792_v45 = vpop.f32.mrf.mxu0  ;;  %v1056_v46 = vpop.f32.mrf.mxu3 }
 0x13a   :  { %v793_v47 = vadd.f32 %v792_v45, %v6691_v29  ;;  %v6800_v48 = vadd.f32 %v1056_v46, %v968_v38  ;;  %v5662_v38 = vld [vmem:[#allocation4 + $0x10c] sm:$0xf] }
 0x13b   :  { %v881_v59 = vpop.f32.mrf.mxu1  ;;  %v5099_v45 = vor.u32 %v5662_v38, %v5096_v44 }
 0x13c   :  { %9134 = vst [vmem:[#allocation24_spill] sm:$0xff] %v6800_v48  ;;  %v6809_v6 = vadd.f32 %v881_v59, %v793_v47  ;;  %5171 = vmatmul.msk.bf16.gmra.mxu0 %vm6803_vm5, %v9096_v2  ;;  %5219 = vmatmul.msk.bf16.gmra.mxu2 %vm6803_vm5, %v9096_v2  ;;  %v4941_v59 = vsel %vm246_vm7, 1.0, %v9094_v60  ;;  %vm9147_vm7 = vmmov %vm9146_vm1 }
 0x13d   :  { %1398 = vmatpush.bf16.msrb.mxu2 %v5099_v45  ;;  %v6841_v24 = vpack.c.bf16 %v4943_v49, %v4941_v59  ;;  %v4966_v59 = vld [vmem:[#allocation4 + $0x8] sm:$0xf] }
 0x13e   :  { %9137 = vst [vmem:[#allocation25_spill] sm:$0xff] %v6809_v6  ;;  %5191 = vmatmul.msk.bf16.gmra.mxu1 %vm9138_vm13, %v6807_v5  ;;  %5239 = vmatmul.msk.bf16.gmra.mxu3 %vm9139_vm0, %v6807_v5  ;;  %vm247_vm13 = vcmp.eq.s32.totalorder %v178_v25, %v6506_v52  ;;  %vm245_vm0 = vcmp.eq.s32.totalorder %v175_v32, %v6506_v52 }
 0x13f   :  { %v970_v7 = vpop.f32.mrf.mxu2  ;;  %vm6837_vm5 = vmpackc.low %vm247_vm13, %vm245_vm0 }
 0x140   :  { %v971_v8 = vadd.f32 %v970_v7, %v6713_v41 }
 0x141   :  { %v794_v15 = vpop.f32.mrf.mxu0  ;;  %v1059_v22 = vpop.f32.mrf.mxu3 }
 0x142   :  { %v795_v27 = vadd.f32 %v794_v15, %v6691_v29  ;;  %v6823_v28 = vadd.f32 %v1059_v22, %v971_v8  ;;  %v9143_v15 = vmov 0 }
 0x143   :  { %v883_v34 = vpop.f32.mrf.mxu1  ;;  %v9144_v15 = vsel %vm6837_vm5, 4294967295, %v9143_v15 }
 0x144   :  { %9140 = vst [vmem:[#allocation26_spill] sm:$0xff] %v6823_v28  ;;  %v6825_v35 = vadd.f32 %v883_v34, %v795_v27 }
 0x146   :  { %9141 = vst [vmem:[#allocation27_spill] sm:$0xff] %v6825_v35 }
 0x147   :  { %v972_v46 = vpop.f32.mrf.mxu2 }
 0x148   :  { %v973_v47 = vadd.f32 %v972_v46, %v6713_v41  ;;  %v184_v46 = vpop.permute.xlu0 %183 }
 0x149   :  { %v797_v7 = vpop.f32.mrf.mxu0  ;;  %v1061_v8 = vpop.f32.mrf.mxu3  ;;  %vm252_vm13 = vcmp.eq.s32.totalorder %v184_v46, %v6509_v54 }
 0x14a   :  { %v798_v9 = vadd.f32 %v797_v7, %v6691_v29  ;;  %v6835_v12 = vadd.f32 %v1061_v8, %v973_v47  ;;  %v5632_v7 = vld [vmem:[#allocation4 + $0x14] sm:$0xf0]  ;;  %v181_v8 = vpop.permute.xlu2 %180 }
 0x14b   :  { %v886_v22 = vpop.f32.mrf.mxu1  ;;  %vm250_vm0 = vcmp.eq.s32.totalorder %v181_v8, %v6509_v54 }
 0x14c   :  { %9142 = vst [vmem:[#allocation28_spill] sm:$0xff] %v6835_v12  ;;  %v6843_v25 = vadd.f32 %v886_v22, %v798_v9  ;;  %5173 = vmatmul.msk.bf16.gmra.mxu0 %vm6837_vm5, %v9096_v2  ;;  %5221 = vmatmul.msk.bf16.gmra.mxu2 %vm6837_vm5, %v9096_v2  ;;  %v4967_v9 = vor.u32 %v5632_v7, %v4966_v59  ;;  %v4945_v59 = vsel %vm250_vm0, 1.0, %v9094_v60  ;;  %v9151_v7 = vmov 0 }
 0x14e   :  { %9145 = vst [vmem:[#allocation29_spill] sm:$0xff] %v6843_v25  ;;  %5192 = vmatmul.msk.bf16.gmra.mxu1 %vm9146_vm1, %v6841_v24  ;;  %5240 = vmatmul.msk.bf16.gmra.mxu3 %vm9147_vm7, %v6841_v24  ;;  %vm251_vm1 = vcmp.eq.s32.totalorder %v184_v46, %v6506_v52  ;;  %vm249_vm7 = vcmp.eq.s32.totalorder %v181_v8, %v6506_v52 }
 0x14f   :  { %v975_v27 = vpop.f32.mrf.mxu2  ;;  %1131 = vmatpush.bf16.msrb.mxu1 %v4967_v9  ;;  %vm6871_vm5 = vmpackc.low %vm251_vm1, %vm249_vm7 }
 0x150   :  { %v976_v32 = vadd.f32 %v975_v27, %v6713_v41  ;;  %v9152_v7 = vsel %vm6871_vm5, 4294967295, %v9151_v7 }
 0x151   :  { %v799_v34 = vpop.f32.mrf.mxu0  ;;  %v1064_v38 = vpop.f32.mrf.mxu3 }
 0x152   :  { %v800_v44 = vadd.f32 %v799_v34, %v6691_v29  ;;  %v6857_v45 = vadd.f32 %v1064_v38, %v976_v32  ;;  %v4947_v32 = vsel %vm252_vm13, 1.0, %v9094_v60  ;;  %vm9154_vm13 = vcmask 523264   ;;  %v187_v60 = vpop.permute.xlu1 %186 }
 0x153   :  { %v888_v47 = vpop.f32.mrf.mxu1  ;;  %v6875_v46 = vpack.c.bf16 %v4947_v32, %v4945_v59  ;;  %vm9155_vm0 = vmmov %vm9154_vm13  ;;  %v5630_v32 = vld [vmem:[#allocation4 + $0xc] sm:$0xf]  ;;  %vm254_vm1 = vcmp.eq.s32.totalorder %v187_v60, %v6509_v54 }
 0x154   :  { %9148 = vst [vmem:[#allocation30_spill] sm:$0xff] %v6857_v45  ;;  %v6859_v49 = vadd.f32 %v888_v47, %v800_v44  ;;  %v193_v45 = vpop.permute.xlu0 %192 }
 0x156   :  { %9149 = vst [vmem:[#allocation31_spill] sm:$0xff] %v6859_v49 }
 0x157   :  { %v977_v22 = vpop.f32.mrf.mxu2 }
 0x158   :  { %v978_v27 = vadd.f32 %v977_v22, %v6713_v41 }
 0x159   :  { %v802_v34 = vpop.f32.mrf.mxu0  ;;  %v1066_v38 = vpop.f32.mrf.mxu3 }
 0x15a   :  { %v803_v44 = vadd.f32 %v802_v34, %v6691_v29  ;;  %v6868_v47 = vadd.f32 %v1066_v38, %v978_v27  ;;  %v4968_v34 = vld [vmem:[#allocation4 + $0x18] sm:$0xf0] }
 0x15b   :  { %v891_v9 = vpop.f32.mrf.mxu1  ;;  %v4971_v59 = vor.u32 %v5630_v32, %v4968_v34  ;;  %v9158_v32 = vmov 0.0  }
 0x15c   :  { %9150 = vst [vmem:[#allocation32_spill] sm:$0xff] %v6868_v47  ;;  %v6877_v22 = vadd.f32 %v891_v9, %v803_v44  ;;  %5175 = vmatmul.msk.bf16.gmra.mxu0 %vm6871_vm5, %v9096_v2  ;;  %5223 = vmatmul.msk.bf16.gmra.mxu2 %vm6871_vm5, %v9096_v2  ;;  %v190_v47 = vpop.permute.xlu2 %189  ;;  %v4949_v34 = vsel %vm254_vm1, 1.0, %v9158_v32  ;;  %vm9164_vm1 = vcmask 523264  }
 0x15d   :  { %1309 = vmatpush.bf16.msrb.mxu0 %v4971_v59  ;;  %vm256_vm7 = vcmp.eq.s32.totalorder %v190_v47, %v6509_v54 }
 0x15e   :  { %9153 = vst [vmem:[#allocation33_spill] sm:$0xff] %v6877_v22  ;;  %5193 = vmatmul.msk.bf16.gmra.mxu1 %vm9154_vm13, %v6875_v46  ;;  %5241 = vmatmul.msk.bf16.gmra.mxu3 %vm9155_vm0, %v6875_v46  ;;  %vm253_vm13 = vcmp.eq.s32.totalorder %v187_v60, %v6506_v52  ;;  %vm255_vm0 = vcmp.eq.s32.totalorder %v190_v47, %v6506_v52  ;;  %v4951_v59 = vsel %vm256_vm7, 1.0, %v9158_v32  ;;  %vm9165_vm7 = vmmov %vm9164_vm1  ;;  %v5705_v47 = vld [vmem:[%s9082_s2 + $0xe4] sm:$0xf] }
 0x15f   :  { %v980_v8 = vpop.f32.mrf.mxu2  ;;  %vm6905_vm5 = vmpackc.low %vm255_vm0, %vm253_vm13  ;;  %v6909_v60 = vpack.c.bf16 %v4951_v59, %v4949_v34  ;;  %v196_v59 = vpop.permute.xlu1 %195  ;;  %vm258_vm0 = vcmp.eq.s32.totalorder %v193_v45, %v6509_v54 }
 0x160   :  { %v981_v27 = vadd.f32 %v980_v8, %v6713_v41  ;;  %vm260_vm13 = vcmp.eq.s32.totalorder %v196_v59, %v6509_v54 }
 0x161   :  { %v804_v38 = vpop.f32.mrf.mxu0  ;;  %v1069_v44 = vpop.f32.mrf.mxu3 }
 0x162   :  { %v805_v9 = vadd.f32 %v804_v38, %v6691_v29  ;;  %v6891_v0 = vadd.f32 %v1069_v44, %v981_v27 }
 0x163   :  { %v893_v2 = vpop.f32.mrf.mxu1 }
 0x164   :  { %9156 = vst [vmem:[#allocation34_spill] sm:$0xff] %v6891_v0  ;;  %v6893_v22 = vadd.f32 %v893_v2, %v805_v9  ;;  %v9160_v9 = vmov 0  ;;  %v9163_v0 = vmov 1.0|1.0  }
 0x165   :  { %v9161_v9 = vsel %vm6905_vm5, 4294967295, %v9160_v9 }
 0x166   :  { %9157 = vst [vmem:[#allocation35_spill] sm:$0xff] %v6893_v22 }
 0x167   :  { %v982_v49 = vpop.f32.mrf.mxu2 }
 0x168   :  { %v983_v8 = vadd.f32 %v982_v49, %v6713_v41 }
 0x169   :  { %v807_v38 = vpop.f32.mrf.mxu0  ;;  %v1071_v27 = vpop.f32.mrf.mxu3 }
 0x16a   :  { %v808_v44 = vadd.f32 %v807_v38, %v6691_v29  ;;  %v6902_v2 = vadd.f32 %v1071_v27, %v983_v8 }
 0x16b   :  { %v896_v22 = vpop.f32.mrf.mxu1 }
 0x16c   :  { %9159 = vst [vmem:[#allocation36_spill] sm:$0xff] %v6902_v2  ;;  %v6911_v49 = vadd.f32 %v896_v22, %v808_v44  ;;  %5177 = vmatmul.msk.bf16.gmra.mxu0 %vm6905_vm5, %v9163_v0  ;;  %5225 = vmatmul.msk.bf16.gmra.mxu2 %vm6905_vm5, %v9163_v0  ;;  %v5456_v22 = vld [vmem:[%s9082_s2 + $0xf0] sm:$0xf0] }
 0x16d   :  { %v6929_v34 = vor.u32 %v5705_v47, %v5456_v22  ;;  %v5454_v47 = vld [vmem:[%s9082_s2 + $0xe0] sm:$0xf]  ;;  %v5707_v22 = vld [vmem:[%s9082_s2 + $0xec] sm:$0xf0] }
 0x16e   :  { %9162 = vst [vmem:[#allocation37_spill] sm:$0xff] %v6911_v49  ;;  %5194 = vmatmul.msk.bf16.gmra.mxu1 %vm9164_vm1, %v6909_v60  ;;  %5242 = vmatmul.msk.bf16.gmra.mxu3 %vm9165_vm7, %v6909_v60  ;;  %vm259_vm1 = vcmp.eq.s32.totalorder %v196_v59, %v6506_v52  ;;  %vm257_vm7 = vcmp.eq.s32.totalorder %v193_v45, %v6506_v52 }
 0x16f   :  { %v985_v8 = vpop.f32.mrf.mxu2  ;;  %1686 = vmatpush.bf16.msra.mxu3 %v6929_v34  ;;  %vm6957_vm5 = vmpackc.low %vm259_vm1, %vm257_vm7 }
 0x170   :  { %v986_v38 = vadd.f32 %v985_v8, %v6713_v41  ;;  %v6944_v8 = vor.u32 %v5707_v22, %v5454_v47 }
 0x171   :  { %v809_v27 = vpop.f32.mrf.mxu0  ;;  %v1074_v44 = vpop.f32.mrf.mxu3 }
 0x172   :  { %v810_v49 = vadd.f32 %v809_v27, %v6691_v29  ;;  %v6934_v2 = vadd.f32 %v1074_v44, %v986_v38  ;;  %1672 = vmatpush.bf16.msra.mxu1 %v6944_v8  ;;  %v4953_v27 = vsel %vm258_vm0, 1.0, %v9158_v32 }
 0x173   :  { %v898_v25 = vpop.f32.mrf.mxu1 }
 0x174   :  { %9166 = vst [vmem:[#allocation38_spill] sm:$0xff] %v6934_v2  ;;  %v6936_v12 = vadd.f32 %v898_v25, %v810_v49  ;;  %v4955_v49 = vsel %vm260_vm13, 1.0, %v9158_v32  ;;  %vm9172_vm13 = vcmask 523264  }
 0x175   :  { %v6961_v59 = vpack.c.bf16 %v4955_v49, %v4953_v27  ;;  %vm9173_vm0 = vmmov %vm9172_vm13 }
 0x176   :  { %9167 = vst [vmem:[#allocation39_spill] sm:$0xff] %v6936_v12  ;;  %vm9178_vm1 = vmmov %vm9173_vm0 }
 0x177   :  { %v987_v38 = vpop.f32.mrf.mxu2  ;;  %vm9179_vm7 = vmmov %vm9173_vm0 }
 0x178   :  { %v988_v25 = vadd.f32 %v987_v38, %v6713_v41  ;;  %v5708_v38 = vld [vmem:[%s9082_s2 + $0xf4] sm:$0xf0] }
 0x179   :  { %v812_v44 = vpop.f32.mrf.mxu0  ;;  %v1076_v47 = vpop.f32.mrf.mxu3 }
 0x17a   :  { %v813_v22 = vadd.f32 %v812_v44, %v6691_v29  ;;  %v6955_v12 = vadd.f32 %v1076_v47, %v988_v25 }
 0x17b   :  { %v901_v2 = vpop.f32.mrf.mxu1 }
 0x17c   :  { %9168 = vst [vmem:[#allocation40_spill] sm:$0xff] %v6955_v12  ;;  %v6963_v52 = vadd.f32 %v901_v2, %v813_v22  ;;  %5179 = vmatmul.msk.bf16.gmra.mxu0 %vm6957_vm5, %v9163_v0  ;;  %5227 = vmatmul.msk.bf16.gmra.mxu2 %vm6957_vm5, %v9163_v0  ;;  %v5462_v2 = vld [vmem:[%s9082_s2 + $0xe8] sm:$0xf]  ;;  %v5464_v12 = vld [vmem:[%s9082_s2 + $0xf8] sm:$0xf0] }
 0x17d   :  { %v6982_v27 = vor.u32 %v5708_v38, %v5462_v2 }
 0x17e   :  { %9171 = vst [vmem:[#allocation41_spill] sm:$0xff] %v6963_v52  ;;  %5195 = vmatmul.msk.bf16.gmra.mxu1 %vm9172_vm13, %v6961_v59  ;;  %5243 = vmatmul.msk.bf16.gmra.mxu3 %vm9173_vm0, %v6961_v59  ;;  %v5706_v52 = vld [vmem:[%s9082_s2 + $0xec] sm:$0xf]  ;;  %vm9185_vm13 = vmmov %vm9173_vm0 }
 0x17f   :  { %v990_v45 = vpop.f32.mrf.mxu2  ;;  %1700 = vmatpush.bf16.msra.mxu0 %v6982_v27  ;;  %v6996_v35 = vor.u32 %v5706_v52, %v5464_v12  ;;  %v5701_v12 = vld [vmem:[%s9082_s2 + $0xc4] sm:$0xf]  ;;  %v5440_v52 = vld [vmem:[%s9082_s2 + $0xd0] sm:$0xf0] }
 0x180   :  { %v991_v32 = vadd.f32 %v990_v45, %v6713_v41 }
 0x181   :  { %v814_v25 = vpop.f32.mrf.mxu0  ;;  %v1079_v49 = vpop.f32.mrf.mxu3  ;;  %1714 = vmatpush.bf16.msra.mxu2 %v6996_v35 }
 0x182   :  { %v815_v44 = vadd.f32 %v814_v25, %v6691_v29  ;;  %v6985_v47 = vadd.f32 %v1079_v49, %v991_v32 }
 0x183   :  { %v903_v22 = vpop.f32.mrf.mxu1 }
 0x184   :  { %9174 = vst [vmem:[#allocation42_spill] sm:$0xff] %v6985_v47  ;;  %v6988_v45 = vadd.f32 %v903_v22, %v815_v44 }
 0x186   :  { %9175 = vst [vmem:[#allocation43_spill] sm:$0xff] %v6988_v45 }
 0x187   :  { %v992_v2 = vpop.f32.mrf.mxu2 }
 0x188   :  { %v993_v32 = vadd.f32 %v992_v2, %v6713_v41 }
 0x189   :  { %v817_v38 = vpop.f32.mrf.mxu0  ;;  %v1081_v25 = vpop.f32.mrf.mxu3 }
 0x18a   :  { %v818_v49 = vadd.f32 %v817_v38, %v6691_v29  ;;  %v7001_v44 = vadd.f32 %v1081_v25, %v993_v32  ;;  %v7021_v32 = vor.u32 %v5701_v12, %v5440_v52  ;;  %v5703_v12 = vld [vmem:[%s9082_s2 + $0xcc] sm:$0xf0] }
 0x18b   :  { %v906_v22 = vpop.f32.mrf.mxu1 }
 0x18c   :  { %9176 = vst [vmem:[#allocation44_spill] sm:$0xff] %v7001_v44  ;;  %v7003_v45 = vadd.f32 %v906_v22, %v818_v49  ;;  %5293 = vmatmul.msk.bf16.vlgmr.msrb.gmra.mxu0 %vm6517_vm4, %v9163_v0  ;;  %5324 = vmatmul.msk.bf16.vlgmr.msrb.gmra.mxu2 %vm9178_vm1, %v6521_v1  ;;  %v5438_v44 = vld [vmem:[%s9082_s2 + $0xc0] sm:$0xf]  ;;  %vm9196_vm1 = vmmov %vm9173_vm0 }
 0x18d   :  { %1687 = vmatpush.bf16.msra.mxu3 %v7021_v32  ;;  %v7036_v52 = vor.u32 %v5703_v12, %v5438_v44 }
 0x18e   :  { %9177 = vst [vmem:[#allocation45_spill] sm:$0xff] %v7003_v45  ;;  %5245 = vmatmul.msk.bf16.vlgmr.msrb.gmra.mxu1 %vm6517_vm4, %v9163_v0  ;;  %5276 = vmatmul.msk.bf16.vlgmr.msrb.gmra.mxu3 %vm9179_vm7, %v6521_v1  ;;  %vm9184_vm4 = vmmov %vm9173_vm0 }
 0x18f   :  { %v995_v2 = vpop.f32.mrf.mxu2  ;;  %1673 = vmatpush.bf16.msra.mxu1 %v7036_v52  ;;  %vm9202_vm7 = vmmov %vm9173_vm0 }
 0x190   :  { %v996_v38 = vadd.f32 %v995_v2, %v6713_v41 }
 0x191   :  { %v819_v25 = vpop.f32.mrf.mxu0  ;;  %v1084_v49 = vpop.f32.mrf.mxu3 }
 0x192   :  { %v820_v63 = vadd.f32 %v819_v25, %v6691_v29  ;;  %v7026_v1 = vadd.f32 %v1084_v49, %v996_v38 }
 0x193   :  { %v908_v22 = vpop.f32.mrf.mxu1 }
 0x194   :  { %9180 = vst [vmem:[#allocation46_spill] sm:$0xff] %v7026_v1  ;;  %v7028_v45 = vadd.f32 %v908_v22, %v820_v63 }
 0x196   :  { %9181 = vst [vmem:[#allocation47_spill] sm:$0xff] %v7028_v45 }
 0x197   :  { %v997_v2 = vpop.f32.mrf.mxu2 }
 0x198   :  { %v998_v25 = vadd.f32 %v997_v2, %v6713_v41  ;;  %v5704_v2 = vld [vmem:[%s9082_s2 + $0xd4] sm:$0xf0] }
 0x199   :  { %v822_v38 = vpop.f32.mrf.mxu0  ;;  %v1086_v49 = vpop.f32.mrf.mxu3 }
 0x19a   :  { %v823_v63 = vadd.f32 %v822_v38, %v6691_v29  ;;  %v7041_v22 = vadd.f32 %v1086_v49, %v998_v25 }
 0x19b   :  { %v911_v45 = vpop.f32.mrf.mxu1 }
 0x19c   :  { %9182 = vst [vmem:[#allocation48_spill] sm:$0xff] %v7041_v22  ;;  %v7043_v1 = vadd.f32 %v911_v45, %v823_v63  ;;  %5295 = vmatmul.msk.bf16.gmra.mxu0 %vm6539_vm10, %v9163_v0  ;;  %5325 = vmatmul.msk.bf16.gmra.mxu2 %vm9184_vm4, %v6543_v11  ;;  %v5446_v45 = vld [vmem:[%s9082_s2 + $0xc8] sm:$0xf]  ;;  %v5448_v22 = vld [vmem:[%s9082_s2 + $0xd8] sm:$0xf0]  ;;  %vm9208_vm4 = vmmov %vm9173_vm0 }
 0x19d   :  { %v7062_v49 = vor.u32 %v5704_v2, %v5446_v45 }
 0x19e   :  { %9183 = vst [vmem:[#allocation49_spill] sm:$0xff] %v7043_v1  ;;  %5247 = vmatmul.msk.bf16.gmra.mxu1 %vm6539_vm10, %v9163_v0  ;;  %5277 = vmatmul.msk.bf16.gmra.mxu3 %vm9185_vm13, %v6543_v11  ;;  %v5702_v1 = vld [vmem:[%s9082_s2 + $0xcc] sm:$0xf]  ;;  %vm9190_vm10 = vmmov %vm9173_vm0 }
 0x19f   :  { %v1000_v44 = vpop.f32.mrf.mxu2  ;;  %1701 = vmatpush.bf16.msra.mxu0 %v7062_v49  ;;  %v7076_v47 = vor.u32 %v5702_v1, %v5448_v22  ;;  %v5697_v1 = vld [vmem:[%s9082_s2 + $0xa4] sm:$0xf]  ;;  %v5424_v22 = vld [vmem:[%s9082_s2 + $0xb0] sm:$0xf0]  ;;  %vm9214_vm13 = vmmov %vm9173_vm0 }
 0x1a0   :  { %v1001_v12 = vadd.f32 %v1000_v44, %v6713_v41 }
 0x1a1   :  { %v824_v25 = vpop.f32.mrf.mxu0  ;;  %v1089_v38 = vpop.f32.mrf.mxu3  ;;  %1715 = vmatpush.bf16.msra.mxu2 %v7076_v47 }
 0x1a2   :  { %v825_v10 = vadd.f32 %v824_v25, %v6691_v29  ;;  %v7065_v63 = vadd.f32 %v1089_v38, %v1001_v12 }
 0x1a3   :  { %v913_v11 = vpop.f32.mrf.mxu1 }
 0x1a4   :  { %9186 = vst [vmem:[#allocation50_spill] sm:$0xff] %v7065_v63  ;;  %v7068_v44 = vadd.f32 %v913_v11, %v825_v10 }
 0x1a6   :  { %9187 = vst [vmem:[#allocation51_spill] sm:$0xff] %v7068_v44 }
 0x1a7   :  { %v1002_v45 = vpop.f32.mrf.mxu2 }
 0x1a8   :  { %v1003_v12 = vadd.f32 %v1002_v45, %v6713_v41 }
 0x1a9   :  { %v827_v2 = vpop.f32.mrf.mxu0  ;;  %v1091_v25 = vpop.f32.mrf.mxu3 }
 0x1aa   :  { %v828_v38 = vadd.f32 %v827_v2, %v6691_v29  ;;  %v7081_v10 = vadd.f32 %v1091_v25, %v1003_v12  ;;  %v7101_v12 = vor.u32 %v5697_v1, %v5424_v22  ;;  %v5699_v1 = vld [vmem:[%s9082_s2 + $0xac] sm:$0xf0] }
 0x1ab   :  { %v916_v11 = vpop.f32.mrf.mxu1 }
 0x1ac   :  { %9188 = vst [vmem:[#allocation52_spill] sm:$0xff] %v7081_v10  ;;  %v7083_v44 = vadd.f32 %v916_v11, %v828_v38  ;;  %5297 = vmatmul.msk.bf16.gmra.mxu0 %vm6561_vm15, %v9163_v0  ;;  %5326 = vmatmul.msk.bf16.gmra.mxu2 %vm9190_vm10, %v6565_v19  ;;  %v5422_v10 = vld [vmem:[%s9082_s2 + $0xa0] sm:$0xf]  ;;  %vm9220_vm10 = vmmov %vm9173_vm0 }
 0x1ad   :  { %1688 = vmatpush.bf16.msra.mxu3 %v7101_v12  ;;  %v7116_v22 = vor.u32 %v5699_v1, %v5422_v10 }
 0x1ae   :  { %9189 = vst [vmem:[#allocation53_spill] sm:$0xff] %v7083_v44  ;;  %5249 = vmatmul.msk.bf16.gmra.mxu1 %vm6561_vm15, %v9163_v0  ;;  %5278 = vmatmul.msk.bf16.gmra.mxu3 %vm9173_vm0, %v6565_v19  ;;  %vm9195_vm15 = vmmov %vm9173_vm0 }
 0x1af   :  { %v1005_v45 = vpop.f32.mrf.mxu2  ;;  %1674 = vmatpush.bf16.msra.mxu1 %v7116_v22 }
 0x1b0   :  { %v1006_v2 = vadd.f32 %v1005_v45, %v6713_v41 }
 0x1b1   :  { %v829_v25 = vpop.f32.mrf.mxu0  ;;  %v1094_v38 = vpop.f32.mrf.mxu3 }
 0x1b2   :  { %v830_v18 = vadd.f32 %v829_v25, %v6691_v29  ;;  %v7106_v19 = vadd.f32 %v1094_v38, %v1006_v2 }
 0x1b3   :  { %v918_v11 = vpop.f32.mrf.mxu1 }
 0x1b4   :  { %9191 = vst [vmem:[#allocation54_spill] sm:$0xff] %v7106_v19  ;;  %v7108_v44 = vadd.f32 %v918_v11, %v830_v18 }
 0x1b6   :  { %9192 = vst [vmem:[#allocation55_spill] sm:$0xff] %v7108_v44 }
 0x1b7   :  { %v1007_v45 = vpop.f32.mrf.mxu2 }
 0x1b8   :  { %v1008_v25 = vadd.f32 %v1007_v45, %v6713_v41  ;;  %v5700_v45 = vld [vmem:[%s9082_s2 + $0xb4] sm:$0xf0] }
 0x1b9   :  { %v832_v2 = vpop.f32.mrf.mxu0  ;;  %v1096_v38 = vpop.f32.mrf.mxu3 }
 0x1ba   :  { %v833_v18 = vadd.f32 %v832_v2, %v6691_v29  ;;  %v7121_v11 = vadd.f32 %v1096_v38, %v1008_v25 }
 0x1bb   :  { %v921_v44 = vpop.f32.mrf.mxu1 }
 0x1bc   :  { %9193 = vst [vmem:[#allocation56_spill] sm:$0xff] %v7121_v11  ;;  %v7123_v19 = vadd.f32 %v921_v44, %v833_v18  ;;  %5299 = vmatmul.msk.bf16.gmra.mxu0 %vm6583_vm6, %v9163_v0  ;;  %5327 = vmatmul.msk.bf16.gmra.mxu2 %vm9195_vm15, %v6587_v31  ;;  %v5430_v44 = vld [vmem:[%s9082_s2 + $0xa8] sm:$0xf]  ;;  %v5432_v11 = vld [vmem:[%s9082_s2 + $0xb8] sm:$0xf0]  ;;  %vm9228_vm15 = vmmov %vm9173_vm0 }
 0x1bd   :  { %v7142_v38 = vor.u32 %v5700_v45, %v5430_v44 }
 0x1be   :  { %9194 = vst [vmem:[#allocation57_spill] sm:$0xff] %v7123_v19  ;;  %5251 = vmatmul.msk.bf16.gmra.mxu1 %vm6583_vm6, %v9163_v0  ;;  %5279 = vmatmul.msk.bf16.gmra.mxu3 %vm9196_vm1, %v6587_v31  ;;  %v5698_v19 = vld [vmem:[%s9082_s2 + $0xac] sm:$0xf]  ;;  %vm9201_vm6 = vmmov %vm9173_vm0 }
 0x1bf   :  { %v1010_v10 = vpop.f32.mrf.mxu2  ;;  %1702 = vmatpush.bf16.msra.mxu0 %v7142_v38  ;;  %v7156_v63 = vor.u32 %v5698_v19, %v5432_v11  ;;  %v5693_v19 = vld [vmem:[%s9082_s2 + $0x84] sm:$0xf]  ;;  %v5408_v11 = vld [vmem:[%s9082_s2 + $0x90] sm:$0xf0]  ;;  %vm9233_vm1 = vmmov %vm9173_vm0 }
 0x1c0   :  { %v1011_v1 = vadd.f32 %v1010_v10, %v6713_v41 }
 0x1c1   :  { %v834_v25 = vpop.f32.mrf.mxu0  ;;  %v1099_v2 = vpop.f32.mrf.mxu3  ;;  %1716 = vmatpush.bf16.msra.mxu2 %v7156_v63 }
 0x1c2   :  { %v835_v30 = vadd.f32 %v834_v25, %v6691_v29  ;;  %v7145_v18 = vadd.f32 %v1099_v2, %v1011_v1 }
 0x1c3   :  { %v923_v31 = vpop.f32.mrf.mxu1 }
 0x1c4   :  { %9197 = vst [vmem:[#allocation58_spill] sm:$0xff] %v7145_v18  ;;  %v7148_v10 = vadd.f32 %v923_v31, %v835_v30 }
 0x1c6   :  { %9198 = vst [vmem:[#allocation59_spill] sm:$0xff] %v7148_v10 }
 0x1c7   :  { %v1012_v44 = vpop.f32.mrf.mxu2 }
 0x1c8   :  { %v1013_v1 = vadd.f32 %v1012_v44, %v6713_v41 }
 0x1c9   :  { %v837_v45 = vpop.f32.mrf.mxu0  ;;  %v1101_v25 = vpop.f32.mrf.mxu3 }
 0x1ca   :  { %v838_v2 = vadd.f32 %v837_v45, %v6691_v29  ;;  %v7161_v30 = vadd.f32 %v1101_v25, %v1013_v1  ;;  %v7181_v1 = vor.u32 %v5693_v19, %v5408_v11  ;;  %v5695_v19 = vld [vmem:[%s9082_s2 + $0x8c] sm:$0xf0] }
 0x1cb   :  { %v926_v31 = vpop.f32.mrf.mxu1 }
 0x1cc   :  { %9199 = vst [vmem:[#allocation60_spill] sm:$0xff] %v7161_v30  ;;  %v7163_v10 = vadd.f32 %v926_v31, %v838_v2  ;;  %5301 = vmatmul.msk.bf16.gmra.mxu0 %vm6605_vm12, %v9163_v0  ;;  %5328 = vmatmul.msk.bf16.gmra.mxu2 %vm9201_vm6, %v6609_v43  ;;  %v5406_v30 = vld [vmem:[%s9082_s2 + $0x80] sm:$0xf]  ;;  %vm9239_vm6 = vmmov %vm9173_vm0 }
 0x1cd   :  { %1689 = vmatpush.bf16.msra.mxu3 %v7181_v1  ;;  %v7196_v11 = vor.u32 %v5695_v19, %v5406_v30 }
 0x1ce   :  { %9200 = vst [vmem:[#allocation61_spill] sm:$0xff] %v7163_v10  ;;  %5253 = vmatmul.msk.bf16.gmra.mxu1 %vm6605_vm12, %v9163_v0  ;;  %5280 = vmatmul.msk.bf16.gmra.mxu3 %vm9202_vm7, %v6609_v43  ;;  %vm9207_vm12 = vmmov %vm9173_vm0 }
 0x1cf   :  { %v1015_v44 = vpop.f32.mrf.mxu2  ;;  %1675 = vmatpush.bf16.msra.mxu1 %v7196_v11  ;;  %vm9240_vm7 = vmmov %vm9173_vm0 }
 0x1d0   :  { %v1016_v45 = vadd.f32 %v1015_v44, %v6713_v41 }
 0x1d1   :  { %v839_v25 = vpop.f32.mrf.mxu0  ;;  %v1104_v2 = vpop.f32.mrf.mxu3 }
 0x1d2   :  { %v840_v42 = vadd.f32 %v839_v25, %v6691_v29  ;;  %v7186_v43 = vadd.f32 %v1104_v2, %v1016_v45 }
 0x1d3   :  { %v928_v31 = vpop.f32.mrf.mxu1 }
 0x1d4   :  { %9203 = vst [vmem:[#allocation62_spill] sm:$0xff] %v7186_v43  ;;  %v7188_v10 = vadd.f32 %v928_v31, %v840_v42 }
 0x1d6   :  { %9204 = vst [vmem:[#allocation63_spill] sm:$0xff] %v7188_v10 }
 0x1d7   :  { %v1017_v44 = vpop.f32.mrf.mxu2 }
 0x1d8   :  { %v1018_v25 = vadd.f32 %v1017_v44, %v6713_v41  ;;  %v5696_v44 = vld [vmem:[%s9082_s2 + $0x94] sm:$0xf0] }
 0x1d9   :  { %v842_v45 = vpop.f32.mrf.mxu0  ;;  %v1106_v2 = vpop.f32.mrf.mxu3 }
 0x1da   :  { %v843_v42 = vadd.f32 %v842_v45, %v6691_v29  ;;  %v7201_v31 = vadd.f32 %v1106_v2, %v1018_v25 }
 0x1db   :  { %v931_v10 = vpop.f32.mrf.mxu1 }
 0x1dc   :  { %9205 = vst [vmem:[#allocation64_spill] sm:$0xff] %v7201_v31  ;;  %v7203_v43 = vadd.f32 %v931_v10, %v843_v42  ;;  %5303 = vmatmul.msk.bf16.gmra.mxu0 %vm6627_vm2, %v9163_v0  ;;  %5329 = vmatmul.msk.bf16.gmra.mxu2 %vm9207_vm12, %v6631_v53  ;;  %v5414_v10 = vld [vmem:[%s9082_s2 + $0x88] sm:$0xf]  ;;  %v5416_v31 = vld [vmem:[%s9082_s2 + $0x98] sm:$0xf0]  ;;  %vm9245_vm12 = vnez %v9144_v15 }
 0x1dd   :  { %v7222_v2 = vor.u32 %v5696_v44, %v5414_v10 }
 0x1de   :  { %9206 = vst [vmem:[#allocation65_spill] sm:$0xff] %v7203_v43  ;;  %5255 = vmatmul.msk.bf16.gmra.mxu1 %vm6627_vm2, %v9163_v0  ;;  %5281 = vmatmul.msk.bf16.gmra.mxu3 %vm9208_vm4, %v6631_v53  ;;  %v5694_v43 = vld [vmem:[%s9082_s2 + $0x8c] sm:$0xf]  ;;  %vm9213_vm2 = vmmov %vm9173_vm0 }
 0x1df   :  { %v1020_v30 = vpop.f32.mrf.mxu2  ;;  %1703 = vmatpush.bf16.msra.mxu0 %v7222_v2  ;;  %v7236_v18 = vor.u32 %v5694_v43, %v5416_v31  ;;  %v5689_v43 = vld [vmem:[%s9082_s2 + $0x64] sm:$0xf]  ;;  %v5392_v31 = vld [vmem:[%s9082_s2 + $0x70] sm:$0xf0]  ;;  %vm9246_vm4 = vmmov %vm9173_vm0 }
 0x1e0   :  { %v1021_v19 = vadd.f32 %v1020_v30, %v6713_v41 }
 0x1e1   :  { %v844_v25 = vpop.f32.mrf.mxu0  ;;  %v1109_v45 = vpop.f32.mrf.mxu3  ;;  %1717 = vmatpush.bf16.msra.mxu2 %v7236_v18 }
 0x1e2   :  { %v845_v51 = vadd.f32 %v844_v25, %v6691_v29  ;;  %v7225_v42 = vadd.f32 %v1109_v45, %v1021_v19 }
 0x1e3   :  { %v933_v53 = vpop.f32.mrf.mxu1 }
 0x1e4   :  { %9209 = vst [vmem:[#allocation66_spill] sm:$0xff] %v7225_v42  ;;  %v7228_v30 = vadd.f32 %v933_v53, %v845_v51 }
 0x1e6   :  { %9210 = vst [vmem:[#allocation67_spill] sm:$0xff] %v7228_v30 }
 0x1e7   :  { %v1022_v10 = vpop.f32.mrf.mxu2 }
 0x1e8   :  { %v1023_v19 = vadd.f32 %v1022_v10, %v6713_v41 }
 0x1e9   :  { %v847_v44 = vpop.f32.mrf.mxu0  ;;  %v1111_v25 = vpop.f32.mrf.mxu3 }
 0x1ea   :  { %v848_v45 = vadd.f32 %v847_v44, %v6691_v29  ;;  %v7241_v51 = vadd.f32 %v1111_v25, %v1023_v19  ;;  %v7261_v19 = vor.u32 %v5689_v43, %v5392_v31  ;;  %v5691_v43 = vld [vmem:[%s9082_s2 + $0x6c] sm:$0xf0] }
 0x1eb   :  { %v936_v53 = vpop.f32.mrf.mxu1 }
 0x1ec   :  { %9211 = vst [vmem:[#allocation68_spill] sm:$0xff] %v7241_v51  ;;  %v7243_v30 = vadd.f32 %v936_v53, %v848_v45  ;;  %5305 = vmatmul.msk.bf16.gmra.mxu0 %vm6649_vm11, %v9163_v0  ;;  %5330 = vmatmul.msk.bf16.gmra.mxu2 %vm9213_vm2, %v6653_v4  ;;  %v5390_v51 = vld [vmem:[%s9082_s2 + $0x60] sm:$0xf]  ;;  %vm9247_vm2 = vmmov %vm9173_vm0 }
 0x1ed   :  { %1690 = vmatpush.bf16.msra.mxu3 %v7261_v19  ;;  %v7276_v31 = vor.u32 %v5691_v43, %v5390_v51 }
 0x1ee   :  { %9212 = vst [vmem:[#allocation69_spill] sm:$0xff] %v7243_v30  ;;  %5257 = vmatmul.msk.bf16.gmra.mxu1 %vm6649_vm11, %v9163_v0  ;;  %5282 = vmatmul.msk.bf16.gmra.mxu3 %vm9214_vm13, %v6653_v4  ;;  %vm9219_vm11 = vmmov %vm9173_vm0  ;;  %vm9252_vm13 = vnez %v9152_v7 }
 0x1ef   :  { %v1025_v10 = vpop.f32.mrf.mxu2  ;;  %1676 = vmatpush.bf16.msra.mxu1 %v7276_v31 }
 0x1f0   :  { %v1026_v44 = vadd.f32 %v1025_v10, %v6713_v41 }
 0x1f1   :  { %v849_v25 = vpop.f32.mrf.mxu0  ;;  %v1114_v45 = vpop.f32.mrf.mxu3 }
 0x1f2   :  { %v850_v3 = vadd.f32 %v849_v25, %v6691_v29  ;;  %v7266_v4 = vadd.f32 %v1114_v45, %v1026_v44 }
 0x1f3   :  { %v938_v53 = vpop.f32.mrf.mxu1 }
 0x1f4   :  { %9215 = vst [vmem:[#allocation70_spill] sm:$0xff] %v7266_v4  ;;  %v7268_v30 = vadd.f32 %v938_v53, %v850_v3 }
 0x1f6   :  { %9216 = vst [vmem:[#allocation71_spill] sm:$0xff] %v7268_v30 }
 0x1f7   :  { %v1027_v10 = vpop.f32.mrf.mxu2 }
 0x1f8   :  { %v1028_v25 = vadd.f32 %v1027_v10, %v6713_v41  ;;  %v5692_v10 = vld [vmem:[%s9082_s2 + $0x74] sm:$0xf0] }
 0x1f9   :  { %v852_v44 = vpop.f32.mrf.mxu0  ;;  %v1116_v45 = vpop.f32.mrf.mxu3 }
 0x1fa   :  { %v853_v3 = vadd.f32 %v852_v44, %v6691_v29  ;;  %v7281_v53 = vadd.f32 %v1116_v45, %v1028_v25 }
 0x1fb   :  { %v941_v30 = vpop.f32.mrf.mxu1 }
 0x1fc   :  { %9217 = vst [vmem:[#allocation72_spill] sm:$0xff] %v7281_v53  ;;  %v7283_v4 = vadd.f32 %v941_v30, %v853_v3  ;;  %5307 = vmatmul.msk.bf16.gmra.mxu0 %vm6671_vm3, %v9163_v0  ;;  %5331 = vmatmul.msk.bf16.gmra.mxu2 %vm9219_vm11, %v6675_v20  ;;  %v5398_v30 = vld [vmem:[%s9082_s2 + $0x68] sm:$0xf]  ;;  %v5400_v53 = vld [vmem:[%s9082_s2 + $0x78] sm:$0xf0]  ;;  %vm9253_vm11 = vmmov %vm9173_vm0 }
 0x1fd   :  { %v7302_v45 = vor.u32 %v5692_v10, %v5398_v30 }
 0x1fe   :  { %9218 = vst [vmem:[#allocation73_spill] sm:$0xff] %v7283_v4  ;;  %5259 = vmatmul.msk.bf16.gmra.mxu1 %vm6671_vm3, %v9163_v0  ;;  %5283 = vmatmul.msk.bf16.gmra.mxu3 %vm9220_vm10, %v6675_v20  ;;  %v5690_v4 = vld [vmem:[%s9082_s2 + $0x6c] sm:$0xf]  ;;  %vm9226_vm3 = vmmov %vm9173_vm0 }
 0x1ff   :  { %v1030_v51 = vpop.f32.mrf.mxu2  ;;  %1704 = vmatpush.bf16.msra.mxu0 %v7302_v45  ;;  %v7316_v42 = vor.u32 %v5690_v4, %v5400_v53  ;;  %v5685_v4 = vld [vmem:[%s9082_s2 + $0x44] sm:$0xf]  ;;  %v5376_v53 = vld [vmem:[%s9082_s2 + $0x50] sm:$0xf0]  ;;  %vm9254_vm10 = vmmov %vm9173_vm0 }
 0x200   :  { %v1031_v43 = vadd.f32 %v1030_v51, %v6713_v41 }
 0x201   :  { %v854_v25 = vpop.f32.mrf.mxu0  ;;  %v1119_v44 = vpop.f32.mrf.mxu3  ;;  %1718 = vmatpush.bf16.msra.mxu2 %v7316_v42 }
 0x202   :  { %v855_v17 = vadd.f32 %v854_v25, %v6691_v29  ;;  %v7305_v3 = vadd.f32 %v1119_v44, %v1031_v43  ;;  %v6249_v44 = vld [vmem:[%s9083_s3] sm:$0xf] }
 0x203   :  { %v943_v20 = vpop.f32.mrf.mxu1 }
 0x204   :  { %9221 = vst [vmem:[#allocation74_spill] sm:$0xff] %v7305_v3  ;;  %v7308_v51 = vadd.f32 %v943_v20, %v855_v17  ;;  %v7325_v17 = vperm.slane %v6249_v44, 3  ;;  %v5374_v3 = vld [vmem:[%s9082_s2 + $0x40] sm:$0xf] }
 0x206   :  { %9222 = vst [vmem:[#allocation75_spill] sm:$0xff] %v7308_v51  ;;  %v7327_v51 = vperm.slane %v6249_v44, 2 }
 0x207   :  { %v1032_v30 = vpop.f32.mrf.mxu2  ;;  %9224 = vst [vmem:[#allocation77_spill] sm:$0xff] %v7325_v17 }
 0x208   :  { %v1033_v29 = vadd.f32 %v1032_v30, %v6713_v41  ;;  %9225 = vst [vmem:[#allocation78_spill] sm:$0xff] %v7327_v51 }
 0x209   :  { %v1121_v43 = vpop.f32.mrf.mxu3  ;;  %v1311_v10 = vpop.f32.mrf.mxu0 }
 0x20a   :  { %v7320_v25 = vadd.f32 %v1121_v43, %v1033_v29  ;;  %v1312_v41 = vadd.f32 %v1311_v10, %v7325_v17  ;;  %v7346_v29 = vor.u32 %v5685_v4, %v5376_v53  ;;  %v5687_v4 = vld [vmem:[%s9082_s2 + $0x4c] sm:$0xf0] }
 0x20b   :  { %v1133_v20 = vpop.f32.mrf.mxu1  ;;  %v7360_v53 = vor.u32 %v5687_v4, %v5374_v3 }
 0x20c   :  { %9223 = vst [vmem:[#allocation76_spill] sm:$0xff] %v7320_v25  ;;  %5309 = vmatmul.msk.bf16.gmra.mxu0 %vm6699_vm14, %v9163_v0  ;;  %5332 = vmatmul.msk.bf16.gmra.mxu2 %vm9226_vm3, %v6703_v39  ;;  %v1134_v43 = vadd.f32 %v1133_v20, %v7327_v51  ;;  %vm9261_vm3 = vnez %v9161_v9 }
 0x20d   :  { %1691 = vmatpush.bf16.msra.mxu3 %v7346_v29  ;;  %1677 = vmatpush.bf16.msra.mxu1 %v7360_v53 }
 0x20e   :  { %5261 = vmatmul.msk.bf16.gmra.mxu1 %vm6699_vm14, %v9163_v0  ;;  %5284 = vmatmul.msk.bf16.gmra.mxu3 %vm9173_vm0, %v6703_v39  ;;  %vm9227_vm14 = vmmov %vm9173_vm0 }
 0x20f   :  { %v1400_v30 = vpop.f32.mrf.mxu2 }
 0x210   :  { %v7349_v10 = vadd.f32 %v1400_v30, %v1312_v41 }
 0x211   :  { %v1222_v37 = vpop.f32.mrf.mxu3  ;;  %v1313_v44 = vpop.f32.mrf.mxu0 }
 0x212   :  { %v7352_v39 = vadd.f32 %v1222_v37, %v1134_v43  ;;  %v1314_v20 = vadd.f32 %v1313_v44, %v7325_v17 }
 0x213   :  { %v1135_v25 = vpop.f32.mrf.mxu1 }
 0x214   :  { %v1136_v30 = vadd.f32 %v1135_v25, %v7327_v51 }
 0x217   :  { %v1402_v41 = vpop.f32.mrf.mxu2 }
 0x218   :  { %v7365_v43 = vadd.f32 %v1402_v41, %v1314_v20  ;;  %v5382_v20 = vld [vmem:[%s9082_s2 + $0x48] sm:$0xf] }
 0x219   :  { %v1224_v37 = vpop.f32.mrf.mxu3  ;;  %v1316_v28 = vpop.f32.mrf.mxu0 }
 0x21a   :  { %v7367_v6 = vadd.f32 %v1224_v37, %v1136_v30  ;;  %v1317_v3 = vadd.f32 %v1316_v28, %v7325_v17  ;;  %v5688_v28 = vld [vmem:[%s9082_s2 + $0x54] sm:$0xf0] }
 0x21b   :  { %v1138_v48 = vpop.f32.mrf.mxu1  ;;  %v7389_v14 = vor.u32 %v5688_v28, %v5382_v20 }
 0x21c   :  { %5311 = vmatmul.msk.bf16.gmra.mxu0 %vm6735_vm9, %v9163_v0  ;;  %5333 = vmatmul.msk.bf16.gmra.mxu2 %vm9227_vm14, %v6739_v16  ;;  %v1139_v44 = vadd.f32 %v1138_v48, %v7327_v51  ;;  %v5686_v48 = vld [vmem:[%s9082_s2 + $0x4c] sm:$0xf]  ;;  %vm9262_vm14 = vmmov %vm9173_vm0 }
 0x21d   :  { %1705 = vmatpush.bf16.msra.mxu0 %v7389_v14 }
 0x21e   :  { %5263 = vmatmul.msk.bf16.gmra.mxu1 %vm6735_vm9, %v9163_v0  ;;  %5285 = vmatmul.msk.bf16.gmra.mxu3 %vm9228_vm15, %v6739_v16  ;;  %vm9232_vm9 = vmmov %vm9173_vm0 }
 0x21f   :  { %v1405_v25 = vpop.f32.mrf.mxu2  ;;  %vm9269_vm15 = vmmov %vm9173_vm0 }
 0x220   :  { %v7381_v4 = vadd.f32 %v1405_v25, %v1317_v3  ;;  %v5384_v3 = vld [vmem:[%s9082_s2 + $0x58] sm:$0xf0] }
 0x221   :  { %v1227_v41 = vpop.f32.mrf.mxu3  ;;  %v1318_v30 = vpop.f32.mrf.mxu0  ;;  %v7400_v25 = vor.u32 %v5686_v48, %v5384_v3 }
 0x222   :  { %9229 = vst [vmem:[#allocation79_spill] sm:$0xff] %v7381_v4  ;;  %v7391_v37 = vadd.f32 %v1227_v41, %v1139_v44  ;;  %v1319_v26 = vadd.f32 %v1318_v30, %v7325_v17 }
 0x223   :  { %v1140_v16 = vpop.f32.mrf.mxu1  ;;  %1719 = vmatpush.bf16.msra.mxu2 %v7400_v25 }
 0x224   :  { %v1141_v44 = vadd.f32 %v1140_v16, %v7327_v51 }
 0x227   :  { %v1407_v23 = vpop.f32.mrf.mxu2 }
 0x228   :  { %v7405_v20 = vadd.f32 %v1407_v23, %v1319_v26  ;;  %v5681_v23 = vld [vmem:[%s9082_s2 + $0x24] sm:$0xf]  ;;  %v5360_v26 = vld [vmem:[%s9082_s2 + $0x30] sm:$0xf0] }
 0x229   :  { %v1229_v28 = vpop.f32.mrf.mxu3  ;;  %v1321_v41 = vpop.f32.mrf.mxu0  ;;  %v7426_v48 = vor.u32 %v5681_v23, %v5360_v26  ;;  %v5683_v23 = vld [vmem:[%s9082_s2 + $0x2c] sm:$0xf0] }
 0x22a   :  { %9230 = vst [vmem:[#allocation80_spill] sm:$0xff] %v7405_v20  ;;  %v7407_v62 = vadd.f32 %v1229_v28, %v1141_v44  ;;  %v1322_v30 = vadd.f32 %v1321_v41, %v7325_v17  ;;  %v5358_v20 = vld [vmem:[%s9082_s2 + $0x20] sm:$0xf] }
 0x22b   :  { %v1143_v4 = vpop.f32.mrf.mxu1  ;;  %1692 = vmatpush.bf16.msra.mxu3 %v7426_v48  ;;  %v7440_v26 = vor.u32 %v5683_v23, %v5358_v20 }
 0x22c   :  { %9231 = vst [vmem:[#allocation81_spill] sm:$0xff] %v7407_v62  ;;  %5313 = vmatmul.msk.bf16.gmra.mxu0 %vm6769_vm8, %v9163_v0  ;;  %5334 = vmatmul.msk.bf16.gmra.mxu2 %vm9232_vm9, %v6773_v61  ;;  %v1144_v3 = vadd.f32 %v1143_v4, %v7327_v51  ;;  %vm9270_vm9 = vmmov %vm9173_vm0 }
 0x22d   :  { %1678 = vmatpush.bf16.msra.mxu1 %v7440_v26 }
 0x22e   :  { %5265 = vmatmul.msk.bf16.gmra.mxu1 %vm6769_vm8, %v9163_v0  ;;  %5286 = vmatmul.msk.bf16.gmra.mxu3 %vm9233_vm1, %v6773_v61  ;;  %vm9238_vm8 = vnez %v9136_v56 }
 0x22f   :  { %v1410_v16 = vpop.f32.mrf.mxu2 }
 0x230   :  { %v7429_v44 = vadd.f32 %v1410_v16, %v1322_v30 }
 0x231   :  { %v1232_v58 = vpop.f32.mrf.mxu3  ;;  %v1323_v28 = vpop.f32.mrf.mxu0 }
 0x232   :  { %9234 = vst [vmem:[#allocation82_spill] sm:$0xff] %v7429_v44  ;;  %v7432_v61 = vadd.f32 %v1232_v58, %v1144_v3  ;;  %v1324_v4 = vadd.f32 %v1323_v28, %v7325_v17 }
 0x233   :  { %v1145_v41 = vpop.f32.mrf.mxu1 }
 0x234   :  { %9235 = vst [vmem:[#allocation83_spill] sm:$0xff] %v7432_v61  ;;  %v1146_v16 = vadd.f32 %v1145_v41, %v7327_v51 }
 0x237   :  { %v1412_v30 = vpop.f32.mrf.mxu2 }
 0x238   :  { %v7445_v3 = vadd.f32 %v1412_v30, %v1324_v4  ;;  %v5366_v4 = vld [vmem:[%s9082_s2 + $0x28] sm:$0xf] }
 0x239   :  { %v1234_v58 = vpop.f32.mrf.mxu3  ;;  %v1326_v44 = vpop.f32.mrf.mxu0 }
 0x23a   :  { %9236 = vst [vmem:[#allocation84_spill] sm:$0xff] %v7445_v3  ;;  %v7447_v61 = vadd.f32 %v1234_v58, %v1146_v16  ;;  %v1327_v20 = vadd.f32 %v1326_v44, %v7325_v17  ;;  %v5684_v44 = vld [vmem:[%s9082_s2 + $0x34] sm:$0xf0] }
 0x23b   :  { %v1148_v55 = vpop.f32.mrf.mxu1  ;;  %v7469_v56 = vor.u32 %v5684_v44, %v5366_v4 }
 0x23c   :  { %9237 = vst [vmem:[#allocation85_spill] sm:$0xff] %v7447_v61  ;;  %5315 = vmatmul.msk.bf16.gmra.mxu0 %vm9238_vm8, %v9163_v0  ;;  %5335 = vmatmul.msk.bf16.gmra.mxu2 %vm9239_vm6, %v6807_v5  ;;  %v1149_v41 = vadd.f32 %v1148_v55, %v7327_v51  ;;  %v5682_v55 = vld [vmem:[%s9082_s2 + $0x2c] sm:$0xf] }
 0x23d   :  { %1706 = vmatpush.bf16.msra.mxu0 %v7469_v56 }
 0x23e   :  { %5267 = vmatmul.msk.bf16.gmra.mxu1 %vm9238_vm8, %v9163_v0  ;;  %5287 = vmatmul.msk.bf16.gmra.mxu3 %vm9240_vm7, %v6807_v5 }
 0x23f   :  { %v1415_v28 = vpop.f32.mrf.mxu2 }
 0x240   :  { %v7461_v23 = vadd.f32 %v1415_v28, %v1327_v20  ;;  %v5368_v20 = vld [vmem:[%s9082_s2 + $0x38] sm:$0xf0] }
 0x241   :  { %v1237_v30 = vpop.f32.mrf.mxu3  ;;  %v1328_v16 = vpop.f32.mrf.mxu0  ;;  %v7480_v28 = vor.u32 %v5682_v55, %v5368_v20 }
 0x242   :  { %9241 = vst [vmem:[#allocation86_spill] sm:$0xff] %v7461_v23  ;;  %v7471_v58 = vadd.f32 %v1237_v30, %v1149_v41  ;;  %v1329_v23 = vadd.f32 %v1328_v16, %v7325_v17 }
 0x243   :  { %v1150_v5 = vpop.f32.mrf.mxu1  ;;  %1720 = vmatpush.bf16.msra.mxu2 %v7480_v28 }
 0x244   :  { %9242 = vst [vmem:[#allocation87_spill] sm:$0xff] %v7471_v58  ;;  %v1151_v41 = vadd.f32 %v1150_v5, %v7327_v51 }
 0x247   :  { %v1417_v3 = vpop.f32.mrf.mxu2 }
 0x248   :  { %v7485_v4 = vadd.f32 %v1417_v3, %v1329_v23  ;;  %v5677_v3 = vld [vmem:[%s9082_s2 + $0x4] sm:$0xf]  ;;  %v5344_v23 = vld [vmem:[%s9082_s2 + $0x10] sm:$0xf0] }
 0x249   :  { %v1239_v44 = vpop.f32.mrf.mxu3  ;;  %v1331_v30 = vpop.f32.mrf.mxu0  ;;  %v7506_v55 = vor.u32 %v5677_v3, %v5344_v23  ;;  %v5679_v3 = vld [vmem:[%s9082_s2 + $0xc] sm:$0xf0] }
 0x24a   :  { %9243 = vst [vmem:[#allocation88_spill] sm:$0xff] %v7485_v4  ;;  %v7487_v58 = vadd.f32 %v1239_v44, %v1151_v41  ;;  %v1332_v16 = vadd.f32 %v1331_v30, %v7325_v17  ;;  %v5342_v4 = vld [vmem:[%s9082_s2] sm:$0xf] }
 0x24b   :  { %v1153_v61 = vpop.f32.mrf.mxu1  ;;  %1693 = vmatpush.bf16.msra.mxu3 %v7506_v55 }
 0x24c   :  { %9244 = vst [vmem:[#allocation89_spill] sm:$0xff] %v7487_v58  ;;  %5317 = vmatmul.msk.bf16.gmra.mxu0 %vm9245_vm12, %v9163_v0  ;;  %5336 = vmatmul.msk.bf16.gmra.mxu2 %vm9246_vm4, %v6841_v24  ;;  %v1154_v20 = vadd.f32 %v1153_v61, %v7327_v51  ;;  %v7521_v61 = vor.u32 %v5679_v3, %v5342_v4 }
 0x24e   :  { %5269 = vmatmul.msk.bf16.gmra.mxu1 %vm9245_vm12, %v9163_v0  ;;  %5288 = vmatmul.msk.bf16.gmra.mxu3 %vm9247_vm2, %v6841_v24 }
 0x24f   :  { %v1420_v5 = vpop.f32.mrf.mxu2  ;;  %1877 = vmatpush.bf16.msrb.mxu3 %v6929_v34  ;;  %1679 = vmatpush.bf16.msra.mxu1 %v7521_v61 }
 0x250   :  { %v7509_v41 = vadd.f32 %v1420_v5, %v1332_v16 }
 0x251   :  { %v1242_v15 = vpop.f32.mrf.mxu3  ;;  %v1333_v44 = vpop.f32.mrf.mxu0 }
 0x252   :  { %9248 = vst [vmem:[#allocation90_spill] sm:$0xff] %v7509_v41  ;;  %v7512_v24 = vadd.f32 %v1242_v15, %v1154_v20  ;;  %v1334_v16 = vadd.f32 %v1333_v44, %v7325_v17 }
 0x253   :  { %v1155_v30 = vpop.f32.mrf.mxu1  ;;  %1878 = vmatpush.bf16.msrb.mxu3 %v7021_v32  ;;  %1863 = vmatpush.bf16.msrb.mxu1 %v6944_v8 }
 0x254   :  { %9249 = vst [vmem:[#allocation91_spill] sm:$0xff] %v7512_v24  ;;  %v1156_v5 = vadd.f32 %v1155_v30, %v7327_v51 }
 0x257   :  { %v1422_v23 = vpop.f32.mrf.mxu2  ;;  %1879 = vmatpush.bf16.msrb.mxu3 %v7101_v12  ;;  %1864 = vmatpush.bf16.msrb.mxu1 %v7036_v52 }
 0x258   :  { %v7527_v20 = vadd.f32 %v1422_v23, %v1334_v16  ;;  %v5350_v23 = vld [vmem:[%s9082_s2 + $0x8] sm:$0xf] }
 0x259   :  { %v1244_v15 = vpop.f32.mrf.mxu3  ;;  %v1336_v41 = vpop.f32.mrf.mxu0 }
 0x25a   :  { %9250 = vst [vmem:[#allocation92_spill] sm:$0xff] %v7527_v20  ;;  %v7530_v24 = vadd.f32 %v1244_v15, %v1156_v5  ;;  %v1337_v44 = vadd.f32 %v1336_v41, %v7325_v17  ;;  %v5680_v41 = vld [vmem:[%s9082_s2 + $0x14] sm:$0xf0] }
 0x25b   :  { %v1158_v4 = vpop.f32.mrf.mxu1  ;;  %1880 = vmatpush.bf16.msrb.mxu3 %v7181_v1  ;;  %v7557_v15 = vor.u32 %v5680_v41, %v5350_v23  ;;  %1865 = vmatpush.bf16.msrb.mxu1 %v7116_v22 }
 0x25c   :  { %9251 = vst [vmem:[#allocation93_spill] sm:$0xff] %v7530_v24  ;;  %5319 = vmatmul.msk.bf16.gmra.mxu0 %vm9252_vm13, %v9163_v0  ;;  %5337 = vmatmul.msk.bf16.gmra.mxu2 %vm9253_vm11, %v6875_v46  ;;  %v1159_v3 = vadd.f32 %v1158_v4, %v7327_v51 }
 0x25d   :  { %1707 = vmatpush.bf16.msra.mxu0 %v7557_v15 }
 0x25e   :  { %5271 = vmatmul.msk.bf16.gmra.mxu1 %vm9252_vm13, %v9163_v0  ;;  %5289 = vmatmul.msk.bf16.gmra.mxu3 %vm9254_vm10, %v6875_v46 }
 0x25f   :  { %v1425_v30 = vpop.f32.mrf.mxu2  ;;  %1881 = vmatpush.bf16.msrb.mxu3 %v7261_v19  ;;  %1866 = vmatpush.bf16.msrb.mxu1 %v7196_v11 }
 0x260   :  { %v7547_v16 = vadd.f32 %v1425_v30, %v1337_v44  ;;  %v5678_v44 = vld [vmem:[%s9082_s2 + $0xc] sm:$0xf]  ;;  %v5352_v30 = vld [vmem:[%s9082_s2 + $0x18] sm:$0xf0] }
 0x261   :  { %v1247_v7 = vpop.f32.mrf.mxu3  ;;  %v7555_v5 = vpop.f32.mrf.mxu0  ;;  %1891 = vmatpush.bf16.msrb.mxu0 %v6982_v27  ;;  %v7573_v23 = vor.u32 %v5678_v44, %v5352_v30 }
 0x262   :  { %9255 = vst [vmem:[#allocation94_spill] sm:$0xff] %v7547_v16  ;;  %v7560_v46 = vadd.f32 %v1247_v7, %v1159_v3 }
 0x263   :  { %9256 = vst [vmem:[#allocation95_spill] sm:$0xff] %v7555_v5  ;;  %v7562_v4 = vpop.f32.mrf.mxu1  ;;  %1721 = vmatpush.bf16.msra.mxu2 %v7573_v23  ;;  %1882 = vmatpush.bf16.msrb.mxu3 %v7346_v29 }
 0x264   :  { %9257 = vst [vmem:[#allocation96_spill] sm:$0xff] %v7560_v46  ;;  %1867 = vmatpush.bf16.msrb.mxu1 %v7276_v31 }
 0x265   :  { %9258 = vst [vmem:[#allocation97_spill] sm:$0xff] %v7562_v4  ;;  %1892 = vmatpush.bf16.msrb.mxu0 %v7062_v49 }
 0x267   :  { %v7576_v3 = vpop.f32.mrf.mxu2  ;;  %1905 = vmatpush.bf16.msrb.mxu2 %v6996_v35  ;;  %1883 = vmatpush.bf16.msrb.mxu3 %v7426_v48 }
 0x268   :  { %9259 = vst [vmem:[#allocation98_spill] sm:$0xff] %v7576_v3  ;;  %1868 = vmatpush.bf16.msrb.mxu1 %v7360_v53 }
 0x269   :  { %v7582_v41 = vpop.f32.mrf.mxu3  ;;  %v1341_v7 = vpop.f32.mrf.mxu0  ;;  %1893 = vmatpush.bf16.msrb.mxu0 %v7142_v38 }
 0x26a   :  { %9260 = vst [vmem:[#allocation99_spill] sm:$0xff] %v7582_v41  ;;  %v1342_v44 = vadd.f32 %v1341_v7, %v7325_v17 }
 0x26b   :  { %v1163_v5 = vpop.f32.mrf.mxu1  ;;  %1906 = vmatpush.bf16.msrb.mxu2 %v7076_v47  ;;  %1884 = vmatpush.bf16.msrb.mxu3 %v7506_v55 }
 0x26c   :  { %5321 = vmatmul.msk.bf16.gmra.mxu0 %vm9261_vm3, %v9163_v0  ;;  %5338 = vmatmul.msk.bf16.gmra.mxu2 %vm9173_vm0, %v6909_v60  ;;  %v1164_v3 = vadd.f32 %v1163_v5, %v7327_v51 }
 0x26d   :  { %1894 = vmatpush.bf16.msrb.mxu0 %v7222_v2  ;;  %1869 = vmatpush.bf16.msrb.mxu1 %v7440_v26 }
 0x26e   :  { %5273 = vmatmul.msk.bf16.gmra.mxu1 %vm9261_vm3, %v9163_v0  ;;  %5290 = vmatmul.msk.bf16.gmra.mxu3 %vm9262_vm14, %v6909_v60 }
 0x26f   :  { %v1430_v30 = vpop.f32.mrf.mxu2  ;;  %1907 = vmatpush.bf16.msrb.mxu2 %v7156_v63 }
 0x270   :  { %v7602_v16 = vadd.f32 %v1430_v30, %v1342_v44 }
 0x271   :  { %v1252_v41 = vpop.f32.mrf.mxu3  ;;  %v7604_v46 = vpop.f32.mrf.mxu0  ;;  %1895 = vmatpush.bf16.msrb.mxu0 %v7302_v45  ;;  %1870 = vmatpush.bf16.msrb.mxu1 %v7521_v61 }
 0x272   :  { %9263 = vst [vmem:[#allocation100_spill] sm:$0xff] %v7602_v16  ;;  %v7608_v9 = vadd.f32 %v1252_v41, %v1164_v3 }
 0x273   :  { %9264 = vst [vmem:[#allocation101_spill] sm:$0xff] %v7604_v46  ;;  %v7610_v7 = vpop.f32.mrf.mxu1  ;;  %1908 = vmatpush.bf16.msrb.mxu2 %v7236_v18 }
 0x274   :  { %9265 = vst [vmem:[#allocation102_spill] sm:$0xff] %v7608_v9 }
 0x275   :  { %9266 = vst [vmem:[#allocation103_spill] sm:$0xff] %v7610_v7  ;;  %1896 = vmatpush.bf16.msrb.mxu0 %v7389_v14 }
 0x277   :  { %v7615_v60 = vpop.f32.mrf.mxu2  ;;  %1909 = vmatpush.bf16.msrb.mxu2 %v7316_v42 }
 0x278   :  { %9267 = vst [vmem:[#allocation104_spill] sm:$0xff] %v7615_v60 }
 0x279   :  { %v7618_v5 = vpop.f32.mrf.mxu3  ;;  %v1346_v44 = vpop.f32.mrf.mxu0  ;;  %1897 = vmatpush.bf16.msrb.mxu0 %v7469_v56 }
 0x27a   :  { %9268 = vst [vmem:[#allocation105_spill] sm:$0xff] %v7618_v5  ;;  %v1347_v41 = vadd.f32 %v1346_v44, %v7325_v17 }
 0x27b   :  { %v1168_v3 = vpop.f32.mrf.mxu1  ;;  %1910 = vmatpush.bf16.msrb.mxu2 %v7400_v25 }
 0x27c   :  { %5323 = vmatmul.msk.bf16.gmra.mxu0 %vm6957_vm5, %v9163_v0  ;;  %5339 = vmatmul.msk.bf16.gmra.mxu2 %vm9269_vm15, %v6961_v59  ;;  %v1169_v60 = vadd.f32 %v1168_v3, %v7327_v51 }
 0x27d   :  { %1898 = vmatpush.bf16.msrb.mxu0 %v7557_v15 }
 0x27e   :  { %5275 = vmatmul.msk.bf16.gmra.mxu1 %vm6957_vm5, %v9163_v0  ;;  %5291 = vmatmul.msk.bf16.gmra.mxu3 %vm9270_vm9, %v6961_v59 }
 0x27f   :  { %v1435_v30 = vpop.f32.mrf.mxu2  ;;  %1911 = vmatpush.bf16.msrb.mxu2 %v7480_v28 }
 0x280   :  { %v7636_v46 = vadd.f32 %v1435_v30, %v1347_v41  ;;  %v9277_v41 = vmov 0  }
 0x281   :  { %v1257_v16 = vpop.f32.mrf.mxu3  ;;  %v7638_v5 = vpop.f32.mrf.mxu0 }
 0x282   :  { %9271 = vst [vmem:[#allocation106_spill] sm:$0xff] %v7636_v46  ;;  %v7642_v44 = vadd.f32 %v1257_v16, %v1169_v60 }
 0x283   :  { %9272 = vst [vmem:[#allocation107_spill] sm:$0xff] %v7638_v5  ;;  %v7644_v9 = vpop.f32.mrf.mxu1  ;;  %1912 = vmatpush.bf16.msrb.mxu2 %v7573_v23 }
 0x284   :  { %9273 = vst [vmem:[#allocation108_spill] sm:$0xff] %v7642_v44 }
 0x285   :  { %9274 = vst [vmem:[#allocation109_spill] sm:$0xff] %v7644_v9 }
 0x287   :  { %v7647_v0 = vpop.f32.mrf.mxu2 }
 0x288   :  { %9275 = vst [vmem:[#allocation110_spill] sm:$0xff] %v7647_v0 }
 0x289   :  { %v7649_v54 = vpop.f32.mrf.mxu3  ;;  %v1351_v59 = vpop.f32.mrf.mxu0 }
 0x28a   :  { %9276 = vst [vmem:[#allocation111_spill] sm:$0xff] %v7649_v54  ;;  %v1352_v16 = vadd.f32 %v1351_v59, %v7325_v17 }
 0x28b   :  { %v1173_v3 = vpop.f32.mrf.mxu1 }
 0x28c   :  { %1708 = vmatmul.bf16.vlgmr.msra.gmra.mxu0 %v9277_v41  ;;  %1722 = vmatmul.bf16.vlgmr.msra.gmra.mxu2 %v9277_v41  ;;  %v1174_v30 = vadd.f32 %v1173_v3, %v7327_v51 }
 0x28d   :  { %2082 = vmatpush.bf16.msra.mxu0 %v6982_v27  ;;  %2096 = vmatpush.bf16.msra.mxu2 %v6996_v35 }
 0x28e   :  { %1680 = vmatmul.bf16.vlgmr.msra.gmra.mxu1 %v9277_v41  ;;  %1694 = vmatmul.bf16.vlgmr.msra.gmra.mxu3 %v9277_v41 }
 0x28f   :  { %v1440_v60 = vpop.f32.mrf.mxu2  ;;  %2054 = vmatpush.bf16.msra.mxu1 %v6944_v8  ;;  %2068 = vmatpush.bf16.msra.mxu3 %v6929_v34 }
 0x290   :  { %v7661_v0 = vadd.f32 %v1440_v60, %v1352_v16 }
 0x291   :  { %v1262_v5 = vpop.f32.mrf.mxu3  ;;  %v7663_v46 = vpop.f32.mrf.mxu0  ;;  %2083 = vmatpush.bf16.msra.mxu0 %v7062_v49  ;;  %2097 = vmatpush.bf16.msra.mxu2 %v7076_v47 }
 0x292   :  { %9278 = vst [vmem:[#allocation112_spill] sm:$0xff] %v7661_v0  ;;  %v7667_v59 = vadd.f32 %v1262_v5, %v1174_v30 }
 0x293   :  { %9279 = vst [vmem:[#allocation113_spill] sm:$0xff] %v7663_v46  ;;  %v7669_v54 = vpop.f32.mrf.mxu1  ;;  %2055 = vmatpush.bf16.msra.mxu1 %v7036_v52  ;;  %2069 = vmatpush.bf16.msra.mxu3 %v7021_v32 }
 0x294   :  { %9280 = vst [vmem:[#allocation114_spill] sm:$0xff] %v7667_v59 }
 0x295   :  { %9281 = vst [vmem:[#allocation115_spill] sm:$0xff] %v7669_v54  ;;  %2084 = vmatpush.bf16.msra.mxu0 %v7142_v38  ;;  %2098 = vmatpush.bf16.msra.mxu2 %v7156_v63 }
 0x297   :  { %v7675_v3 = vpop.f32.mrf.mxu2  ;;  %2056 = vmatpush.bf16.msra.mxu1 %v7116_v22  ;;  %2070 = vmatpush.bf16.msra.mxu3 %v7101_v12 }
 0x298   :  { %9282 = vst [vmem:[#allocation116_spill] sm:$0xff] %v7675_v3 }
 0x299   :  { %v7679_v41 = vpop.f32.mrf.mxu3  ;;  %v1356_v5 = vpop.f32.mrf.mxu0  ;;  %2085 = vmatpush.bf16.msra.mxu0 %v7222_v2  ;;  %2099 = vmatpush.bf16.msra.mxu2 %v7236_v18 }
 0x29a   :  { %9283 = vst [vmem:[#allocation117_spill] sm:$0xff] %v7679_v41  ;;  %v1357_v60 = vadd.f32 %v1356_v5, %v7325_v17 }
 0x29b   :  { %v1178_v16 = vpop.f32.mrf.mxu1  ;;  %2057 = vmatpush.bf16.msra.mxu1 %v7196_v11  ;;  %2071 = vmatpush.bf16.msra.mxu3 %v7181_v1 }
 0x29c   :  { %v1179_v3 = vadd.f32 %v1178_v16, %v7327_v51 }
 0x29d   :  { %2086 = vmatpush.bf16.msra.mxu0 %v7302_v45  ;;  %2100 = vmatpush.bf16.msra.mxu2 %v7316_v42 }
 0x29f   :  { %v1445_v30 = vpop.f32.mrf.mxu2  ;;  %2058 = vmatpush.bf16.msra.mxu1 %v7276_v31  ;;  %2072 = vmatpush.bf16.msra.mxu3 %v7261_v19 }
 0x2a0   :  { %v7691_v46 = vadd.f32 %v1445_v30, %v1357_v60 }
 0x2a1   :  { %v1267_v0 = vpop.f32.mrf.mxu3  ;;  %v7693_v41 = vpop.f32.mrf.mxu0  ;;  %2087 = vmatpush.bf16.msra.mxu0 %v7389_v14  ;;  %2101 = vmatpush.bf16.msra.mxu2 %v7400_v25 }
 0x2a2   :  { %9284 = vst [vmem:[#allocation118_spill] sm:$0xff] %v7691_v46  ;;  %v7697_v59 = vadd.f32 %v1267_v0, %v1179_v3 }
 0x2a3   :  { %9285 = vst [vmem:[#allocation119_spill] sm:$0xff] %v7693_v41  ;;  %v7699_v54 = vpop.f32.mrf.mxu1  ;;  %2059 = vmatpush.bf16.msra.mxu1 %v7360_v53  ;;  %2073 = vmatpush.bf16.msra.mxu3 %v7346_v29 }
 0x2a4   :  { %9286 = vst [vmem:[#allocation120_spill] sm:$0xff] %v7697_v59 }
 0x2a5   :  { %9287 = vst [vmem:[#allocation121_spill] sm:$0xff] %v7699_v54  ;;  %2088 = vmatpush.bf16.msra.mxu0 %v7469_v56  ;;  %2102 = vmatpush.bf16.msra.mxu2 %v7480_v28 }
 0x2a7   :  { %v7705_v5 = vpop.f32.mrf.mxu2  ;;  %2060 = vmatpush.bf16.msra.mxu1 %v7440_v26  ;;  %2074 = vmatpush.bf16.msra.mxu3 %v7426_v48 }
 0x2a8   :  { %9288 = vst [vmem:[#allocation122_spill] sm:$0xff] %v7705_v5 }
 0x2a9   :  { %v7709_v16 = vpop.f32.mrf.mxu3  ;;  %v1361_v0 = vpop.f32.mrf.mxu0  ;;  %2089 = vmatpush.bf16.msra.mxu0 %v7557_v15  ;;  %2103 = vmatpush.bf16.msra.mxu2 %v7573_v23 }
 0x2aa   :  { %9289 = vst [vmem:[#allocation123_spill] sm:$0xff] %v7709_v16  ;;  %v1362_v60 = vadd.f32 %v1361_v0, %v7325_v17 }
 0x2ab   :  { %v1183_v3 = vpop.f32.mrf.mxu1  ;;  %2061 = vmatpush.bf16.msra.mxu1 %v7521_v61  ;;  %2075 = vmatpush.bf16.msra.mxu3 %v7506_v55 }
 0x2ac   :  { %v1184_v5 = vadd.f32 %v1183_v3, %v7327_v51 }
 0x2af   :  { %v1450_v30 = vpop.f32.mrf.mxu2 }
 0x2b0   :  { %v7717_v41 = vadd.f32 %v1450_v30, %v1362_v60 }
 0x2b1   :  { %v1272_v46 = vpop.f32.mrf.mxu3  ;;  %v7719_v59 = vpop.f32.mrf.mxu0 }
 0x2b2   :  { %9290 = vst [vmem:[#allocation124_spill] sm:$0xff] %v7717_v41  ;;  %v7721_v16 = vadd.f32 %v1272_v46, %v1184_v5 }
 0x2b3   :  { %9291 = vst [vmem:[#allocation125_spill] sm:$0xff] %v7719_v59  ;;  %v7723_v54 = vpop.f32.mrf.mxu1 }
 0x2b4   :  { %9292 = vst [vmem:[#allocation126_spill] sm:$0xff] %v7721_v16 }
 0x2b5   :  { %9293 = vst [vmem:[#allocation127_spill] sm:$0xff] %v7723_v54 }
 0x2b7   :  { %v7725_v44 = vpop.f32.mrf.mxu2 }
 0x2b8   :  { %9294 = vst [vmem:[#allocation128_spill] sm:$0xff] %v7725_v44 }
 0x2b9   :  { %v7727_v9 = vpop.f32.mrf.mxu3  ;;  %v1366_v7 = vpop.f32.mrf.mxu0 }
 0x2ba   :  { %9295 = vst [vmem:[#allocation129_spill] sm:$0xff] %v7727_v9  ;;  %v1367_v0 = vadd.f32 %v1366_v7, %v7325_v17 }
 0x2bb   :  { %v1188_v4 = vpop.f32.mrf.mxu1 }
 0x2bc   :  { %v1189_v3 = vadd.f32 %v1188_v4, %v7327_v51 }
 0x2bf   :  { %v1455_v20 = vpop.f32.mrf.mxu2 }
 0x2c0   :  { %v7731_v60 = vadd.f32 %v1455_v20, %v1367_v0 }
 0x2c1   :  { %v1277_v30 = vpop.f32.mrf.mxu3  ;;  %v7733_v41 = vpop.f32.mrf.mxu0 }
 0x2c2   :  { %9296 = vst [vmem:[#allocation130_spill] sm:$0xff] %v7731_v60  ;;  %v7735_v46 = vadd.f32 %v1277_v30, %v1189_v3 }
 0x2c3   :  { %9297 = vst [vmem:[#allocation131_spill] sm:$0xff] %v7733_v41  ;;  %v7737_v5 = vpop.f32.mrf.mxu1 }
 0x2c4   :  { %9298 = vst [vmem:[#allocation132_spill] sm:$0xff] %v7735_v46 }
 0x2c5   :  { %9299 = vst [vmem:[#allocation133_spill] sm:$0xff] %v7737_v5 }
 0x2c7   :  { %v7739_v59 = vpop.f32.mrf.mxu2 }
 0x2c8   :  { %9300 = vst [vmem:[#allocation134_spill] sm:$0xff] %v7739_v59 }
 0x2c9   :  { %v7741_v44 = vpop.f32.mrf.mxu3  ;;  %v1371_v9 = vpop.f32.mrf.mxu0 }
 0x2ca   :  { %9301 = vst [vmem:[#allocation135_spill] sm:$0xff] %v7741_v44  ;;  %v1372_v7 = vadd.f32 %v1371_v9, %v7325_v17 }
 0x2cb   :  { %v1193_v16 = vpop.f32.mrf.mxu1 }
 0x2cc   :  { %v1194_v4 = vadd.f32 %v1193_v16, %v7327_v51 }
 0x2cf   :  { %v1460_v54 = vpop.f32.mrf.mxu2 }
 0x2d0   :  { %v7745_v20 = vadd.f32 %v1460_v54, %v1372_v7 }
 0x2d1   :  { %v1282_v0 = vpop.f32.mrf.mxu3  ;;  %v7747_v60 = vpop.f32.mrf.mxu0 }
 0x2d2   :  { %9302 = vst [vmem:[#allocation136_spill] sm:$0xff] %v7745_v20  ;;  %v7749_v3 = vadd.f32 %v1282_v0, %v1194_v4 }
 0x2d3   :  { %9303 = vst [vmem:[#allocation137_spill] sm:$0xff] %v7747_v60  ;;  %v7751_v30 = vpop.f32.mrf.mxu1 }
 0x2d4   :  { %9304 = vst [vmem:[#allocation138_spill] sm:$0xff] %v7749_v3 }
 0x2d5   :  { %9305 = vst [vmem:[#allocation139_spill] sm:$0xff] %v7751_v30 }
 0x2d7   :  { %v7753_v41 = vpop.f32.mrf.mxu2 }
 0x2d8   :  { %9306 = vst [vmem:[#allocation140_spill] sm:$0xff] %v7753_v41 }
 0x2d9   :  { %v7755_v59 = vpop.f32.mrf.mxu3  ;;  %v1376_v44 = vpop.f32.mrf.mxu0 }
 0x2da   :  { %9307 = vst [vmem:[#allocation141_spill] sm:$0xff] %v7755_v59  ;;  %v1377_v9 = vadd.f32 %v1376_v44, %v7325_v17 }
 0x2db   :  { %v1198_v46 = vpop.f32.mrf.mxu1 }
 0x2dc   :  { %v1199_v16 = vadd.f32 %v1198_v46, %v7327_v51 }
 0x2df   :  { %v1465_v5 = vpop.f32.mrf.mxu2 }
 0x2e0   :  { %v7759_v54 = vadd.f32 %v1465_v5, %v1377_v9 }
 0x2e1   :  { %v1287_v7 = vpop.f32.mrf.mxu3  ;;  %v7761_v20 = vpop.f32.mrf.mxu0 }
 0x2e2   :  { %9308 = vst [vmem:[#allocation142_spill] sm:$0xff] %v7759_v54  ;;  %v7763_v4 = vadd.f32 %v1287_v7, %v1199_v16 }
 0x2e3   :  { %9309 = vst [vmem:[#allocation143_spill] sm:$0xff] %v7761_v20  ;;  %v7765_v0 = vpop.f32.mrf.mxu1 }
 0x2e4   :  { %9310 = vst [vmem:[#allocation144_spill] sm:$0xff] %v7763_v4 }
 0x2e5   :  { %9311 = vst [vmem:[#allocation145_spill] sm:$0xff] %v7765_v0 }
 0x2e7   :  { %v7767_v60 = vpop.f32.mrf.mxu2 }
 0x2e8   :  { %9312 = vst [vmem:[#allocation146_spill] sm:$0xff] %v7767_v60 }
 0x2e9   :  { %v7769_v41 = vpop.f32.mrf.mxu3  ;;  %v1381_v59 = vpop.f32.mrf.mxu0 }
 0x2ea   :  { %9313 = vst [vmem:[#allocation147_spill] sm:$0xff] %v7769_v41  ;;  %v1382_v44 = vadd.f32 %v1381_v59, %v7325_v17 }
 0x2eb   :  { %v1203_v3 = vpop.f32.mrf.mxu1 }
 0x2ec   :  { %v1204_v46 = vadd.f32 %v1203_v3, %v7327_v51 }
 0x2ef   :  { %v1470_v30 = vpop.f32.mrf.mxu2 }
 0x2f0   :  { %v7773_v5 = vadd.f32 %v1470_v30, %v1382_v44 }
 0x2f1   :  { %v1292_v9 = vpop.f32.mrf.mxu3  ;;  %v7775_v54 = vpop.f32.mrf.mxu0 }
 0x2f2   :  { %9314 = vst [vmem:[#allocation148_spill] sm:$0xff] %v7773_v5  ;;  %v7777_v16 = vadd.f32 %v1292_v9, %v1204_v46 }
 0x2f3   :  { %9315 = vst [vmem:[#allocation149_spill] sm:$0xff] %v7775_v54  ;;  %v7779_v7 = vpop.f32.mrf.mxu1 }
 0x2f4   :  { %9316 = vst [vmem:[#allocation150_spill] sm:$0xff] %v7777_v16 }
 0x2f5   :  { %9317 = vst [vmem:[#allocation151_spill] sm:$0xff] %v7779_v7 }
 0x2f7   :  { %v7781_v20 = vpop.f32.mrf.mxu2 }
 0x2f8   :  { %9318 = vst [vmem:[#allocation152_spill] sm:$0xff] %v7781_v20 }
 0x2f9   :  { %v7783_v60 = vpop.f32.mrf.mxu3  ;;  %v1386_v41 = vpop.f32.mrf.mxu0 }
 0x2fa   :  { %9319 = vst [vmem:[#allocation153_spill] sm:$0xff] %v7783_v60  ;;  %v1387_v59 = vadd.f32 %v1386_v41, %v7325_v17 }
 0x2fb   :  { %v1208_v4 = vpop.f32.mrf.mxu1 }
 0x2fc   :  { %v1209_v3 = vadd.f32 %v1208_v4, %v7327_v51 }
 0x2ff   :  { %v1475_v0 = vpop.f32.mrf.mxu2 }
 0x300   :  { %v7787_v30 = vadd.f32 %v1475_v0, %v1387_v59 }
 0x301   :  { %v1297_v44 = vpop.f32.mrf.mxu3  ;;  %v7789_v5 = vpop.f32.mrf.mxu0 }
 0x302   :  { %9320 = vst [vmem:[#allocation154_spill] sm:$0xff] %v7787_v30  ;;  %v7791_v46 = vadd.f32 %v1297_v44, %v1209_v3 }
 0x303   :  { %9321 = vst [vmem:[#allocation155_spill] sm:$0xff] %v7789_v5  ;;  %v7793_v9 = vpop.f32.mrf.mxu1 }
 0x304   :  { %9322 = vst [vmem:[#allocation156_spill] sm:$0xff] %v7791_v46 }
 0x305   :  { %9323 = vst [vmem:[#allocation157_spill] sm:$0xff] %v7793_v9 }
 0x307   :  { %v7798_v41 = vpop.f32.mrf.mxu2 }
 0x308   :  { %9325 = vst [vmem:[#allocation159_spill] sm:$0xff] %v7798_v41 }
 0x309   :  { %v7795_v54 = vpop.f32.mrf.mxu3  ;;  %v1709_v20 = vpop.f32.mrf.mxu0 }
 0x30a   :  { %9324 = vst [vmem:[#allocation158_spill] sm:$0xff] %v7795_v54  ;;  %v1730_v4 = vadd.f32 %v1709_v20, %v7352_v39 }
 0x30b   :  { %v1681_v60 = vpop.f32.mrf.mxu1 }
 0x30c   :  { %v1728_v16 = vadd.f32 %v1681_v60, %v6705_v40  ;;  %v5470_v30 = vmul.f32 -1.442695, %v1730_v4 }
 0x30e   :  { %v5468_v7 = vmul.f32 -1.442695, %v1728_v16 }
 0x30f   :  { %v1723_v20 = vpop.f32.mrf.mxu2 }
 0x310   :  { %5737 = vpow2.f32 %v5468_v7 }
 0x311   :  { %v1695_v0 = vpop.f32.mrf.mxu3  ;;  %v1711_v59 = vpop.f32.mrf.mxu0 }
 0x312   :  { %v1729_v5 = vadd.f32 %v1695_v0, %v6721_v50  ;;  %v1734_v3 = vadd.f32 %v1711_v59, %v7367_v6 }
 0x313   :  { %v1683_v44 = vpop.f32.mrf.mxu1 }
 0x314   :  { %v5469_v9 = vmul.f32 -1.442695, %v1729_v5  ;;  %v1732_v54 = vadd.f32 %v1683_v44, %v6723_v57  ;;  %v5473_v60 = vmul.f32 -1.442695, %v1734_v3 }
 0x316   :  { %v5738_v46 = vpop.eup %5737  ;;  %5739 = vpow2.f32 %v5469_v9  ;;  %v5471_v40 = vmul.f32 -1.442695, %v1732_v54  ;;  %v1731_v9 = vadd.f32 %v1723_v20, %v7349_v10 }
 0x317   :  { %5741 = vpow2.f32 %v5470_v30  ;;  %v1754_v16 = vadd.f32 1.0, %v5738_v46 }
 0x318   :  { %5743 = vpow2.f32 %v5471_v40 }
 0x319   :  { %v1697_v39 = vpop.f32.mrf.mxu3  ;;  %5745 = vrcp.f32 %v1754_v16  ;;  %v1771_v44 = vand.u32 2147483648, %v1754_v16  ;;  %vm1765_vm1 = vweird.f32 %v1754_v16 }
 0x31a   :  { %5747 = vpow2.f32 %v5473_v60  ;;  %v1733_v50 = vadd.f32 %v1697_v39, %v6733_v13  ;;  %v1769_v13 = vand.u32 2147483647, %v1754_v16  ;;  %v1725_v60 = vpop.f32.mrf.mxu2 }
 0x31c   :  { %v5740_v7 = vpop.eup %5739  ;;  %v5472_v0 = vmul.f32 -1.442695, %v1733_v50  ;;  %vm1770_vm6 = vcmp.eq.f32.partialorder %v1769_v13, 8.507059e+37 }
 0x31d   :  { %v1755_v6 = vadd.f32 1.0, %v5740_v7  ;;  %v5742_v4 = vpop.eup %5741 }
 0x31e   :  { %v5744_v5 = vpop.eup %5743  ;;  %v7808_v59 = vadd.f32 1.0, %v5742_v4 }
 0x31f   :  { %5749 = vrcp.f32 %v1755_v6  ;;  %v5746_v57 = vpop.eup %5745  ;;  %v7806_v54 = vadd.f32 1.0, %v5744_v5  ;;  %v1772_v5 = vor.u32 1.1754944e-38, %v1771_v44  ;;  %v1784_v41 = vand.u32 2147483647, %v1755_v6 }
 0x320   :  { %5751 = vpow2.f32 %v5472_v0  ;;  %v5748_v30 = vpop.eup %5747  ;;  %v1761_v46 = vmul.f32 %v5746_v57, %v1754_v16  ;;  %vm1766_vm5 = vweird.f32 %v5746_v57  ;;  %v1735_v0 = vadd.f32 %v1725_v60, %v7365_v43 }
 0x321   :  { %5753 = vrcp.f32 %v7806_v54  ;;  %v7811_v40 = vadd.f32 1.0, %v5748_v30  ;;  %vm1767_vm8 = vmor %vm1765_vm1, %vm1766_vm5  ;;  %vm1780_vm12 = vweird.f32 %v1755_v6  ;;  %vm1785_vm2 = vcmp.eq.f32.partialorder %v1784_v41, 8.507059e+37 }
 0x322   :  { %v1762_v3 = vsub.f32 1.0, %v1761_v46  ;;  %5755 = vtanh.f32 %v1731_v9  ;;  %vm1810_vm11 = vweird.f32 %v7806_v54 }
 0x323   :  { %5757 = vrcp.f32 %v7808_v59 }
 0x324   :  { %v1763_v50 = vmul.f32 %v5746_v57, %v1762_v3  ;;  %5759 = vrcp.f32 %v7811_v40  ;;  %v1786_v3 = vand.u32 2147483648, %v1755_v6 }
 0x325   :  { %v5750_v39 = vpop.eup %5749 }
 0x326   :  { %v5752_v10 = vpop.eup %5751  ;;  %v1776_v20 = vmul.f32 %v5750_v39, %v1755_v6  ;;  %v1764_v7 = vadd.f32 %v5746_v57, %v1763_v50  ;;  %vm1781_vm7 = vweird.f32 %v5750_v39  ;;  %v1787_v44 = vor.u32 1.1754944e-38, %v1786_v3 }
 0x327   :  { %v1758_v4 = vadd.f32 1.0, %v5752_v10  ;;  %v5754_v9 = vpop.eup %5753  ;;  %vm1782_vm4 = vmor %vm1780_vm12, %vm1781_vm7  ;;  %vm1840_vm7 = vweird.f32 %v7811_v40 }
 0x328   :  { %v1777_v46 = vsub.f32 1.0, %v1776_v20  ;;  %v1768_v30 = vsel %vm1767_vm8, %v5746_v57, %v1764_v7  ;;  %v5756_v17 = vpop.eup %5755  ;;  %v1806_v16 = vmul.f32 %v5754_v9, %v7806_v54  ;;  %v1816_v57 = vand.u32 2147483648, %v7806_v54 }
 0x329   :  { %5761 = vrcp.f32 %v1758_v4  ;;  %v1773_v51 = vsel %vm1770_vm6, %v1772_v5, %v1768_v30  ;;  %v7817_v43 = vpop.eup %5757  ;;  %vm1811_vm13 = vweird.f32 %v5754_v9  ;;  %v1814_v5 = vand.u32 2147483647, %v7806_v54 }
 0x32a   :  { %v1778_v24 = vmul.f32 %v5750_v39, %v1777_v46  ;;  %v1854_v50 = vmul.f32 %v5756_v17, %v1773_v51  ;;  %v1807_v13 = vsub.f32 1.0, %v1806_v16  ;;  %5763 = vtanh.f32 %v1735_v0  ;;  %v7820_v10 = vpop.eup %5759  ;;  %vm1812_vm10 = vmor %vm1810_vm11, %vm1811_vm13 }
 0x32b   :  { %v1791_v41 = vmul.f32 %v7817_v43, %v7808_v59  ;;  %v1836_v6 = vmul.f32 %v7820_v10, %v7811_v40  ;;  %v1817_v0 = vor.u32 1.1754944e-38, %v1816_v57  ;;  %vm1815_vm3 = vcmp.eq.f32.partialorder %v1814_v5, 8.507059e+37 }
 0x32c   :  { %v1779_v60 = vadd.f32 %v5750_v39, %v1778_v24  ;;  %v1808_v7 = vmul.f32 %v5754_v9, %v1807_v13  ;;  %v1829_v54 = vand.u32 2147483647, %v1758_v4  ;;  %vm1825_vm14 = vweird.f32 %v1758_v4 }
 0x32d   :  { %v1837_v58 = vsub.f32 1.0, %v1836_v6  ;;  %vm1796_vm5 = vweird.f32 %v7817_v43  ;;  %vm1841_vm1 = vweird.f32 %v7820_v10  ;;  %vm1795_vm8 = vweird.f32 %v7808_v59 }
 0x32e   :  { %v1783_v20 = vsel %vm1782_vm4, %v5750_v39, %v1779_v60  ;;  %v1809_v30 = vadd.f32 %v5754_v9, %v1808_v7  ;;  %vm1830_vm9 = vcmp.eq.f32.partialorder %v1829_v54, 8.507059e+37  ;;  %vm1797_vm6 = vmor %vm1795_vm8, %vm1796_vm5 }
 0x32f   :  { %v5762_v46 = vpop.eup %5761  ;;  %v1788_v51 = vsel %vm1785_vm2, %v1787_v44, %v1783_v20  ;;  %v1831_v44 = vand.u32 2147483648, %v1758_v4  ;;  %vm1842_vm12 = vmor %vm1840_vm7, %vm1841_vm1 }
 0x330   :  { %v1852_v17 = vmul.f32 0.0, %v1788_v51  ;;  %v1821_v24 = vmul.f32 %v5762_v46, %v1758_v4  ;;  %v1813_v3 = vsel %vm1812_vm10, %v5754_v9, %v1809_v30  ;;  %v5764_v60 = vpop.eup %5763  ;;  %vm1826_vm0 = vweird.f32 %v5762_v46 }
 0x331   :  { %v1818_v13 = vsel %vm1815_vm3, %v1817_v0, %v1813_v3  ;;  %v1792_v51 = vsub.f32 1.0, %v1791_v41  ;;  %vm1827_vm15 = vmor %vm1825_vm14, %vm1826_vm0  ;;  %v1832_v36 = vor.u32 1.1754944e-38, %v1831_v44  ;;  %v1838_v9 = vmul.f32 %v7820_v10, %v1837_v58 }
 0x332   :  { %v7828_v39 = vadd.f32 %v1854_v50, %v1852_v17  ;;  %v1822_v16 = vsub.f32 1.0, %v1821_v24  ;;  %v1855_v20 = vmul.f32 %v5764_v60, %v1818_v13  ;;  %v1846_v58 = vand.u32 2147483648, %v7811_v40 }
 0x333   :  { %v1793_v50 = vmul.f32 %v7817_v43, %v1792_v51  ;;  %v1839_v4 = vadd.f32 %v7820_v10, %v1838_v9  ;;  %v9326_v51 = vld [vmem:[#allocation18_spill] sm:$0xff] }
 0x334   :  { %v1823_v7 = vmul.f32 %v5762_v46, %v1822_v16  ;;  %5765 = vtanh.f32 %v7828_v39  ;;  %v1847_v0 = vor.u32 1.1754944e-38, %v1846_v58 }
 0x335   :  { %v1794_v30 = vadd.f32 %v7817_v43, %v1793_v50  ;;  %v1843_v24 = vsel %vm1842_vm12, %v7820_v10, %v1839_v4 }
 0x336   :  { %v1824_v62 = vadd.f32 %v5762_v46, %v1823_v7 }
 0x338   :  { %v1828_v33 = vsel %vm1827_vm15, %v5762_v46, %v1824_v62  ;;  %v1801_v62 = vand.u32 2147483648, %v7808_v59  ;;  %v1798_v46 = vsel %vm1797_vm6, %v7817_v43, %v1794_v30 }
 0x339   :  { %v1833_v57 = vsel %vm1830_vm9, %v1832_v36, %v1828_v33  ;;  %v1799_v33 = vand.u32 2147483647, %v7808_v59  ;;  %v1844_v36 = vand.u32 2147483647, %v7811_v40 }
 0x33a   :  { %v1853_v5 = vmul.f32 0.0, %v1833_v57  ;;  %v5766_v41 = vpop.eup %5765  ;;  %v1802_v6 = vor.u32 1.1754944e-38, %v1801_v62  ;;  %v9328_v62 = vld [vmem:[#allocation81_spill] sm:$0xff] }
 0x33b   :  { %vm1800_vm4 = vcmp.eq.f32.partialorder %v1799_v33, 8.507059e+37  ;;  %vm1845_vm2 = vcmp.eq.f32.partialorder %v1844_v36, 8.507059e+37 }
 0x33c   :  { %v7833_v17 = vadd.f32 %v1855_v20, %v1853_v5  ;;  %v1803_v16 = vsel %vm1800_vm4, %v1802_v6, %v1798_v46  ;;  %v1848_v60 = vsel %vm1845_vm2, %v1847_v0, %v1843_v24  ;;  %v9327_v5 = vld [vmem:[#allocation19_spill] sm:$0xff]  ;;  %v9329_v6 = vld [vmem:[#allocation20_spill] sm:$0xff] }
 0x33d   :  { %v1860_v13 = vmul.f32 %v5766_v41, %v1803_v16 }
 0x33e   :  { %5767 = vtanh.f32 %v7833_v17 }
 0x344   :  { %v5768_v3 = vpop.eup %5767 }
 0x345   :  { %v1861_v44 = vmul.f32 %v5768_v3, %v1848_v60 }
 0x347   :  { %v1862_v59 = vpack.c.bf16 %v1861_v44, %v1860_v13 }
 0x349   :  { %1871 = vmatmul.bf16.vlgmr.msrb.gmra.mxu1 %v1862_v59  ;;  %1885 = vmatmul.bf16.vlgmr.msrb.gmra.mxu3 %v1862_v59 }
 0x34a   :  { %1899 = vmatmul.bf16.vlgmr.msrb.gmra.mxu0 %v1862_v59  ;;  %1913 = vmatmul.bf16.vlgmr.msrb.gmra.mxu2 %v1862_v59  ;;  %v9330_v59 = vld [vmem:[#allocation79_spill] sm:$0xff] }
 0x34b   :  { %2245 = vmatpush.bf16.msrb.mxu1 %v6944_v8  ;;  %2259 = vmatpush.bf16.msrb.mxu3 %v6929_v34 }
 0x34c   :  { %2273 = vmatpush.bf16.msrb.mxu0 %v6982_v27  ;;  %2287 = vmatpush.bf16.msrb.mxu2 %v6996_v35 }
 0x34f   :  { %2246 = vmatpush.bf16.msrb.mxu1 %v7036_v52  ;;  %2260 = vmatpush.bf16.msrb.mxu3 %v7021_v32 }
 0x350   :  { %2274 = vmatpush.bf16.msrb.mxu0 %v7062_v49  ;;  %2288 = vmatpush.bf16.msrb.mxu2 %v7076_v47 }
 0x353   :  { %2247 = vmatpush.bf16.msrb.mxu1 %v7116_v22  ;;  %2261 = vmatpush.bf16.msrb.mxu3 %v7101_v12 }
 0x354   :  { %2275 = vmatpush.bf16.msrb.mxu0 %v7142_v38  ;;  %2289 = vmatpush.bf16.msrb.mxu2 %v7156_v63 }
 0x357   :  { %2248 = vmatpush.bf16.msrb.mxu1 %v7196_v11  ;;  %2262 = vmatpush.bf16.msrb.mxu3 %v7181_v1 }
 0x358   :  { %2276 = vmatpush.bf16.msrb.mxu0 %v7222_v2  ;;  %2290 = vmatpush.bf16.msrb.mxu2 %v7236_v18 }
 0x35b   :  { %2249 = vmatpush.bf16.msrb.mxu1 %v7276_v31  ;;  %2263 = vmatpush.bf16.msrb.mxu3 %v7261_v19 }
 0x35c   :  { %2277 = vmatpush.bf16.msrb.mxu0 %v7302_v45  ;;  %2291 = vmatpush.bf16.msrb.mxu2 %v7316_v42 }
 0x35f   :  { %2250 = vmatpush.bf16.msrb.mxu1 %v7360_v53  ;;  %2264 = vmatpush.bf16.msrb.mxu3 %v7346_v29 }
 0x360   :  { %2278 = vmatpush.bf16.msrb.mxu0 %v7389_v14  ;;  %2292 = vmatpush.bf16.msrb.mxu2 %v7400_v25 }
 0x363   :  { %2251 = vmatpush.bf16.msrb.mxu1 %v7440_v26  ;;  %2265 = vmatpush.bf16.msrb.mxu3 %v7426_v48 }
 0x364   :  { %2279 = vmatpush.bf16.msrb.mxu0 %v7469_v56  ;;  %2293 = vmatpush.bf16.msrb.mxu2 %v7480_v28 }
 0x367   :  { %2252 = vmatpush.bf16.msrb.mxu1 %v7521_v61  ;;  %2266 = vmatpush.bf16.msrb.mxu3 %v7506_v55 }
 0x368   :  { %2280 = vmatpush.bf16.msrb.mxu0 %v7557_v15  ;;  %2294 = vmatpush.bf16.msrb.mxu2 %v7573_v23 }
 0x3c6   :  { %v1872_v40 = vpop.f32.mrf.mxu1 }
 0x3c7   :  { %v1919_v43 = vadd.f32 %v1872_v40, %v6741_v21  ;;  %v1900_v10 = vpop.f32.mrf.mxu0 }
 0x3c8   :  { %v1921_v54 = vadd.f32 %v1900_v10, %v7391_v37 }
 0x3c9   :  { %v5474_v20 = vmul.f32 -1.442695, %v1919_v43 }
 0x3ca   :  { %v5476_v36 = vmul.f32 -1.442695, %v1921_v54 }
 0x3cb   :  { %5769 = vpow2.f32 %v5474_v20 }
 0x3cc   :  { %v1886_v7 = vpop.f32.mrf.mxu3 }
 0x3cd   :  { %v1920_v50 = vadd.f32 %v1886_v7, %v9326_v51  ;;  %v1914_v37 = vpop.f32.mrf.mxu2 }
 0x3ce   :  { %v1874_v9 = vpop.f32.mrf.mxu1  ;;  %v1922_v40 = vadd.f32 %v1914_v37, %v9330_v59 }
 0x3cf   :  { %v5475_v57 = vmul.f32 -1.442695, %v1920_v50  ;;  %v1923_v30 = vadd.f32 %v1874_v9, %v9327_v5  ;;  %v1902_v4 = vpop.f32.mrf.mxu0 }
 0x3d0   :  { %v1925_v58 = vadd.f32 %v1902_v4, %v9328_v62 }
 0x3d1   :  { %v5770_v33 = vpop.eup %5769  ;;  %5771 = vpow2.f32 %v5475_v57  ;;  %v5477_v46 = vmul.f32 -1.442695, %v1923_v30 }
 0x3d2   :  { %v1945_v21 = vadd.f32 1.0, %v5770_v33  ;;  %v5479_v24 = vmul.f32 -1.442695, %v1925_v58 }
 0x3d3   :  { %5773 = vpow2.f32 %v5477_v46 }
 0x3d4   :  { %5775 = vrcp.f32 %v1945_v21  ;;  %v1888_v41 = vpop.f32.mrf.mxu3  ;;  %v1960_v50 = vand.u32 2147483647, %v1945_v21  ;;  %v1962_v9 = vand.u32 2147483648, %v1945_v21  ;;  %vm1956_vm11 = vweird.f32 %v1945_v21 }
 0x3d5   :  { %5777 = vpow2.f32 %v5476_v36  ;;  %v1924_v0 = vadd.f32 %v1888_v41, %v9329_v6  ;;  %v1916_v4 = vpop.f32.mrf.mxu2  ;;  %v9331_v6 = vld [vmem:[#allocation80_spill] sm:$0xff] }
 0x3d6   :  { %5779 = vpow2.f32 %v5479_v24  ;;  %vm1961_vm3 = vcmp.eq.f32.partialorder %v1960_v50, 8.507059e+37  ;;  %v1963_v36 = vor.u32 1.1754944e-38, %v1962_v9 }
 0x3d7   :  { %v5772_v3 = vpop.eup %5771  ;;  %v5478_v60 = vmul.f32 -1.442695, %v1924_v0  ;;  %v1926_v0 = vadd.f32 %v1916_v4, %v9331_v6 }
 0x3d8   :  { %v1946_v16 = vadd.f32 1.0, %v5772_v3 }
 0x3d9   :  { %v5774_v13 = vpop.eup %5773 }
 0x3da   :  { %v5776_v44 = vpop.eup %5775  ;;  %5781 = vrcp.f32 %v1946_v16  ;;  %v7887_v20 = vadd.f32 1.0, %v5774_v13  ;;  %vm1971_vm14 = vweird.f32 %v1946_v16 }
 0x3db   :  { %v5778_v43 = vpop.eup %5777  ;;  %v1952_v10 = vmul.f32 %v5776_v44, %v1945_v21  ;;  %5783 = vpow2.f32 %v5478_v60  ;;  %vm1957_vm13 = vweird.f32 %v5776_v44  ;;  %v1977_v60 = vand.u32 2147483648, %v1946_v16 }
 0x3dc   :  { %v5780_v7 = vpop.eup %5779  ;;  %5785 = vrcp.f32 %v7887_v20  ;;  %v7890_v51 = vadd.f32 1.0, %v5778_v43  ;;  %vm1958_vm10 = vmor %vm1956_vm11, %vm1957_vm13  ;;  %vm2001_vm1 = vweird.f32 %v7887_v20 }
 0x3dd   :  { %v1953_v54 = vsub.f32 1.0, %v1952_v10  ;;  %5787 = vtanh.f32 %v1922_v40  ;;  %v7892_v5 = vadd.f32 1.0, %v5780_v7  ;;  %v1975_v40 = vand.u32 2147483647, %v1946_v16 }
 0x3de   :  { %5789 = vrcp.f32 %v7890_v51  ;;  %v1978_v50 = vor.u32 1.1754944e-38, %v1977_v60 }
 0x3df   :  { %v1954_v57 = vmul.f32 %v5776_v44, %v1953_v54  ;;  %5791 = vrcp.f32 %v7892_v5  ;;  %v2007_v54 = vand.u32 2147483648, %v7887_v20  ;;  %vm1976_vm5 = vcmp.eq.f32.partialorder %v1975_v40, 8.507059e+37 }
 0x3e0   :  { %v5782_v30 = vpop.eup %5781 }
 0x3e1   :  { %v5784_v62 = vpop.eup %5783  ;;  %v1967_v58 = vmul.f32 %v5782_v30, %v1946_v16  ;;  %v1955_v33 = vadd.f32 %v5776_v44, %v1954_v57  ;;  %vm1972_vm0 = vweird.f32 %v5782_v30  ;;  %v2005_v57 = vand.u32 2147483647, %v7887_v20 }
 0x3e2   :  { %v1949_v46 = vadd.f32 1.0, %v5784_v62  ;;  %v5786_v24 = vpop.eup %5785  ;;  %vm1973_vm15 = vmor %vm1971_vm14, %vm1972_vm0  ;;  %vm2031_vm0 = vweird.f32 %v7892_v5 }
 0x3e3   :  { %v1968_v41 = vsub.f32 1.0, %v1967_v58  ;;  %v1959_v37 = vsel %vm1958_vm10, %v5776_v44, %v1955_v33  ;;  %v5788_v3 = vpop.eup %5787  ;;  %v1997_v59 = vmul.f32 %v5786_v24, %v7887_v20  ;;  %vm2002_vm9 = vweird.f32 %v5786_v24 }
 0x3e4   :  { %v1964_v13 = vsel %vm1961_vm3, %v1963_v36, %v1959_v37  ;;  %5793 = vrcp.f32 %v1949_v46  ;;  %v7899_v44 = vpop.eup %5789  ;;  %vm2003_vm8 = vmor %vm2001_vm1, %vm2002_vm9  ;;  %v2008_v37 = vor.u32 1.1754944e-38, %v2007_v54  ;;  %vm2006_vm6 = vcmp.eq.f32.partialorder %v2005_v57, 8.507059e+37 }
 0x3e5   :  { %v1969_v21 = vmul.f32 %v5782_v30, %v1968_v41  ;;  %v2045_v43 = vmul.f32 %v5788_v3, %v1964_v13  ;;  %v1998_v10 = vsub.f32 1.0, %v1997_v59  ;;  %5795 = vtanh.f32 %v1926_v0  ;;  %v5792_v4 = vpop.eup %5791 }
 0x3e6   :  { %v1982_v6 = vmul.f32 %v7899_v44, %v7890_v51  ;;  %v2027_v0 = vmul.f32 %v5792_v4, %v7892_v5  ;;  %vm2016_vm12 = vweird.f32 %v1949_v46  ;;  %vm1987_vm13 = vweird.f32 %v7899_v44 }
 0x3e7   :  { %v1970_v7 = vadd.f32 %v5782_v30, %v1969_v21  ;;  %v1999_v9 = vmul.f32 %v5786_v24, %v1998_v10  ;;  %v2022_v21 = vand.u32 2147483648, %v1949_v46  ;;  %vm2032_vm11 = vweird.f32 %v5792_v4 }
 0x3e8   :  { %v1983_v10 = vsub.f32 1.0, %v1982_v6  ;;  %vm1986_vm10 = vweird.f32 %v7890_v51  ;;  %vm2033_vm14 = vmor %vm2031_vm0, %vm2032_vm11 }
 0x3e9   :  { %v1974_v62 = vsel %vm1973_vm15, %v5782_v30, %v1970_v7  ;;  %v2000_v36 = vadd.f32 %v5786_v24, %v1999_v9  ;;  %v2028_v7 = vsub.f32 1.0, %v2027_v0  ;;  %vm1988_vm3 = vmor %vm1986_vm10, %vm1987_vm13 }
 0x3ea   :  { %v5794_v58 = vpop.eup %5793  ;;  %v1979_v33 = vsel %vm1976_vm5, %v1978_v50, %v1974_v62  ;;  %v2023_v50 = vor.u32 1.1754944e-38, %v2022_v21 }
 0x3eb   :  { %v2043_v16 = vmul.f32 %v1979_v33, %v7828_v39  ;;  %v2012_v41 = vmul.f32 %v5794_v58, %v1949_v46  ;;  %v2004_v3 = vsel %vm2003_vm8, %v5786_v24, %v2000_v36  ;;  %v5796_v60 = vpop.eup %5795  ;;  %vm2017_vm7 = vweird.f32 %v5794_v58 }
 0x3ec   :  { %v2009_v59 = vsel %vm2006_vm6, %v2008_v37, %v2004_v3  ;;  %v2020_v39 = vand.u32 2147483647, %v1949_v46  ;;  %vm2018_vm4 = vmor %vm2016_vm12, %vm2017_vm7  ;;  %v1984_v24 = vmul.f32 %v7899_v44, %v1983_v10  ;;  %v2029_v57 = vmul.f32 %v5792_v4, %v2028_v7 }
 0x3ed   :  { %v7907_v30 = vadd.f32 %v2045_v43, %v2043_v16  ;;  %v2013_v13 = vsub.f32 1.0, %v2012_v41  ;;  %v2046_v40 = vmul.f32 %v5796_v60, %v2009_v59  ;;  %v2037_v16 = vand.u32 2147483648, %v7892_v5 }
 0x3ee   :  { %vm2021_vm2 = vcmp.eq.f32.partialorder %v2020_v39, 8.507059e+37  ;;  %v1985_v36 = vadd.f32 %v7899_v44, %v1984_v24  ;;  %v2030_v46 = vadd.f32 %v5792_v4, %v2029_v57  ;;  %v2035_v41 = vand.u32 2147483647, %v7892_v5  ;;  %v9332_v5 = vld [vmem:[#allocation21_spill] sm:$0xff] }
 0x3ef   :  { %v2014_v20 = vmul.f32 %v5794_v58, %v2013_v13  ;;  %5797 = vtanh.f32 %v7907_v30  ;;  %v2038_v60 = vor.u32 1.1754944e-38, %v2037_v16 }
 0x3f0   :  { %v1989_v37 = vsel %vm1988_vm3, %v7899_v44, %v1985_v36  ;;  %v2034_v6 = vsel %vm2033_vm14, %v5792_v4, %v2030_v46  ;;  %vm2036_vm9 = vcmp.eq.f32.partialorder %v2035_v41, 8.507059e+37 }
 0x3f1   :  { %v2015_v54 = vadd.f32 %v5794_v58, %v2014_v20  ;;  %v2039_v21 = vsel %vm2036_vm9, %v2038_v60, %v2034_v6 }
 0x3f3   :  { %v2019_v9 = vsel %vm2018_vm4, %v5794_v58, %v2015_v54  ;;  %v1992_v58 = vand.u32 2147483648, %v7890_v51  ;;  %v9333_v54 = vld [vmem:[#allocation83_spill] sm:$0xff] }
 0x3f4   :  { %v2024_v43 = vsel %vm2021_vm2, %v2023_v50, %v2019_v9  ;;  %v9334_v9 = vld [vmem:[#allocation22_spill] sm:$0xff] }
 0x3f5   :  { %v2044_v62 = vmul.f32 %v2024_v43, %v7833_v17  ;;  %v1990_v17 = vand.u32 2147483647, %v7890_v51  ;;  %v5798_v0 = vpop.eup %5797  ;;  %v1993_v3 = vor.u32 1.1754944e-38, %v1992_v58  ;;  %v9336_v58 = vld [vmem:[#allocation85_spill] sm:$0xff] }
 0x3f7   :  { %v7913_v33 = vadd.f32 %v2046_v40, %v2044_v62  ;;  %vm1991_vm15 = vcmp.eq.f32.partialorder %v1990_v17, 8.507059e+37  ;;  %v9335_v62 = vld [vmem:[#allocation23_spill] sm:$0xff] }
 0x3f8   :  { %v1994_v59 = vsel %vm1991_vm15, %v1993_v3, %v1989_v37 }
 0x3f9   :  { %5799 = vtanh.f32 %v7913_v33  ;;  %v2051_v40 = vmul.f32 %v5798_v0, %v1994_v59 }
 0x3ff   :  { %v5800_v13 = vpop.eup %5799 }
 0x400   :  { %v2052_v20 = vmul.f32 %v5800_v13, %v2039_v21  ;;  %v9337_v13 = vld [vmem:[#allocation24_spill] sm:$0xff] }
 0x402   :  { %v2053_v39 = vpack.c.bf16 %v2052_v20, %v2051_v40 }
 0x404   :  { %2062 = vmatmul.bf16.vlgmr.msra.gmra.mxu1 %v2053_v39  ;;  %2076 = vmatmul.bf16.vlgmr.msra.gmra.mxu3 %v2053_v39 }
 0x405   :  { %2090 = vmatmul.bf16.vlgmr.msra.gmra.mxu0 %v2053_v39  ;;  %2104 = vmatmul.bf16.vlgmr.msra.gmra.mxu2 %v2053_v39 }
 0x406   :  { %2436 = vmatpush.bf16.msra.mxu1 %v6944_v8  ;;  %2450 = vmatpush.bf16.msra.mxu3 %v6929_v34 }
 0x407   :  { %2464 = vmatpush.bf16.msra.mxu0 %v6982_v27  ;;  %2478 = vmatpush.bf16.msra.mxu2 %v6996_v35 }
 0x40a   :  { %2437 = vmatpush.bf16.msra.mxu1 %v7036_v52  ;;  %2451 = vmatpush.bf16.msra.mxu3 %v7021_v32 }
 0x40b   :  { %2465 = vmatpush.bf16.msra.mxu0 %v7062_v49  ;;  %2479 = vmatpush.bf16.msra.mxu2 %v7076_v47 }
 0x40e   :  { %2438 = vmatpush.bf16.msra.mxu1 %v7116_v22  ;;  %2452 = vmatpush.bf16.msra.mxu3 %v7101_v12 }
 0x40f   :  { %2466 = vmatpush.bf16.msra.mxu0 %v7142_v38  ;;  %2480 = vmatpush.bf16.msra.mxu2 %v7156_v63 }
 0x412   :  { %2439 = vmatpush.bf16.msra.mxu1 %v7196_v11  ;;  %2453 = vmatpush.bf16.msra.mxu3 %v7181_v1 }
 0x413   :  { %2467 = vmatpush.bf16.msra.mxu0 %v7222_v2  ;;  %2481 = vmatpush.bf16.msra.mxu2 %v7236_v18 }
 0x416   :  { %2440 = vmatpush.bf16.msra.mxu1 %v7276_v31  ;;  %2454 = vmatpush.bf16.msra.mxu3 %v7261_v19 }
 0x417   :  { %2468 = vmatpush.bf16.msra.mxu0 %v7302_v45  ;;  %2482 = vmatpush.bf16.msra.mxu2 %v7316_v42 }
 0x41a   :  { %2441 = vmatpush.bf16.msra.mxu1 %v7360_v53  ;;  %2455 = vmatpush.bf16.msra.mxu3 %v7346_v29 }
 0x41b   :  { %2469 = vmatpush.bf16.msra.mxu0 %v7389_v14  ;;  %2483 = vmatpush.bf16.msra.mxu2 %v7400_v25 }
 0x41e   :  { %2442 = vmatpush.bf16.msra.mxu1 %v7440_v26  ;;  %2456 = vmatpush.bf16.msra.mxu3 %v7426_v48 }
 0x41f   :  { %2470 = vmatpush.bf16.msra.mxu0 %v7469_v56  ;;  %2484 = vmatpush.bf16.msra.mxu2 %v7480_v28 }
 0x422   :  { %2443 = vmatpush.bf16.msra.mxu1 %v7521_v61  ;;  %2457 = vmatpush.bf16.msra.mxu3 %v7506_v55 }
 0x423   :  { %2471 = vmatpush.bf16.msra.mxu0 %v7557_v15  ;;  %2485 = vmatpush.bf16.msra.mxu2 %v7573_v23 }
 0x481   :  { %v2063_v51 = vpop.f32.mrf.mxu1 }
 0x482   :  { %v2110_v44 = vadd.f32 %v2063_v51, %v9332_v5  ;;  %v2091_v4 = vpop.f32.mrf.mxu0  ;;  %v9338_v5 = vld [vmem:[#allocation82_spill] sm:$0xff] }
 0x483   :  { %v2112_v50 = vadd.f32 %v2091_v4, %v9333_v54 }
 0x484   :  { %v5480_v10 = vmul.f32 -1.442695, %v2110_v44 }
 0x485   :  { %v5482_v41 = vmul.f32 -1.442695, %v2112_v50 }
 0x486   :  { %5801 = vpow2.f32 %v5480_v10 }
 0x487   :  { %v2077_v7 = vpop.f32.mrf.mxu3 }
 0x488   :  { %v2111_v24 = vadd.f32 %v2077_v7, %v9334_v9  ;;  %v2105_v60 = vpop.f32.mrf.mxu2 }
 0x489   :  { %v2065_v57 = vpop.f32.mrf.mxu1  ;;  %v2113_v44 = vadd.f32 %v2105_v60, %v9338_v5 }
 0x48a   :  { %v5481_v43 = vmul.f32 -1.442695, %v2111_v24  ;;  %v2114_v36 = vadd.f32 %v2065_v57, %v9335_v62  ;;  %v2093_v46 = vpop.f32.mrf.mxu0 }
 0x48b   :  { %v2116_v16 = vadd.f32 %v2093_v46, %v9336_v58 }
 0x48c   :  { %v5802_v17 = vpop.eup %5801  ;;  %5803 = vpow2.f32 %v5481_v43  ;;  %v5483_v37 = vmul.f32 -1.442695, %v2114_v36 }
 0x48d   :  { %v2136_v6 = vadd.f32 1.0, %v5802_v17  ;;  %v5485_v0 = vmul.f32 -1.442695, %v2116_v16 }
 0x48e   :  { %5805 = vpow2.f32 %v5483_v37 }
 0x48f   :  { %5807 = vrcp.f32 %v2136_v6  ;;  %v2079_v3 = vpop.f32.mrf.mxu3  ;;  %v2151_v24 = vand.u32 2147483647, %v2136_v6  ;;  %v2153_v57 = vand.u32 2147483648, %v2136_v6  ;;  %vm2147_vm1 = vweird.f32 %v2136_v6 }
 0x490   :  { %5809 = vpow2.f32 %v5482_v41  ;;  %v2115_v59 = vadd.f32 %v2079_v3, %v9337_v13  ;;  %v2107_v46 = vpop.f32.mrf.mxu2  ;;  %v9339_v13 = vld [vmem:[#allocation84_spill] sm:$0xff] }
 0x491   :  { %5811 = vpow2.f32 %v5485_v0  ;;  %vm2152_vm6 = vcmp.eq.f32.partialorder %v2151_v24, 8.507059e+37  ;;  %v2154_v41 = vor.u32 1.1754944e-38, %v2153_v57 }
 0x492   :  { %v5804_v21 = vpop.eup %5803  ;;  %v5484_v20 = vmul.f32 -1.442695, %v2115_v59  ;;  %v2117_v59 = vadd.f32 %v2107_v46, %v9339_v13 }
 0x493   :  { %v2137_v40 = vadd.f32 1.0, %v5804_v21 }
 0x494   :  { %v5806_v39 = vpop.eup %5805 }
 0x495   :  { %v5808_v51 = vpop.eup %5807  ;;  %5813 = vrcp.f32 %v2137_v40  ;;  %v7963_v7 = vadd.f32 1.0, %v5806_v39  ;;  %vm2162_vm12 = vweird.f32 %v2137_v40 }
 0x496   :  { %v5810_v4 = vpop.eup %5809  ;;  %v2143_v10 = vmul.f32 %v5808_v51, %v2136_v6  ;;  %5815 = vpow2.f32 %v5484_v20  ;;  %vm2148_vm5 = vweird.f32 %v5808_v51  ;;  %v2168_v20 = vand.u32 2147483648, %v2137_v40 }
 0x497   :  { %v5812_v54 = vpop.eup %5811  ;;  %5817 = vrcp.f32 %v7963_v7  ;;  %v7966_v9 = vadd.f32 1.0, %v5810_v4  ;;  %vm2149_vm8 = vmor %vm2147_vm1, %vm2148_vm5  ;;  %vm2192_vm11 = vweird.f32 %v7963_v7 }
 0x498   :  { %v2144_v50 = vsub.f32 1.0, %v2143_v10  ;;  %5819 = vtanh.f32 %v2113_v44  ;;  %v7968_v62 = vadd.f32 1.0, %v5812_v54  ;;  %v2166_v44 = vand.u32 2147483647, %v2137_v40 }
 0x499   :  { %5821 = vrcp.f32 %v7966_v9  ;;  %v2169_v24 = vor.u32 1.1754944e-38, %v2168_v20 }
 0x49a   :  { %v2145_v43 = vmul.f32 %v5808_v51, %v2144_v50  ;;  %5823 = vrcp.f32 %v7968_v62  ;;  %v2198_v50 = vand.u32 2147483648, %v7963_v7  ;;  %vm2167_vm13 = vcmp.eq.f32.partialorder %v2166_v44, 8.507059e+37 }
 0x49b   :  { %v5814_v36 = vpop.eup %5813 }
 0x49c   :  { %v5816_v58 = vpop.eup %5815  ;;  %v2158_v16 = vmul.f32 %v5814_v36, %v2137_v40  ;;  %v2146_v17 = vadd.f32 %v5808_v51, %v2145_v43  ;;  %vm2163_vm7 = vweird.f32 %v5814_v36  ;;  %v2196_v43 = vand.u32 2147483647, %v7963_v7 }
 0x49d   :  { %v2140_v37 = vadd.f32 1.0, %v5816_v58  ;;  %v5818_v0 = vpop.eup %5817  ;;  %vm2164_vm4 = vmor %vm2162_vm12, %vm2163_vm7  ;;  %vm2222_vm7 = vweird.f32 %v7968_v62 }
 0x49e   :  { %v2159_v3 = vsub.f32 1.0, %v2158_v16  ;;  %v2150_v60 = vsel %vm2149_vm8, %v5808_v51, %v2146_v17  ;;  %v5820_v21 = vpop.eup %5819  ;;  %v2188_v5 = vmul.f32 %v5818_v0, %v7963_v7  ;;  %vm2193_vm2 = vweird.f32 %v5818_v0 }
 0x49f   :  { %v2155_v39 = vsel %vm2152_vm6, %v2154_v41, %v2150_v60  ;;  %5825 = vrcp.f32 %v2140_v37  ;;  %v7975_v51 = vpop.eup %5821  ;;  %vm2194_vm10 = vmor %vm2192_vm11, %vm2193_vm2  ;;  %v2199_v60 = vor.u32 1.1754944e-38, %v2198_v50  ;;  %vm2197_vm3 = vcmp.eq.f32.partialorder %v2196_v43, 8.507059e+37 }
 0x4a0   :  { %v2160_v6 = vmul.f32 %v5814_v36, %v2159_v3  ;;  %v2236_v4 = vmul.f32 %v5820_v21, %v2155_v39  ;;  %v2189_v10 = vsub.f32 1.0, %v2188_v5  ;;  %5827 = vtanh.f32 %v2117_v59  ;;  %v5824_v46 = vpop.eup %5823 }
 0x4a1   :  { %v2173_v13 = vmul.f32 %v7975_v51, %v7966_v9  ;;  %v2218_v59 = vmul.f32 %v5824_v46, %v7968_v62  ;;  %vm2207_vm14 = vweird.f32 %v2140_v37  ;;  %vm2178_vm5 = vweird.f32 %v7975_v51 }
 0x4a2   :  { %v2161_v54 = vadd.f32 %v5814_v36, %v2160_v6  ;;  %v2190_v57 = vmul.f32 %v5818_v0, %v2189_v10  ;;  %v2213_v6 = vand.u32 2147483648, %v2140_v37  ;;  %vm2223_vm1 = vweird.f32 %v5824_v46 }
 0x4a3   :  { %v2174_v10 = vsub.f32 1.0, %v2173_v13  ;;  %vm2177_vm8 = vweird.f32 %v7966_v9  ;;  %vm2224_vm12 = vmor %vm2222_vm7, %vm2223_vm1 }
 0x4a4   :  { %v2165_v58 = vsel %vm2164_vm4, %v5814_v36, %v2161_v54  ;;  %v2191_v41 = vadd.f32 %v5818_v0, %v2190_v57  ;;  %v2219_v54 = vsub.f32 1.0, %v2218_v59  ;;  %vm2179_vm6 = vmor %vm2177_vm8, %vm2178_vm5 }
 0x4a5   :  { %v5826_v16 = vpop.eup %5825  ;;  %v2170_v17 = vsel %vm2167_vm13, %v2169_v24, %v2165_v58  ;;  %v2214_v24 = vor.u32 1.1754944e-38, %v2213_v6 }
 0x4a6   :  { %v2234_v40 = vmul.f32 %v2170_v17, %v7907_v30  ;;  %v2203_v3 = vmul.f32 %v5826_v16, %v2140_v37  ;;  %v2195_v21 = vsel %vm2194_vm10, %v5818_v0, %v2191_v41  ;;  %v5828_v20 = vpop.eup %5827  ;;  %vm2208_vm0 = vweird.f32 %v5826_v16 }
 0x4a7   :  { %v2200_v5 = vsel %vm2197_vm3, %v2199_v60, %v2195_v21  ;;  %v2211_v30 = vand.u32 2147483647, %v2140_v37  ;;  %vm2209_vm15 = vmor %vm2207_vm14, %vm2208_vm0  ;;  %v2175_v0 = vmul.f32 %v7975_v51, %v2174_v10  ;;  %v2220_v43 = vmul.f32 %v5824_v46, %v2219_v54 }
 0x4a8   :  { %v7983_v36 = vadd.f32 %v2236_v4, %v2234_v40  ;;  %v2204_v39 = vsub.f32 1.0, %v2203_v3  ;;  %v2237_v44 = vmul.f32 %v5828_v20, %v2200_v5  ;;  %v2228_v40 = vand.u32 2147483648, %v7968_v62 }
 0x4a9   :  { %vm2212_vm9 = vcmp.eq.f32.partialorder %v2211_v30, 8.507059e+37  ;;  %v2176_v41 = vadd.f32 %v7975_v51, %v2175_v0  ;;  %v2221_v37 = vadd.f32 %v5824_v46, %v2220_v43  ;;  %v2226_v3 = vand.u32 2147483647, %v7968_v62  ;;  %v9340_v62 = vld [vmem:[#allocation25_spill] sm:$0xff] }
 0x4aa   :  { %v2205_v7 = vmul.f32 %v5826_v16, %v2204_v39  ;;  %5829 = vtanh.f32 %v7983_v36  ;;  %v2229_v20 = vor.u32 1.1754944e-38, %v2228_v40 }
 0x4ab   :  { %v2180_v60 = vsel %vm2179_vm6, %v7975_v51, %v2176_v41  ;;  %v2225_v13 = vsel %vm2224_vm12, %v5824_v46, %v2221_v37  ;;  %vm2227_vm2 = vcmp.eq.f32.partialorder %v2226_v3, 8.507059e+37 }
 0x4ac   :  { %v2206_v50 = vadd.f32 %v5826_v16, %v2205_v7  ;;  %v2230_v6 = vsel %vm2227_vm2, %v2229_v20, %v2225_v13 }
 0x4ae   :  { %v2210_v57 = vsel %vm2209_vm15, %v5826_v16, %v2206_v50  ;;  %v2183_v16 = vand.u32 2147483648, %v7966_v9  ;;  %v9341_v50 = vld [vmem:[#allocation87_spill] sm:$0xff] }
 0x4af   :  { %v2215_v4 = vsel %vm2212_vm9, %v2214_v24, %v2210_v57  ;;  %v9342_v57 = vld [vmem:[#allocation26_spill] sm:$0xff] }
 0x4b0   :  { %v2235_v58 = vmul.f32 %v2215_v4, %v7913_v33  ;;  %v2181_v33 = vand.u32 2147483647, %v7966_v9  ;;  %v5830_v59 = vpop.eup %5829  ;;  %v2184_v21 = vor.u32 1.1754944e-38, %v2183_v16  ;;  %v9344_v16 = vld [vmem:[#allocation89_spill] sm:$0xff] }
 0x4b2   :  { %v7989_v17 = vadd.f32 %v2237_v44, %v2235_v58  ;;  %vm2182_vm4 = vcmp.eq.f32.partialorder %v2181_v33, 8.507059e+37  ;;  %v9343_v58 = vld [vmem:[#allocation27_spill] sm:$0xff] }
 0x4b3   :  { %v2185_v5 = vsel %vm2182_vm4, %v2184_v21, %v2180_v60 }
 0x4b4   :  { %5831 = vtanh.f32 %v7989_v17  ;;  %v2242_v44 = vmul.f32 %v5830_v59, %v2185_v5 }
 0x4ba   :  { %v5832_v39 = vpop.eup %5831 }
 0x4bb   :  { %v2243_v7 = vmul.f32 %v5832_v39, %v2230_v6  ;;  %v9345_v39 = vld [vmem:[#allocation28_spill] sm:$0xff] }
 0x4bd   :  { %v2244_v30 = vpack.c.bf16 %v2243_v7, %v2242_v44 }
 0x4bf   :  { %2253 = vmatmul.bf16.vlgmr.msrb.gmra.mxu1 %v2244_v30  ;;  %2267 = vmatmul.bf16.vlgmr.msrb.gmra.mxu3 %v2244_v30 }
 0x4c0   :  { %2281 = vmatmul.bf16.vlgmr.msrb.gmra.mxu0 %v2244_v30  ;;  %2295 = vmatmul.bf16.vlgmr.msrb.gmra.mxu2 %v2244_v30 }
 0x4c1   :  { %2627 = vmatpush.bf16.msrb.mxu1 %v6944_v8  ;;  %2641 = vmatpush.bf16.msrb.mxu3 %v6929_v34 }
 0x4c2   :  { %2655 = vmatpush.bf16.msrb.mxu0 %v6982_v27  ;;  %2669 = vmatpush.bf16.msrb.mxu2 %v6996_v35 }
 0x4c5   :  { %2628 = vmatpush.bf16.msrb.mxu1 %v7036_v52  ;;  %2642 = vmatpush.bf16.msrb.mxu3 %v7021_v32 }
 0x4c6   :  { %2656 = vmatpush.bf16.msrb.mxu0 %v7062_v49  ;;  %2670 = vmatpush.bf16.msrb.mxu2 %v7076_v47 }
 0x4c9   :  { %2629 = vmatpush.bf16.msrb.mxu1 %v7116_v22  ;;  %2643 = vmatpush.bf16.msrb.mxu3 %v7101_v12 }
 0x4ca   :  { %2657 = vmatpush.bf16.msrb.mxu0 %v7142_v38  ;;  %2671 = vmatpush.bf16.msrb.mxu2 %v7156_v63 }
 0x4cd   :  { %2630 = vmatpush.bf16.msrb.mxu1 %v7196_v11  ;;  %2644 = vmatpush.bf16.msrb.mxu3 %v7181_v1 }
 0x4ce   :  { %2658 = vmatpush.bf16.msrb.mxu0 %v7222_v2  ;;  %2672 = vmatpush.bf16.msrb.mxu2 %v7236_v18 }
 0x4d1   :  { %2631 = vmatpush.bf16.msrb.mxu1 %v7276_v31  ;;  %2645 = vmatpush.bf16.msrb.mxu3 %v7261_v19 }
 0x4d2   :  { %2659 = vmatpush.bf16.msrb.mxu0 %v7302_v45  ;;  %2673 = vmatpush.bf16.msrb.mxu2 %v7316_v42 }
 0x4d5   :  { %2632 = vmatpush.bf16.msrb.mxu1 %v7360_v53  ;;  %2646 = vmatpush.bf16.msrb.mxu3 %v7346_v29 }
 0x4d6   :  { %2660 = vmatpush.bf16.msrb.mxu0 %v7389_v14  ;;  %2674 = vmatpush.bf16.msrb.mxu2 %v7400_v25 }
 0x4d9   :  { %2633 = vmatpush.bf16.msrb.mxu1 %v7440_v26  ;;  %2647 = vmatpush.bf16.msrb.mxu3 %v7426_v48 }
 0x4da   :  { %2661 = vmatpush.bf16.msrb.mxu0 %v7469_v56  ;;  %2675 = vmatpush.bf16.msrb.mxu2 %v7480_v28 }
 0x4dd   :  { %2634 = vmatpush.bf16.msrb.mxu1 %v7521_v61  ;;  %2648 = vmatpush.bf16.msrb.mxu3 %v7506_v55 }
 0x4de   :  { %2662 = vmatpush.bf16.msrb.mxu0 %v7557_v15  ;;  %2676 = vmatpush.bf16.msrb.mxu2 %v7573_v23 }
 0x53c   :  { %v2254_v9 = vpop.f32.mrf.mxu1 }
 0x53d   :  { %v2301_v51 = vadd.f32 %v2254_v9, %v9340_v62  ;;  %v2282_v46 = vpop.f32.mrf.mxu0  ;;  %v9346_v62 = vld [vmem:[#allocation86_spill] sm:$0xff] }
 0x53e   :  { %v2303_v24 = vadd.f32 %v2282_v46, %v9341_v50 }
 0x53f   :  { %v5486_v10 = vmul.f32 -1.442695, %v2301_v51 }
 0x540   :  { %v5488_v3 = vmul.f32 -1.442695, %v2303_v24 }
 0x541   :  { %5833 = vpow2.f32 %v5486_v10 }
 0x542   :  { %v2268_v54 = vpop.f32.mrf.mxu3 }
 0x543   :  { %v2302_v0 = vadd.f32 %v2268_v54, %v9342_v57  ;;  %v2296_v20 = vpop.f32.mrf.mxu2 }
 0x544   :  { %v2256_v43 = vpop.f32.mrf.mxu1  ;;  %v2304_v51 = vadd.f32 %v2296_v20, %v9346_v62 }
 0x545   :  { %v5487_v4 = vmul.f32 -1.442695, %v2302_v0  ;;  %v2305_v41 = vadd.f32 %v2256_v43, %v9343_v58  ;;  %v2284_v37 = vpop.f32.mrf.mxu0 }
 0x546   :  { %v2307_v40 = vadd.f32 %v2284_v37, %v9344_v16 }
 0x547   :  { %v5834_v33 = vpop.eup %5833  ;;  %5835 = vpow2.f32 %v5487_v4  ;;  %v5489_v60 = vmul.f32 -1.442695, %v2305_v41 }
 0x548   :  { %v2327_v13 = vadd.f32 1.0, %v5834_v33  ;;  %v5491_v59 = vmul.f32 -1.442695, %v2307_v40 }
 0x549   :  { %5837 = vpow2.f32 %v5489_v60 }
 0x54a   :  { %5839 = vrcp.f32 %v2327_v13  ;;  %v2270_v21 = vpop.f32.mrf.mxu3  ;;  %v2342_v0 = vand.u32 2147483647, %v2327_v13  ;;  %v2344_v43 = vand.u32 2147483648, %v2327_v13  ;;  %vm2338_vm11 = vweird.f32 %v2327_v13 }
 0x54b   :  { %5841 = vpow2.f32 %v5488_v3  ;;  %v2306_v5 = vadd.f32 %v2270_v21, %v9345_v39  ;;  %v2298_v37 = vpop.f32.mrf.mxu2  ;;  %v9347_v39 = vld [vmem:[#allocation88_spill] sm:$0xff] }
 0x54c   :  { %5843 = vpow2.f32 %v5491_v59  ;;  %vm2343_vm3 = vcmp.eq.f32.partialorder %v2342_v0, 8.507059e+37  ;;  %v2345_v3 = vor.u32 1.1754944e-38, %v2344_v43 }
 0x54d   :  { %v5836_v6 = vpop.eup %5835  ;;  %v5490_v7 = vmul.f32 -1.442695, %v2306_v5  ;;  %v2308_v5 = vadd.f32 %v2298_v37, %v9347_v39 }
 0x54e   :  { %v2328_v44 = vadd.f32 1.0, %v5836_v6 }
 0x54f   :  { %v5838_v30 = vpop.eup %5837 }
 0x550   :  { %v5840_v9 = vpop.eup %5839  ;;  %5845 = vrcp.f32 %v2328_v44  ;;  %v8039_v54 = vadd.f32 1.0, %v5838_v30  ;;  %vm2353_vm14 = vweird.f32 %v2328_v44 }
 0x551   :  { %v5842_v46 = vpop.eup %5841  ;;  %v2334_v10 = vmul.f32 %v5840_v9, %v2327_v13  ;;  %5847 = vpow2.f32 %v5490_v7  ;;  %vm2339_vm13 = vweird.f32 %v5840_v9  ;;  %v2359_v7 = vand.u32 2147483648, %v2328_v44 }
 0x552   :  { %v5844_v50 = vpop.eup %5843  ;;  %5849 = vrcp.f32 %v8039_v54  ;;  %v8042_v57 = vadd.f32 1.0, %v5842_v46  ;;  %vm2340_vm10 = vmor %vm2338_vm11, %vm2339_vm13  ;;  %vm2383_vm1 = vweird.f32 %v8039_v54 }
 0x553   :  { %v2335_v24 = vsub.f32 1.0, %v2334_v10  ;;  %5851 = vtanh.f32 %v2304_v51  ;;  %v8044_v58 = vadd.f32 1.0, %v5844_v50  ;;  %v2357_v51 = vand.u32 2147483647, %v2328_v44 }
 0x554   :  { %5853 = vrcp.f32 %v8042_v57  ;;  %v2360_v0 = vor.u32 1.1754944e-38, %v2359_v7 }
 0x555   :  { %v2336_v4 = vmul.f32 %v5840_v9, %v2335_v24  ;;  %5855 = vrcp.f32 %v8044_v58  ;;  %v2389_v24 = vand.u32 2147483648, %v8039_v54  ;;  %vm2358_vm5 = vcmp.eq.f32.partialorder %v2357_v51, 8.507059e+37 }
 0x556   :  { %v5846_v41 = vpop.eup %5845 }
 0x557   :  { %v5848_v16 = vpop.eup %5847  ;;  %v2349_v40 = vmul.f32 %v5846_v41, %v2328_v44  ;;  %v2337_v33 = vadd.f32 %v5840_v9, %v2336_v4  ;;  %vm2354_vm0 = vweird.f32 %v5846_v41  ;;  %v2387_v4 = vand.u32 2147483647, %v8039_v54 }
 0x558   :  { %v2331_v60 = vadd.f32 1.0, %v5848_v16  ;;  %v5850_v59 = vpop.eup %5849  ;;  %vm2355_vm15 = vmor %vm2353_vm14, %vm2354_vm0  ;;  %vm2413_vm0 = vweird.f32 %v8044_v58 }
 0x559   :  { %v2350_v21 = vsub.f32 1.0, %v2349_v40  ;;  %v2341_v20 = vsel %vm2340_vm10, %v5840_v9, %v2337_v33  ;;  %v5852_v6 = vpop.eup %5851  ;;  %v2379_v62 = vmul.f32 %v5850_v59, %v8039_v54  ;;  %vm2384_vm9 = vweird.f32 %v5850_v59 }
 0x55a   :  { %v2346_v30 = vsel %vm2343_vm3, %v2345_v3, %v2341_v20  ;;  %5857 = vrcp.f32 %v2331_v60  ;;  %v8051_v9 = vpop.eup %5853  ;;  %vm2385_vm8 = vmor %vm2383_vm1, %vm2384_vm9  ;;  %v2390_v20 = vor.u32 1.1754944e-38, %v2389_v24  ;;  %vm2388_vm6 = vcmp.eq.f32.partialorder %v2387_v4, 8.507059e+37 }
 0x55b   :  { %v2351_v13 = vmul.f32 %v5846_v41, %v2350_v21  ;;  %v2427_v46 = vmul.f32 %v5852_v6, %v2346_v30  ;;  %v2380_v10 = vsub.f32 1.0, %v2379_v62  ;;  %5859 = vtanh.f32 %v2308_v5  ;;  %v5856_v37 = vpop.eup %5855 }
 0x55c   :  { %v2364_v39 = vmul.f32 %v8051_v9, %v8042_v57  ;;  %v2409_v5 = vmul.f32 %v5856_v37, %v8044_v58  ;;  %vm2398_vm12 = vweird.f32 %v2331_v60  ;;  %vm2369_vm13 = vweird.f32 %v8051_v9 }
 0x55d   :  { %v2352_v50 = vadd.f32 %v5846_v41, %v2351_v13  ;;  %v2381_v43 = vmul.f32 %v5850_v59, %v2380_v10  ;;  %v2404_v13 = vand.u32 2147483648, %v2331_v60  ;;  %vm2414_vm11 = vweird.f32 %v5856_v37 }
 0x55e   :  { %v2365_v10 = vsub.f32 1.0, %v2364_v39  ;;  %vm2368_vm10 = vweird.f32 %v8042_v57  ;;  %vm2415_vm14 = vmor %vm2413_vm0, %vm2414_vm11 }
 0x55f   :  { %v2356_v16 = vsel %vm2355_vm15, %v5846_v41, %v2352_v50  ;;  %v2382_v3 = vadd.f32 %v5850_v59, %v2381_v43  ;;  %v2410_v50 = vsub.f32 1.0, %v2409_v5  ;;  %vm2370_vm3 = vmor %vm2368_vm10, %vm2369_vm13 }
 0x560   :  { %v5858_v40 = vpop.eup %5857  ;;  %v2361_v33 = vsel %vm2358_vm5, %v2360_v0, %v2356_v16  ;;  %v2405_v0 = vor.u32 1.1754944e-38, %v2404_v13 }
 0x561   :  { %v2425_v44 = vmul.f32 %v2361_v33, %v7983_v36  ;;  %v2394_v21 = vmul.f32 %v5858_v40, %v2331_v60  ;;  %v2386_v6 = vsel %vm2385_vm8, %v5850_v59, %v2382_v3  ;;  %v5860_v7 = vpop.eup %5859  ;;  %vm2399_vm7 = vweird.f32 %v5858_v40 }
 0x562   :  { %v2391_v62 = vsel %vm2388_vm6, %v2390_v20, %v2386_v6  ;;  %v2402_v36 = vand.u32 2147483647, %v2331_v60  ;;  %vm2400_vm4 = vmor %vm2398_vm12, %vm2399_vm7  ;;  %v2366_v59 = vmul.f32 %v8051_v9, %v2365_v10  ;;  %v2411_v4 = vmul.f32 %v5856_v37, %v2410_v50 }
 0x563   :  { %v8059_v41 = vadd.f32 %v2427_v46, %v2425_v44  ;;  %v2395_v30 = vsub.f32 1.0, %v2394_v21  ;;  %v2428_v51 = vmul.f32 %v5860_v7, %v2391_v62  ;;  %v2419_v44 = vand.u32 2147483648, %v8044_v58 }
 0x564   :  { %vm2403_vm2 = vcmp.eq.f32.partialorder %v2402_v36, 8.507059e+37  ;;  %v2367_v3 = vadd.f32 %v8051_v9, %v2366_v59  ;;  %v2412_v60 = vadd.f32 %v5856_v37, %v2411_v4  ;;  %v2417_v21 = vand.u32 2147483647, %v8044_v58  ;;  %v9348_v58 = vld [vmem:[#allocation29_spill] sm:$0xff] }
 0x565   :  { %v2396_v54 = vmul.f32 %v5858_v40, %v2395_v30  ;;  %5861 = vtanh.f32 %v8059_v41  ;;  %v2420_v7 = vor.u32 1.1754944e-38, %v2419_v44 }
 0x566   :  { %v2371_v20 = vsel %vm2370_vm3, %v8051_v9, %v2367_v3  ;;  %v2416_v39 = vsel %vm2415_vm14, %v5856_v37, %v2412_v60  ;;  %vm2418_vm9 = vcmp.eq.f32.partialorder %v2417_v21, 8.507059e+37 }
 0x567   :  { %v2397_v24 = vadd.f32 %v5858_v40, %v2396_v54  ;;  %v2421_v13 = vsel %vm2418_vm9, %v2420_v7, %v2416_v39 }
 0x569   :  { %v2401_v43 = vsel %vm2400_vm4, %v5858_v40, %v2397_v24  ;;  %v2374_v40 = vand.u32 2147483648, %v8042_v57  ;;  %v9349_v24 = vld [vmem:[#allocation91_spill] sm:$0xff] }
 0x56a   :  { %v2406_v46 = vsel %vm2403_vm2, %v2405_v0, %v2401_v43  ;;  %v9350_v43 = vld [vmem:[#allocation30_spill] sm:$0xff] }
 0x56b   :  { %v2426_v16 = vmul.f32 %v2406_v46, %v7989_v17  ;;  %v2372_v17 = vand.u32 2147483647, %v8042_v57  ;;  %v5862_v5 = vpop.eup %5861  ;;  %v2375_v6 = vor.u32 1.1754944e-38, %v2374_v40  ;;  %v9352_v40 = vld [vmem:[#allocation93_spill] sm:$0xff] }
 0x56d   :  { %v8065_v33 = vadd.f32 %v2428_v51, %v2426_v16  ;;  %vm2373_vm15 = vcmp.eq.f32.partialorder %v2372_v17, 8.507059e+37  ;;  %v9351_v16 = vld [vmem:[#allocation31_spill] sm:$0xff] }
 0x56e   :  { %v2376_v62 = vsel %vm2373_vm15, %v2375_v6, %v2371_v20 }
 0x56f   :  { %5863 = vtanh.f32 %v8065_v33  ;;  %v2433_v51 = vmul.f32 %v5862_v5, %v2376_v62 }
 0x575   :  { %v5864_v30 = vpop.eup %5863 }
 0x576   :  { %v2434_v54 = vmul.f32 %v5864_v30, %v2421_v13  ;;  %v9353_v30 = vld [vmem:[#allocation32_spill] sm:$0xff] }
 0x578   :  { %v2435_v36 = vpack.c.bf16 %v2434_v54, %v2433_v51 }
 0x57a   :  { %2444 = vmatmul.bf16.vlgmr.msra.gmra.mxu1 %v2435_v36  ;;  %2458 = vmatmul.bf16.vlgmr.msra.gmra.mxu3 %v2435_v36 }
 0x57b   :  { %2472 = vmatmul.bf16.vlgmr.msra.gmra.mxu0 %v2435_v36  ;;  %2486 = vmatmul.bf16.vlgmr.msra.gmra.mxu2 %v2435_v36 }
 0x57c   :  { %2818 = vmatpush.bf16.msra.mxu1 %v6944_v8  ;;  %2832 = vmatpush.bf16.msra.mxu3 %v6929_v34 }
 0x57d   :  { %2846 = vmatpush.bf16.msra.mxu0 %v6982_v27  ;;  %2860 = vmatpush.bf16.msra.mxu2 %v6996_v35 }
 0x580   :  { %2819 = vmatpush.bf16.msra.mxu1 %v7036_v52  ;;  %2833 = vmatpush.bf16.msra.mxu3 %v7021_v32 }
 0x581   :  { %2847 = vmatpush.bf16.msra.mxu0 %v7062_v49  ;;  %2861 = vmatpush.bf16.msra.mxu2 %v7076_v47 }
 0x584   :  { %2820 = vmatpush.bf16.msra.mxu1 %v7116_v22  ;;  %2834 = vmatpush.bf16.msra.mxu3 %v7101_v12 }
 0x585   :  { %2848 = vmatpush.bf16.msra.mxu0 %v7142_v38  ;;  %2862 = vmatpush.bf16.msra.mxu2 %v7156_v63 }
 0x588   :  { %2821 = vmatpush.bf16.msra.mxu1 %v7196_v11  ;;  %2835 = vmatpush.bf16.msra.mxu3 %v7181_v1 }
 0x589   :  { %2849 = vmatpush.bf16.msra.mxu0 %v7222_v2  ;;  %2863 = vmatpush.bf16.msra.mxu2 %v7236_v18 }
 0x58c   :  { %2822 = vmatpush.bf16.msra.mxu1 %v7276_v31  ;;  %2836 = vmatpush.bf16.msra.mxu3 %v7261_v19 }
 0x58d   :  { %2850 = vmatpush.bf16.msra.mxu0 %v7302_v45  ;;  %2864 = vmatpush.bf16.msra.mxu2 %v7316_v42 }
 0x590   :  { %2823 = vmatpush.bf16.msra.mxu1 %v7360_v53  ;;  %2837 = vmatpush.bf16.msra.mxu3 %v7346_v29 }
 0x591   :  { %2851 = vmatpush.bf16.msra.mxu0 %v7389_v14  ;;  %2865 = vmatpush.bf16.msra.mxu2 %v7400_v25 }
 0x594   :  { %2824 = vmatpush.bf16.msra.mxu1 %v7440_v26  ;;  %2838 = vmatpush.bf16.msra.mxu3 %v7426_v48 }
 0x595   :  { %2852 = vmatpush.bf16.msra.mxu0 %v7469_v56  ;;  %2866 = vmatpush.bf16.msra.mxu2 %v7480_v28 }
 0x598   :  { %2825 = vmatpush.bf16.msra.mxu1 %v7521_v61  ;;  %2839 = vmatpush.bf16.msra.mxu3 %v7506_v55 }
 0x599   :  { %2853 = vmatpush.bf16.msra.mxu0 %v7557_v15  ;;  %2867 = vmatpush.bf16.msra.mxu2 %v7573_v23 }
 0x5f7   :  { %v2445_v57 = vpop.f32.mrf.mxu1 }
 0x5f8   :  { %v2492_v9 = vadd.f32 %v2445_v57, %v9348_v58  ;;  %v2473_v37 = vpop.f32.mrf.mxu0  ;;  %v9354_v58 = vld [vmem:[#allocation90_spill] sm:$0xff] }
 0x5f9   :  { %v2494_v0 = vadd.f32 %v2473_v37, %v9349_v24 }
 0x5fa   :  { %v5492_v10 = vmul.f32 -1.442695, %v2492_v9 }
 0x5fb   :  { %v5494_v21 = vmul.f32 -1.442695, %v2494_v0 }
 0x5fc   :  { %5865 = vpow2.f32 %v5492_v10 }
 0x5fd   :  { %v2459_v50 = vpop.f32.mrf.mxu3 }
 0x5fe   :  { %v2493_v59 = vadd.f32 %v2459_v50, %v9350_v43  ;;  %v2487_v7 = vpop.f32.mrf.mxu2 }
 0x5ff   :  { %v2447_v4 = vpop.f32.mrf.mxu1  ;;  %v2495_v9 = vadd.f32 %v2487_v7, %v9354_v58 }
 0x600   :  { %v5493_v46 = vmul.f32 -1.442695, %v2493_v59  ;;  %v2496_v3 = vadd.f32 %v2447_v4, %v9351_v16  ;;  %v2475_v60 = vpop.f32.mrf.mxu0 }
 0x601   :  { %v2498_v44 = vadd.f32 %v2475_v60, %v9352_v40 }
 0x602   :  { %v5866_v17 = vpop.eup %5865  ;;  %5867 = vpow2.f32 %v5493_v46  ;;  %v5495_v20 = vmul.f32 -1.442695, %v2496_v3 }
 0x603   :  { %v2518_v39 = vadd.f32 1.0, %v5866_v17  ;;  %v5497_v5 = vmul.f32 -1.442695, %v2498_v44 }
 0x604   :  { %5869 = vpow2.f32 %v5495_v20 }
 0x605   :  { %5871 = vrcp.f32 %v2518_v39  ;;  %v2461_v6 = vpop.f32.mrf.mxu3  ;;  %v2533_v59 = vand.u32 2147483647, %v2518_v39  ;;  %v2535_v4 = vand.u32 2147483648, %v2518_v39  ;;  %vm2529_vm1 = vweird.f32 %v2518_v39 }
 0x606   :  { %5873 = vpow2.f32 %v5494_v21  ;;  %v2497_v62 = vadd.f32 %v2461_v6, %v9353_v30  ;;  %v2489_v60 = vpop.f32.mrf.mxu2  ;;  %v9355_v30 = vld [vmem:[#allocation92_spill] sm:$0xff] }
 0x607   :  { %5875 = vpow2.f32 %v5497_v5  ;;  %vm2534_vm6 = vcmp.eq.f32.partialorder %v2533_v59, 8.507059e+37  ;;  %v2536_v21 = vor.u32 1.1754944e-38, %v2535_v4 }
 0x608   :  { %v5868_v13 = vpop.eup %5867  ;;  %v5496_v54 = vmul.f32 -1.442695, %v2497_v62  ;;  %v2499_v62 = vadd.f32 %v2489_v60, %v9355_v30 }
 0x609   :  { %v2519_v51 = vadd.f32 1.0, %v5868_v13 }
 0x60a   :  { %v5870_v36 = vpop.eup %5869 }
 0x60b   :  { %v5872_v57 = vpop.eup %5871  ;;  %5877 = vrcp.f32 %v2519_v51  ;;  %v8115_v50 = vadd.f32 1.0, %v5870_v36  ;;  %vm2544_vm12 = vweird.f32 %v2519_v51 }
 0x60c   :  { %v5874_v37 = vpop.eup %5873  ;;  %v2525_v10 = vmul.f32 %v5872_v57, %v2518_v39  ;;  %5879 = vpow2.f32 %v5496_v54  ;;  %vm2530_vm5 = vweird.f32 %v5872_v57  ;;  %v2550_v54 = vand.u32 2147483648, %v2519_v51 }
 0x60d   :  { %v5876_v24 = vpop.eup %5875  ;;  %5881 = vrcp.f32 %v8115_v50  ;;  %v8118_v43 = vadd.f32 1.0, %v5874_v37  ;;  %vm2531_vm8 = vmor %vm2529_vm1, %vm2530_vm5  ;;  %vm2574_vm11 = vweird.f32 %v8115_v50 }
 0x60e   :  { %v2526_v0 = vsub.f32 1.0, %v2525_v10  ;;  %5883 = vtanh.f32 %v2495_v9  ;;  %v8120_v16 = vadd.f32 1.0, %v5876_v24  ;;  %v2548_v9 = vand.u32 2147483647, %v2519_v51 }
 0x60f   :  { %5885 = vrcp.f32 %v8118_v43  ;;  %v2551_v59 = vor.u32 1.1754944e-38, %v2550_v54 }
 0x610   :  { %v2527_v46 = vmul.f32 %v5872_v57, %v2526_v0  ;;  %5887 = vrcp.f32 %v8120_v16  ;;  %v2580_v0 = vand.u32 2147483648, %v8115_v50  ;;  %vm2549_vm13 = vcmp.eq.f32.partialorder %v2548_v9, 8.507059e+37 }
 0x611   :  { %v5878_v3 = vpop.eup %5877 }
 0x612   :  { %v5880_v40 = vpop.eup %5879  ;;  %v2540_v44 = vmul.f32 %v5878_v3, %v2519_v51  ;;  %v2528_v17 = vadd.f32 %v5872_v57, %v2527_v46  ;;  %vm2545_vm7 = vweird.f32 %v5878_v3  ;;  %v2578_v46 = vand.u32 2147483647, %v8115_v50 }
 0x613   :  { %v2522_v20 = vadd.f32 1.0, %v5880_v40  ;;  %v5882_v5 = vpop.eup %5881  ;;  %vm2546_vm4 = vmor %vm2544_vm12, %vm2545_vm7  ;;  %vm2604_vm7 = vweird.f32 %v8120_v16 }
 0x614   :  { %v2541_v6 = vsub.f32 1.0, %v2540_v44  ;;  %v2532_v7 = vsel %vm2531_vm8, %v5872_v57, %v2528_v17  ;;  %v5884_v13 = vpop.eup %5883  ;;  %v2570_v58 = vmul.f32 %v5882_v5, %v8115_v50  ;;  %vm2575_vm2 = vweird.f32 %v5882_v5 }
 0x615   :  { %v2537_v36 = vsel %vm2534_vm6, %v2536_v21, %v2532_v7  ;;  %5889 = vrcp.f32 %v2522_v20  ;;  %v8127_v57 = vpop.eup %5885  ;;  %vm2576_vm10 = vmor %vm2574_vm11, %vm2575_vm2  ;;  %v2581_v7 = vor.u32 1.1754944e-38, %v2580_v0  ;;  %vm2579_vm3 = vcmp.eq.f32.partialorder %v2578_v46, 8.507059e+37 }
 0x616   :  { %v2542_v39 = vmul.f32 %v5878_v3, %v2541_v6  ;;  %v2618_v37 = vmul.f32 %v5884_v13, %v2537_v36  ;;  %v2571_v10 = vsub.f32 1.0, %v2570_v58  ;;  %5891 = vtanh.f32 %v2499_v62  ;;  %v5888_v60 = vpop.eup %5887 }
 0x617   :  { %v2555_v30 = vmul.f32 %v8127_v57, %v8118_v43  ;;  %v2600_v62 = vmul.f32 %v5888_v60, %v8120_v16  ;;  %vm2589_vm14 = vweird.f32 %v2522_v20  ;;  %vm2560_vm5 = vweird.f32 %v8127_v57 }
 0x618   :  { %v2543_v24 = vadd.f32 %v5878_v3, %v2542_v39  ;;  %v2572_v4 = vmul.f32 %v5882_v5, %v2571_v10  ;;  %v2595_v39 = vand.u32 2147483648, %v2522_v20  ;;  %vm2605_vm1 = vweird.f32 %v5888_v60 }
 0x619   :  { %v2556_v10 = vsub.f32 1.0, %v2555_v30  ;;  %vm2559_vm8 = vweird.f32 %v8118_v43  ;;  %vm2606_vm12 = vmor %vm2604_vm7, %vm2605_vm1 }
 0x61a   :  { %v2547_v40 = vsel %vm2546_vm4, %v5878_v3, %v2543_v24  ;;  %v2573_v21 = vadd.f32 %v5882_v5, %v2572_v4  ;;  %v2601_v24 = vsub.f32 1.0, %v2600_v62  ;;  %vm2561_vm6 = vmor %vm2559_vm8, %vm2560_vm5 }
 0x61b   :  { %v5890_v44 = vpop.eup %5889  ;;  %v2552_v17 = vsel %vm2549_vm13, %v2551_v59, %v2547_v40  ;;  %v2596_v59 = vor.u32 1.1754944e-38, %v2595_v39 }
 0x61c   :  { %v2616_v51 = vmul.f32 %v2552_v17, %v8059_v41  ;;  %v2585_v6 = vmul.f32 %v5890_v44, %v2522_v20  ;;  %v2577_v13 = vsel %vm2576_vm10, %v5882_v5, %v2573_v21  ;;  %v5892_v54 = vpop.eup %5891  ;;  %vm2590_vm0 = vweird.f32 %v5890_v44 }
 0x61d   :  { %v2582_v58 = vsel %vm2579_vm3, %v2581_v7, %v2577_v13  ;;  %v2593_v41 = vand.u32 2147483647, %v2522_v20  ;;  %vm2591_vm15 = vmor %vm2589_vm14, %vm2590_vm0  ;;  %v2557_v5 = vmul.f32 %v8127_v57, %v2556_v10  ;;  %v2602_v46 = vmul.f32 %v5888_v60, %v2601_v24  ;;  %v9357_v24 = vld [vmem:[#allocation78_spill] sm:$0xff] }
 0x61e   :  { %v8135_v3 = vadd.f32 %v2618_v37, %v2616_v51  ;;  %v2586_v36 = vsub.f32 1.0, %v2585_v6  ;;  %v2619_v9 = vmul.f32 %v5892_v54, %v2582_v58  ;;  %v2610_v51 = vand.u32 2147483648, %v8120_v16 }
 0x61f   :  { %vm2594_vm9 = vcmp.eq.f32.partialorder %v2593_v41, 8.507059e+37  ;;  %v2558_v21 = vadd.f32 %v8127_v57, %v2557_v5  ;;  %v2603_v20 = vadd.f32 %v5888_v60, %v2602_v46  ;;  %v2608_v6 = vand.u32 2147483647, %v8120_v16  ;;  %v9356_v16 = vld [vmem:[#allocation33_spill] sm:$0xff]  ;;  %v9359_v5 = vld [vmem:[#allocation96_spill] sm:$0xff] }
 0x620   :  { %v2587_v50 = vmul.f32 %v5890_v44, %v2586_v36  ;;  %5893 = vtanh.f32 %v8135_v3  ;;  %v2611_v54 = vor.u32 1.1754944e-38, %v2610_v51 }
 0x621   :  { %v2562_v7 = vsel %vm2561_vm6, %v8127_v57, %v2558_v21  ;;  %v2607_v30 = vsel %vm2606_vm12, %v5888_v60, %v2603_v20  ;;  %vm2609_vm2 = vcmp.eq.f32.partialorder %v2608_v6, 8.507059e+37  ;;  %v9361_v21 = vld [vmem:[#allocation99_spill] sm:$0xff] }
 0x622   :  { %v2588_v0 = vadd.f32 %v5890_v44, %v2587_v50  ;;  %v2612_v39 = vsel %vm2609_vm2, %v2611_v54, %v2607_v30 }
 0x624   :  { %v2592_v4 = vsel %vm2591_vm15, %v5890_v44, %v2588_v0  ;;  %v2565_v44 = vand.u32 2147483648, %v8118_v43  ;;  %v9358_v0 = vld [vmem:[#allocation97_spill] sm:$0xff] }
 0x625   :  { %v2597_v37 = vsel %vm2594_vm9, %v2596_v59, %v2592_v4  ;;  %v1161_v59 = vadd.f32 %v9358_v0, %v9357_v24  ;;  %v9364_v0 = vld [vmem:[#allocation94_spill] sm:$0xff] }
 0x626   :  { %v2617_v40 = vmul.f32 %v2597_v37, %v8065_v33  ;;  %v2563_v33 = vand.u32 2147483647, %v8118_v43  ;;  %v5894_v62 = vpop.eup %5893  ;;  %v2566_v13 = vor.u32 1.1754944e-38, %v2565_v44  ;;  %v9360_v37 = vld [vmem:[#allocation34_spill] sm:$0xff] }
 0x627   :  { %v1250_v20 = vadd.f32 %v9361_v21, %v1161_v59 }
 0x628   :  { %v8141_v17 = vadd.f32 %v2619_v9, %v2617_v40  ;;  %vm2564_vm4 = vcmp.eq.f32.partialorder %v2563_v33, 8.507059e+37  ;;  %v9362_v33 = vld [vmem:[#allocation35_spill] sm:$0xff] }
 0x629   :  { %v2567_v58 = vsel %vm2564_vm4, %v2566_v13, %v2562_v7 }
 0x62a   :  { %5895 = vtanh.f32 %v8141_v17  ;;  %v2624_v9 = vmul.f32 %v5894_v62, %v2567_v58 }
 0x630   :  { %v5896_v36 = vpop.eup %5895 }
 0x631   :  { %v2625_v50 = vmul.f32 %v5896_v36, %v2612_v39 }
 0x633   :  { %v2626_v41 = vpack.c.bf16 %v2625_v50, %v2624_v9  ;;  %v9363_v9 = vld [vmem:[#allocation36_spill] sm:$0xff] }
 0x635   :  { %2635 = vmatmul.bf16.vlgmr.msrb.gmra.mxu1 %v2626_v41  ;;  %2649 = vmatmul.bf16.vlgmr.msrb.gmra.mxu3 %v2626_v41 }
 0x636   :  { %2663 = vmatmul.bf16.vlgmr.msrb.gmra.mxu0 %v2626_v41  ;;  %2677 = vmatmul.bf16.vlgmr.msrb.gmra.mxu2 %v2626_v41 }
 0x637   :  { %3009 = vmatpush.bf16.msrb.mxu1 %v6944_v8  ;;  %3023 = vmatpush.bf16.msrb.mxu3 %v6929_v34 }
 0x638   :  { %3037 = vmatpush.bf16.msrb.mxu0 %v6982_v27  ;;  %3051 = vmatpush.bf16.msrb.mxu2 %v6996_v35 }
 0x63b   :  { %3010 = vmatpush.bf16.msrb.mxu1 %v7036_v52  ;;  %3024 = vmatpush.bf16.msrb.mxu3 %v7021_v32 }
 0x63c   :  { %3038 = vmatpush.bf16.msrb.mxu0 %v7062_v49  ;;  %3052 = vmatpush.bf16.msrb.mxu2 %v7076_v47 }
 0x63f   :  { %3011 = vmatpush.bf16.msrb.mxu1 %v7116_v22  ;;  %3025 = vmatpush.bf16.msrb.mxu3 %v7101_v12 }
 0x640   :  { %3039 = vmatpush.bf16.msrb.mxu0 %v7142_v38  ;;  %3053 = vmatpush.bf16.msrb.mxu2 %v7156_v63 }
 0x643   :  { %3012 = vmatpush.bf16.msrb.mxu1 %v7196_v11  ;;  %3026 = vmatpush.bf16.msrb.mxu3 %v7181_v1 }
 0x644   :  { %3040 = vmatpush.bf16.msrb.mxu0 %v7222_v2  ;;  %3054 = vmatpush.bf16.msrb.mxu2 %v7236_v18 }
 0x647   :  { %3013 = vmatpush.bf16.msrb.mxu1 %v7276_v31  ;;  %3027 = vmatpush.bf16.msrb.mxu3 %v7261_v19 }
 0x648   :  { %3041 = vmatpush.bf16.msrb.mxu0 %v7302_v45  ;;  %3055 = vmatpush.bf16.msrb.mxu2 %v7316_v42 }
 0x64b   :  { %3014 = vmatpush.bf16.msrb.mxu1 %v7360_v53  ;;  %3028 = vmatpush.bf16.msrb.mxu3 %v7346_v29 }
 0x64c   :  { %3042 = vmatpush.bf16.msrb.mxu0 %v7389_v14  ;;  %3056 = vmatpush.bf16.msrb.mxu2 %v7400_v25 }
 0x64f   :  { %3015 = vmatpush.bf16.msrb.mxu1 %v7440_v26  ;;  %3029 = vmatpush.bf16.msrb.mxu3 %v7426_v48 }
 0x650   :  { %3043 = vmatpush.bf16.msrb.mxu0 %v7469_v56  ;;  %3057 = vmatpush.bf16.msrb.mxu2 %v7480_v28 }
 0x653   :  { %3016 = vmatpush.bf16.msrb.mxu1 %v7521_v61  ;;  %3030 = vmatpush.bf16.msrb.mxu3 %v7506_v55 }
 0x654   :  { %3044 = vmatpush.bf16.msrb.mxu0 %v7557_v15  ;;  %3058 = vmatpush.bf16.msrb.mxu2 %v7573_v23 }
 0x6b2   :  { %v2636_v43 = vpop.f32.mrf.mxu1 }
 0x6b3   :  { %v2683_v57 = vadd.f32 %v2636_v43, %v9356_v16  ;;  %v2664_v60 = vpop.f32.mrf.mxu0 }
 0x6b4   :  { %v2685_v46 = vadd.f32 %v2664_v60, %v9359_v5 }
 0x6b5   :  { %v5498_v10 = vmul.f32 -1.442695, %v2683_v57 }
 0x6b6   :  { %v5500_v13 = vmul.f32 -1.442695, %v2685_v46 }
 0x6b7   :  { %5897 = vpow2.f32 %v5498_v10 }
 0x6b8   :  { %v2650_v4 = vpop.f32.mrf.mxu3 }
 0x6b9   :  { %v2684_v40 = vadd.f32 %v2650_v4, %v9360_v37  ;;  %v2678_v43 = vpop.f32.mrf.mxu2 }
 0x6ba   :  { %v2638_v44 = vpop.f32.mrf.mxu1  ;;  %v2686_v59 = vadd.f32 %v2678_v43, %v9364_v0 }
 0x6bb   :  { %v5499_v51 = vmul.f32 -1.442695, %v2684_v40  ;;  %v2687_v6 = vadd.f32 %v2638_v44, %v9362_v33  ;;  %v2666_v7 = vpop.f32.mrf.mxu0 }
 0x6bc   :  { %v2689_v30 = vadd.f32 %v2666_v7, %v1250_v20 }
 0x6bd   :  { %v5898_v62 = vpop.eup %5897  ;;  %5899 = vpow2.f32 %v5499_v51  ;;  %v5501_v54 = vmul.f32 -1.442695, %v2687_v6 }
 0x6be   :  { %v2709_v36 = vadd.f32 1.0, %v5898_v62  ;;  %v5503_v58 = vmul.f32 -1.442695, %v2689_v30 }
 0x6bf   :  { %5901 = vpow2.f32 %v5501_v54 }
 0x6c0   :  { %5903 = vrcp.f32 %v2709_v36  ;;  %v2652_v39 = vpop.f32.mrf.mxu3  ;;  %v2726_v20 = vand.u32 2147483648, %v2709_v36  ;;  %v2724_v51 = vand.u32 2147483647, %v2709_v36  ;;  %vm2720_vm11 = vweird.f32 %v2709_v36 }
 0x6c1   :  { %5905 = vpow2.f32 %v5500_v13  ;;  %v2688_v50 = vadd.f32 %v2652_v39, %v9363_v9 }
 0x6c2   :  { %5907 = vpow2.f32 %v5503_v58  ;;  %v2727_v13 = vor.u32 1.1754944e-38, %v2726_v20  ;;  %vm2725_vm3 = vcmp.eq.f32.partialorder %v2724_v51, 8.507059e+37 }
 0x6c3   :  { %v5900_v41 = vpop.eup %5899  ;;  %v5502_v57 = vmul.f32 -1.442695, %v2688_v50 }
 0x6c4   :  { %v2710_v16 = vadd.f32 1.0, %v5900_v41 }
 0x6c5   :  { %v5902_v60 = vpop.eup %5901 }
 0x6c6   :  { %v5904_v10 = vpop.eup %5903  ;;  %5909 = vrcp.f32 %v2710_v16  ;;  %v8193_v46 = vadd.f32 1.0, %v5902_v60  ;;  %v2741_v41 = vand.u32 2147483648, %v2710_v16  ;;  %vm2735_vm14 = vweird.f32 %v2710_v16 }
 0x6c7   :  { %v5906_v4 = vpop.eup %5905  ;;  %v2716_v5 = vmul.f32 %v5904_v10, %v2709_v36  ;;  %5911 = vpow2.f32 %v5502_v57  ;;  %vm2721_vm13 = vweird.f32 %v5904_v10  ;;  %v2739_v36 = vand.u32 2147483647, %v2710_v16 }
 0x6c8   :  { %v5908_v37 = vpop.eup %5907  ;;  %5913 = vrcp.f32 %v8193_v46  ;;  %v8196_v21 = vadd.f32 1.0, %v5906_v4  ;;  %vm2722_vm10 = vmor %vm2720_vm11, %vm2721_vm13  ;;  %v9366_v4 = vld [vmem:[#allocation95_spill] sm:$0xff]  ;;  %vm2765_vm1 = vweird.f32 %v8193_v46 }
 0x6c9   :  { %v2717_v40 = vsub.f32 1.0, %v2716_v5  ;;  %5915 = vtanh.f32 %v2686_v59  ;;  %v8198_v33 = vadd.f32 1.0, %v5908_v37  ;;  %v9365_v59 = vld [vmem:[#allocation77_spill] sm:$0xff]  ;;  %vm2740_vm9 = vcmp.eq.f32.partialorder %v2739_v36, 8.507059e+37 }
 0x6ca   :  { %5917 = vrcp.f32 %v8196_v21  ;;  %v1339_v5 = vadd.f32 %v9366_v4, %v9365_v59  ;;  %v2769_v36 = vand.u32 2147483647, %v8193_v46 }
 0x6cb   :  { %v2718_v44 = vmul.f32 %v5904_v10, %v2717_v40  ;;  %5919 = vrcp.f32 %v8198_v33 }
 0x6cc   :  { %v5910_v6 = vpop.eup %5909  ;;  %vm2770_vm12 = vcmp.eq.f32.partialorder %v2769_v36, 8.507059e+37 }
 0x6cd   :  { %v5912_v7 = vpop.eup %5911  ;;  %v2731_v30 = vmul.f32 %v5910_v6, %v2710_v16  ;;  %v2719_v62 = vadd.f32 %v5904_v10, %v2718_v44  ;;  %vm2736_vm0 = vweird.f32 %v5910_v6  ;;  %v9367_v44 = vld [vmem:[#allocation98_spill] sm:$0xff] }
 0x6ce   :  { %v2713_v54 = vadd.f32 1.0, %v5912_v7  ;;  %v5914_v58 = vpop.eup %5913  ;;  %v1428_v51 = vadd.f32 %v9367_v44, %v1339_v5  ;;  %vm2737_vm15 = vmor %vm2735_vm14, %vm2736_vm0  ;;  %v2742_v7 = vor.u32 1.1754944e-38, %v2741_v41  ;;  %v2771_v41 = vand.u32 2147483648, %v8193_v46 }
 0x6cf   :  { %v2732_v39 = vsub.f32 1.0, %v2731_v30  ;;  %v2723_v9 = vsel %vm2722_vm10, %v5904_v10, %v2719_v62  ;;  %v5916_v50 = vpop.eup %5915  ;;  %v2761_v57 = vmul.f32 %v5914_v58, %v8193_v46  ;;  %v2680_v10 = vpop.f32.mrf.mxu2  ;;  %vm2766_vm5 = vweird.f32 %v5914_v58 }
 0x6d0   :  { %v2728_v43 = vsel %vm2725_vm3, %v2727_v13, %v2723_v9  ;;  %5921 = vrcp.f32 %v2713_v54  ;;  %v8205_v20 = vpop.eup %5917  ;;  %vm2767_vm8 = vmor %vm2765_vm1, %vm2766_vm5  ;;  %vm2780_vm7 = vweird.f32 %v2713_v54  ;;  %vm2750_vm10 = vweird.f32 %v8196_v21 }
 0x6d1   :  { %v2733_v60 = vmul.f32 %v5910_v6, %v2732_v39  ;;  %v2809_v0 = vmul.f32 %v5916_v50, %v2728_v43  ;;  %v2762_v37 = vsub.f32 1.0, %v2761_v57  ;;  %v8208_v62 = vpop.eup %5919  ;;  %v2690_v50 = vadd.f32 %v2680_v10, %v1428_v51 }
 0x6d2   :  { %v2791_v4 = vmul.f32 %v8208_v62, %v8198_v33  ;;  %v2784_v10 = vand.u32 2147483647, %v2713_v54  ;;  %vm2751_vm13 = vweird.f32 %v8205_v20  ;;  %vm2796_vm11 = vweird.f32 %v8208_v62 }
 0x6d3   :  { %v2734_v40 = vadd.f32 %v5910_v6, %v2733_v60  ;;  %v2763_v30 = vmul.f32 %v5914_v58, %v2762_v37  ;;  %v2746_v60 = vmul.f32 %v8205_v20, %v8196_v21  ;;  %v2786_v37 = vand.u32 2147483648, %v2713_v54  ;;  %vm2752_vm3 = vmor %vm2750_vm10, %vm2751_vm13 }
 0x6d4   :  { %5923 = vtanh.f32 %v2690_v50  ;;  %v2792_v51 = vsub.f32 1.0, %v2791_v4  ;;  %vm2785_vm2 = vcmp.eq.f32.partialorder %v2784_v10, 8.507059e+37  ;;  %v2756_v4 = vand.u32 2147483648, %v8196_v21 }
 0x6d5   :  { %v2738_v13 = vsel %vm2737_vm15, %v5910_v6, %v2734_v40  ;;  %v2764_v16 = vadd.f32 %v5914_v58, %v2763_v30  ;;  %v2747_v44 = vsub.f32 1.0, %v2746_v60  ;;  %vm2795_vm0 = vweird.f32 %v8198_v33 }
 0x6d6   :  { %v5922_v39 = vpop.eup %5921  ;;  %v2743_v9 = vsel %vm2740_vm9, %v2742_v7, %v2738_v13  ;;  %v2772_v7 = vor.u32 1.1754944e-38, %v2771_v41  ;;  %v2793_v50 = vmul.f32 %v8208_v62, %v2792_v51  ;;  %v2801_v41 = vand.u32 2147483648, %v8198_v33  ;;  %vm2797_vm14 = vmor %vm2795_vm0, %vm2796_vm11 }
 0x6d7   :  { %v2807_v43 = vmul.f32 %v2743_v9, %v8135_v3  ;;  %v2776_v57 = vmul.f32 %v5922_v39, %v2713_v54  ;;  %vm2781_vm6 = vweird.f32 %v5922_v39  ;;  %v2768_v40 = vsel %vm2767_vm8, %v5914_v58, %v2764_v16 }
 0x6d8   :  { %vm2782_vm4 = vmor %vm2780_vm7, %vm2781_vm6  ;;  %v2773_v13 = vsel %vm2770_vm12, %v2772_v7, %v2768_v40  ;;  %v2748_v46 = vmul.f32 %v8205_v20, %v2747_v44  ;;  %v2757_v40 = vor.u32 1.1754944e-38, %v2756_v4  ;;  %v2802_v10 = vor.u32 1.1754944e-38, %v2801_v41 }
 0x6d9   :  { %v8216_v5 = vadd.f32 %v2809_v0, %v2807_v43  ;;  %v2777_v6 = vsub.f32 1.0, %v2776_v57  ;;  %v2787_v0 = vor.u32 1.1754944e-38, %v2786_v37 }
 0x6da   :  { %v5924_v43 = vpop.eup %5923  ;;  %v2749_v60 = vadd.f32 %v8205_v20, %v2748_v46 }
 0x6db   :  { %v2778_v3 = vmul.f32 %v5922_v39, %v2777_v6  ;;  %v2810_v16 = vmul.f32 %v5924_v43, %v2773_v13  ;;  %5925 = vtanh.f32 %v8216_v5  ;;  %v2799_v6 = vand.u32 2147483647, %v8198_v33  ;;  %v9369_v43 = vld [vmem:[#allocation103_spill] sm:$0xff] }
 0x6dc   :  { %v2753_v36 = vsel %vm2752_vm3, %v8205_v20, %v2749_v60  ;;  %v9368_v20 = vld [vmem:[#allocation37_spill] sm:$0xff]  ;;  %v1166_v46 = vadd.f32 %v9369_v43, %v9357_v24 }
 0x6dd   :  { %v2779_v30 = vadd.f32 %v5922_v39, %v2778_v3  ;;  %vm2800_vm9 = vcmp.eq.f32.partialorder %v2799_v6, 8.507059e+37  ;;  %v9373_v6 = vld [vmem:[#allocation39_spill] sm:$0xff] }
 0x6df   :  { %v2783_v9 = vsel %vm2782_vm4, %v5922_v39, %v2779_v30  ;;  %v2794_v39 = vadd.f32 %v8208_v62, %v2793_v50 }
 0x6e0   :  { %v2788_v57 = vsel %vm2785_vm2, %v2787_v0, %v2783_v9 }
 0x6e1   :  { %v2808_v58 = vmul.f32 %v2788_v57, %v8141_v17  ;;  %v2754_v17 = vand.u32 2147483647, %v8196_v21  ;;  %v2798_v37 = vsel %vm2797_vm14, %v8208_v62, %v2794_v39  ;;  %v5926_v3 = vpop.eup %5925  ;;  %v9370_v57 = vld [vmem:[#allocation102_spill] sm:$0xff]  ;;  %v9372_v39 = vld [vmem:[#allocation105_spill] sm:$0xff] }
 0x6e2   :  { %v2803_v7 = vsel %vm2800_vm9, %v2802_v10, %v2798_v37  ;;  %v1255_v4 = vadd.f32 %v9372_v39, %v1166_v46  ;;  %v9375_v46 = vld [vmem:[#allocation100_spill] sm:$0xff] }
 0x6e3   :  { %v8225_v54 = vadd.f32 %v2810_v16, %v2808_v58  ;;  %vm2755_vm15 = vcmp.eq.f32.partialorder %v2754_v17, 8.507059e+37  ;;  %v9371_v16 = vld [vmem:[#allocation38_spill] sm:$0xff] }
 0x6e4   :  { %v2758_v51 = vsel %vm2755_vm15, %v2757_v40, %v2753_v36 }
 0x6e5   :  { %5927 = vtanh.f32 %v8225_v54  ;;  %v2815_v30 = vmul.f32 %v5926_v3, %v2758_v51 }
 0x6eb   :  { %v5928_v44 = vpop.eup %5927 }
 0x6ec   :  { %v2816_v0 = vmul.f32 %v5928_v44, %v2803_v7 }
 0x6ee   :  { %v2817_v21 = vpack.c.bf16 %v2816_v0, %v2815_v30  ;;  %v9374_v0 = vld [vmem:[#allocation40_spill] sm:$0xff] }
 0x6f0   :  { %2826 = vmatmul.bf16.vlgmr.msra.gmra.mxu1 %v2817_v21  ;;  %2840 = vmatmul.bf16.vlgmr.msra.gmra.mxu3 %v2817_v21 }
 0x6f1   :  { %2854 = vmatmul.bf16.vlgmr.msra.gmra.mxu0 %v2817_v21  ;;  %2868 = vmatmul.bf16.vlgmr.msra.gmra.mxu2 %v2817_v21 }
 0x6f2   :  { %3200 = vmatpush.bf16.msra.mxu1 %v6944_v8  ;;  %3214 = vmatpush.bf16.msra.mxu3 %v6929_v34 }
 0x6f3   :  { %3228 = vmatpush.bf16.msra.mxu0 %v6982_v27  ;;  %3242 = vmatpush.bf16.msra.mxu2 %v6996_v35 }
 0x6f6   :  { %3201 = vmatpush.bf16.msra.mxu1 %v7036_v52  ;;  %3215 = vmatpush.bf16.msra.mxu3 %v7021_v32 }
 0x6f7   :  { %3229 = vmatpush.bf16.msra.mxu0 %v7062_v49  ;;  %3243 = vmatpush.bf16.msra.mxu2 %v7076_v47 }
 0x6fa   :  { %3202 = vmatpush.bf16.msra.mxu1 %v7116_v22  ;;  %3216 = vmatpush.bf16.msra.mxu3 %v7101_v12 }
 0x6fb   :  { %3230 = vmatpush.bf16.msra.mxu0 %v7142_v38  ;;  %3244 = vmatpush.bf16.msra.mxu2 %v7156_v63 }
 0x6fe   :  { %3203 = vmatpush.bf16.msra.mxu1 %v7196_v11  ;;  %3217 = vmatpush.bf16.msra.mxu3 %v7181_v1 }
 0x6ff   :  { %3231 = vmatpush.bf16.msra.mxu0 %v7222_v2  ;;  %3245 = vmatpush.bf16.msra.mxu2 %v7236_v18 }
 0x702   :  { %3204 = vmatpush.bf16.msra.mxu1 %v7276_v31  ;;  %3218 = vmatpush.bf16.msra.mxu3 %v7261_v19 }
 0x703   :  { %3232 = vmatpush.bf16.msra.mxu0 %v7302_v45  ;;  %3246 = vmatpush.bf16.msra.mxu2 %v7316_v42 }
 0x706   :  { %3205 = vmatpush.bf16.msra.mxu1 %v7360_v53  ;;  %3219 = vmatpush.bf16.msra.mxu3 %v7346_v29 }
 0x707   :  { %3233 = vmatpush.bf16.msra.mxu0 %v7389_v14  ;;  %3247 = vmatpush.bf16.msra.mxu2 %v7400_v25 }
 0x70a   :  { %3206 = vmatpush.bf16.msra.mxu1 %v7440_v26  ;;  %3220 = vmatpush.bf16.msra.mxu3 %v7426_v48 }
 0x70b   :  { %3234 = vmatpush.bf16.msra.mxu0 %v7469_v56  ;;  %3248 = vmatpush.bf16.msra.mxu2 %v7480_v28 }
 0x70e   :  { %3207 = vmatpush.bf16.msra.mxu1 %v7521_v61  ;;  %3221 = vmatpush.bf16.msra.mxu3 %v7506_v55 }
 0x70f   :  { %3235 = vmatpush.bf16.msra.mxu0 %v7557_v15  ;;  %3249 = vmatpush.bf16.msra.mxu2 %v7573_v23 }
 0x76d   :  { %v2827_v33 = vpop.f32.mrf.mxu1 }
 0x76e   :  { %v2874_v62 = vadd.f32 %v2827_v33, %v9368_v20  ;;  %v2855_v13 = vpop.f32.mrf.mxu0 }
 0x76f   :  { %v2876_v58 = vadd.f32 %v2855_v13, %v9370_v57 }
 0x770   :  { %v5504_v9 = vmul.f32 -1.442695, %v2874_v62 }
 0x771   :  { %v5506_v10 = vmul.f32 -1.442695, %v2876_v58 }
 0x772   :  { %5929 = vpow2.f32 %v5504_v9 }
 0x773   :  { %v2841_v50 = vpop.f32.mrf.mxu3 }
 0x774   :  { %v2875_v60 = vadd.f32 %v2841_v50, %v9371_v16  ;;  %v2869_v20 = vpop.f32.mrf.mxu2 }
 0x775   :  { %v2829_v41 = vpop.f32.mrf.mxu1  ;;  %v2877_v50 = vadd.f32 %v2869_v20, %v9375_v46 }
 0x776   :  { %v5505_v17 = vmul.f32 -1.442695, %v2875_v60  ;;  %v2878_v36 = vadd.f32 %v2829_v41, %v9373_v6  ;;  %v2857_v37 = vpop.f32.mrf.mxu0 }
 0x777   :  { %v2880_v3 = vadd.f32 %v2857_v37, %v1255_v4 }
 0x778   :  { %v5930_v40 = vpop.eup %5929  ;;  %5931 = vpow2.f32 %v5505_v17  ;;  %v5507_v44 = vmul.f32 -1.442695, %v2878_v36 }
 0x779   :  { %v2900_v51 = vadd.f32 1.0, %v5930_v40  ;;  %v5509_v7 = vmul.f32 -1.442695, %v2880_v3 }
 0x77a   :  { %5933 = vpow2.f32 %v5507_v44 }
 0x77b   :  { %5935 = vrcp.f32 %v2900_v51  ;;  %v2843_v30 = vpop.f32.mrf.mxu3  ;;  %v2917_v41 = vand.u32 2147483648, %v2900_v51  ;;  %v2915_v6 = vand.u32 2147483647, %v2900_v51  ;;  %vm2911_vm1 = vweird.f32 %v2900_v51 }
 0x77c   :  { %5937 = vpow2.f32 %v5506_v10  ;;  %v2879_v21 = vadd.f32 %v2843_v30, %v9374_v0 }
 0x77d   :  { %5939 = vpow2.f32 %v5509_v7  ;;  %v2918_v44 = vor.u32 1.1754944e-38, %v2917_v41  ;;  %vm2916_vm6 = vcmp.eq.f32.partialorder %v2915_v6, 8.507059e+37 }
 0x77e   :  { %v5932_v33 = vpop.eup %5931  ;;  %v5508_v13 = vmul.f32 -1.442695, %v2879_v21 }
 0x77f   :  { %v2901_v62 = vadd.f32 1.0, %v5932_v33 }
 0x780   :  { %v5934_v9 = vpop.eup %5933 }
 0x781   :  { %v5936_v43 = vpop.eup %5935  ;;  %5941 = vrcp.f32 %v2901_v62  ;;  %v8280_v16 = vadd.f32 1.0, %v5934_v9  ;;  %v2932_v20 = vand.u32 2147483648, %v2901_v62  ;;  %vm2926_vm12 = vweird.f32 %v2901_v62 }
 0x782   :  { %v5938_v57 = vpop.eup %5937  ;;  %v2907_v58 = vmul.f32 %v5936_v43, %v2900_v51  ;;  %5943 = vpow2.f32 %v5508_v13  ;;  %vm2912_vm5 = vweird.f32 %v5936_v43  ;;  %v2930_v51 = vand.u32 2147483647, %v2901_v62 }
 0x783   :  { %v5940_v60 = vpop.eup %5939  ;;  %5945 = vrcp.f32 %v8280_v16  ;;  %v8283_v4 = vadd.f32 1.0, %v5938_v57  ;;  %vm2913_vm8 = vmor %vm2911_vm1, %vm2912_vm5  ;;  %v9376_v57 = vld [vmem:[#allocation101_spill] sm:$0xff]  ;;  %vm2956_vm11 = vweird.f32 %v8280_v16 }
 0x784   :  { %v2908_v39 = vsub.f32 1.0, %v2907_v58  ;;  %5947 = vtanh.f32 %v2877_v50  ;;  %v8285_v36 = vadd.f32 1.0, %v5940_v60  ;;  %v1344_v58 = vadd.f32 %v9376_v57, %v9365_v59 }
 0x785   :  { %5949 = vrcp.f32 %v8283_v4  ;;  %vm2931_vm2 = vcmp.eq.f32.partialorder %v2930_v51, 8.507059e+37  ;;  %v2960_v51 = vand.u32 2147483647, %v8280_v16 }
 0x786   :  { %v2909_v17 = vmul.f32 %v5936_v43, %v2908_v39  ;;  %5951 = vrcp.f32 %v8285_v36 }
 0x787   :  { %v5942_v37 = vpop.eup %5941  ;;  %vm2961_vm14 = vcmp.eq.f32.partialorder %v2960_v51, 8.507059e+37 }
 0x788   :  { %v5944_v3 = vpop.eup %5943  ;;  %v2922_v40 = vmul.f32 %v5942_v37, %v2901_v62  ;;  %v2910_v10 = vadd.f32 %v5936_v43, %v2909_v17  ;;  %vm2927_vm7 = vweird.f32 %v5942_v37  ;;  %v9377_v17 = vld [vmem:[#allocation104_spill] sm:$0xff] }
 0x789   :  { %v2904_v7 = vadd.f32 1.0, %v5944_v3  ;;  %v5946_v30 = vpop.eup %5945  ;;  %v1433_v6 = vadd.f32 %v9377_v17, %v1344_v58  ;;  %vm2928_vm4 = vmor %vm2926_vm12, %vm2927_vm7  ;;  %v2933_v3 = vor.u32 1.1754944e-38, %v2932_v20  ;;  %v2962_v20 = vand.u32 2147483648, %v8280_v16 }
 0x78a   :  { %v2923_v0 = vsub.f32 1.0, %v2922_v40  ;;  %v2914_v21 = vsel %vm2913_vm8, %v5936_v43, %v2910_v10  ;;  %v5948_v33 = vpop.eup %5947  ;;  %v2952_v9 = vmul.f32 %v5946_v30, %v8280_v16  ;;  %v2871_v43 = vpop.f32.mrf.mxu2  ;;  %vm2957_vm13 = vweird.f32 %v5946_v30 }
 0x78b   :  { %v2919_v13 = vsel %vm2916_vm6, %v2918_v44, %v2914_v21  ;;  %5953 = vrcp.f32 %v2904_v7  ;;  %v8292_v41 = vpop.eup %5949  ;;  %vm2958_vm10 = vmor %vm2956_vm11, %vm2957_vm13  ;;  %vm2971_vm0 = vweird.f32 %v2904_v7  ;;  %vm2941_vm8 = vweird.f32 %v8283_v4 }
 0x78c   :  { %v2924_v46 = vmul.f32 %v5942_v37, %v2923_v0  ;;  %v3000_v50 = vmul.f32 %v5948_v33, %v2919_v13  ;;  %v2953_v60 = vsub.f32 1.0, %v2952_v9  ;;  %v8295_v10 = vpop.eup %5951  ;;  %v2881_v33 = vadd.f32 %v2871_v43, %v1433_v6 }
 0x78d   :  { %v2982_v57 = vmul.f32 %v8295_v10, %v8285_v36  ;;  %v2975_v43 = vand.u32 2147483647, %v2904_v7  ;;  %vm2942_vm5 = vweird.f32 %v8292_v41  ;;  %vm2987_vm1 = vweird.f32 %v8295_v10 }
 0x78e   :  { %v2925_v39 = vadd.f32 %v5942_v37, %v2924_v46  ;;  %v2954_v40 = vmul.f32 %v5946_v30, %v2953_v60  ;;  %v2937_v46 = vmul.f32 %v8292_v41, %v8283_v4  ;;  %v2977_v60 = vand.u32 2147483648, %v2904_v7  ;;  %vm2943_vm6 = vmor %vm2941_vm8, %vm2942_vm5 }
 0x78f   :  { %5955 = vtanh.f32 %v2881_v33  ;;  %v2983_v6 = vsub.f32 1.0, %v2982_v57  ;;  %vm2976_vm9 = vcmp.eq.f32.partialorder %v2975_v43, 8.507059e+37  ;;  %v2947_v57 = vand.u32 2147483648, %v8283_v4 }
 0x790   :  { %v2929_v44 = vsel %vm2928_vm4, %v5942_v37, %v2925_v39  ;;  %v2955_v62 = vadd.f32 %v5946_v30, %v2954_v40  ;;  %v2938_v17 = vsub.f32 1.0, %v2937_v46  ;;  %vm2986_vm7 = vweird.f32 %v8285_v36 }
 0x791   :  { %v5954_v0 = vpop.eup %5953  ;;  %v2934_v21 = vsel %vm2931_vm2, %v2933_v3, %v2929_v44  ;;  %v2963_v3 = vor.u32 1.1754944e-38, %v2962_v20  ;;  %v2984_v33 = vmul.f32 %v8295_v10, %v2983_v6  ;;  %v2992_v20 = vand.u32 2147483648, %v8285_v36  ;;  %vm2988_vm12 = vmor %vm2986_vm7, %vm2987_vm1 }
 0x792   :  { %v2998_v13 = vmul.f32 %v2934_v21, %v8216_v5  ;;  %v2967_v9 = vmul.f32 %v5954_v0, %v2904_v7  ;;  %vm2972_vm3 = vweird.f32 %v5954_v0  ;;  %v2959_v39 = vsel %vm2958_vm10, %v5946_v30, %v2955_v62 }
 0x793   :  { %vm2973_vm15 = vmor %vm2971_vm0, %vm2972_vm3  ;;  %v2964_v44 = vsel %vm2961_vm14, %v2963_v3, %v2959_v39  ;;  %v2939_v16 = vmul.f32 %v8292_v41, %v2938_v17  ;;  %v2948_v39 = vor.u32 1.1754944e-38, %v2947_v57  ;;  %v2993_v43 = vor.u32 1.1754944e-38, %v2992_v20 }
 0x794   :  { %v8303_v58 = vadd.f32 %v3000_v50, %v2998_v13  ;;  %v2968_v37 = vsub.f32 1.0, %v2967_v9  ;;  %v2978_v50 = vor.u32 1.1754944e-38, %v2977_v60 }
 0x795   :  { %v5956_v13 = vpop.eup %5955  ;;  %v2940_v46 = vadd.f32 %v8292_v41, %v2939_v16 }
 0x796   :  { %v2969_v5 = vmul.f32 %v5954_v0, %v2968_v37  ;;  %v3001_v62 = vmul.f32 %v5956_v13, %v2964_v44  ;;  %5957 = vtanh.f32 %v8303_v58  ;;  %v2990_v37 = vand.u32 2147483647, %v8285_v36  ;;  %v9379_v13 = vld [vmem:[#allocation109_spill] sm:$0xff] }
 0x797   :  { %v2944_v51 = vsel %vm2943_vm6, %v8292_v41, %v2940_v46  ;;  %v9378_v41 = vld [vmem:[#allocation41_spill] sm:$0xff]  ;;  %v1171_v16 = vadd.f32 %v9379_v13, %v9357_v24 }
 0x798   :  { %v2970_v40 = vadd.f32 %v5954_v0, %v2969_v5  ;;  %vm2991_vm2 = vcmp.eq.f32.partialorder %v2990_v37, 8.507059e+37  ;;  %v9383_v37 = vld [vmem:[#allocation43_spill] sm:$0xff] }
 0x79a   :  { %v2974_v21 = vsel %vm2973_vm15, %v5954_v0, %v2970_v40  ;;  %v2985_v0 = vadd.f32 %v8295_v10, %v2984_v33 }
 0x79b   :  { %v2979_v9 = vsel %vm2976_vm9, %v2978_v50, %v2974_v21 }
 0x79c   :  { %v2999_v30 = vmul.f32 %v2979_v9, %v8225_v54  ;;  %v2945_v54 = vand.u32 2147483647, %v8283_v4  ;;  %v2989_v60 = vsel %vm2988_vm12, %v8295_v10, %v2985_v0  ;;  %v5958_v5 = vpop.eup %5957  ;;  %v9380_v9 = vld [vmem:[#allocation108_spill] sm:$0xff]  ;;  %v9382_v0 = vld [vmem:[#allocation111_spill] sm:$0xff] }
 0x79d   :  { %v2994_v3 = vsel %vm2991_vm2, %v2993_v43, %v2989_v60  ;;  %v1260_v57 = vadd.f32 %v9382_v0, %v1171_v16  ;;  %v9385_v16 = vld [vmem:[#allocation106_spill] sm:$0xff] }
 0x79e   :  { %v8312_v7 = vadd.f32 %v3001_v62, %v2999_v30  ;;  %vm2946_vm4 = vcmp.eq.f32.partialorder %v2945_v54, 8.507059e+37  ;;  %v9381_v62 = vld [vmem:[#allocation42_spill] sm:$0xff] }
 0x79f   :  { %v2949_v6 = vsel %vm2946_vm4, %v2948_v39, %v2944_v51 }
 0x7a0   :  { %5959 = vtanh.f32 %v8312_v7  ;;  %v3006_v40 = vmul.f32 %v5958_v5, %v2949_v6 }
 0x7a6   :  { %v5960_v17 = vpop.eup %5959 }
 0x7a7   :  { %v3007_v50 = vmul.f32 %v5960_v17, %v2994_v3 }
 0x7a9   :  { %v3008_v4 = vpack.c.bf16 %v3007_v50, %v3006_v40  ;;  %v9384_v50 = vld [vmem:[#allocation44_spill] sm:$0xff] }
 0x7ab   :  { %3017 = vmatmul.bf16.vlgmr.msrb.gmra.mxu1 %v3008_v4  ;;  %3031 = vmatmul.bf16.vlgmr.msrb.gmra.mxu3 %v3008_v4 }
 0x7ac   :  { %3045 = vmatmul.bf16.vlgmr.msrb.gmra.mxu0 %v3008_v4  ;;  %3059 = vmatmul.bf16.vlgmr.msrb.gmra.mxu2 %v3008_v4 }
 0x7ad   :  { %3391 = vmatpush.bf16.msrb.mxu1 %v6944_v8  ;;  %3405 = vmatpush.bf16.msrb.mxu3 %v6929_v34 }
 0x7ae   :  { %3419 = vmatpush.bf16.msrb.mxu0 %v6982_v27  ;;  %3433 = vmatpush.bf16.msrb.mxu2 %v6996_v35 }
 0x7b1   :  { %3392 = vmatpush.bf16.msrb.mxu1 %v7036_v52  ;;  %3406 = vmatpush.bf16.msrb.mxu3 %v7021_v32 }
 0x7b2   :  { %3420 = vmatpush.bf16.msrb.mxu0 %v7062_v49  ;;  %3434 = vmatpush.bf16.msrb.mxu2 %v7076_v47 }
 0x7b5   :  { %3393 = vmatpush.bf16.msrb.mxu1 %v7116_v22  ;;  %3407 = vmatpush.bf16.msrb.mxu3 %v7101_v12 }
 0x7b6   :  { %3421 = vmatpush.bf16.msrb.mxu0 %v7142_v38  ;;  %3435 = vmatpush.bf16.msrb.mxu2 %v7156_v63 }
 0x7b9   :  { %3394 = vmatpush.bf16.msrb.mxu1 %v7196_v11  ;;  %3408 = vmatpush.bf16.msrb.mxu3 %v7181_v1 }
 0x7ba   :  { %3422 = vmatpush.bf16.msrb.mxu0 %v7222_v2  ;;  %3436 = vmatpush.bf16.msrb.mxu2 %v7236_v18 }
 0x7bd   :  { %3395 = vmatpush.bf16.msrb.mxu1 %v7276_v31  ;;  %3409 = vmatpush.bf16.msrb.mxu3 %v7261_v19 }
 0x7be   :  { %3423 = vmatpush.bf16.msrb.mxu0 %v7302_v45  ;;  %3437 = vmatpush.bf16.msrb.mxu2 %v7316_v42 }
 0x7c1   :  { %3396 = vmatpush.bf16.msrb.mxu1 %v7360_v53  ;;  %3410 = vmatpush.bf16.msrb.mxu3 %v7346_v29 }
 0x7c2   :  { %3424 = vmatpush.bf16.msrb.mxu0 %v7389_v14  ;;  %3438 = vmatpush.bf16.msrb.mxu2 %v7400_v25 }
 0x7c5   :  { %3397 = vmatpush.bf16.msrb.mxu1 %v7440_v26  ;;  %3411 = vmatpush.bf16.msrb.mxu3 %v7426_v48 }
 0x7c6   :  { %3425 = vmatpush.bf16.msrb.mxu0 %v7469_v56  ;;  %3439 = vmatpush.bf16.msrb.mxu2 %v7480_v28 }
 0x7c9   :  { %3398 = vmatpush.bf16.msrb.mxu1 %v7521_v61  ;;  %3412 = vmatpush.bf16.msrb.mxu3 %v7506_v55 }
 0x7ca   :  { %3426 = vmatpush.bf16.msrb.mxu0 %v7557_v15  ;;  %3440 = vmatpush.bf16.msrb.mxu2 %v7573_v23 }
 0x828   :  { %v3018_v36 = vpop.f32.mrf.mxu1 }
 0x829   :  { %v3065_v10 = vadd.f32 %v3018_v36, %v9378_v41  ;;  %v3046_v44 = vpop.f32.mrf.mxu0 }
 0x82a   :  { %v3067_v30 = vadd.f32 %v3046_v44, %v9380_v9 }
 0x82b   :  { %v5510_v21 = vmul.f32 -1.442695, %v3065_v10 }
 0x82c   :  { %v5512_v43 = vmul.f32 -1.442695, %v3067_v30 }
 0x82d   :  { %5961 = vpow2.f32 %v5510_v21 }
 0x82e   :  { %v3032_v33 = vpop.f32.mrf.mxu3 }
 0x82f   :  { %v3066_v46 = vadd.f32 %v3032_v33, %v9381_v62  ;;  %v3060_v41 = vpop.f32.mrf.mxu2 }
 0x830   :  { %v3020_v20 = vpop.f32.mrf.mxu1  ;;  %v3068_v33 = vadd.f32 %v3060_v41, %v9385_v16 }
 0x831   :  { %v5511_v54 = vmul.f32 -1.442695, %v3066_v46  ;;  %v3069_v51 = vadd.f32 %v3020_v20, %v9383_v37  ;;  %v3048_v60 = vpop.f32.mrf.mxu0 }
 0x832   :  { %v3071_v5 = vadd.f32 %v3048_v60, %v1260_v57 }
 0x833   :  { %v5962_v39 = vpop.eup %5961  ;;  %5963 = vpow2.f32 %v5511_v54  ;;  %v5513_v17 = vmul.f32 -1.442695, %v3069_v51 }
 0x834   :  { %v3091_v6 = vadd.f32 1.0, %v5962_v39  ;;  %v5515_v3 = vmul.f32 -1.442695, %v3071_v5 }
 0x835   :  { %5965 = vpow2.f32 %v5513_v17 }
 0x836   :  { %5967 = vrcp.f32 %v3091_v6  ;;  %v3034_v40 = vpop.f32.mrf.mxu3  ;;  %v3108_v20 = vand.u32 2147483648, %v3091_v6  ;;  %v3106_v37 = vand.u32 2147483647, %v3091_v6  ;;  %vm3102_vm11 = vweird.f32 %v3091_v6 }
 0x837   :  { %5969 = vpow2.f32 %v5512_v43  ;;  %v3070_v4 = vadd.f32 %v3034_v40, %v9384_v50 }
 0x838   :  { %5971 = vpow2.f32 %v5515_v3  ;;  %v3109_v17 = vor.u32 1.1754944e-38, %v3108_v20  ;;  %vm3107_vm3 = vcmp.eq.f32.partialorder %v3106_v37, 8.507059e+37 }
 0x839   :  { %v5964_v36 = vpop.eup %5963  ;;  %v5514_v44 = vmul.f32 -1.442695, %v3070_v4 }
 0x83a   :  { %v3092_v10 = vadd.f32 1.0, %v5964_v36 }
 0x83b   :  { %v5966_v21 = vpop.eup %5965 }
 0x83c   :  { %v5968_v13 = vpop.eup %5967  ;;  %5973 = vrcp.f32 %v3092_v10  ;;  %v8367_v62 = vadd.f32 1.0, %v5966_v21  ;;  %v3123_v41 = vand.u32 2147483648, %v3092_v10  ;;  %vm3117_vm14 = vweird.f32 %v3092_v10 }
 0x83d   :  { %v5970_v9 = vpop.eup %5969  ;;  %v3098_v30 = vmul.f32 %v5968_v13, %v3091_v6  ;;  %5975 = vpow2.f32 %v5514_v44  ;;  %vm3103_vm13 = vweird.f32 %v5968_v13  ;;  %v3121_v6 = vand.u32 2147483647, %v3092_v10 }
 0x83e   :  { %v5972_v46 = vpop.eup %5971  ;;  %5977 = vrcp.f32 %v8367_v62  ;;  %v8370_v57 = vadd.f32 1.0, %v5970_v9  ;;  %vm3104_vm10 = vmor %vm3102_vm11, %vm3103_vm13  ;;  %v9386_v9 = vld [vmem:[#allocation107_spill] sm:$0xff]  ;;  %vm3147_vm1 = vweird.f32 %v8367_v62 }
 0x83f   :  { %v3099_v0 = vsub.f32 1.0, %v3098_v30  ;;  %5979 = vtanh.f32 %v3068_v33  ;;  %v8372_v51 = vadd.f32 1.0, %v5972_v46  ;;  %v1349_v30 = vadd.f32 %v9386_v9, %v9365_v59 }
 0x840   :  { %5981 = vrcp.f32 %v8370_v57  ;;  %vm3122_vm9 = vcmp.eq.f32.partialorder %v3121_v6, 8.507059e+37  ;;  %v3151_v6 = vand.u32 2147483647, %v8367_v62 }
 0x841   :  { %v3100_v54 = vmul.f32 %v5968_v13, %v3099_v0  ;;  %5983 = vrcp.f32 %v8372_v51 }
 0x842   :  { %v5974_v60 = vpop.eup %5973  ;;  %vm3152_vm12 = vcmp.eq.f32.partialorder %v3151_v6, 8.507059e+37 }
 0x843   :  { %v5976_v5 = vpop.eup %5975  ;;  %v3113_v39 = vmul.f32 %v5974_v60, %v3092_v10  ;;  %v3101_v43 = vadd.f32 %v5968_v13, %v3100_v54  ;;  %vm3118_vm0 = vweird.f32 %v5974_v60  ;;  %v9387_v54 = vld [vmem:[#allocation110_spill] sm:$0xff] }
 0x844   :  { %v3095_v3 = vadd.f32 1.0, %v5976_v5  ;;  %v5978_v40 = vpop.eup %5977  ;;  %v1438_v37 = vadd.f32 %v9387_v54, %v1349_v30  ;;  %vm3119_vm15 = vmor %vm3117_vm14, %vm3118_vm0  ;;  %v3124_v5 = vor.u32 1.1754944e-38, %v3123_v41  ;;  %v3153_v41 = vand.u32 2147483648, %v8367_v62 }
 0x845   :  { %v3114_v50 = vsub.f32 1.0, %v3113_v39  ;;  %v3105_v4 = vsel %vm3104_vm10, %v5968_v13, %v3101_v43  ;;  %v5980_v36 = vpop.eup %5979  ;;  %v3143_v21 = vmul.f32 %v5978_v40, %v8367_v62  ;;  %v3062_v13 = vpop.f32.mrf.mxu2  ;;  %vm3148_vm5 = vweird.f32 %v5978_v40 }
 0x846   :  { %v3110_v44 = vsel %vm3107_vm3, %v3109_v17, %v3105_v4  ;;  %5985 = vrcp.f32 %v3095_v3  ;;  %v8379_v20 = vpop.eup %5981  ;;  %vm3149_vm8 = vmor %vm3147_vm1, %vm3148_vm5  ;;  %vm3162_vm7 = vweird.f32 %v3095_v3  ;;  %vm3132_vm10 = vweird.f32 %v8370_v57 }
 0x847   :  { %v3115_v16 = vmul.f32 %v5974_v60, %v3114_v50  ;;  %v3191_v33 = vmul.f32 %v5980_v36, %v3110_v44  ;;  %v3144_v46 = vsub.f32 1.0, %v3143_v21  ;;  %v8382_v43 = vpop.eup %5983  ;;  %v3072_v36 = vadd.f32 %v3062_v13, %v1438_v37 }
 0x848   :  { %v3173_v9 = vmul.f32 %v8382_v43, %v8372_v51  ;;  %v3166_v13 = vand.u32 2147483647, %v3095_v3  ;;  %vm3133_vm13 = vweird.f32 %v8379_v20  ;;  %vm3178_vm11 = vweird.f32 %v8382_v43 }
 0x849   :  { %v3116_v0 = vadd.f32 %v5974_v60, %v3115_v16  ;;  %v3145_v39 = vmul.f32 %v5978_v40, %v3144_v46  ;;  %v3128_v16 = vmul.f32 %v8379_v20, %v8370_v57  ;;  %v3168_v46 = vand.u32 2147483648, %v3095_v3  ;;  %vm3134_vm3 = vmor %vm3132_vm10, %vm3133_vm13 }
 0x84a   :  { %5987 = vtanh.f32 %v3072_v36  ;;  %v3174_v37 = vsub.f32 1.0, %v3173_v9  ;;  %vm3167_vm2 = vcmp.eq.f32.partialorder %v3166_v13, 8.507059e+37  ;;  %v3138_v9 = vand.u32 2147483648, %v8370_v57 }
 0x84b   :  { %v3120_v17 = vsel %vm3119_vm15, %v5974_v60, %v3116_v0  ;;  %v3146_v10 = vadd.f32 %v5978_v40, %v3145_v39  ;;  %v3129_v54 = vsub.f32 1.0, %v3128_v16  ;;  %vm3177_vm0 = vweird.f32 %v8372_v51 }
 0x84c   :  { %v5986_v50 = vpop.eup %5985  ;;  %v3125_v4 = vsel %vm3122_vm9, %v3124_v5, %v3120_v17  ;;  %v3154_v5 = vor.u32 1.1754944e-38, %v3153_v41  ;;  %v3175_v36 = vmul.f32 %v8382_v43, %v3174_v37  ;;  %v3183_v41 = vand.u32 2147483648, %v8372_v51  ;;  %vm3179_vm14 = vmor %vm3177_vm0, %vm3178_vm11 }
 0x84d   :  { %v3189_v44 = vmul.f32 %v3125_v4, %v8303_v58  ;;  %v3158_v21 = vmul.f32 %v5986_v50, %v3095_v3  ;;  %vm3163_vm6 = vweird.f32 %v5986_v50  ;;  %v3150_v0 = vsel %vm3149_vm8, %v5978_v40, %v3146_v10 }
 0x84e   :  { %vm3164_vm4 = vmor %vm3162_vm7, %vm3163_vm6  ;;  %v3155_v17 = vsel %vm3152_vm12, %v3154_v5, %v3150_v0  ;;  %v3130_v62 = vmul.f32 %v8379_v20, %v3129_v54  ;;  %v3139_v0 = vor.u32 1.1754944e-38, %v3138_v9  ;;  %v3184_v13 = vor.u32 1.1754944e-38, %v3183_v41 }
 0x84f   :  { %v8390_v30 = vadd.f32 %v3191_v33, %v3189_v44  ;;  %v3159_v60 = vsub.f32 1.0, %v3158_v21  ;;  %v3169_v33 = vor.u32 1.1754944e-38, %v3168_v46 }
 0x850   :  { %v5988_v44 = vpop.eup %5987  ;;  %v3131_v16 = vadd.f32 %v8379_v20, %v3130_v62 }
 0x851   :  { %v3160_v58 = vmul.f32 %v5986_v50, %v3159_v60  ;;  %v3192_v10 = vmul.f32 %v5988_v44, %v3155_v17  ;;  %5989 = vtanh.f32 %v8390_v30  ;;  %v3181_v60 = vand.u32 2147483647, %v8372_v51  ;;  %v9389_v44 = vld [vmem:[#allocation115_spill] sm:$0xff] }
 0x852   :  { %v3135_v6 = vsel %vm3134_vm3, %v8379_v20, %v3131_v16  ;;  %v9388_v20 = vld [vmem:[#allocation45_spill] sm:$0xff]  ;;  %v1176_v62 = vadd.f32 %v9389_v44, %v9357_v24 }
 0x853   :  { %v3161_v39 = vadd.f32 %v5986_v50, %v3160_v58  ;;  %vm3182_vm9 = vcmp.eq.f32.partialorder %v3181_v60, 8.507059e+37  ;;  %v9393_v60 = vld [vmem:[#allocation47_spill] sm:$0xff] }
 0x855   :  { %v3165_v4 = vsel %vm3164_vm4, %v5986_v50, %v3161_v39  ;;  %v3176_v50 = vadd.f32 %v8382_v43, %v3175_v36 }
 0x856   :  { %v3170_v21 = vsel %vm3167_vm2, %v3169_v33, %v3165_v4 }
 0x857   :  { %v3190_v40 = vmul.f32 %v3170_v21, %v8312_v7  ;;  %v3136_v7 = vand.u32 2147483647, %v8370_v57  ;;  %v3180_v46 = vsel %vm3179_vm14, %v8382_v43, %v3176_v50  ;;  %v5990_v58 = vpop.eup %5989  ;;  %v9390_v21 = vld [vmem:[#allocation114_spill] sm:$0xff]  ;;  %v9392_v50 = vld [vmem:[#allocation117_spill] sm:$0xff] }
 0x858   :  { %v3185_v5 = vsel %vm3182_vm9, %v3184_v13, %v3180_v46  ;;  %v1265_v9 = vadd.f32 %v9392_v50, %v1176_v62  ;;  %v9395_v62 = vld [vmem:[#allocation112_spill] sm:$0xff] }
 0x859   :  { %v8399_v3 = vadd.f32 %v3192_v10, %v3190_v40  ;;  %vm3137_vm15 = vcmp.eq.f32.partialorder %v3136_v7, 8.507059e+37  ;;  %v9391_v10 = vld [vmem:[#allocation46_spill] sm:$0xff] }
 0x85a   :  { %v3140_v37 = vsel %vm3137_vm15, %v3139_v0, %v3135_v6 }
 0x85b   :  { %5991 = vtanh.f32 %v8399_v3  ;;  %v3197_v39 = vmul.f32 %v5990_v58, %v3140_v37 }
 0x861   :  { %v5992_v54 = vpop.eup %5991 }
 0x862   :  { %v3198_v33 = vmul.f32 %v5992_v54, %v3185_v5 }
 0x864   :  { %v3199_v57 = vpack.c.bf16 %v3198_v33, %v3197_v39  ;;  %v9394_v33 = vld [vmem:[#allocation48_spill] sm:$0xff] }
 0x866   :  { %3208 = vmatmul.bf16.vlgmr.msra.gmra.mxu1 %v3199_v57  ;;  %3222 = vmatmul.bf16.vlgmr.msra.gmra.mxu3 %v3199_v57 }
 0x867   :  { %3236 = vmatmul.bf16.vlgmr.msra.gmra.mxu0 %v3199_v57  ;;  %3250 = vmatmul.bf16.vlgmr.msra.gmra.mxu2 %v3199_v57 }
 0x868   :  { %3582 = vmatpush.bf16.msra.mxu1 %v6944_v8  ;;  %3596 = vmatpush.bf16.msra.mxu3 %v6929_v34 }
 0x869   :  { %3610 = vmatpush.bf16.msra.mxu0 %v6982_v27  ;;  %3624 = vmatpush.bf16.msra.mxu2 %v6996_v35 }
 0x86c   :  { %3583 = vmatpush.bf16.msra.mxu1 %v7036_v52  ;;  %3597 = vmatpush.bf16.msra.mxu3 %v7021_v32 }
 0x86d   :  { %3611 = vmatpush.bf16.msra.mxu0 %v7062_v49  ;;  %3625 = vmatpush.bf16.msra.mxu2 %v7076_v47 }
 0x870   :  { %3584 = vmatpush.bf16.msra.mxu1 %v7116_v22  ;;  %3598 = vmatpush.bf16.msra.mxu3 %v7101_v12 }
 0x871   :  { %3612 = vmatpush.bf16.msra.mxu0 %v7142_v38  ;;  %3626 = vmatpush.bf16.msra.mxu2 %v7156_v63 }
 0x874   :  { %3585 = vmatpush.bf16.msra.mxu1 %v7196_v11  ;;  %3599 = vmatpush.bf16.msra.mxu3 %v7181_v1 }
 0x875   :  { %3613 = vmatpush.bf16.msra.mxu0 %v7222_v2  ;;  %3627 = vmatpush.bf16.msra.mxu2 %v7236_v18 }
 0x878   :  { %3586 = vmatpush.bf16.msra.mxu1 %v7276_v31  ;;  %3600 = vmatpush.bf16.msra.mxu3 %v7261_v19 }
 0x879   :  { %3614 = vmatpush.bf16.msra.mxu0 %v7302_v45  ;;  %3628 = vmatpush.bf16.msra.mxu2 %v7316_v42 }
 0x87c   :  { %3587 = vmatpush.bf16.msra.mxu1 %v7360_v53  ;;  %3601 = vmatpush.bf16.msra.mxu3 %v7346_v29 }
 0x87d   :  { %3615 = vmatpush.bf16.msra.mxu0 %v7389_v14  ;;  %3629 = vmatpush.bf16.msra.mxu2 %v7400_v25 }
 0x880   :  { %3588 = vmatpush.bf16.msra.mxu1 %v7440_v26  ;;  %3602 = vmatpush.bf16.msra.mxu3 %v7426_v48 }
 0x881   :  { %3616 = vmatpush.bf16.msra.mxu0 %v7469_v56  ;;  %3630 = vmatpush.bf16.msra.mxu2 %v7480_v28 }
 0x884   :  { %3589 = vmatpush.bf16.msra.mxu1 %v7521_v61  ;;  %3603 = vmatpush.bf16.msra.mxu3 %v7506_v55 }
 0x885   :  { %3617 = vmatpush.bf16.msra.mxu0 %v7557_v15  ;;  %3631 = vmatpush.bf16.msra.mxu2 %v7573_v23 }
 0x8e3   :  { %v3209_v51 = vpop.f32.mrf.mxu1 }
 0x8e4   :  { %v3256_v43 = vadd.f32 %v3209_v51, %v9388_v20  ;;  %v3237_v17 = vpop.f32.mrf.mxu0 }
 0x8e5   :  { %v3258_v40 = vadd.f32 %v3237_v17, %v9390_v21 }
 0x8e6   :  { %v5516_v4 = vmul.f32 -1.442695, %v3256_v43 }
 0x8e7   :  { %v5518_v13 = vmul.f32 -1.442695, %v3258_v40 }
 0x8e8   :  { %5993 = vpow2.f32 %v5516_v4 }
 0x8e9   :  { %v3223_v36 = vpop.f32.mrf.mxu3 }
 0x8ea   :  { %v3257_v16 = vadd.f32 %v3223_v36, %v9391_v10  ;;  %v3251_v20 = vpop.f32.mrf.mxu2 }
 0x8eb   :  { %v3211_v41 = vpop.f32.mrf.mxu1  ;;  %v3259_v36 = vadd.f32 %v3251_v20, %v9395_v62 }
 0x8ec   :  { %v5517_v7 = vmul.f32 -1.442695, %v3257_v16  ;;  %v3260_v6 = vadd.f32 %v3211_v41, %v9393_v60  ;;  %v3239_v46 = vpop.f32.mrf.mxu0 }
 0x8ed   :  { %v3262_v58 = vadd.f32 %v3239_v46, %v1265_v9 }
 0x8ee   :  { %v5994_v0 = vpop.eup %5993  ;;  %5995 = vpow2.f32 %v5517_v7  ;;  %v5519_v54 = vmul.f32 -1.442695, %v3260_v6 }
 0x8ef   :  { %v3282_v37 = vadd.f32 1.0, %v5994_v0  ;;  %v5521_v5 = vmul.f32 -1.442695, %v3262_v58 }
 0x8f0   :  { %5997 = vpow2.f32 %v5519_v54 }
 0x8f1   :  { %5999 = vrcp.f32 %v3282_v37  ;;  %v3225_v39 = vpop.f32.mrf.mxu3  ;;  %v3299_v41 = vand.u32 2147483648, %v3282_v37  ;;  %v3297_v60 = vand.u32 2147483647, %v3282_v37  ;;  %vm3293_vm1 = vweird.f32 %v3282_v37 }
 0x8f2   :  { %6001 = vpow2.f32 %v5518_v13  ;;  %v3261_v57 = vadd.f32 %v3225_v39, %v9394_v33 }
 0x8f3   :  { %6003 = vpow2.f32 %v5521_v5  ;;  %v3300_v54 = vor.u32 1.1754944e-38, %v3299_v41  ;;  %vm3298_vm6 = vcmp.eq.f32.partialorder %v3297_v60, 8.507059e+37 }
 0x8f4   :  { %v5996_v51 = vpop.eup %5995  ;;  %v5520_v17 = vmul.f32 -1.442695, %v3261_v57 }
 0x8f5   :  { %v3283_v43 = vadd.f32 1.0, %v5996_v51 }
 0x8f6   :  { %v5998_v4 = vpop.eup %5997 }
 0x8f7   :  { %v6000_v44 = vpop.eup %5999  ;;  %6005 = vrcp.f32 %v3283_v43  ;;  %v8454_v10 = vadd.f32 1.0, %v5998_v4  ;;  %v3314_v20 = vand.u32 2147483648, %v3283_v43  ;;  %vm3308_vm12 = vweird.f32 %v3283_v43 }
 0x8f8   :  { %v6002_v21 = vpop.eup %6001  ;;  %v3289_v40 = vmul.f32 %v6000_v44, %v3282_v37  ;;  %6007 = vpow2.f32 %v5520_v17  ;;  %vm3294_vm5 = vweird.f32 %v6000_v44  ;;  %v3312_v37 = vand.u32 2147483647, %v3283_v43 }
 0x8f9   :  { %v6004_v16 = vpop.eup %6003  ;;  %6009 = vrcp.f32 %v8454_v10  ;;  %v8457_v9 = vadd.f32 1.0, %v6002_v21  ;;  %vm3295_vm8 = vmor %vm3293_vm1, %vm3294_vm5  ;;  %v9396_v21 = vld [vmem:[#allocation113_spill] sm:$0xff]  ;;  %vm3338_vm11 = vweird.f32 %v8454_v10 }
 0x8fa   :  { %v3290_v50 = vsub.f32 1.0, %v3289_v40  ;;  %6011 = vtanh.f32 %v3259_v36  ;;  %v8459_v6 = vadd.f32 1.0, %v6004_v16  ;;  %v1354_v40 = vadd.f32 %v9396_v21, %v9365_v59 }
 0x8fb   :  { %6013 = vrcp.f32 %v8457_v9  ;;  %vm3313_vm2 = vcmp.eq.f32.partialorder %v3312_v37, 8.507059e+37  ;;  %v3342_v37 = vand.u32 2147483647, %v8454_v10 }
 0x8fc   :  { %v3291_v7 = vmul.f32 %v6000_v44, %v3290_v50  ;;  %6015 = vrcp.f32 %v8459_v6 }
 0x8fd   :  { %v6006_v46 = vpop.eup %6005  ;;  %vm3343_vm14 = vcmp.eq.f32.partialorder %v3342_v37, 8.507059e+37 }
 0x8fe   :  { %v6008_v58 = vpop.eup %6007  ;;  %v3304_v0 = vmul.f32 %v6006_v46, %v3283_v43  ;;  %v3292_v13 = vadd.f32 %v6000_v44, %v3291_v7  ;;  %vm3309_vm7 = vweird.f32 %v6006_v46  ;;  %v9397_v7 = vld [vmem:[#allocation116_spill] sm:$0xff] }
 0x8ff   :  { %v3286_v5 = vadd.f32 1.0, %v6008_v58  ;;  %v6010_v39 = vpop.eup %6009  ;;  %v1443_v60 = vadd.f32 %v9397_v7, %v1354_v40  ;;  %vm3310_vm4 = vmor %vm3308_vm12, %vm3309_vm7  ;;  %v3315_v58 = vor.u32 1.1754944e-38, %v3314_v20  ;;  %v3344_v20 = vand.u32 2147483648, %v8454_v10 }
 0x900   :  { %v3305_v33 = vsub.f32 1.0, %v3304_v0  ;;  %v3296_v57 = vsel %vm3295_vm8, %v6000_v44, %v3292_v13  ;;  %v6012_v51 = vpop.eup %6011  ;;  %v3334_v4 = vmul.f32 %v6010_v39, %v8454_v10  ;;  %v3253_v44 = vpop.f32.mrf.mxu2  ;;  %vm3339_vm13 = vweird.f32 %v6010_v39 }
 0x901   :  { %v3301_v17 = vsel %vm3298_vm6, %v3300_v54, %v3296_v57  ;;  %6017 = vrcp.f32 %v3286_v5  ;;  %v8466_v41 = vpop.eup %6013  ;;  %vm3340_vm10 = vmor %vm3338_vm11, %vm3339_vm13  ;;  %vm3353_vm0 = vweird.f32 %v3286_v5  ;;  %vm3323_vm8 = vweird.f32 %v8457_v9 }
 0x902   :  { %v3306_v62 = vmul.f32 %v6006_v46, %v3305_v33  ;;  %v3382_v36 = vmul.f32 %v6012_v51, %v3301_v17  ;;  %v3335_v16 = vsub.f32 1.0, %v3334_v4  ;;  %v8469_v13 = vpop.eup %6015  ;;  %v3263_v51 = vadd.f32 %v3253_v44, %v1443_v60 }
 0x903   :  { %v3364_v21 = vmul.f32 %v8469_v13, %v8459_v6  ;;  %v3357_v44 = vand.u32 2147483647, %v3286_v5  ;;  %vm3324_vm5 = vweird.f32 %v8466_v41  ;;  %vm3369_vm1 = vweird.f32 %v8469_v13 }
 0x904   :  { %v3307_v50 = vadd.f32 %v6006_v46, %v3306_v62  ;;  %v3336_v0 = vmul.f32 %v6010_v39, %v3335_v16  ;;  %v3319_v62 = vmul.f32 %v8466_v41, %v8457_v9  ;;  %v3359_v16 = vand.u32 2147483648, %v3286_v5  ;;  %vm3325_vm6 = vmor %vm3323_vm8, %vm3324_vm5 }
 0x905   :  { %6019 = vtanh.f32 %v3263_v51  ;;  %v3365_v60 = vsub.f32 1.0, %v3364_v21  ;;  %vm3358_vm9 = vcmp.eq.f32.partialorder %v3357_v44, 8.507059e+37  ;;  %v3329_v21 = vand.u32 2147483648, %v8457_v9 }
 0x906   :  { %v3311_v54 = vsel %vm3310_vm4, %v6006_v46, %v3307_v50  ;;  %v3337_v43 = vadd.f32 %v6010_v39, %v3336_v0  ;;  %v3320_v7 = vsub.f32 1.0, %v3319_v62  ;;  %vm3368_vm7 = vweird.f32 %v8459_v6 }
 0x907   :  { %v6018_v33 = vpop.eup %6017  ;;  %v3316_v57 = vsel %vm3313_vm2, %v3315_v58, %v3311_v54  ;;  %v3345_v58 = vor.u32 1.1754944e-38, %v3344_v20  ;;  %v3366_v51 = vmul.f32 %v8469_v13, %v3365_v60  ;;  %v3374_v20 = vand.u32 2147483648, %v8459_v6  ;;  %vm3370_vm12 = vmor %vm3368_vm7, %vm3369_vm1 }
 0x908   :  { %v3380_v17 = vmul.f32 %v3316_v57, %v8390_v30  ;;  %v3349_v4 = vmul.f32 %v6018_v33, %v3286_v5  ;;  %vm3354_vm3 = vweird.f32 %v6018_v33  ;;  %v3341_v50 = vsel %vm3340_vm10, %v6010_v39, %v3337_v43 }
 0x909   :  { %vm3355_vm15 = vmor %vm3353_vm0, %vm3354_vm3  ;;  %v3346_v54 = vsel %vm3343_vm14, %v3345_v58, %v3341_v50  ;;  %v3321_v10 = vmul.f32 %v8466_v41, %v3320_v7  ;;  %v3330_v50 = vor.u32 1.1754944e-38, %v3329_v21  ;;  %v3375_v44 = vor.u32 1.1754944e-38, %v3374_v20 }
 0x90a   :  { %v8477_v40 = vadd.f32 %v3382_v36, %v3380_v17  ;;  %v3350_v46 = vsub.f32 1.0, %v3349_v4  ;;  %v3360_v36 = vor.u32 1.1754944e-38, %v3359_v16 }
 0x90b   :  { %v6020_v17 = vpop.eup %6019  ;;  %v3322_v62 = vadd.f32 %v8466_v41, %v3321_v10 }
 0x90c   :  { %v3351_v30 = vmul.f32 %v6018_v33, %v3350_v46  ;;  %v3383_v43 = vmul.f32 %v6020_v17, %v3346_v54  ;;  %6021 = vtanh.f32 %v8477_v40  ;;  %v3372_v46 = vand.u32 2147483647, %v8459_v6  ;;  %v9399_v17 = vld [vmem:[#allocation121_spill] sm:$0xff] }
 0x90d   :  { %v3326_v37 = vsel %vm3325_vm6, %v8466_v41, %v3322_v62  ;;  %v9398_v41 = vld [vmem:[#allocation49_spill] sm:$0xff]  ;;  %v1181_v10 = vadd.f32 %v9399_v17, %v9357_v24 }
 0x90e   :  { %v3352_v0 = vadd.f32 %v6018_v33, %v3351_v30  ;;  %vm3373_vm2 = vcmp.eq.f32.partialorder %v3372_v46, 8.507059e+37  ;;  %v9403_v46 = vld [vmem:[#allocation51_spill] sm:$0xff] }
 0x910   :  { %v3356_v57 = vsel %vm3355_vm15, %v6018_v33, %v3352_v0  ;;  %v3367_v33 = vadd.f32 %v8469_v13, %v3366_v51 }
 0x911   :  { %v3361_v4 = vsel %vm3358_vm9, %v3360_v36, %v3356_v57 }
 0x912   :  { %v3381_v39 = vmul.f32 %v3361_v4, %v8399_v3  ;;  %v3327_v3 = vand.u32 2147483647, %v8457_v9  ;;  %v3371_v16 = vsel %vm3370_vm12, %v8469_v13, %v3367_v33  ;;  %v6022_v30 = vpop.eup %6021  ;;  %v9400_v4 = vld [vmem:[#allocation120_spill] sm:$0xff]  ;;  %v9402_v33 = vld [vmem:[#allocation123_spill] sm:$0xff] }
 0x913   :  { %v3376_v58 = vsel %vm3373_vm2, %v3375_v44, %v3371_v16  ;;  %v1270_v21 = vadd.f32 %v9402_v33, %v1181_v10  ;;  %v9405_v10 = vld [vmem:[#allocation118_spill] sm:$0xff] }
 0x914   :  { %v8486_v5 = vadd.f32 %v3383_v43, %v3381_v39  ;;  %vm3328_vm4 = vcmp.eq.f32.partialorder %v3327_v3, 8.507059e+37  ;;  %v9401_v43 = vld [vmem:[#allocation50_spill] sm:$0xff] }
 0x915   :  { %v3331_v60 = vsel %vm3328_vm4, %v3330_v50, %v3326_v37 }
 0x916   :  { %6023 = vtanh.f32 %v8486_v5  ;;  %v3388_v0 = vmul.f32 %v6022_v30, %v3331_v60 }
 0x91c   :  { %v6024_v7 = vpop.eup %6023 }
 0x91d   :  { %v3389_v36 = vmul.f32 %v6024_v7, %v3376_v58 }
 0x91f   :  { %v3390_v9 = vpack.c.bf16 %v3389_v36, %v3388_v0  ;;  %v9404_v36 = vld [vmem:[#allocation52_spill] sm:$0xff] }
 0x921   :  { %3399 = vmatmul.bf16.vlgmr.msrb.gmra.mxu1 %v3390_v9  ;;  %3413 = vmatmul.bf16.vlgmr.msrb.gmra.mxu3 %v3390_v9 }
 0x922   :  { %3427 = vmatmul.bf16.vlgmr.msrb.gmra.mxu0 %v3390_v9  ;;  %3441 = vmatmul.bf16.vlgmr.msrb.gmra.mxu2 %v3390_v9 }
 0x923   :  { %3773 = vmatpush.bf16.msrb.mxu1 %v6944_v8  ;;  %3787 = vmatpush.bf16.msrb.mxu3 %v6929_v34 }
 0x924   :  { %3801 = vmatpush.bf16.msrb.mxu0 %v6982_v27  ;;  %3815 = vmatpush.bf16.msrb.mxu2 %v6996_v35 }
 0x927   :  { %3774 = vmatpush.bf16.msrb.mxu1 %v7036_v52  ;;  %3788 = vmatpush.bf16.msrb.mxu3 %v7021_v32 }
 0x928   :  { %3802 = vmatpush.bf16.msrb.mxu0 %v7062_v49  ;;  %3816 = vmatpush.bf16.msrb.mxu2 %v7076_v47 }
 0x92b   :  { %3775 = vmatpush.bf16.msrb.mxu1 %v7116_v22  ;;  %3789 = vmatpush.bf16.msrb.mxu3 %v7101_v12 }
 0x92c   :  { %3803 = vmatpush.bf16.msrb.mxu0 %v7142_v38  ;;  %3817 = vmatpush.bf16.msrb.mxu2 %v7156_v63 }
 0x92f   :  { %3776 = vmatpush.bf16.msrb.mxu1 %v7196_v11  ;;  %3790 = vmatpush.bf16.msrb.mxu3 %v7181_v1 }
 0x930   :  { %3804 = vmatpush.bf16.msrb.mxu0 %v7222_v2  ;;  %3818 = vmatpush.bf16.msrb.mxu2 %v7236_v18 }
 0x933   :  { %3777 = vmatpush.bf16.msrb.mxu1 %v7276_v31  ;;  %3791 = vmatpush.bf16.msrb.mxu3 %v7261_v19 }
 0x934   :  { %3805 = vmatpush.bf16.msrb.mxu0 %v7302_v45  ;;  %3819 = vmatpush.bf16.msrb.mxu2 %v7316_v42 }
 0x937   :  { %3778 = vmatpush.bf16.msrb.mxu1 %v7360_v53  ;;  %3792 = vmatpush.bf16.msrb.mxu3 %v7346_v29 }
 0x938   :  { %3806 = vmatpush.bf16.msrb.mxu0 %v7389_v14  ;;  %3820 = vmatpush.bf16.msrb.mxu2 %v7400_v25 }
 0x93b   :  { %3779 = vmatpush.bf16.msrb.mxu1 %v7440_v26  ;;  %3793 = vmatpush.bf16.msrb.mxu3 %v7426_v48 }
 0x93c   :  { %3807 = vmatpush.bf16.msrb.mxu0 %v7469_v56  ;;  %3821 = vmatpush.bf16.msrb.mxu2 %v7480_v28 }
 0x93f   :  { %3780 = vmatpush.bf16.msrb.mxu1 %v7521_v61  ;;  %3794 = vmatpush.bf16.msrb.mxu3 %v7506_v55 }
 0x940   :  { %3808 = vmatpush.bf16.msrb.mxu0 %v7557_v15  ;;  %3822 = vmatpush.bf16.msrb.mxu2 %v7573_v23 }
 0x99e   :  { %v3400_v6 = vpop.f32.mrf.mxu1 }
 0x99f   :  { %v3447_v13 = vadd.f32 %v3400_v6, %v9398_v41  ;;  %v3428_v54 = vpop.f32.mrf.mxu0 }
 0x9a0   :  { %v3449_v39 = vadd.f32 %v3428_v54, %v9400_v4 }
 0x9a1   :  { %v5522_v57 = vmul.f32 -1.442695, %v3447_v13 }
 0x9a2   :  { %v5524_v44 = vmul.f32 -1.442695, %v3449_v39 }
 0x9a3   :  { %6025 = vpow2.f32 %v5522_v57 }
 0x9a4   :  { %v3414_v51 = vpop.f32.mrf.mxu3 }
 0x9a5   :  { %v3448_v62 = vadd.f32 %v3414_v51, %v9401_v43  ;;  %v3442_v41 = vpop.f32.mrf.mxu2 }
 0x9a6   :  { %v3402_v20 = vpop.f32.mrf.mxu1  ;;  %v3450_v51 = vadd.f32 %v3442_v41, %v9405_v10 }
 0x9a7   :  { %v5523_v3 = vmul.f32 -1.442695, %v3448_v62  ;;  %v3451_v37 = vadd.f32 %v3402_v20, %v9403_v46  ;;  %v3430_v16 = vpop.f32.mrf.mxu0 }
 0x9a8   :  { %v3453_v30 = vadd.f32 %v3430_v16, %v1270_v21 }
 0x9a9   :  { %v6026_v50 = vpop.eup %6025  ;;  %6027 = vpow2.f32 %v5523_v3  ;;  %v5525_v7 = vmul.f32 -1.442695, %v3451_v37 }
 0x9aa   :  { %v3473_v60 = vadd.f32 1.0, %v6026_v50  ;;  %v5527_v58 = vmul.f32 -1.442695, %v3453_v30 }
 0x9ab   :  { %6029 = vpow2.f32 %v5525_v7 }
 0x9ac   :  { %6031 = vrcp.f32 %v3473_v60  ;;  %v3416_v0 = vpop.f32.mrf.mxu3  ;;  %v3490_v20 = vand.u32 2147483648, %v3473_v60  ;;  %v3488_v46 = vand.u32 2147483647, %v3473_v60  ;;  %vm3484_vm11 = vweird.f32 %v3473_v60 }
 0x9ad   :  { %6033 = vpow2.f32 %v5524_v44  ;;  %v3452_v9 = vadd.f32 %v3416_v0, %v9404_v36 }
 0x9ae   :  { %6035 = vpow2.f32 %v5527_v58  ;;  %v3491_v7 = vor.u32 1.1754944e-38, %v3490_v20  ;;  %vm3489_vm3 = vcmp.eq.f32.partialorder %v3488_v46, 8.507059e+37 }
 0x9af   :  { %v6028_v6 = vpop.eup %6027  ;;  %v5526_v54 = vmul.f32 -1.442695, %v3452_v9 }
 0x9b0   :  { %v3474_v13 = vadd.f32 1.0, %v6028_v6 }
 0x9b1   :  { %v6030_v57 = vpop.eup %6029 }
 0x9b2   :  { %v6032_v17 = vpop.eup %6031  ;;  %6037 = vrcp.f32 %v3474_v13  ;;  %v8541_v43 = vadd.f32 1.0, %v6030_v57  ;;  %v3505_v41 = vand.u32 2147483648, %v3474_v13  ;;  %vm3499_vm14 = vweird.f32 %v3474_v13 }
 0x9b3   :  { %v6034_v4 = vpop.eup %6033  ;;  %v3480_v39 = vmul.f32 %v6032_v17, %v3473_v60  ;;  %6039 = vpow2.f32 %v5526_v54  ;;  %vm3485_vm13 = vweird.f32 %v6032_v17  ;;  %v3503_v60 = vand.u32 2147483647, %v3474_v13 }
 0x9b4   :  { %v6036_v62 = vpop.eup %6035  ;;  %6041 = vrcp.f32 %v8541_v43  ;;  %v8544_v21 = vadd.f32 1.0, %v6034_v4  ;;  %vm3486_vm10 = vmor %vm3484_vm11, %vm3485_vm13  ;;  %v9406_v4 = vld [vmem:[#allocation119_spill] sm:$0xff]  ;;  %vm3529_vm1 = vweird.f32 %v8541_v43 }
 0x9b5   :  { %v3481_v33 = vsub.f32 1.0, %v3480_v39  ;;  %6043 = vtanh.f32 %v3450_v51  ;;  %v8546_v37 = vadd.f32 1.0, %v6036_v62  ;;  %v1359_v39 = vadd.f32 %v9406_v4, %v9365_v59 }
 0x9b6   :  { %6045 = vrcp.f32 %v8544_v21  ;;  %vm3504_vm9 = vcmp.eq.f32.partialorder %v3503_v60, 8.507059e+37  ;;  %v3533_v60 = vand.u32 2147483647, %v8541_v43 }
 0x9b7   :  { %v3482_v3 = vmul.f32 %v6032_v17, %v3481_v33  ;;  %6047 = vrcp.f32 %v8546_v37 }
 0x9b8   :  { %v6038_v16 = vpop.eup %6037  ;;  %vm3534_vm12 = vcmp.eq.f32.partialorder %v3533_v60, 8.507059e+37 }
 0x9b9   :  { %v6040_v30 = vpop.eup %6039  ;;  %v3495_v50 = vmul.f32 %v6038_v16, %v3474_v13  ;;  %v3483_v44 = vadd.f32 %v6032_v17, %v3482_v3  ;;  %vm3500_vm0 = vweird.f32 %v6038_v16  ;;  %v9407_v3 = vld [vmem:[#allocation122_spill] sm:$0xff] }
 0x9ba   :  { %v3477_v58 = vadd.f32 1.0, %v6040_v30  ;;  %v6042_v0 = vpop.eup %6041  ;;  %v1448_v46 = vadd.f32 %v9407_v3, %v1359_v39  ;;  %vm3501_vm15 = vmor %vm3499_vm14, %vm3500_vm0  ;;  %v3506_v30 = vor.u32 1.1754944e-38, %v3505_v41  ;;  %v3535_v41 = vand.u32 2147483648, %v8541_v43 }
 0x9bb   :  { %v3496_v36 = vsub.f32 1.0, %v3495_v50  ;;  %v3487_v9 = vsel %vm3486_vm10, %v6032_v17, %v3483_v44  ;;  %v6044_v6 = vpop.eup %6043  ;;  %v3525_v57 = vmul.f32 %v6042_v0, %v8541_v43  ;;  %v3444_v17 = vpop.f32.mrf.mxu2  ;;  %vm3530_vm5 = vweird.f32 %v6042_v0 }
 0x9bc   :  { %v3492_v54 = vsel %vm3489_vm3, %v3491_v7, %v3487_v9  ;;  %6049 = vrcp.f32 %v3477_v58  ;;  %v8553_v20 = vpop.eup %6045  ;;  %vm3531_vm8 = vmor %vm3529_vm1, %vm3530_vm5  ;;  %vm3544_vm7 = vweird.f32 %v3477_v58  ;;  %vm3514_vm10 = vweird.f32 %v8544_v21 }
 0x9bd   :  { %v3497_v10 = vmul.f32 %v6038_v16, %v3496_v36  ;;  %v3573_v51 = vmul.f32 %v6044_v6, %v3492_v54  ;;  %v3526_v62 = vsub.f32 1.0, %v3525_v57  ;;  %v8556_v44 = vpop.eup %6047  ;;  %v3454_v6 = vadd.f32 %v3444_v17, %v1448_v46 }
 0x9be   :  { %v3555_v4 = vmul.f32 %v8556_v44, %v8546_v37  ;;  %v3548_v17 = vand.u32 2147483647, %v3477_v58  ;;  %vm3515_vm13 = vweird.f32 %v8553_v20  ;;  %vm3560_vm11 = vweird.f32 %v8556_v44 }
 0x9bf   :  { %v3498_v33 = vadd.f32 %v6038_v16, %v3497_v10  ;;  %v3527_v50 = vmul.f32 %v6042_v0, %v3526_v62  ;;  %v3510_v10 = vmul.f32 %v8553_v20, %v8544_v21  ;;  %v3550_v62 = vand.u32 2147483648, %v3477_v58  ;;  %vm3516_vm3 = vmor %vm3514_vm10, %vm3515_vm13 }
 0x9c0   :  { %6051 = vtanh.f32 %v3454_v6  ;;  %v3556_v46 = vsub.f32 1.0, %v3555_v4  ;;  %vm3549_vm2 = vcmp.eq.f32.partialorder %v3548_v17, 8.507059e+37  ;;  %v3520_v4 = vand.u32 2147483648, %v8544_v21 }
 0x9c1   :  { %v3502_v7 = vsel %vm3501_vm15, %v6038_v16, %v3498_v33  ;;  %v3528_v13 = vadd.f32 %v6042_v0, %v3527_v50  ;;  %v3511_v3 = vsub.f32 1.0, %v3510_v10  ;;  %vm3559_vm0 = vweird.f32 %v8546_v37 }
 0x9c2   :  { %v6050_v36 = vpop.eup %6049  ;;  %v3507_v9 = vsel %vm3504_vm9, %v3506_v30, %v3502_v7  ;;  %v3536_v30 = vor.u32 1.1754944e-38, %v3535_v41  ;;  %v3557_v6 = vmul.f32 %v8556_v44, %v3556_v46  ;;  %v3565_v41 = vand.u32 2147483648, %v8546_v37  ;;  %vm3561_vm14 = vmor %vm3559_vm0, %vm3560_vm11 }
 0x9c3   :  { %v3571_v54 = vmul.f32 %v3507_v9, %v8477_v40  ;;  %v3540_v57 = vmul.f32 %v6050_v36, %v3477_v58  ;;  %vm3545_vm6 = vweird.f32 %v6050_v36  ;;  %v3532_v33 = vsel %vm3531_vm8, %v6042_v0, %v3528_v13 }
 0x9c4   :  { %vm3546_vm4 = vmor %vm3544_vm7, %vm3545_vm6  ;;  %v3537_v7 = vsel %vm3534_vm12, %v3536_v30, %v3532_v33  ;;  %v3512_v43 = vmul.f32 %v8553_v20, %v3511_v3  ;;  %v3521_v33 = vor.u32 1.1754944e-38, %v3520_v4  ;;  %v3566_v17 = vor.u32 1.1754944e-38, %v3565_v41 }
 0x9c5   :  { %v8564_v39 = vadd.f32 %v3573_v51, %v3571_v54  ;;  %v3541_v16 = vsub.f32 1.0, %v3540_v57  ;;  %v3551_v51 = vor.u32 1.1754944e-38, %v3550_v62 }
 0x9c6   :  { %v6052_v54 = vpop.eup %6051  ;;  %v3513_v10 = vadd.f32 %v8553_v20, %v3512_v43 }
 0x9c7   :  { %v3542_v40 = vmul.f32 %v6050_v36, %v3541_v16  ;;  %v3574_v13 = vmul.f32 %v6052_v54, %v3537_v7  ;;  %6053 = vtanh.f32 %v8564_v39  ;;  %v3563_v16 = vand.u32 2147483647, %v8546_v37  ;;  %v9409_v54 = vld [vmem:[#allocation127_spill] sm:$0xff] }
 0x9c8   :  { %v3517_v60 = vsel %vm3516_vm3, %v8553_v20, %v3513_v10  ;;  %v9408_v20 = vld [vmem:[#allocation53_spill] sm:$0xff]  ;;  %v1186_v43 = vadd.f32 %v9409_v54, %v9357_v24 }
 0x9c9   :  { %v3543_v50 = vadd.f32 %v6050_v36, %v3542_v40  ;;  %vm3564_vm9 = vcmp.eq.f32.partialorder %v3563_v16, 8.507059e+37  ;;  %v9413_v16 = vld [vmem:[#allocation55_spill] sm:$0xff] }
 0x9cb   :  { %v3547_v9 = vsel %vm3546_vm4, %v6050_v36, %v3543_v50  ;;  %v3558_v36 = vadd.f32 %v8556_v44, %v3557_v6 }
 0x9cc   :  { %v3552_v57 = vsel %vm3549_vm2, %v3551_v51, %v3547_v9 }
 0x9cd   :  { %v3572_v0 = vmul.f32 %v3552_v57, %v8486_v5  ;;  %v3518_v5 = vand.u32 2147483647, %v8544_v21  ;;  %v3562_v62 = vsel %vm3561_vm14, %v8556_v44, %v3558_v36  ;;  %v6054_v40 = vpop.eup %6053  ;;  %v9410_v57 = vld [vmem:[#allocation126_spill] sm:$0xff]  ;;  %v9412_v36 = vld [vmem:[#allocation129_spill] sm:$0xff] }
 0x9ce   :  { %v3567_v30 = vsel %vm3564_vm9, %v3566_v17, %v3562_v62  ;;  %v1275_v4 = vadd.f32 %v9412_v36, %v1186_v43  ;;  %v9415_v43 = vld [vmem:[#allocation124_spill] sm:$0xff] }
 0x9cf   :  { %v8573_v58 = vadd.f32 %v3574_v13, %v3572_v0  ;;  %vm3519_vm15 = vcmp.eq.f32.partialorder %v3518_v5, 8.507059e+37  ;;  %v9411_v13 = vld [vmem:[#allocation54_spill] sm:$0xff] }
 0x9d0   :  { %v3522_v46 = vsel %vm3519_vm15, %v3521_v33, %v3517_v60 }
 0x9d1   :  { %6055 = vtanh.f32 %v8573_v58  ;;  %v3579_v50 = vmul.f32 %v6054_v40, %v3522_v46 }
 0x9d7   :  { %v6056_v3 = vpop.eup %6055 }
 0x9d8   :  { %v3580_v51 = vmul.f32 %v6056_v3, %v3567_v30 }
 0x9da   :  { %v3581_v21 = vpack.c.bf16 %v3580_v51, %v3579_v50  ;;  %v9414_v51 = vld [vmem:[#allocation56_spill] sm:$0xff] }
 0x9dc   :  { %3590 = vmatmul.bf16.vlgmr.msra.gmra.mxu1 %v3581_v21  ;;  %3604 = vmatmul.bf16.vlgmr.msra.gmra.mxu3 %v3581_v21 }
 0x9dd   :  { %3618 = vmatmul.bf16.vlgmr.msra.gmra.mxu0 %v3581_v21  ;;  %3632 = vmatmul.bf16.vlgmr.msra.gmra.mxu2 %v3581_v21 }
 0x9de   :  { %3964 = vmatpush.bf16.msra.mxu1 %v6944_v8  ;;  %3978 = vmatpush.bf16.msra.mxu3 %v6929_v34 }
 0x9df   :  { %3992 = vmatpush.bf16.msra.mxu0 %v6982_v27  ;;  %4006 = vmatpush.bf16.msra.mxu2 %v6996_v35 }
 0x9e2   :  { %3965 = vmatpush.bf16.msra.mxu1 %v7036_v52  ;;  %3979 = vmatpush.bf16.msra.mxu3 %v7021_v32 }
 0x9e3   :  { %3993 = vmatpush.bf16.msra.mxu0 %v7062_v49  ;;  %4007 = vmatpush.bf16.msra.mxu2 %v7076_v47 }
 0x9e6   :  { %3966 = vmatpush.bf16.msra.mxu1 %v7116_v22  ;;  %3980 = vmatpush.bf16.msra.mxu3 %v7101_v12 }
 0x9e7   :  { %3994 = vmatpush.bf16.msra.mxu0 %v7142_v38  ;;  %4008 = vmatpush.bf16.msra.mxu2 %v7156_v63 }
 0x9ea   :  { %3967 = vmatpush.bf16.msra.mxu1 %v7196_v11  ;;  %3981 = vmatpush.bf16.msra.mxu3 %v7181_v1 }
 0x9eb   :  { %3995 = vmatpush.bf16.msra.mxu0 %v7222_v2  ;;  %4009 = vmatpush.bf16.msra.mxu2 %v7236_v18 }
 0x9ee   :  { %3968 = vmatpush.bf16.msra.mxu1 %v7276_v31  ;;  %3982 = vmatpush.bf16.msra.mxu3 %v7261_v19 }
 0x9ef   :  { %3996 = vmatpush.bf16.msra.mxu0 %v7302_v45  ;;  %4010 = vmatpush.bf16.msra.mxu2 %v7316_v42 }
 0x9f2   :  { %3969 = vmatpush.bf16.msra.mxu1 %v7360_v53  ;;  %3983 = vmatpush.bf16.msra.mxu3 %v7346_v29 }
 0x9f3   :  { %3997 = vmatpush.bf16.msra.mxu0 %v7389_v14  ;;  %4011 = vmatpush.bf16.msra.mxu2 %v7400_v25 }
 0x9f6   :  { %3970 = vmatpush.bf16.msra.mxu1 %v7440_v26  ;;  %3984 = vmatpush.bf16.msra.mxu3 %v7426_v48 }
 0x9f7   :  { %3998 = vmatpush.bf16.msra.mxu0 %v7469_v56  ;;  %4012 = vmatpush.bf16.msra.mxu2 %v7480_v28 }
 0x9fa   :  { %3971 = vmatpush.bf16.msra.mxu1 %v7521_v61  ;;  %3985 = vmatpush.bf16.msra.mxu3 %v7506_v55 }
 0x9fb   :  { %3999 = vmatpush.bf16.msra.mxu0 %v7557_v15  ;;  %4013 = vmatpush.bf16.msra.mxu2 %v7573_v23 }
 0xa59   :  { %v3591_v37 = vpop.f32.mrf.mxu1 }
 0xa5a   :  { %v3638_v44 = vadd.f32 %v3591_v37, %v9408_v20  ;;  %v3619_v7 = vpop.f32.mrf.mxu0 }
 0xa5b   :  { %v3640_v0 = vadd.f32 %v3619_v7, %v9410_v57 }
 0xa5c   :  { %v5528_v9 = vmul.f32 -1.442695, %v3638_v44 }
 0xa5d   :  { %v5530_v17 = vmul.f32 -1.442695, %v3640_v0 }
 0xa5e   :  { %6057 = vpow2.f32 %v5528_v9 }
 0xa5f   :  { %v3605_v6 = vpop.f32.mrf.mxu3 }
 0xa60   :  { %v3639_v10 = vadd.f32 %v3605_v6, %v9411_v13  ;;  %v3633_v20 = vpop.f32.mrf.mxu2 }
 0xa61   :  { %v3593_v41 = vpop.f32.mrf.mxu1  ;;  %v3641_v6 = vadd.f32 %v3633_v20, %v9415_v43 }
 0xa62   :  { %v5529_v5 = vmul.f32 -1.442695, %v3639_v10  ;;  %v3642_v60 = vadd.f32 %v3593_v41, %v9413_v16  ;;  %v3621_v62 = vpop.f32.mrf.mxu0 }
 0xa63   :  { %v3644_v40 = vadd.f32 %v3621_v62, %v1275_v4 }
 0xa64   :  { %v6058_v33 = vpop.eup %6057  ;;  %6059 = vpow2.f32 %v5529_v5  ;;  %v5531_v3 = vmul.f32 -1.442695, %v3642_v60 }
 0xa65   :  { %v3664_v46 = vadd.f32 1.0, %v6058_v33  ;;  %v5533_v30 = vmul.f32 -1.442695, %v3644_v40 }
 0xa66   :  { %6061 = vpow2.f32 %v5531_v3 }
 0xa67   :  { %6063 = vrcp.f32 %v3664_v46  ;;  %v3607_v50 = vpop.f32.mrf.mxu3  ;;  %v3681_v41 = vand.u32 2147483648, %v3664_v46  ;;  %v3679_v16 = vand.u32 2147483647, %v3664_v46  ;;  %vm3675_vm1 = vweird.f32 %v3664_v46 }
 0xa68   :  { %6065 = vpow2.f32 %v5530_v17  ;;  %v3643_v21 = vadd.f32 %v3607_v50, %v9414_v51 }
 0xa69   :  { %6067 = vpow2.f32 %v5533_v30  ;;  %v3682_v3 = vor.u32 1.1754944e-38, %v3681_v41  ;;  %vm3680_vm6 = vcmp.eq.f32.partialorder %v3679_v16, 8.507059e+37 }
 0xa6a   :  { %v6060_v37 = vpop.eup %6059  ;;  %v5532_v7 = vmul.f32 -1.442695, %v3643_v21 }
 0xa6b   :  { %v3665_v44 = vadd.f32 1.0, %v6060_v37 }
 0xa6c   :  { %v6062_v9 = vpop.eup %6061 }
 0xa6d   :  { %v6064_v54 = vpop.eup %6063  ;;  %6069 = vrcp.f32 %v3665_v44  ;;  %v8628_v13 = vadd.f32 1.0, %v6062_v9  ;;  %v3696_v20 = vand.u32 2147483648, %v3665_v44  ;;  %vm3690_vm12 = vweird.f32 %v3665_v44 }
 0xa6e   :  { %v6066_v57 = vpop.eup %6065  ;;  %v3671_v0 = vmul.f32 %v6064_v54, %v3664_v46  ;;  %6071 = vpow2.f32 %v5532_v7  ;;  %vm3676_vm5 = vweird.f32 %v6064_v54  ;;  %v3694_v46 = vand.u32 2147483647, %v3665_v44 }
 0xa6f   :  { %v6068_v10 = vpop.eup %6067  ;;  %6073 = vrcp.f32 %v8628_v13  ;;  %v8631_v4 = vadd.f32 1.0, %v6066_v57  ;;  %vm3677_vm8 = vmor %vm3675_vm1, %vm3676_vm5  ;;  %v9416_v57 = vld [vmem:[#allocation125_spill] sm:$0xff]  ;;  %vm3720_vm11 = vweird.f32 %v8628_v13 }
 0xa70   :  { %v3672_v36 = vsub.f32 1.0, %v3671_v0  ;;  %6075 = vtanh.f32 %v3641_v6  ;;  %v8633_v60 = vadd.f32 1.0, %v6068_v10  ;;  %v1364_v0 = vadd.f32 %v9416_v57, %v9365_v59 }
 0xa71   :  { %6077 = vrcp.f32 %v8631_v4  ;;  %vm3695_vm2 = vcmp.eq.f32.partialorder %v3694_v46, 8.507059e+37  ;;  %v3724_v46 = vand.u32 2147483647, %v8628_v13 }
 0xa72   :  { %v3673_v5 = vmul.f32 %v6064_v54, %v3672_v36  ;;  %6079 = vrcp.f32 %v8633_v60 }
 0xa73   :  { %v6070_v62 = vpop.eup %6069  ;;  %vm3725_vm14 = vcmp.eq.f32.partialorder %v3724_v46, 8.507059e+37 }
 0xa74   :  { %v6072_v40 = vpop.eup %6071  ;;  %v3686_v33 = vmul.f32 %v6070_v62, %v3665_v44  ;;  %v3674_v17 = vadd.f32 %v6064_v54, %v3673_v5  ;;  %vm3691_vm7 = vweird.f32 %v6070_v62  ;;  %v9417_v5 = vld [vmem:[#allocation128_spill] sm:$0xff] }
 0xa75   :  { %v3668_v30 = vadd.f32 1.0, %v6072_v40  ;;  %v6074_v50 = vpop.eup %6073  ;;  %v1453_v16 = vadd.f32 %v9417_v5, %v1364_v0  ;;  %vm3692_vm4 = vmor %vm3690_vm12, %vm3691_vm7  ;;  %v3697_v40 = vor.u32 1.1754944e-38, %v3696_v20  ;;  %v3726_v20 = vand.u32 2147483648, %v8628_v13 }
 0xa76   :  { %v3687_v51 = vsub.f32 1.0, %v3686_v33  ;;  %v3678_v21 = vsel %vm3677_vm8, %v6064_v54, %v3674_v17  ;;  %v6076_v37 = vpop.eup %6075  ;;  %v3716_v9 = vmul.f32 %v6074_v50, %v8628_v13  ;;  %v3635_v54 = vpop.f32.mrf.mxu2  ;;  %vm3721_vm13 = vweird.f32 %v6074_v50 }
 0xa77   :  { %v3683_v7 = vsel %vm3680_vm6, %v3682_v3, %v3678_v21  ;;  %6081 = vrcp.f32 %v3668_v30  ;;  %v8640_v41 = vpop.eup %6077  ;;  %vm3722_vm10 = vmor %vm3720_vm11, %vm3721_vm13  ;;  %vm3735_vm0 = vweird.f32 %v3668_v30  ;;  %vm3705_vm8 = vweird.f32 %v8631_v4 }
 0xa78   :  { %v3688_v43 = vmul.f32 %v6070_v62, %v3687_v51  ;;  %v3764_v6 = vmul.f32 %v6076_v37, %v3683_v7  ;;  %v3717_v10 = vsub.f32 1.0, %v3716_v9  ;;  %v8643_v17 = vpop.eup %6079  ;;  %v3645_v37 = vadd.f32 %v3635_v54, %v1453_v16 }
 0xa79   :  { %v3746_v57 = vmul.f32 %v8643_v17, %v8633_v60  ;;  %v3739_v54 = vand.u32 2147483647, %v3668_v30  ;;  %vm3706_vm5 = vweird.f32 %v8640_v41  ;;  %vm3751_vm1 = vweird.f32 %v8643_v17 }
 0xa7a   :  { %v3689_v36 = vadd.f32 %v6070_v62, %v3688_v43  ;;  %v3718_v33 = vmul.f32 %v6074_v50, %v3717_v10  ;;  %v3701_v43 = vmul.f32 %v8640_v41, %v8631_v4  ;;  %v3741_v10 = vand.u32 2147483648, %v3668_v30  ;;  %vm3707_vm6 = vmor %vm3705_vm8, %vm3706_vm5 }
 0xa7b   :  { %6083 = vtanh.f32 %v3645_v37  ;;  %v3747_v16 = vsub.f32 1.0, %v3746_v57  ;;  %vm3740_vm9 = vcmp.eq.f32.partialorder %v3739_v54, 8.507059e+37  ;;  %v3711_v57 = vand.u32 2147483648, %v8631_v4 }
 0xa7c   :  { %v3693_v3 = vsel %vm3692_vm4, %v6070_v62, %v3689_v36  ;;  %v3719_v44 = vadd.f32 %v6074_v50, %v3718_v33  ;;  %v3702_v5 = vsub.f32 1.0, %v3701_v43  ;;  %vm3750_vm7 = vweird.f32 %v8633_v60 }
 0xa7d   :  { %v6082_v51 = vpop.eup %6081  ;;  %v3698_v21 = vsel %vm3695_vm2, %v3697_v40, %v3693_v3  ;;  %v3727_v40 = vor.u32 1.1754944e-38, %v3726_v20  ;;  %v3748_v37 = vmul.f32 %v8643_v17, %v3747_v16  ;;  %v3756_v20 = vand.u32 2147483648, %v8633_v60  ;;  %vm3752_vm12 = vmor %vm3750_vm7, %vm3751_vm1 }
 0xa7e   :  { %v3762_v7 = vmul.f32 %v3698_v21, %v8564_v39  ;;  %v3731_v9 = vmul.f32 %v6082_v51, %v3668_v30  ;;  %vm3736_vm3 = vweird.f32 %v6082_v51  ;;  %v3723_v36 = vsel %vm3722_vm10, %v6074_v50, %v3719_v44 }
 0xa7f   :  { %vm3737_vm15 = vmor %vm3735_vm0, %vm3736_vm3  ;;  %v3728_v3 = vsel %vm3725_vm14, %v3727_v40, %v3723_v36  ;;  %v3703_v13 = vmul.f32 %v8640_v41, %v3702_v5  ;;  %v3712_v36 = vor.u32 1.1754944e-38, %v3711_v57  ;;  %v3757_v54 = vor.u32 1.1754944e-38, %v3756_v20 }
 0xa80   :  { %v8651_v0 = vadd.f32 %v3764_v6, %v3762_v7  ;;  %v3732_v62 = vsub.f32 1.0, %v3731_v9  ;;  %v3742_v6 = vor.u32 1.1754944e-38, %v3741_v10 }
 0xa81   :  { %v6084_v7 = vpop.eup %6083  ;;  %v3704_v43 = vadd.f32 %v8640_v41, %v3703_v13 }
 0xa82   :  { %v3733_v39 = vmul.f32 %v6082_v51, %v3732_v62  ;;  %v3765_v44 = vmul.f32 %v6084_v7, %v3728_v3  ;;  %6085 = vtanh.f32 %v8651_v0  ;;  %v3754_v62 = vand.u32 2147483647, %v8633_v60  ;;  %v9419_v7 = vld [vmem:[#allocation133_spill] sm:$0xff] }
 0xa83   :  { %v3708_v46 = vsel %vm3707_vm6, %v8640_v41, %v3704_v43  ;;  %v9418_v41 = vld [vmem:[#allocation57_spill] sm:$0xff]  ;;  %v1191_v13 = vadd.f32 %v9419_v7, %v9357_v24 }
 0xa84   :  { %v3734_v33 = vadd.f32 %v6082_v51, %v3733_v39  ;;  %vm3755_vm2 = vcmp.eq.f32.partialorder %v3754_v62, 8.507059e+37  ;;  %v9423_v62 = vld [vmem:[#allocation59_spill] sm:$0xff] }
 0xa86   :  { %v3738_v21 = vsel %vm3737_vm15, %v6082_v51, %v3734_v33  ;;  %v3749_v51 = vadd.f32 %v8643_v17, %v3748_v37 }
 0xa87   :  { %v3743_v9 = vsel %vm3740_vm9, %v3742_v6, %v3738_v21 }
 0xa88   :  { %v3763_v50 = vmul.f32 %v3743_v9, %v8573_v58  ;;  %v3709_v58 = vand.u32 2147483647, %v8631_v4  ;;  %v3753_v10 = vsel %vm3752_vm12, %v8643_v17, %v3749_v51  ;;  %v6086_v39 = vpop.eup %6085  ;;  %v9420_v9 = vld [vmem:[#allocation132_spill] sm:$0xff]  ;;  %v9422_v51 = vld [vmem:[#allocation135_spill] sm:$0xff] }
 0xa89   :  { %v3758_v40 = vsel %vm3755_vm2, %v3757_v54, %v3753_v10  ;;  %v1280_v57 = vadd.f32 %v9422_v51, %v1191_v13  ;;  %v9425_v13 = vld [vmem:[#allocation130_spill] sm:$0xff] }
 0xa8a   :  { %v8660_v30 = vadd.f32 %v3765_v44, %v3763_v50  ;;  %vm3710_vm4 = vcmp.eq.f32.partialorder %v3709_v58, 8.507059e+37  ;;  %v9421_v44 = vld [vmem:[#allocation58_spill] sm:$0xff] }
 0xa8b   :  { %v3713_v16 = vsel %vm3710_vm4, %v3712_v36, %v3708_v46 }
 0xa8c   :  { %6087 = vtanh.f32 %v8660_v30  ;;  %v3770_v33 = vmul.f32 %v6086_v39, %v3713_v16 }
 0xa92   :  { %v6088_v5 = vpop.eup %6087 }
 0xa93   :  { %v3771_v6 = vmul.f32 %v6088_v5, %v3758_v40 }
 0xa95   :  { %v3772_v4 = vpack.c.bf16 %v3771_v6, %v3770_v33  ;;  %v9424_v6 = vld [vmem:[#allocation60_spill] sm:$0xff] }
 0xa97   :  { %3781 = vmatmul.bf16.vlgmr.msrb.gmra.mxu1 %v3772_v4  ;;  %3795 = vmatmul.bf16.vlgmr.msrb.gmra.mxu3 %v3772_v4 }
 0xa98   :  { %3809 = vmatmul.bf16.vlgmr.msrb.gmra.mxu0 %v3772_v4  ;;  %3823 = vmatmul.bf16.vlgmr.msrb.gmra.mxu2 %v3772_v4 }
 0xa99   :  { %4155 = vmatpush.bf16.msrb.mxu1 %v6944_v8  ;;  %4169 = vmatpush.bf16.msrb.mxu3 %v6929_v34 }
 0xa9a   :  { %4183 = vmatpush.bf16.msrb.mxu0 %v6982_v27  ;;  %4197 = vmatpush.bf16.msrb.mxu2 %v6996_v35 }
 0xa9d   :  { %4156 = vmatpush.bf16.msrb.mxu1 %v7036_v52  ;;  %4170 = vmatpush.bf16.msrb.mxu3 %v7021_v32 }
 0xa9e   :  { %4184 = vmatpush.bf16.msrb.mxu0 %v7062_v49  ;;  %4198 = vmatpush.bf16.msrb.mxu2 %v7076_v47 }
 0xaa1   :  { %4157 = vmatpush.bf16.msrb.mxu1 %v7116_v22  ;;  %4171 = vmatpush.bf16.msrb.mxu3 %v7101_v12 }
 0xaa2   :  { %4185 = vmatpush.bf16.msrb.mxu0 %v7142_v38  ;;  %4199 = vmatpush.bf16.msrb.mxu2 %v7156_v63 }
 0xaa5   :  { %4158 = vmatpush.bf16.msrb.mxu1 %v7196_v11  ;;  %4172 = vmatpush.bf16.msrb.mxu3 %v7181_v1 }
 0xaa6   :  { %4186 = vmatpush.bf16.msrb.mxu0 %v7222_v2  ;;  %4200 = vmatpush.bf16.msrb.mxu2 %v7236_v18 }
 0xaa9   :  { %4159 = vmatpush.bf16.msrb.mxu1 %v7276_v31  ;;  %4173 = vmatpush.bf16.msrb.mxu3 %v7261_v19 }
 0xaaa   :  { %4187 = vmatpush.bf16.msrb.mxu0 %v7302_v45  ;;  %4201 = vmatpush.bf16.msrb.mxu2 %v7316_v42 }
 0xaad   :  { %4160 = vmatpush.bf16.msrb.mxu1 %v7360_v53  ;;  %4174 = vmatpush.bf16.msrb.mxu3 %v7346_v29 }
 0xaae   :  { %4188 = vmatpush.bf16.msrb.mxu0 %v7389_v14  ;;  %4202 = vmatpush.bf16.msrb.mxu2 %v7400_v25 }
 0xab1   :  { %4161 = vmatpush.bf16.msrb.mxu1 %v7440_v26  ;;  %4175 = vmatpush.bf16.msrb.mxu3 %v7426_v48 }
 0xab2   :  { %4189 = vmatpush.bf16.msrb.mxu0 %v7469_v56  ;;  %4203 = vmatpush.bf16.msrb.mxu2 %v7480_v28 }
 0xab5   :  { %4162 = vmatpush.bf16.msrb.mxu1 %v7521_v61  ;;  %4176 = vmatpush.bf16.msrb.mxu3 %v7506_v55 }
 0xab6   :  { %4190 = vmatpush.bf16.msrb.mxu0 %v7557_v15  ;;  %4204 = vmatpush.bf16.msrb.mxu2 %v7573_v23 }
 0xb14   :  { %v3782_v60 = vpop.f32.mrf.mxu1 }
 0xb15   :  { %v3829_v17 = vadd.f32 %v3782_v60, %v9418_v41  ;;  %v3810_v3 = vpop.f32.mrf.mxu0 }
 0xb16   :  { %v3831_v50 = vadd.f32 %v3810_v3, %v9420_v9 }
 0xb17   :  { %v5534_v21 = vmul.f32 -1.442695, %v3829_v17 }
 0xb18   :  { %v5536_v54 = vmul.f32 -1.442695, %v3831_v50 }
 0xb19   :  { %6089 = vpow2.f32 %v5534_v21 }
 0xb1a   :  { %v3796_v37 = vpop.f32.mrf.mxu3 }
 0xb1b   :  { %v3830_v43 = vadd.f32 %v3796_v37, %v9421_v44  ;;  %v3824_v41 = vpop.f32.mrf.mxu2 }
 0xb1c   :  { %v3784_v20 = vpop.f32.mrf.mxu1  ;;  %v3832_v37 = vadd.f32 %v3824_v41, %v9425_v13 }
 0xb1d   :  { %v5535_v58 = vmul.f32 -1.442695, %v3830_v43  ;;  %v3833_v46 = vadd.f32 %v3784_v20, %v9423_v62  ;;  %v3812_v10 = vpop.f32.mrf.mxu0 }
 0xb1e   :  { %v3835_v39 = vadd.f32 %v3812_v10, %v1280_v57 }
 0xb1f   :  { %v6090_v36 = vpop.eup %6089  ;;  %6091 = vpow2.f32 %v5535_v58  ;;  %v5537_v5 = vmul.f32 -1.442695, %v3833_v46 }
 0xb20   :  { %v3855_v16 = vadd.f32 1.0, %v6090_v36  ;;  %v5539_v40 = vmul.f32 -1.442695, %v3835_v39 }
 0xb21   :  { %6093 = vpow2.f32 %v5537_v5 }
 0xb22   :  { %6095 = vrcp.f32 %v3855_v16  ;;  %v3798_v33 = vpop.f32.mrf.mxu3  ;;  %v3872_v20 = vand.u32 2147483648, %v3855_v16  ;;  %v3870_v62 = vand.u32 2147483647, %v3855_v16  ;;  %vm3866_vm11 = vweird.f32 %v3855_v16 }
 0xb23   :  { %6097 = vpow2.f32 %v5536_v54  ;;  %v3834_v4 = vadd.f32 %v3798_v33, %v9424_v6 }
 0xb24   :  { %6099 = vpow2.f32 %v5539_v40  ;;  %v3873_v5 = vor.u32 1.1754944e-38, %v3872_v20  ;;  %vm3871_vm3 = vcmp.eq.f32.partialorder %v3870_v62, 8.507059e+37 }
 0xb25   :  { %v6092_v60 = vpop.eup %6091  ;;  %v5538_v3 = vmul.f32 -1.442695, %v3834_v4 }
 0xb26   :  { %v3856_v17 = vadd.f32 1.0, %v6092_v60 }
 0xb27   :  { %v6094_v21 = vpop.eup %6093 }
 0xb28   :  { %v6096_v7 = vpop.eup %6095  ;;  %6101 = vrcp.f32 %v3856_v17  ;;  %v8715_v44 = vadd.f32 1.0, %v6094_v21  ;;  %v3887_v41 = vand.u32 2147483648, %v3856_v17  ;;  %vm3881_vm14 = vweird.f32 %v3856_v17 }
 0xb29   :  { %v6098_v9 = vpop.eup %6097  ;;  %v3862_v50 = vmul.f32 %v6096_v7, %v3855_v16  ;;  %6103 = vpow2.f32 %v5538_v3  ;;  %vm3867_vm13 = vweird.f32 %v6096_v7  ;;  %v3885_v16 = vand.u32 2147483647, %v3856_v17 }
 0xb2a   :  { %v6100_v43 = vpop.eup %6099  ;;  %6105 = vrcp.f32 %v8715_v44  ;;  %v8718_v57 = vadd.f32 1.0, %v6098_v9  ;;  %vm3868_vm10 = vmor %vm3866_vm11, %vm3867_vm13  ;;  %v9426_v9 = vld [vmem:[#allocation131_spill] sm:$0xff]  ;;  %vm3911_vm1 = vweird.f32 %v8715_v44 }
 0xb2b   :  { %v3863_v51 = vsub.f32 1.0, %v3862_v50  ;;  %6107 = vtanh.f32 %v3832_v37  ;;  %v8720_v46 = vadd.f32 1.0, %v6100_v43  ;;  %v1369_v50 = vadd.f32 %v9426_v9, %v9365_v59 }
 0xb2c   :  { %6109 = vrcp.f32 %v8718_v57  ;;  %vm3886_vm9 = vcmp.eq.f32.partialorder %v3885_v16, 8.507059e+37  ;;  %v3915_v16 = vand.u32 2147483647, %v8715_v44 }
 0xb2d   :  { %v3864_v58 = vmul.f32 %v6096_v7, %v3863_v51  ;;  %6111 = vrcp.f32 %v8720_v46 }
 0xb2e   :  { %v6102_v10 = vpop.eup %6101  ;;  %vm3916_vm12 = vcmp.eq.f32.partialorder %v3915_v16, 8.507059e+37 }
 0xb2f   :  { %v6104_v39 = vpop.eup %6103  ;;  %v3877_v36 = vmul.f32 %v6102_v10, %v3856_v17  ;;  %v3865_v54 = vadd.f32 %v6096_v7, %v3864_v58  ;;  %vm3882_vm0 = vweird.f32 %v6102_v10  ;;  %v9427_v58 = vld [vmem:[#allocation134_spill] sm:$0xff] }
 0xb30   :  { %v3859_v40 = vadd.f32 1.0, %v6104_v39  ;;  %v6106_v33 = vpop.eup %6105  ;;  %v1458_v62 = vadd.f32 %v9427_v58, %v1369_v50  ;;  %vm3883_vm15 = vmor %vm3881_vm14, %vm3882_vm0  ;;  %v3888_v39 = vor.u32 1.1754944e-38, %v3887_v41  ;;  %v3917_v41 = vand.u32 2147483648, %v8715_v44 }
 0xb31   :  { %v3878_v6 = vsub.f32 1.0, %v3877_v36  ;;  %v3869_v4 = vsel %vm3868_vm10, %v6096_v7, %v3865_v54  ;;  %v6108_v60 = vpop.eup %6107  ;;  %v3907_v21 = vmul.f32 %v6106_v33, %v8715_v44  ;;  %v3826_v7 = vpop.f32.mrf.mxu2  ;;  %vm3912_vm5 = vweird.f32 %v6106_v33 }
 0xb32   :  { %v3874_v3 = vsel %vm3871_vm3, %v3873_v5, %v3869_v4  ;;  %6113 = vrcp.f32 %v3859_v40  ;;  %v8727_v20 = vpop.eup %6109  ;;  %vm3913_vm8 = vmor %vm3911_vm1, %vm3912_vm5  ;;  %vm3926_vm7 = vweird.f32 %v3859_v40  ;;  %vm3896_vm10 = vweird.f32 %v8718_v57 }
 0xb33   :  { %v3879_v13 = vmul.f32 %v6102_v10, %v3878_v6  ;;  %v3955_v37 = vmul.f32 %v6108_v60, %v3874_v3  ;;  %v3908_v43 = vsub.f32 1.0, %v3907_v21  ;;  %v8730_v54 = vpop.eup %6111  ;;  %v3836_v60 = vadd.f32 %v3826_v7, %v1458_v62 }
 0xb34   :  { %v3937_v9 = vmul.f32 %v8730_v54, %v8720_v46  ;;  %v3930_v7 = vand.u32 2147483647, %v3859_v40  ;;  %vm3897_vm13 = vweird.f32 %v8727_v20  ;;  %vm3942_vm11 = vweird.f32 %v8730_v54 }
 0xb35   :  { %v3880_v51 = vadd.f32 %v6102_v10, %v3879_v13  ;;  %v3909_v36 = vmul.f32 %v6106_v33, %v3908_v43  ;;  %v3892_v13 = vmul.f32 %v8727_v20, %v8718_v57  ;;  %v3932_v43 = vand.u32 2147483648, %v3859_v40  ;;  %vm3898_vm3 = vmor %vm3896_vm10, %vm3897_vm13 }
 0xb36   :  { %6115 = vtanh.f32 %v3836_v60  ;;  %v3938_v62 = vsub.f32 1.0, %v3937_v9  ;;  %vm3931_vm2 = vcmp.eq.f32.partialorder %v3930_v7, 8.507059e+37  ;;  %v3902_v9 = vand.u32 2147483648, %v8718_v57 }
 0xb37   :  { %v3884_v5 = vsel %vm3883_vm15, %v6102_v10, %v3880_v51  ;;  %v3910_v17 = vadd.f32 %v6106_v33, %v3909_v36  ;;  %v3893_v58 = vsub.f32 1.0, %v3892_v13  ;;  %vm3941_vm0 = vweird.f32 %v8720_v46 }
 0xb38   :  { %v6114_v6 = vpop.eup %6113  ;;  %v3889_v4 = vsel %vm3886_vm9, %v3888_v39, %v3884_v5  ;;  %v3918_v39 = vor.u32 1.1754944e-38, %v3917_v41  ;;  %v3939_v60 = vmul.f32 %v8730_v54, %v3938_v62  ;;  %v3947_v41 = vand.u32 2147483648, %v8720_v46  ;;  %vm3943_vm14 = vmor %vm3941_vm0, %vm3942_vm11 }
 0xb39   :  { %v3953_v3 = vmul.f32 %v3889_v4, %v8651_v0  ;;  %v3922_v21 = vmul.f32 %v6114_v6, %v3859_v40  ;;  %vm3927_vm6 = vweird.f32 %v6114_v6  ;;  %v3914_v51 = vsel %vm3913_vm8, %v6106_v33, %v3910_v17 }
 0xb3a   :  { %vm3928_vm4 = vmor %vm3926_vm7, %vm3927_vm6  ;;  %v3919_v5 = vsel %vm3916_vm12, %v3918_v39, %v3914_v51  ;;  %v3894_v44 = vmul.f32 %v8727_v20, %v3893_v58  ;;  %v3903_v51 = vor.u32 1.1754944e-38, %v3902_v9  ;;  %v3948_v7 = vor.u32 1.1754944e-38, %v3947_v41 }
 0xb3b   :  { %v8738_v50 = vadd.f32 %v3955_v37, %v3953_v3  ;;  %v3923_v10 = vsub.f32 1.0, %v3922_v21  ;;  %v3933_v37 = vor.u32 1.1754944e-38, %v3932_v43 }
 0xb3c   :  { %v6116_v3 = vpop.eup %6115  ;;  %v3895_v13 = vadd.f32 %v8727_v20, %v3894_v44 }
 0xb3d   :  { %v3924_v0 = vmul.f32 %v6114_v6, %v3923_v10  ;;  %v3956_v17 = vmul.f32 %v6116_v3, %v3919_v5  ;;  %6117 = vtanh.f32 %v8738_v50  ;;  %v3945_v10 = vand.u32 2147483647, %v8720_v46  ;;  %v9429_v3 = vld [vmem:[#allocation139_spill] sm:$0xff] }
 0xb3e   :  { %v3899_v16 = vsel %vm3898_vm3, %v8727_v20, %v3895_v13  ;;  %v9428_v20 = vld [vmem:[#allocation61_spill] sm:$0xff]  ;;  %v1196_v44 = vadd.f32 %v9429_v3, %v9357_v24 }
 0xb3f   :  { %v3925_v36 = vadd.f32 %v6114_v6, %v3924_v0  ;;  %vm3946_vm9 = vcmp.eq.f32.partialorder %v3945_v10, 8.507059e+37  ;;  %v9433_v10 = vld [vmem:[#allocation63_spill] sm:$0xff] }
 0xb41   :  { %v3929_v4 = vsel %vm3928_vm4, %v6114_v6, %v3925_v36  ;;  %v3940_v6 = vadd.f32 %v8730_v54, %v3939_v60 }
 0xb42   :  { %v3934_v21 = vsel %vm3931_vm2, %v3933_v37, %v3929_v4 }
 0xb43   :  { %v3954_v33 = vmul.f32 %v3934_v21, %v8660_v30  ;;  %v3900_v30 = vand.u32 2147483647, %v8718_v57  ;;  %v3944_v43 = vsel %vm3943_vm14, %v8730_v54, %v3940_v6  ;;  %v6118_v0 = vpop.eup %6117  ;;  %v9430_v21 = vld [vmem:[#allocation138_spill] sm:$0xff]  ;;  %v9432_v6 = vld [vmem:[#allocation141_spill] sm:$0xff] }
 0xb44   :  { %v3949_v39 = vsel %vm3946_vm9, %v3948_v7, %v3944_v43  ;;  %v1285_v9 = vadd.f32 %v9432_v6, %v1196_v44  ;;  %v9435_v44 = vld [vmem:[#allocation136_spill] sm:$0xff] }
 0xb45   :  { %v8747_v40 = vadd.f32 %v3956_v17, %v3954_v33  ;;  %vm3901_vm15 = vcmp.eq.f32.partialorder %v3900_v30, 8.507059e+37  ;;  %v9431_v17 = vld [vmem:[#allocation62_spill] sm:$0xff] }
 0xb46   :  { %v3904_v62 = vsel %vm3901_vm15, %v3903_v51, %v3899_v16 }
 0xb47   :  { %6119 = vtanh.f32 %v8747_v40  ;;  %v3961_v36 = vmul.f32 %v6118_v0, %v3904_v62 }
 0xb4d   :  { %v6120_v58 = vpop.eup %6119 }
 0xb4e   :  { %v3962_v37 = vmul.f32 %v6120_v58, %v3949_v39 }
 0xb50   :  { %v3963_v57 = vpack.c.bf16 %v3962_v37, %v3961_v36  ;;  %v9434_v37 = vld [vmem:[#allocation64_spill] sm:$0xff] }
 0xb52   :  { %3972 = vmatmul.bf16.vlgmr.msra.gmra.mxu1 %v3963_v57  ;;  %3986 = vmatmul.bf16.vlgmr.msra.gmra.mxu3 %v3963_v57 }
 0xb53   :  { %4000 = vmatmul.bf16.vlgmr.msra.gmra.mxu0 %v3963_v57  ;;  %4014 = vmatmul.bf16.vlgmr.msra.gmra.mxu2 %v3963_v57 }
 0xb54   :  { %4346 = vmatpush.bf16.msra.mxu1 %v6944_v8  ;;  %4360 = vmatpush.bf16.msra.mxu3 %v6929_v34 }
 0xb55   :  { %4374 = vmatpush.bf16.msra.mxu0 %v6982_v27  ;;  %4388 = vmatpush.bf16.msra.mxu2 %v6996_v35 }
 0xb58   :  { %4347 = vmatpush.bf16.msra.mxu1 %v7036_v52  ;;  %4361 = vmatpush.bf16.msra.mxu3 %v7021_v32 }
 0xb59   :  { %4375 = vmatpush.bf16.msra.mxu0 %v7062_v49  ;;  %4389 = vmatpush.bf16.msra.mxu2 %v7076_v47 }
 0xb5c   :  { %4348 = vmatpush.bf16.msra.mxu1 %v7116_v22  ;;  %4362 = vmatpush.bf16.msra.mxu3 %v7101_v12 }
 0xb5d   :  { %4376 = vmatpush.bf16.msra.mxu0 %v7142_v38  ;;  %4390 = vmatpush.bf16.msra.mxu2 %v7156_v63 }
 0xb60   :  { %4349 = vmatpush.bf16.msra.mxu1 %v7196_v11  ;;  %4363 = vmatpush.bf16.msra.mxu3 %v7181_v1 }
 0xb61   :  { %4377 = vmatpush.bf16.msra.mxu0 %v7222_v2  ;;  %4391 = vmatpush.bf16.msra.mxu2 %v7236_v18 }
 0xb64   :  { %4350 = vmatpush.bf16.msra.mxu1 %v7276_v31  ;;  %4364 = vmatpush.bf16.msra.mxu3 %v7261_v19 }
 0xb65   :  { %4378 = vmatpush.bf16.msra.mxu0 %v7302_v45  ;;  %4392 = vmatpush.bf16.msra.mxu2 %v7316_v42 }
 0xb68   :  { %4351 = vmatpush.bf16.msra.mxu1 %v7360_v53  ;;  %4365 = vmatpush.bf16.msra.mxu3 %v7346_v29 }
 0xb69   :  { %4379 = vmatpush.bf16.msra.mxu0 %v7389_v14  ;;  %4393 = vmatpush.bf16.msra.mxu2 %v7400_v25 }
 0xb6c   :  { %4352 = vmatpush.bf16.msra.mxu1 %v7440_v26  ;;  %4366 = vmatpush.bf16.msra.mxu3 %v7426_v48 }
 0xb6d   :  { %4380 = vmatpush.bf16.msra.mxu0 %v7469_v56  ;;  %4394 = vmatpush.bf16.msra.mxu2 %v7480_v28 }
 0xb70   :  { %4353 = vmatpush.bf16.msra.mxu1 %v7521_v61  ;;  %4367 = vmatpush.bf16.msra.mxu3 %v7506_v55 }
 0xb71   :  { %4381 = vmatpush.bf16.msra.mxu0 %v7557_v15  ;;  %4395 = vmatpush.bf16.msra.mxu2 %v7573_v23 }
 0xbcf   :  { %v3973_v46 = vpop.f32.mrf.mxu1 }
 0xbd0   :  { %v4020_v54 = vadd.f32 %v3973_v46, %v9428_v20  ;;  %v4001_v5 = vpop.f32.mrf.mxu0 }
 0xbd1   :  { %v4022_v33 = vadd.f32 %v4001_v5, %v9430_v21 }
 0xbd2   :  { %v5540_v4 = vmul.f32 -1.442695, %v4020_v54 }
 0xbd3   :  { %v5542_v7 = vmul.f32 -1.442695, %v4022_v33 }
 0xbd4   :  { %6121 = vpow2.f32 %v5540_v4 }
 0xbd5   :  { %v3987_v60 = vpop.f32.mrf.mxu3 }
 0xbd6   :  { %v4021_v13 = vadd.f32 %v3987_v60, %v9431_v17  ;;  %v4015_v20 = vpop.f32.mrf.mxu2 }
 0xbd7   :  { %v3975_v41 = vpop.f32.mrf.mxu1  ;;  %v4023_v60 = vadd.f32 %v4015_v20, %v9435_v44 }
 0xbd8   :  { %v5541_v30 = vmul.f32 -1.442695, %v4021_v13  ;;  %v4024_v16 = vadd.f32 %v3975_v41, %v9433_v10  ;;  %v4003_v43 = vpop.f32.mrf.mxu0 }
 0xbd9   :  { %v4026_v0 = vadd.f32 %v4003_v43, %v1285_v9 }
 0xbda   :  { %v6122_v51 = vpop.eup %6121  ;;  %6123 = vpow2.f32 %v5541_v30  ;;  %v5543_v58 = vmul.f32 -1.442695, %v4024_v16 }
 0xbdb   :  { %v4046_v62 = vadd.f32 1.0, %v6122_v51  ;;  %v5545_v39 = vmul.f32 -1.442695, %v4026_v0 }
 0xbdc   :  { %6125 = vpow2.f32 %v5543_v58 }
 0xbdd   :  { %6127 = vrcp.f32 %v4046_v62  ;;  %v3989_v36 = vpop.f32.mrf.mxu3  ;;  %v4063_v41 = vand.u32 2147483648, %v4046_v62  ;;  %v4061_v10 = vand.u32 2147483647, %v4046_v62  ;;  %vm4057_vm1 = vweird.f32 %v4046_v62 }
 0xbde   :  { %6129 = vpow2.f32 %v5542_v7  ;;  %v4025_v57 = vadd.f32 %v3989_v36, %v9434_v37 }
 0xbdf   :  { %6131 = vpow2.f32 %v5545_v39  ;;  %v4064_v58 = vor.u32 1.1754944e-38, %v4063_v41  ;;  %vm4062_vm6 = vcmp.eq.f32.partialorder %v4061_v10, 8.507059e+37 }
 0xbe0   :  { %v6124_v46 = vpop.eup %6123  ;;  %v5544_v5 = vmul.f32 -1.442695, %v4025_v57 }
 0xbe1   :  { %v4047_v54 = vadd.f32 1.0, %v6124_v46 }
 0xbe2   :  { %v6126_v4 = vpop.eup %6125 }
 0xbe3   :  { %v6128_v3 = vpop.eup %6127  ;;  %6133 = vrcp.f32 %v4047_v54  ;;  %v8802_v17 = vadd.f32 1.0, %v6126_v4  ;;  %v4078_v20 = vand.u32 2147483648, %v4047_v54  ;;  %vm4072_vm12 = vweird.f32 %v4047_v54 }
 0xbe4   :  { %v6130_v21 = vpop.eup %6129  ;;  %v4053_v33 = vmul.f32 %v6128_v3, %v4046_v62  ;;  %6135 = vpow2.f32 %v5544_v5  ;;  %vm4058_vm5 = vweird.f32 %v6128_v3  ;;  %v4076_v62 = vand.u32 2147483647, %v4047_v54 }
 0xbe5   :  { %v6132_v13 = vpop.eup %6131  ;;  %6137 = vrcp.f32 %v8802_v17  ;;  %v8805_v9 = vadd.f32 1.0, %v6130_v21  ;;  %vm4059_vm8 = vmor %vm4057_vm1, %vm4058_vm5  ;;  %v9436_v21 = vld [vmem:[#allocation137_spill] sm:$0xff]  ;;  %vm4102_vm11 = vweird.f32 %v8802_v17 }
 0xbe6   :  { %v4054_v6 = vsub.f32 1.0, %v4053_v33  ;;  %6139 = vtanh.f32 %v4023_v60  ;;  %v8807_v16 = vadd.f32 1.0, %v6132_v13  ;;  %v1374_v33 = vadd.f32 %v9436_v21, %v9365_v59 }
 0xbe7   :  { %6141 = vrcp.f32 %v8805_v9  ;;  %vm4077_vm2 = vcmp.eq.f32.partialorder %v4076_v62, 8.507059e+37  ;;  %v4106_v62 = vand.u32 2147483647, %v8802_v17 }
 0xbe8   :  { %v4055_v30 = vmul.f32 %v6128_v3, %v4054_v6  ;;  %6143 = vrcp.f32 %v8807_v16 }
 0xbe9   :  { %v6134_v43 = vpop.eup %6133  ;;  %vm4107_vm14 = vcmp.eq.f32.partialorder %v4106_v62, 8.507059e+37 }
 0xbea   :  { %v6136_v0 = vpop.eup %6135  ;;  %v4068_v51 = vmul.f32 %v6134_v43, %v4047_v54  ;;  %v4056_v7 = vadd.f32 %v6128_v3, %v4055_v30  ;;  %vm4073_vm7 = vweird.f32 %v6134_v43  ;;  %v9437_v30 = vld [vmem:[#allocation140_spill] sm:$0xff] }
 0xbeb   :  { %v4050_v39 = vadd.f32 1.0, %v6136_v0  ;;  %v6138_v36 = vpop.eup %6137  ;;  %v1463_v10 = vadd.f32 %v9437_v30, %v1374_v33  ;;  %vm4074_vm4 = vmor %vm4072_vm12, %vm4073_vm7  ;;  %v4079_v0 = vor.u32 1.1754944e-38, %v4078_v20  ;;  %v4108_v20 = vand.u32 2147483648, %v8802_v17 }
 0xbec   :  { %v4069_v37 = vsub.f32 1.0, %v4068_v51  ;;  %v4060_v57 = vsel %vm4059_vm8, %v6128_v3, %v4056_v7  ;;  %v6140_v46 = vpop.eup %6139  ;;  %v4098_v4 = vmul.f32 %v6138_v36, %v8802_v17  ;;  %v4017_v3 = vpop.f32.mrf.mxu2  ;;  %vm4103_vm13 = vweird.f32 %v6138_v36 }
 0xbed   :  { %v4065_v5 = vsel %vm4062_vm6, %v4064_v58, %v4060_v57  ;;  %6145 = vrcp.f32 %v4050_v39  ;;  %v8814_v41 = vpop.eup %6141  ;;  %vm4104_vm10 = vmor %vm4102_vm11, %vm4103_vm13  ;;  %vm4117_vm0 = vweird.f32 %v4050_v39  ;;  %vm4087_vm8 = vweird.f32 %v8805_v9 }
 0xbee   :  { %v4070_v44 = vmul.f32 %v6134_v43, %v4069_v37  ;;  %v4146_v60 = vmul.f32 %v6140_v46, %v4065_v5  ;;  %v4099_v13 = vsub.f32 1.0, %v4098_v4  ;;  %v8817_v7 = vpop.eup %6143  ;;  %v4027_v46 = vadd.f32 %v4017_v3, %v1463_v10 }
 0xbef   :  { %v4128_v21 = vmul.f32 %v8817_v7, %v8807_v16  ;;  %v4121_v3 = vand.u32 2147483647, %v4050_v39  ;;  %vm4088_vm5 = vweird.f32 %v8814_v41  ;;  %vm4133_vm1 = vweird.f32 %v8817_v7 }
 0xbf0   :  { %v4071_v6 = vadd.f32 %v6134_v43, %v4070_v44  ;;  %v4100_v51 = vmul.f32 %v6138_v36, %v4099_v13  ;;  %v4083_v44 = vmul.f32 %v8814_v41, %v8805_v9  ;;  %v4123_v13 = vand.u32 2147483648, %v4050_v39  ;;  %vm4089_vm6 = vmor %vm4087_vm8, %vm4088_vm5 }
 0xbf1   :  { %6147 = vtanh.f32 %v4027_v46  ;;  %v4129_v10 = vsub.f32 1.0, %v4128_v21  ;;  %vm4122_vm9 = vcmp.eq.f32.partialorder %v4121_v3, 8.507059e+37  ;;  %v4093_v21 = vand.u32 2147483648, %v8805_v9 }
 0xbf2   :  { %v4075_v58 = vsel %vm4074_vm4, %v6134_v43, %v4071_v6  ;;  %v4101_v54 = vadd.f32 %v6138_v36, %v4100_v51  ;;  %v4084_v30 = vsub.f32 1.0, %v4083_v44  ;;  %vm4132_vm7 = vweird.f32 %v8807_v16 }
 0xbf3   :  { %v6146_v37 = vpop.eup %6145  ;;  %v4080_v57 = vsel %vm4077_vm2, %v4079_v0, %v4075_v58  ;;  %v4109_v0 = vor.u32 1.1754944e-38, %v4108_v20  ;;  %v4130_v46 = vmul.f32 %v8817_v7, %v4129_v10  ;;  %v4138_v20 = vand.u32 2147483648, %v8807_v16  ;;  %vm4134_vm12 = vmor %vm4132_vm7, %vm4133_vm1 }
 0xbf4   :  { %v4144_v5 = vmul.f32 %v4080_v57, %v8738_v50  ;;  %v4113_v4 = vmul.f32 %v6146_v37, %v4050_v39  ;;  %vm4118_vm3 = vweird.f32 %v6146_v37  ;;  %v4105_v6 = vsel %vm4104_vm10, %v6138_v36, %v4101_v54 }
 0xbf5   :  { %vm4119_vm15 = vmor %vm4117_vm0, %vm4118_vm3  ;;  %v4110_v58 = vsel %vm4107_vm14, %v4109_v0, %v4105_v6  ;;  %v4085_v17 = vmul.f32 %v8814_v41, %v4084_v30  ;;  %v4094_v6 = vor.u32 1.1754944e-38, %v4093_v21  ;;  %v4139_v3 = vor.u32 1.1754944e-38, %v4138_v20 }
 0xbf6   :  { %v8825_v33 = vadd.f32 %v4146_v60, %v4144_v5  ;;  %v4114_v43 = vsub.f32 1.0, %v4113_v4  ;;  %v4124_v60 = vor.u32 1.1754944e-38, %v4123_v13 }
 0xbf7   :  { %v6148_v5 = vpop.eup %6147  ;;  %v4086_v44 = vadd.f32 %v8814_v41, %v4085_v17 }
 0xbf8   :  { %v4115_v50 = vmul.f32 %v6146_v37, %v4114_v43  ;;  %v4147_v54 = vmul.f32 %v6148_v5, %v4110_v58  ;;  %6149 = vtanh.f32 %v8825_v33  ;;  %v4136_v43 = vand.u32 2147483647, %v8807_v16 }
 0xbf9   :  { %v4090_v62 = vsel %vm4089_vm6, %v8814_v41, %v4086_v44 }
 0xbfa   :  { %v4116_v51 = vadd.f32 %v6146_v37, %v4115_v50  ;;  %vm4137_vm2 = vcmp.eq.f32.partialorder %v4136_v43, 8.507059e+37 }
 0xbfc   :  { %v4120_v57 = vsel %vm4119_vm15, %v6146_v37, %v4116_v51  ;;  %v4131_v37 = vadd.f32 %v8817_v7, %v4130_v46 }
 0xbfd   :  { %v4125_v4 = vsel %vm4122_vm9, %v4124_v60, %v4120_v57 }
 0xbfe   :  { %v4145_v36 = vmul.f32 %v4125_v4, %v8747_v40  ;;  %v4091_v40 = vand.u32 2147483647, %v8805_v9  ;;  %v4135_v13 = vsel %vm4134_vm12, %v8817_v7, %v4131_v37  ;;  %v6150_v50 = vpop.eup %6149  ;;  %v9445_v7 = vld [vmem:[#allocation142_spill] sm:$0xff] }
 0xbff   :  { %v4140_v0 = vsel %vm4137_vm2, %v4139_v3, %v4135_v13 }
 0xc00   :  { %v8834_v39 = vadd.f32 %v4147_v54, %v4145_v36  ;;  %vm4092_vm4 = vcmp.eq.f32.partialorder %v4091_v40, 8.507059e+37 }
 0xc01   :  { %v4095_v10 = vsel %vm4092_vm4, %v4094_v6, %v4090_v62 }
 0xc02   :  { %6151 = vtanh.f32 %v8834_v39  ;;  %v4152_v51 = vmul.f32 %v6150_v50, %v4095_v10 }
 0xc08   :  { %v6152_v30 = vpop.eup %6151 }
 0xc09   :  { %v4153_v60 = vmul.f32 %v6152_v30, %v4140_v0 }
 0xc0b   :  { %v4154_v9 = vpack.c.bf16 %v4153_v60, %v4152_v51 }
 0xc0d   :  { %4163 = vmatmul.bf16.vlgmr.msrb.gmra.mxu1 %v4154_v9  ;;  %4177 = vmatmul.bf16.vlgmr.msrb.gmra.mxu3 %v4154_v9 }
 0xc0e   :  { %4191 = vmatmul.bf16.vlgmr.msrb.gmra.mxu0 %v4154_v9  ;;  %4205 = vmatmul.bf16.vlgmr.msrb.gmra.mxu2 %v4154_v9 }
 0xc0f   :  { %4537 = vmatpush.bf16.msrb.mxu1 %v6944_v8  ;;  %4551 = vmatpush.bf16.msrb.mxu3 %v6929_v34  ;;  %v9438_v34 = vld [vmem:[#allocation65_spill] sm:$0xff] }
 0xc10   :  { %4565 = vmatpush.bf16.msrb.mxu0 %v6982_v27  ;;  %4579 = vmatpush.bf16.msrb.mxu2 %v6996_v35 }
 0xc13   :  { %4538 = vmatpush.bf16.msrb.mxu1 %v7036_v52  ;;  %4552 = vmatpush.bf16.msrb.mxu3 %v7021_v32  ;;  %v9439_v32 = vld [vmem:[#allocation145_spill] sm:$0xff] }
 0xc14   :  { %4566 = vmatpush.bf16.msrb.mxu0 %v7062_v49  ;;  %4580 = vmatpush.bf16.msrb.mxu2 %v7076_v47  ;;  %v1201_v52 = vadd.f32 %v9439_v32, %v9357_v24 }
 0xc17   :  { %4539 = vmatpush.bf16.msrb.mxu1 %v7116_v22  ;;  %4553 = vmatpush.bf16.msrb.mxu3 %v7101_v12  ;;  %v9441_v22 = vld [vmem:[#allocation66_spill] sm:$0xff] }
 0xc18   :  { %4567 = vmatpush.bf16.msrb.mxu0 %v7142_v38  ;;  %4581 = vmatpush.bf16.msrb.mxu2 %v7156_v63  ;;  %v9440_v63 = vld [vmem:[#allocation144_spill] sm:$0xff] }
 0xc1b   :  { %4540 = vmatpush.bf16.msrb.mxu1 %v7196_v11  ;;  %4554 = vmatpush.bf16.msrb.mxu3 %v7181_v1 }
 0xc1c   :  { %4568 = vmatpush.bf16.msrb.mxu0 %v7222_v2  ;;  %4582 = vmatpush.bf16.msrb.mxu2 %v7236_v18  ;;  %v9442_v18 = vld [vmem:[#allocation147_spill] sm:$0xff] }
 0xc1d   :  { %v1290_v1 = vadd.f32 %v9442_v18, %v1201_v52 }
 0xc1f   :  { %4541 = vmatpush.bf16.msrb.mxu1 %v7276_v31  ;;  %4555 = vmatpush.bf16.msrb.mxu3 %v7261_v19 }
 0xc20   :  { %4569 = vmatpush.bf16.msrb.mxu0 %v7302_v45  ;;  %4583 = vmatpush.bf16.msrb.mxu2 %v7316_v42  ;;  %v9443_v42 = vld [vmem:[#allocation67_spill] sm:$0xff] }
 0xc23   :  { %4542 = vmatpush.bf16.msrb.mxu1 %v7360_v53  ;;  %4556 = vmatpush.bf16.msrb.mxu3 %v7346_v29 }
 0xc24   :  { %4570 = vmatpush.bf16.msrb.mxu0 %v7389_v14  ;;  %4584 = vmatpush.bf16.msrb.mxu2 %v7400_v25 }
 0xc27   :  { %4543 = vmatpush.bf16.msrb.mxu1 %v7440_v26  ;;  %4557 = vmatpush.bf16.msrb.mxu3 %v7426_v48 }
 0xc28   :  { %4571 = vmatpush.bf16.msrb.mxu0 %v7469_v56  ;;  %4585 = vmatpush.bf16.msrb.mxu2 %v7480_v28  ;;  %v9444_v56 = vld [vmem:[#allocation68_spill] sm:$0xff] }
 0xc2b   :  { %4544 = vmatpush.bf16.msrb.mxu1 %v7521_v61  ;;  %4558 = vmatpush.bf16.msrb.mxu3 %v7506_v55 }
 0xc2c   :  { %4572 = vmatpush.bf16.msrb.mxu0 %v7557_v15  ;;  %4586 = vmatpush.bf16.msrb.mxu2 %v7573_v23 }
 0xc8a   :  { %v4164_v35 = vpop.f32.mrf.mxu1 }
 0xc8b   :  { %v4211_v8 = vadd.f32 %v4164_v35, %v9438_v34  ;;  %v4192_v27 = vpop.f32.mrf.mxu0 }
 0xc8c   :  { %v4213_v12 = vadd.f32 %v4192_v27, %v9440_v63  ;;  %v9447_v63 = vld [vmem:[#allocation146_spill] sm:$0xff] }
 0xc8d   :  { %v5546_v47 = vmul.f32 -1.442695, %v4211_v8  ;;  %v9446_v8 = vld [vmem:[#allocation143_spill] sm:$0xff] }
 0xc8e   :  { %v5548_v53 = vmul.f32 -1.442695, %v4213_v12  ;;  %v1379_v27 = vadd.f32 %v9446_v8, %v9365_v59 }
 0xc8f   :  { %6153 = vpow2.f32 %v5546_v47 }
 0xc90   :  { %v4178_v49 = vpop.f32.mrf.mxu3  ;;  %v1468_v12 = vadd.f32 %v9447_v63, %v1379_v27 }
 0xc91   :  { %v4212_v38 = vadd.f32 %v4178_v49, %v9441_v22  ;;  %v4206_v61 = vpop.f32.mrf.mxu2 }
 0xc92   :  { %v4166_v11 = vpop.f32.mrf.mxu1  ;;  %v4214_v58 = vadd.f32 %v4206_v61, %v9445_v7 }
 0xc93   :  { %v5547_v2 = vmul.f32 -1.442695, %v4212_v38  ;;  %v4215_v19 = vadd.f32 %v4166_v11, %v9443_v42  ;;  %v4194_v31 = vpop.f32.mrf.mxu0 }
 0xc94   :  { %v4217_v45 = vadd.f32 %v4194_v31, %v1290_v1 }
 0xc95   :  { %v6154_v29 = vpop.eup %6153  ;;  %6155 = vpow2.f32 %v5547_v2  ;;  %v5549_v14 = vmul.f32 -1.442695, %v4215_v19 }
 0xc96   :  { %v4237_v25 = vadd.f32 1.0, %v6154_v29  ;;  %v5551_v48 = vmul.f32 -1.442695, %v4217_v45 }
 0xc97   :  { %6157 = vpow2.f32 %v5549_v14 }
 0xc98   :  { %6159 = vrcp.f32 %v4237_v25  ;;  %v4180_v26 = vpop.f32.mrf.mxu3  ;;  %v4254_v54 = vand.u32 2147483648, %v4237_v25  ;;  %v4252_v37 = vand.u32 2147483647, %v4237_v25  ;;  %vm4248_vm11 = vweird.f32 %v4237_v25 }
 0xc99   :  { %6161 = vpow2.f32 %v5548_v53  ;;  %v4216_v28 = vadd.f32 %v4180_v26, %v9444_v56  ;;  %v4208_v52 = vpop.f32.mrf.mxu2 }
 0xc9a   :  { %6163 = vpow2.f32 %v5551_v48  ;;  %v4255_v13 = vor.u32 1.1754944e-38, %v4254_v54  ;;  %vm4253_vm3 = vcmp.eq.f32.partialorder %v4252_v37, 8.507059e+37  ;;  %v4218_v42 = vadd.f32 %v4208_v52, %v1468_v12  ;;  %v9451_v12 = vld [vmem:[#allocation70_spill] sm:$0xff] }
 0xc9b   :  { %v6156_v55 = vpop.eup %6155  ;;  %v5550_v23 = vmul.f32 -1.442695, %v4216_v28 }
 0xc9c   :  { %v4238_v15 = vadd.f32 1.0, %v6156_v55 }
 0xc9d   :  { %v6158_v16 = vpop.eup %6157 }
 0xc9e   :  { %v6160_v41 = vpop.eup %6159  ;;  %6165 = vrcp.f32 %v4238_v15  ;;  %v8889_v17 = vadd.f32 1.0, %v6158_v16  ;;  %v4269_v0 = vand.u32 2147483648, %v4238_v15  ;;  %v4267_v35 = vand.u32 2147483647, %v4238_v15 }
 0xc9f   :  { %v6162_v57 = vpop.eup %6161  ;;  %v4244_v5 = vmul.f32 %v6160_v41, %v4237_v25  ;;  %6167 = vpow2.f32 %v5550_v23  ;;  %vm4249_vm13 = vweird.f32 %v6160_v41  ;;  %vm4263_vm14 = vweird.f32 %v4238_v15 }
 0xca0   :  { %v6164_v46 = vpop.eup %6163  ;;  %6169 = vrcp.f32 %v8889_v17  ;;  %v8892_v36 = vadd.f32 1.0, %v6162_v57  ;;  %vm4250_vm10 = vmor %vm4248_vm11, %vm4249_vm13  ;;  %v4270_v22 = vor.u32 1.1754944e-38, %v4269_v0  ;;  %vm4268_vm9 = vcmp.eq.f32.partialorder %v4267_v35, 8.507059e+37  ;;  %v9448_v35 = vld [vmem:[#allocation69_spill] sm:$0xff] }
 0xca1   :  { %v4245_v4 = vsub.f32 1.0, %v4244_v5  ;;  %6171 = vtanh.f32 %v4214_v58  ;;  %v8894_v21 = vadd.f32 1.0, %v6164_v46  ;;  %v4299_v14 = vand.u32 2147483648, %v8889_v17 }
 0xca2   :  { %6173 = vrcp.f32 %v8892_v36  ;;  %vm4293_vm1 = vweird.f32 %v8889_v17  ;;  %v4297_v26 = vand.u32 2147483647, %v8889_v17 }
 0xca3   :  { %v4246_v44 = vmul.f32 %v6160_v41, %v4245_v4  ;;  %6175 = vrcp.f32 %v8894_v21  ;;  %v4300_v23 = vor.u32 1.1754944e-38, %v4299_v14 }
 0xca4   :  { %v6166_v20 = vpop.eup %6165  ;;  %vm4298_vm12 = vcmp.eq.f32.partialorder %v4297_v26, 8.507059e+37 }
 0xca5   :  { %v6168_v40 = vpop.eup %6167  ;;  %v4259_v43 = vmul.f32 %v6166_v20, %v4238_v15  ;;  %v4247_v62 = vadd.f32 %v6160_v41, %v4246_v44  ;;  %vm4264_vm0 = vweird.f32 %v6166_v20 }
 0xca6   :  { %v4241_v50 = vadd.f32 1.0, %v6168_v40  ;;  %v6170_v6 = vpop.eup %6169  ;;  %vm4265_vm15 = vmor %vm4263_vm14, %vm4264_vm0  ;;  %v4284_v40 = vand.u32 2147483648, %v8892_v36  ;;  %vm4323_vm0 = vweird.f32 %v8894_v21 }
 0xca7   :  { %v4260_v3 = vsub.f32 1.0, %v4259_v43  ;;  %v4251_v30 = vsel %vm4250_vm10, %v6160_v41, %v4247_v62  ;;  %v6172_v10 = vpop.eup %6171  ;;  %v4289_v60 = vmul.f32 %v6170_v6, %v8889_v17  ;;  %vm4294_vm5 = vweird.f32 %v6170_v6 }
 0xca8   :  { %v4256_v51 = vsel %vm4253_vm3, %v4255_v13, %v4251_v30  ;;  %6177 = vrcp.f32 %v4241_v50  ;;  %v8901_v49 = vpop.eup %6173  ;;  %v4314_v56 = vand.u32 2147483648, %v4241_v50  ;;  %vm4295_vm8 = vmor %vm4293_vm1, %vm4294_vm5  ;;  %v4312_v55 = vand.u32 2147483647, %v4241_v50 }
 0xca9   :  { %v4261_v9 = vmul.f32 %v6166_v20, %v4260_v3  ;;  %v4337_v34 = vmul.f32 %v6172_v10, %v4256_v51  ;;  %v4290_v47 = vsub.f32 1.0, %v4289_v60  ;;  %v8904_v18 = vpop.eup %6175  ;;  %v4274_v29 = vmul.f32 %v8901_v49, %v8892_v36 }
 0xcaa   :  { %v4319_v53 = vmul.f32 %v8904_v18, %v8894_v21  ;;  %6179 = vtanh.f32 %v4218_v42  ;;  %vm4308_vm7 = vweird.f32 %v4241_v50  ;;  %v4315_v41 = vor.u32 1.1754944e-38, %v4314_v56  ;;  %v9454_v56 = vld [vmem:[#allocation72_spill] sm:$0xff] }
 0xcab   :  { %v4262_v32 = vadd.f32 %v6166_v20, %v4261_v9  ;;  %v4291_v38 = vmul.f32 %v6170_v6, %v4290_v47  ;;  %v4275_v61 = vsub.f32 1.0, %v4274_v29  ;;  %vm4313_vm2 = vcmp.eq.f32.partialorder %v4312_v55, 8.507059e+37  ;;  %v9449_v47 = vld [vmem:[#allocation151_spill] sm:$0xff] }
 0xcac   :  { %v4320_v15 = vsub.f32 1.0, %v4319_v53  ;;  %vm4279_vm13 = vweird.f32 %v8901_v49  ;;  %vm4324_vm11 = vweird.f32 %v8904_v18  ;;  %vm4278_vm10 = vweird.f32 %v8892_v36 }
 0xcad   :  { %v4266_v1 = vsel %vm4265_vm15, %v6166_v20, %v4262_v32  ;;  %v4292_v45 = vadd.f32 %v6170_v6, %v4291_v38  ;;  %v4276_v5 = vmul.f32 %v8901_v49, %v4275_v61  ;;  %v4329_v43 = vand.u32 2147483648, %v8894_v21  ;;  %vm4280_vm3 = vmor %vm4278_vm10, %vm4279_vm13  ;;  %v9452_v38 = vld [vmem:[#allocation153_spill] sm:$0xff] }
 0xcae   :  { %v6178_v11 = vpop.eup %6177  ;;  %v4271_v2 = vsel %vm4268_vm9, %v4270_v22, %v4266_v1  ;;  %v4321_v17 = vmul.f32 %v8904_v18, %v4320_v15  ;;  %v4327_v62 = vand.u32 2147483647, %v8894_v21  ;;  %vm4325_vm14 = vmor %vm4323_vm0, %vm4324_vm11  ;;  %v4285_v3 = vor.u32 1.1754944e-38, %v4284_v40 }
 0xcaf   :  { %v4335_v19 = vmul.f32 %v4271_v2, %v8825_v33  ;;  %v4304_v31 = vmul.f32 %v6178_v11, %v4241_v50  ;;  %vm4309_vm6 = vweird.f32 %v6178_v11  ;;  %v4296_v28 = vsel %vm4295_vm8, %v6170_v6, %v4292_v45  ;;  %v9453_v2 = vld [vmem:[#allocation71_spill] sm:$0xff] }
 0xcb0   :  { %vm4310_vm4 = vmor %vm4308_vm7, %vm4309_vm6  ;;  %v4301_v7 = vsel %vm4298_vm12, %v4300_v23, %v4296_v28  ;;  %v6180_v57 = vpop.eup %6179  ;;  %v4277_v37 = vadd.f32 %v8901_v49, %v4276_v5  ;;  %v4322_v20 = vadd.f32 %v8904_v18, %v4321_v17  ;;  %v4330_v30 = vor.u32 1.1754944e-38, %v4329_v43 }
 0xcb1   :  { %v8912_v25 = vadd.f32 %v4337_v34, %v4335_v19  ;;  %v4305_v48 = vsub.f32 1.0, %v4304_v31  ;;  %v4338_v54 = vmul.f32 %v6180_v57, %v4301_v7  ;;  %vm4328_vm9 = vcmp.eq.f32.partialorder %v4327_v62, 8.507059e+37 }
 0xcb2   :  { %v4281_v13 = vsel %vm4280_vm3, %v8901_v49, %v4277_v37  ;;  %v4326_v50 = vsel %vm4325_vm14, %v8904_v18, %v4322_v20  ;;  %v1206_v32 = vadd.f32 %v9449_v47, %v9357_v24  ;;  %v9450_v49 = vld [vmem:[#allocation150_spill] sm:$0xff] }
 0xcb3   :  { %v4306_v33 = vmul.f32 %v6178_v11, %v4305_v48  ;;  %6181 = vtanh.f32 %v8912_v25  ;;  %v4331_v51 = vsel %vm4328_vm9, %v4330_v30, %v4326_v50 }
 0xcb4   :  { %v1295_v18 = vadd.f32 %v9452_v38, %v1206_v32 }
 0xcb5   :  { %v4307_v16 = vadd.f32 %v6178_v11, %v4306_v33 }
 0xcb7   :  { %v4311_v58 = vsel %vm4310_vm4, %v6178_v11, %v4307_v16 }
 0xcb8   :  { %v4316_v46 = vsel %vm4313_vm2, %v4315_v41, %v4311_v58  ;;  %v9455_v41 = vld [vmem:[#allocation148_spill] sm:$0xff] }
 0xcb9   :  { %v4336_v4 = vmul.f32 %v4316_v46, %v8834_v39  ;;  %v4282_v39 = vand.u32 2147483647, %v8892_v36  ;;  %v6182_v6 = vpop.eup %6181 }
 0xcbb   :  { %v8921_v44 = vadd.f32 %v4338_v54, %v4336_v4  ;;  %vm4283_vm15 = vcmp.eq.f32.partialorder %v4282_v39, 8.507059e+37 }
 0xcbc   :  { %v4286_v0 = vsel %vm4283_vm15, %v4285_v3, %v4281_v13 }
 0xcbd   :  { %6183 = vtanh.f32 %v8921_v44  ;;  %v4343_v60 = vmul.f32 %v6182_v6, %v4286_v0 }
 0xcc3   :  { %v6184_v10 = vpop.eup %6183 }
 0xcc4   :  { %v4344_v9 = vmul.f32 %v6184_v10, %v4331_v51 }
 0xcc6   :  { %v4345_v36 = vpack.c.bf16 %v4344_v9, %v4343_v60 }
 0xcc8   :  { %4354 = vmatmul.bf16.vlgmr.msra.gmra.mxu1 %v4345_v36  ;;  %4368 = vmatmul.bf16.vlgmr.msra.gmra.mxu3 %v4345_v36 }
 0xcc9   :  { %4382 = vmatmul.bf16.vlgmr.msra.gmra.mxu0 %v4345_v36  ;;  %4396 = vmatmul.bf16.vlgmr.msra.gmra.mxu2 %v4345_v36 }
 0xd45   :  { %v4355_v21 = vpop.f32.mrf.mxu1 }
 0xd46   :  { %v4402_v34 = vadd.f32 %v4355_v21, %v9448_v35  ;;  %v4383_v8 = vpop.f32.mrf.mxu0 }
 0xd47   :  { %v4404_v63 = vadd.f32 %v4383_v8, %v9450_v49  ;;  %v9457_v49 = vld [vmem:[#allocation152_spill] sm:$0xff] }
 0xd48   :  { %v5552_v27 = vmul.f32 -1.442695, %v4402_v34  ;;  %v9456_v34 = vld [vmem:[#allocation149_spill] sm:$0xff] }
 0xd49   :  { %v5554_v29 = vmul.f32 -1.442695, %v4404_v63  ;;  %v1384_v8 = vadd.f32 %v9456_v34, %v9365_v59 }
 0xd4a   :  { %6185 = vpow2.f32 %v5552_v27 }
 0xd4b   :  { %v4369_v52 = vpop.f32.mrf.mxu3  ;;  %v1473_v63 = vadd.f32 %v9457_v49, %v1384_v8  ;;  %v9459_v8 = vld [vmem:[#allocation156_spill] sm:$0xff] }
 0xd4c   :  { %v4403_v22 = vadd.f32 %v4369_v52, %v9451_v12  ;;  %v4397_v55 = vpop.f32.mrf.mxu2 }
 0xd4d   :  { %v4357_v1 = vpop.f32.mrf.mxu1  ;;  %v4405_v7 = vadd.f32 %v4397_v55, %v9455_v41 }
 0xd4e   :  { %v5553_v11 = vmul.f32 -1.442695, %v4403_v22  ;;  %v4406_v42 = vadd.f32 %v4357_v1, %v9453_v2  ;;  %v4385_v19 = vpop.f32.mrf.mxu0 }
 0xd4f   :  { %v4408_v31 = vadd.f32 %v4385_v19, %v1295_v18 }
 0xd50   :  { %v6186_v45 = vpop.eup %6185  ;;  %6187 = vpow2.f32 %v5553_v11  ;;  %v5555_v53 = vmul.f32 -1.442695, %v4406_v42 }
 0xd51   :  { %v4428_v14 = vadd.f32 1.0, %v6186_v45  ;;  %v5557_v48 = vmul.f32 -1.442695, %v4408_v31 }
 0xd52   :  { %6189 = vpow2.f32 %v5555_v53 }
 0xd53   :  { %6191 = vrcp.f32 %v4428_v14  ;;  %v4371_v26 = vpop.f32.mrf.mxu3  ;;  %v4445_v54 = vand.u32 2147483648, %v4428_v14  ;;  %v4443_v20 = vand.u32 2147483647, %v4428_v14  ;;  %vm4439_vm1 = vweird.f32 %v4428_v14 }
 0xd54   :  { %6193 = vpow2.f32 %v5554_v29  ;;  %v4407_v33 = vadd.f32 %v4371_v26, %v9454_v56  ;;  %v4399_v32 = vpop.f32.mrf.mxu2 }
 0xd55   :  { %6195 = vpow2.f32 %v5557_v48  ;;  %v4446_v50 = vor.u32 1.1754944e-38, %v4445_v54  ;;  %vm4444_vm6 = vcmp.eq.f32.partialorder %v4443_v20, 8.507059e+37  ;;  %v4409_v2 = vadd.f32 %v4399_v32, %v1473_v63 }
 0xd56   :  { %v6188_v28 = vpop.eup %6187  ;;  %v5556_v15 = vmul.f32 -1.442695, %v4407_v33 }
 0xd57   :  { %v4429_v61 = vadd.f32 1.0, %v6188_v28 }
 0xd58   :  { %v6190_v23 = vpop.eup %6189 }
 0xd59   :  { %v6192_v16 = vpop.eup %6191  ;;  %6197 = vrcp.f32 %v4429_v61  ;;  %v8944_v5 = vadd.f32 1.0, %v6190_v23  ;;  %v4460_v51 = vand.u32 2147483648, %v4429_v61  ;;  %v4458_v21 = vand.u32 2147483647, %v4429_v61 }
 0xd5a   :  { %v6194_v58 = vpop.eup %6193  ;;  %v4435_v57 = vmul.f32 %v6192_v16, %v4428_v14  ;;  %6199 = vpow2.f32 %v5556_v15  ;;  %vm4440_vm5 = vweird.f32 %v6192_v16  ;;  %vm4454_vm12 = vweird.f32 %v4429_v61 }
 0xd5b   :  { %v6196_v17 = vpop.eup %6195  ;;  %6201 = vrcp.f32 %v8944_v5  ;;  %v8947_v4 = vadd.f32 1.0, %v6194_v58  ;;  %vm4441_vm8 = vmor %vm4439_vm1, %vm4440_vm5  ;;  %v4461_v12 = vor.u32 1.1754944e-38, %v4460_v51  ;;  %vm4459_vm2 = vcmp.eq.f32.partialorder %v4458_v21, 8.507059e+37  ;;  %v9458_v21 = vld [vmem:[#allocation73_spill] sm:$0xff] }
 0xd5c   :  { %v4436_v46 = vsub.f32 1.0, %v4435_v57  ;;  %6203 = vtanh.f32 %v4405_v7  ;;  %v8949_v40 = vadd.f32 1.0, %v6196_v17  ;;  %v4490_v53 = vand.u32 2147483648, %v8944_v5 }
 0xd5d   :  { %6205 = vrcp.f32 %v8947_v4  ;;  %vm4484_vm11 = vweird.f32 %v8944_v5  ;;  %v4488_v26 = vand.u32 2147483647, %v8944_v5 }
 0xd5e   :  { %v4437_v37 = vmul.f32 %v6192_v16, %v4436_v46  ;;  %6207 = vrcp.f32 %v8949_v40  ;;  %v4491_v15 = vor.u32 1.1754944e-38, %v4490_v53 }
 0xd5f   :  { %v6198_v43 = vpop.eup %6197  ;;  %vm4489_vm14 = vcmp.eq.f32.partialorder %v4488_v26, 8.507059e+37 }
 0xd60   :  { %v6200_v39 = vpop.eup %6199  ;;  %v4450_v62 = vmul.f32 %v6198_v43, %v4429_v61  ;;  %v4438_v13 = vadd.f32 %v6192_v16, %v4437_v37  ;;  %vm4455_vm7 = vweird.f32 %v6198_v43 }
 0xd61   :  { %v4432_v6 = vadd.f32 1.0, %v6200_v39  ;;  %v6202_v3 = vpop.eup %6201  ;;  %vm4456_vm4 = vmor %vm4454_vm12, %vm4455_vm7  ;;  %v4475_v39 = vand.u32 2147483648, %v8947_v4  ;;  %vm4514_vm7 = vweird.f32 %v8949_v40 }
 0xd62   :  { %v4451_v30 = vsub.f32 1.0, %v4450_v62  ;;  %v4442_v10 = vsel %vm4441_vm8, %v6192_v16, %v4438_v13  ;;  %v6204_v0 = vpop.eup %6203  ;;  %v4480_v9 = vmul.f32 %v6202_v3, %v8944_v5  ;;  %vm4485_vm13 = vweird.f32 %v6202_v3 }
 0xd63   :  { %v4447_v60 = vsel %vm4444_vm6, %v4446_v50, %v4442_v10  ;;  %6209 = vrcp.f32 %v4432_v6  ;;  %v8956_v52 = vpop.eup %6205  ;;  %v4505_v56 = vand.u32 2147483648, %v4432_v6  ;;  %vm4486_vm10 = vmor %vm4484_vm11, %vm4485_vm13  ;;  %v4503_v28 = vand.u32 2147483647, %v4432_v6 }
 0xd64   :  { %v4452_v36 = vmul.f32 %v6198_v43, %v4451_v30  ;;  %v4528_v35 = vmul.f32 %v6204_v0, %v4447_v60  ;;  %v4481_v27 = vsub.f32 1.0, %v4480_v9  ;;  %v8959_v38 = vpop.eup %6207  ;;  %v4465_v45 = vmul.f32 %v8956_v52, %v8947_v4 }
 0xd65   :  { %v4510_v29 = vmul.f32 %v8959_v38, %v8949_v40  ;;  %6211 = vtanh.f32 %v4409_v2  ;;  %vm4499_vm0 = vweird.f32 %v4432_v6  ;;  %v4506_v16 = vor.u32 1.1754944e-38, %v4505_v56  ;;  %v9463_v2 = vld [vmem:[#allocation75_spill] sm:$0xff] }
 0xd66   :  { %v4453_v47 = vadd.f32 %v6198_v43, %v4452_v36  ;;  %v4482_v22 = vmul.f32 %v6202_v3, %v4481_v27  ;;  %v4466_v55 = vsub.f32 1.0, %v4465_v45  ;;  %vm4504_vm9 = vcmp.eq.f32.partialorder %v4503_v28, 8.507059e+37 }
 0xd67   :  { %v4511_v61 = vsub.f32 1.0, %v4510_v29  ;;  %vm4470_vm5 = vweird.f32 %v8956_v52  ;;  %vm4515_vm1 = vweird.f32 %v8959_v38  ;;  %vm4469_vm8 = vweird.f32 %v8947_v4 }
 0xd68   :  { %v4457_v18 = vsel %vm4456_vm4, %v6198_v43, %v4453_v47  ;;  %v4483_v31 = vadd.f32 %v6202_v3, %v4482_v22  ;;  %v4467_v57 = vmul.f32 %v8956_v52, %v4466_v55  ;;  %v4520_v62 = vand.u32 2147483648, %v8949_v40  ;;  %vm4471_vm6 = vmor %vm4469_vm8, %vm4470_vm5 }
 0xd69   :  { %v6210_v1 = vpop.eup %6209  ;;  %v4462_v11 = vsel %vm4459_vm2, %v4461_v12, %v4457_v18  ;;  %v4512_v5 = vmul.f32 %v8959_v38, %v4511_v61  ;;  %v4518_v13 = vand.u32 2147483647, %v8949_v40  ;;  %vm4516_vm12 = vmor %vm4514_vm7, %vm4515_vm1  ;;  %v4476_v30 = vor.u32 1.1754944e-38, %v4475_v39  ;;  %v9461_v12 = vld [vmem:[#allocation74_spill] sm:$0xff] }
 0xd6a   :  { %v4526_v42 = vmul.f32 %v4462_v11, %v8912_v25  ;;  %v4495_v19 = vmul.f32 %v6210_v1, %v4432_v6  ;;  %vm4500_vm3 = vweird.f32 %v6210_v1  ;;  %v4487_v33 = vsel %vm4486_vm10, %v6202_v3, %v4483_v31 }
 0xd6b   :  { %vm4501_vm15 = vmor %vm4499_vm0, %vm4500_vm3  ;;  %v4492_v41 = vsel %vm4489_vm14, %v4491_v15, %v4487_v33  ;;  %v6212_v58 = vpop.eup %6211  ;;  %v4468_v20 = vadd.f32 %v8956_v52, %v4467_v57  ;;  %v4513_v43 = vadd.f32 %v8959_v38, %v4512_v5  ;;  %v4521_v10 = vor.u32 1.1754944e-38, %v4520_v62 }
 0xd6c   :  { %v8967_v14 = vadd.f32 %v4528_v35, %v4526_v42  ;;  %v4496_v48 = vsub.f32 1.0, %v4495_v19  ;;  %v4529_v54 = vmul.f32 %v6212_v58, %v4492_v41  ;;  %vm4519_vm2 = vcmp.eq.f32.partialorder %v4518_v13, 8.507059e+37  ;;  %v9465_v41 = vld [vmem:[#allocation154_spill] sm:$0xff] }
 0xd6d   :  { %v4472_v50 = vsel %vm4471_vm6, %v8956_v52, %v4468_v20  ;;  %v4517_v6 = vsel %vm4516_vm12, %v8959_v38, %v4513_v43  ;;  %v9460_v52 = vld [vmem:[#allocation157_spill] sm:$0xff]  ;;  %v9462_v38 = vld [vmem:[#allocation158_spill] sm:$0xff] }
 0xd6e   :  { %v4497_v25 = vmul.f32 %v6210_v1, %v4496_v48  ;;  %6213 = vtanh.f32 %v8967_v14  ;;  %v4522_v60 = vsel %vm4519_vm2, %v4521_v10, %v4517_v6  ;;  %v1211_v49 = vadd.f32 %v9460_v52, %v9357_v24  ;;  %v9466_v6 = vld [vmem:[#allocation155_spill] sm:$0xff] }
 0xd70   :  { %v4498_v23 = vadd.f32 %v6210_v1, %v4497_v25  ;;  %v1300_v18 = vadd.f32 %v9462_v38, %v1211_v49  ;;  %v9464_v25 = vld [vmem:[#allocation76_spill] sm:$0xff] }
 0xd72   :  { %v4502_v7 = vsel %vm4501_vm15, %v6210_v1, %v4498_v23 }
 0xd73   :  { %v4507_v17 = vsel %vm4504_vm9, %v4506_v16, %v4502_v7 }
 0xd74   :  { %v4527_v46 = vmul.f32 %v4507_v17, %v8921_v44  ;;  %v4473_v44 = vand.u32 2147483647, %v8947_v4  ;;  %v6214_v3 = vpop.eup %6213 }
 0xd76   :  { %v8976_v37 = vadd.f32 %v4529_v54, %v4527_v46  ;;  %vm4474_vm4 = vcmp.eq.f32.partialorder %v4473_v44, 8.507059e+37 }
 0xd77   :  { %v4477_v51 = vsel %vm4474_vm4, %v4476_v30, %v4472_v50 }
 0xd78   :  { %6215 = vtanh.f32 %v8976_v37  ;;  %v4534_v9 = vmul.f32 %v6214_v3, %v4477_v51  ;;  %v1389_v3 = vadd.f32 %v9466_v6, %v9365_v59 }
 0xd7e   :  { %v6216_v0 = vpop.eup %6215 }
 0xd7f   :  { %v4535_v36 = vmul.f32 %v6216_v0, %v4522_v60 }
 0xd81   :  { %v4536_v4 = vpack.c.bf16 %v4535_v36, %v4534_v9 }
 0xd83   :  { %4545 = vmatmul.bf16.vlgmr.msrb.gmra.mxu1 %v4536_v4  ;;  %4559 = vmatmul.bf16.vlgmr.msrb.gmra.mxu3 %v4536_v4 }
 0xd84   :  { %4573 = vmatmul.bf16.vlgmr.msrb.gmra.mxu0 %v4536_v4  ;;  %4587 = vmatmul.bf16.vlgmr.msrb.gmra.mxu2 %v4536_v4 }
 0xe00   :  { %v4546_v40 = vpop.f32.mrf.mxu1 }
 0xe01   :  { %v4593_v35 = vadd.f32 %v4546_v40, %v9458_v21  ;;  %v4574_v34 = vpop.f32.mrf.mxu0 }
 0xe02   :  { %v4595_v27 = vadd.f32 %v4574_v34, %v9459_v8 }
 0xe03   :  { %v5558_v47 = vmul.f32 -1.442695, %v4593_v35 }
 0xe04   :  { %v5560_v32 = vmul.f32 -1.442695, %v4595_v27  ;;  %v9467_v27 = vld [vmem:[#allocation159_spill] sm:$0xff] }
 0xe05   :  { %6217 = vpow2.f32 %v5558_v47  ;;  %v1478_v47 = vadd.f32 %v9467_v27, %v1389_v3 }
 0xe06   :  { %6219 = vpow2.f32 %v5560_v32  ;;  %v4560_v63 = vpop.f32.mrf.mxu3 }
 0xe07   :  { %v4594_v22 = vadd.f32 %v4560_v63, %v9461_v12  ;;  %v4588_v55 = vpop.f32.mrf.mxu2 }
 0xe08   :  { %v4548_v1 = vpop.f32.mrf.mxu1  ;;  %v4596_v7 = vadd.f32 %v4588_v55, %v9465_v41 }
 0xe09   :  { %v5559_v11 = vmul.f32 -1.442695, %v4594_v22  ;;  %v4597_v42 = vadd.f32 %v4548_v1, %v9463_v2  ;;  %v4576_v19 = vpop.f32.mrf.mxu0 }
 0xe0a   :  { %v4599_v31 = vadd.f32 %v4576_v19, %v1300_v18 }
 0xe0b   :  { %v6218_v45 = vpop.eup %6217  ;;  %6221 = vpow2.f32 %v5559_v11  ;;  %v5561_v29 = vmul.f32 -1.442695, %v4597_v42 }
 0xe0c   :  { %v6220_v53 = vpop.eup %6219  ;;  %v4619_v48 = vadd.f32 1.0, %v6218_v45  ;;  %v5563_v26 = vmul.f32 -1.442695, %v4599_v31 }
 0xe0d   :  { %6223 = vpow2.f32 %v5561_v29  ;;  %v9000_v56 = vadd.f32 1.0, %v6220_v53 }
 0xe0e   :  { %6225 = vrcp.f32 %v4619_v48  ;;  %v4562_v24 = vpop.f32.mrf.mxu3  ;;  %v4636_v46 = vand.u32 2147483648, %v4619_v48  ;;  %v4634_v43 = vand.u32 2147483647, %v4619_v48  ;;  %vm4630_vm11 = vweird.f32 %v4619_v48 }
 0xe0f   :  { %6227 = vpow2.f32 %v5563_v26  ;;  %v4598_v33 = vadd.f32 %v4562_v24, %v9464_v25  ;;  %v4590_v8 = vpop.f32.mrf.mxu2  ;;  %v4666_v45 = vand.u32 2147483648, %v9000_v56  ;;  %vm4660_vm12 = vweird.f32 %v9000_v56 }
 0xe10   :  { %6229 = vrcp.f32 %v9000_v56  ;;  %v4637_v10 = vor.u32 1.1754944e-38, %v4636_v46  ;;  %vm4635_vm3 = vcmp.eq.f32.partialorder %v4634_v43, 8.507059e+37  ;;  %v4600_v12 = vadd.f32 %v4590_v8, %v1478_v47 }
 0xe11   :  { %v6222_v28 = vpop.eup %6221  ;;  %v5562_v15 = vmul.f32 -1.442695, %v4598_v33  ;;  %v4667_v46 = vor.u32 1.1754944e-38, %v4666_v45 }
 0xe12   :  { %v4620_v61 = vadd.f32 1.0, %v6222_v28 }
 0xe13   :  { %v6224_v23 = vpop.eup %6223 }
 0xe14   :  { %v6226_v16 = vpop.eup %6225  ;;  %6231 = vrcp.f32 %v4620_v61  ;;  %v9005_v57 = vadd.f32 1.0, %v6224_v23  ;;  %v4651_v4 = vand.u32 2147483648, %v4620_v61  ;;  %v4649_v35 = vand.u32 2147483647, %v4620_v61 }
 0xe15   :  { %v4626_v58 = vmul.f32 %v6226_v16, %v4619_v48  ;;  %6233 = vpow2.f32 %v5562_v15  ;;  %v6228_v5 = vpop.eup %6227  ;;  %vm4631_vm13 = vweird.f32 %v6226_v16  ;;  %vm4645_vm14 = vweird.f32 %v4620_v61 }
 0xe16   :  { %6235 = vrcp.f32 %v9005_v57  ;;  %v9008_v54 = vpop.eup %6229  ;;  %v9010_v39 = vadd.f32 1.0, %v6228_v5  ;;  %vm4632_vm10 = vmor %vm4630_vm11, %vm4631_vm13  ;;  %v4652_v63 = vor.u32 1.1754944e-38, %v4651_v4  ;;  %vm4650_vm9 = vcmp.eq.f32.partialorder %v4649_v35, 8.507059e+37 }
 0xe17   :  { %v4627_v17 = vsub.f32 1.0, %v4626_v58  ;;  %6237 = vtanh.f32 %v4596_v7  ;;  %v4656_v30 = vmul.f32 %v9008_v54, %v9000_v56  ;;  %v4681_v53 = vand.u32 2147483648, %v9005_v57 }
 0xe18   :  { %6239 = vrcp.f32 %v9010_v39  ;;  %vm4675_vm1 = vweird.f32 %v9005_v57  ;;  %vm4661_vm8 = vweird.f32 %v9008_v54  ;;  %v4664_v15 = vand.u32 2147483647, %v9000_v56 }
 0xe19   :  { %v4628_v20 = vmul.f32 %v6226_v16, %v4627_v17  ;;  %v4657_v32 = vsub.f32 1.0, %v4656_v30  ;;  %vm9052_vm4 = vmor %vm4660_vm12, %vm4661_vm8  ;;  %v4711_v30 = vand.u32 2147483648, %v9010_v39 }
 0xe1a   :  { %v6232_v62 = vpop.eup %6231 }
 0xe1b   :  { %v6234_v44 = vpop.eup %6233  ;;  %v4641_v13 = vmul.f32 %v6232_v62, %v4620_v61  ;;  %v4629_v50 = vadd.f32 %v6226_v16, %v4628_v20  ;;  %vm4646_vm0 = vweird.f32 %v6232_v62  ;;  %v4658_v11 = vmul.f32 %v9008_v54, %v4657_v32 }
 0xe1c   :  { %v9016_v0 = vadd.f32 1.0, %v6234_v44  ;;  %v9018_v51 = vpop.eup %6235  ;;  %vm4647_vm15 = vmor %vm4645_vm14, %vm4646_vm0  ;;  %vm4705_vm14 = vweird.f32 %v9010_v39 }
 0xe1d   :  { %v4642_v60 = vsub.f32 1.0, %v4641_v13  ;;  %v4633_v9 = vsel %vm4632_vm10, %v6226_v16, %v4629_v50  ;;  %v6238_v36 = vpop.eup %6237  ;;  %v4671_v59 = vmul.f32 %v9018_v51, %v9005_v57  ;;  %vm4676_vm5 = vweird.f32 %v9018_v51 }
 0xe1e   :  { %v4638_v40 = vsel %vm4635_vm3, %v4637_v10, %v4633_v9  ;;  %6241 = vrcp.f32 %v9016_v0  ;;  %v9026_v38 = vpop.eup %6239  ;;  %v4659_v24 = vadd.f32 %v9008_v54, %v4658_v11  ;;  %v4696_v25 = vand.u32 2147483648, %v9016_v0  ;;  %vm9042_vm6 = vmor %vm4675_vm1, %vm4676_vm5 }
 0xe1f   :  { %v4643_v21 = vmul.f32 %v6232_v62, %v4642_v60  ;;  %v4719_v34 = vmul.f32 %v6238_v36, %v4638_v40  ;;  %v4672_v52 = vsub.f32 1.0, %v4671_v59  ;;  %v4701_v29 = vmul.f32 %v9026_v38, %v9010_v39 }
 0xe20   :  { %6243 = vtanh.f32 %v4600_v12  ;;  %v4694_v28 = vand.u32 2147483647, %v9016_v0  ;;  %v4682_v16 = vor.u32 1.1754944e-38, %v4681_v53  ;;  %vm4690_vm2 = vweird.f32 %v9016_v0 }
 0xe21   :  { %v4644_v49 = vadd.f32 %v6232_v62, %v4643_v21  ;;  %v4673_v22 = vmul.f32 %v9018_v51, %v4672_v52  ;;  %v4702_v23 = vsub.f32 1.0, %v4701_v29  ;;  %v4697_v5 = vor.u32 1.1754944e-38, %v4696_v25 }
 0xe22   :  { %vm4695_vm10 = vcmp.eq.f32.partialorder %v4694_v28, 8.507059e+37  ;;  %vm4665_vm3 = vcmp.eq.f32.partialorder %v4664_v15, 8.507059e+37  ;;  %vm4706_vm0 = vweird.f32 %v9026_v38  ;;  %v4709_v10 = vand.u32 2147483647, %v9010_v39 }
 0xe23   :  { %v4648_v18 = vsel %vm4647_vm15, %v6232_v62, %v4644_v49  ;;  %v4674_v31 = vadd.f32 %v9018_v51, %v4673_v22  ;;  %v4703_v20 = vmul.f32 %v9026_v38, %v4702_v23  ;;  %vm4707_vm15 = vmor %vm4705_vm14, %vm4706_vm0 }
 0xe24   :  { %v6242_v1 = vpop.eup %6241  ;;  %v4653_v2 = vsel %vm4650_vm9, %v4652_v63, %v4648_v18  ;;  %vm4710_vm9 = vcmp.eq.f32.partialorder %v4709_v10, 8.507059e+37 }
 0xe25   :  { %v4717_v42 = vmul.f32 %v4653_v2, %v8967_v14  ;;  %v4686_v19 = vmul.f32 %v6242_v1, %v9016_v0  ;;  %v4679_v14 = vand.u32 2147483647, %v9005_v57  ;;  %vm4691_vm7 = vweird.f32 %v6242_v1 }
 0xe26   :  { %v4678_v61 = vsel %vm9042_vm6, %v9018_v51, %v4674_v31  ;;  %v6244_v58 = vpop.eup %6243  ;;  %v4663_v57 = vsel %vm9052_vm4, %v9008_v54, %v4659_v24  ;;  %vm4692_vm11 = vmor %vm4690_vm2, %vm4691_vm7  ;;  %v4704_v54 = vadd.f32 %v9026_v38, %v4703_v20  ;;  %v4712_v51 = vor.u32 1.1754944e-38, %v4711_v30 }
 0xe27   :  { %v4721_v48 = vadd.f32 %v4719_v34, %v4717_v42  ;;  %v4687_v26 = vsub.f32 1.0, %v4686_v19  ;;  %vm4680_vm13 = vcmp.eq.f32.partialorder %v4679_v14, 8.507059e+37  ;;  %v4668_v44 = vsel %vm4665_vm3, %v4667_v46, %v4663_v57 }
 0xe28   :  { %v4683_v17 = vsel %vm4680_vm13, %v4682_v16, %v4678_v61  ;;  %v4708_v0 = vsel %vm4707_vm15, %v9026_v38, %v4704_v54 }
 0xe29   :  { %6245 = vtanh.f32 %v4721_v48  ;;  %v4688_v55 = vmul.f32 %v6242_v1, %v4687_v26  ;;  %v4720_v50 = vmul.f32 %v6244_v58, %v4683_v17  ;;  %v4713_v60 = vsel %vm4710_vm9, %v4712_v51, %v4708_v0 }
 0xe2b   :  { %v4689_v7 = vadd.f32 %v6242_v1, %v4688_v55 }
 0xe2d   :  { %v4693_v56 = vsel %vm4692_vm11, %v6242_v1, %v4689_v7 }
 0xe2e   :  { %v4698_v43 = vsel %vm4695_vm10, %v4697_v5, %v4693_v56 }
 0xe2f   :  { %v6246_v62 = vpop.eup %6245  ;;  %v4718_v13 = vmul.f32 %v4698_v43, %v8976_v37 }
 0xe30   :  { %v9062_v6 = vmul.f32 %v6246_v62, %v4668_v44 }
 0xe31   :  { %v4722_v3 = vadd.f32 %v4720_v50, %v4718_v13 }
 0xe33   :  { %6247 = vtanh.f32 %v4722_v3 }
 0xe39   :  { %v6248_v37 = vpop.eup %6247 }
 0xe3a   :  { %v9070_v9 = vmul.f32 %v6248_v37, %v4713_v60 }
 0xe3b   :  { %6350 = dma.done.wait [#allocation3], 2048 }
 0xe3c   :  { %6351 = vsyncadd [#allocation3], 4294965248  ;;  %v5622_v36 = vld [vmem:[#allocation2 + $0x70] sm:$0xf]  ;;  %v5724_v4 = vld [vmem:[#allocation2 + $0x74] sm:$0xf0]  ;;  %v4731_v20 = vpack.c.bf16 %v9070_v9, %v9062_v6 }
 0xe3d   :  { %v5723_v40 = vld [vmem:[#allocation2 + $0x74] sm:$0xf]  ;;  %v5623_v59 = vor.u32 %v5724_v4, %v5622_v36  ;;  %v5624_v21 = vld [vmem:[#allocation2 + $0x78] sm:$0xf0]  ;;  %v5614_v35 = vld [vmem:[#allocation2 + $0x60] sm:$0xf] }
 0xe3e   :  { %v5722_v34 = vld [vmem:[#allocation2 + $0x64] sm:$0xf0]  ;;  %v5627_v8 = vor.u32 %v5723_v40, %v5624_v21  ;;  %v5721_v39 = vld [vmem:[#allocation2 + $0x64] sm:$0xf]  ;;  %v5616_v27 = vld [vmem:[#allocation2 + $0x68] sm:$0xf0] }
 0xe3f   :  { %4834 = vmatpush.bf16.msra.mxu1 %v5623_v59  ;;  %v5615_v47 = vor.u32 %v5722_v34, %v5614_v35  ;;  %v5619_v32 = vor.u32 %v5721_v39, %v5616_v27  ;;  %v5606_v52 = vld [vmem:[#allocation2 + $0x50] sm:$0xf]  ;;  %v5720_v49 = vld [vmem:[#allocation2 + $0x54] sm:$0xf0]  ;;  %v5719_v63 = vld [vmem:[#allocation2 + $0x54] sm:$0xf] }
 0xe40   :  { %4848 = vmatpush.bf16.msra.mxu3 %v5627_v8  ;;  %v5608_v12 = vld [vmem:[#allocation2 + $0x58] sm:$0xf0]  ;;  %v5607_v22 = vor.u32 %v5720_v49, %v5606_v52  ;;  %v5598_v18 = vld [vmem:[#allocation2 + $0x40] sm:$0xf]  ;;  %v5718_v1 = vld [vmem:[#allocation2 + $0x44] sm:$0xf0] }
 0xe41   :  { %v5611_v38 = vor.u32 %v5719_v63, %v5608_v12  ;;  %v5717_v11 = vld [vmem:[#allocation2 + $0x44] sm:$0xf]  ;;  %v5600_v2 = vld [vmem:[#allocation2 + $0x48] sm:$0xf0]  ;;  %v5599_v42 = vor.u32 %v5718_v1, %v5598_v18  ;;  %v5590_v31 = vld [vmem:[#allocation2 + $0x30] sm:$0xf] }
 0xe42   :  { %v5603_v19 = vor.u32 %v5717_v11, %v5600_v2  ;;  %v5716_v45 = vld [vmem:[#allocation2 + $0x34] sm:$0xf0]  ;;  %v5715_v29 = vld [vmem:[#allocation2 + $0x34] sm:$0xf]  ;;  %v5592_v53 = vld [vmem:[#allocation2 + $0x38] sm:$0xf0] }
 0xe43   :  { %4835 = vmatpush.bf16.msra.mxu1 %v5615_v47  ;;  %v5591_v48 = vor.u32 %v5716_v45, %v5590_v31  ;;  %v5595_v26 = vor.u32 %v5715_v29, %v5592_v53  ;;  %v5582_v14 = vld [vmem:[#allocation2 + $0x20] sm:$0xf]  ;;  %v5714_v24 = vld [vmem:[#allocation2 + $0x24] sm:$0xf0]  ;;  %v5713_v25 = vld [vmem:[#allocation2 + $0x24] sm:$0xf] }
 0xe44   :  { %4849 = vmatpush.bf16.msra.mxu3 %v5619_v32  ;;  %v5584_v33 = vld [vmem:[#allocation2 + $0x28] sm:$0xf0]  ;;  %v5583_v28 = vor.u32 %v5714_v24, %v5582_v14  ;;  %v5574_v61 = vld [vmem:[#allocation2 + $0x10] sm:$0xf]  ;;  %v5712_v15 = vld [vmem:[#allocation2 + $0x14] sm:$0xf0] }
 0xe45   :  { %v5587_v55 = vor.u32 %v5713_v25, %v5584_v33  ;;  %v5711_v23 = vld [vmem:[#allocation2 + $0x14] sm:$0xf]  ;;  %v5576_v16 = vld [vmem:[#allocation2 + $0x18] sm:$0xf0]  ;;  %v5575_v41 = vor.u32 %v5712_v15, %v5574_v61  ;;  %v5566_v58 = vld [vmem:[#allocation2] sm:$0xf] }
 0xe46   :  { %v5579_v7 = vor.u32 %v5711_v23, %v5576_v16  ;;  %v5710_v57 = vld [vmem:[#allocation2 + $0x4] sm:$0xf0]  ;;  %v5709_v5 = vld [vmem:[#allocation2 + $0x4] sm:$0xf]  ;;  %v5568_v17 = vld [vmem:[#allocation2 + $0x8] sm:$0xf0] }
 0xe47   :  { %4836 = vmatpush.bf16.msra.mxu1 %v5607_v22  ;;  %v5567_v46 = vor.u32 %v5710_v57, %v5566_v58  ;;  %v5571_v56 = vor.u32 %v5709_v5, %v5568_v17  ;;  %v4748_v43 = vld [vmem:[#allocation7] sm:$0x3]  ;;  %s6362_s4 = smov [#allocation9]   ;;  %s4872_s9 = sshll.u32 %s9086_s6, 4  ;;  %s4873_s9 = int_to_ptr.hbm [resolvable:$true] %s4872_s9 }
 0xe48   :  { %4850 = vmatpush.bf16.msra.mxu3 %v5611_v38  ;;  %v4750_v62 = vperm.slane %v4748_v43, 0  ;;  %v4751_v50 = vperm.slane %v4748_v43, 1  ;;  %s4870_s3 = sshll.u32 %s6362_s4, 4  ;;  %s4871_s3 = int_to_ptr.vmem [resolvable:$true] %s4870_s3 }
 0xe4b   :  { %4837 = vmatpush.bf16.msra.mxu1 %v5599_v42 }
 0xe4c   :  { %4851 = vmatpush.bf16.msra.mxu3 %v5603_v19 }
 0xe4f   :  { %4838 = vmatpush.bf16.msra.mxu1 %v5591_v48 }
 0xe50   :  { %4852 = vmatpush.bf16.msra.mxu3 %v5595_v26 }
 0xe53   :  { %4839 = vmatpush.bf16.msra.mxu1 %v5583_v28 }
 0xe54   :  { %4853 = vmatpush.bf16.msra.mxu3 %v5587_v55 }
 0xe57   :  { %4840 = vmatpush.bf16.msra.mxu1 %v5575_v41 }
 0xe58   :  { %4854 = vmatpush.bf16.msra.mxu3 %v5579_v7 }
 0xe5b   :  { %4841 = vmatpush.bf16.msra.mxu1 %v5567_v46 }
 0xe5c   :  { %4855 = vmatpush.bf16.msra.mxu3 %v5571_v56 }
 0xe5e   :  { %4842 = vmatmul.bf16.vlgmr.msra.gmra.mxu1 %v4731_v20 }
 0xe5f   :  { %4856 = vmatmul.bf16.vlgmr.msra.gmra.mxu3 %v4731_v20 }
 0xedb   :  { %v4843_v44 = vpop.f32.mrf.mxu1 }
 0xedc   :  { %v4844_v13 = vadd.f32 %v4843_v44, %v4750_v62 }
 0xede   :  { %4862 = vst [vmem:[#allocation9] sm:$0xff] %v4844_v13 }
 0xee2   :  { %v4857_v3 = vpop.f32.mrf.mxu3 }
 0xee3   :  { %v4858_v54 = vadd.f32 %v4857_v3, %v4751_v50  ;;  %v4845_v30 = vpop.f32.mrf.mxu1 }
 0xee4   :  { %v4846_v10 = vadd.f32 %v4845_v30, %v4750_v62 }
 0xee5   :  { %4863 = vst [vmem:[#allocation9 + $0x8] sm:$0xff] %v4858_v54 }
 0xee6   :  { %4864 = vst [vmem:[#allocation9 + $0x10] sm:$0xff] %v4846_v10 }
 0xeea   :  { %v4859_v6 = vpop.f32.mrf.mxu3 }
 0xeeb   :  { %v4860_v0 = vadd.f32 %v4859_v6, %v4751_v50 }
 0xeed   :  { %4865 = vst [vmem:[#allocation9 + $0x18] sm:$0xff] %v4860_v0 }
 0xeee   :  { %4878 = dma.vmem_to_hbm [thread:$0]  %s4871_s3, 512, %s4873_s9, [#allocation6], %s6355_s29, %s6355_s29, %s6356_s30  }
 0xeef   :  { %6352 = dma.done.wait [#allocation6], 512  }
 0xef0   :  { %6353 = vsyncadd [#allocation6], 4294966784 }
 0xef1   :  { %4883 = vsyncpa [#allocation5], 1 }
 0xef2   :  { %4884 = vsyncpa [#allocation8], 1 }
 0xef3   :  { %4885 = vsyncpa [#allocation6], 1 }
 0xef4   :  { %4886 = vsyncmov [#allocation3] }
 0xef7   :  { %s4887_s10 = vpop.sfrf %4886 }
 0xef8   :  { %p5628_p0 = scmp.ne.s32.totalorder %s4887_s10, 0 }
 0xefa   :  { %4891 = shalt.err (%p5628_p0)  }

</bundles_post_ra>
